<compile_context>
chip_gen: v6e
topology: v6e:2x2x1
jax: 0.10.0
libtpu: 0.0.40
codegen_flags: <defaults>
</compile_context>

<pallas_src>
import math
from functools import partial

import jax
import jax.numpy as jnp
from jax import lax
from jax.experimental import pallas as pl
from jax.experimental.pallas import tpu as pltpu

EPS_LN = 1e-12     # espnet LayerNorm eps
EPS_BN = 1e-5      # BatchNorm1d eps
NEG = -1e30


# ------------------------------ in-kernel math ------------------------------

def _sigmoid(x):
    return 1.0 / (1.0 + jnp.exp(-x))


def _swish(x):
    return x * _sigmoid(x)


def _relu(x):
    return jnp.maximum(x, 0.0)


def _ln(x, g, b):
    mean = jnp.mean(x, axis=-1, keepdims=True)
    var = jnp.mean((x - mean) ** 2, axis=-1, keepdims=True)
    return (x - mean) * lax.rsqrt(var + EPS_LN) * g + b


def _row_tile(m, cap=512):
    """Largest multiple-of-8 divisor of m (<= cap); else full m."""
    best = None
    t = 8
    while t <= min(m, cap):
        if m % t == 0:
            best = t
        t += 8
    return best if best is not None else m


# ------------------------------ Pallas kernels ------------------------------

def _make_ff_kernel(act, scale, n_post_ln):
    # out = post_ln*( x + scale * (act(LN(x) @ W1 + b1) @ W2 + b2) )
    def kernel(*refs):
        x_ref, g_ref, b_ref, w1_ref, b1_ref, w2_ref, b2_ref = refs[:7]
        post = refs[7:7 + 2 * n_post_ln]
        o_ref = refs[7 + 2 * n_post_ln]
        x = x_ref[...]
        y = _ln(x, g_ref[...], b_ref[...])
        h = act(jnp.dot(y, w1_ref[...],
                        preferred_element_type=jnp.float32) + b1_ref[...])
        o = jnp.dot(h, w2_ref[...],
                    preferred_element_type=jnp.float32) + b2_ref[...]
        out = x + scale * o
        for i in range(n_post_ln):
            out = _ln(out, post[2 * i][...], post[2 * i + 1][...])
        o_ref[...] = out
    return kernel


def _self_attn_kernel(len_ref, x_ref, g_ref, b_ref, wqkv_ref, bqkv_ref,
                      wo_ref, bo_ref, o_ref, *, H, dk, D, causal):
    # 1/sqrt(dk) already folded into the Q weights at wrapper level.
    b = pl.program_id(0)
    klen = len_ref[b]                                   # scalar from SMEM
    x = x_ref[0]                                        # (T, D)
    T = x.shape[0]
    y = _ln(x, g_ref[...], b_ref[...])
    qkv = jnp.dot(y, wqkv_ref[...],
                  preferred_element_type=jnp.float32) + bqkv_ref[...]
    wo = wo_ref[...]
    kpos = lax.broadcasted_iota(jnp.int32, (T, T), 1)
    mask = kpos < klen                                  # key padding mask
    if causal:
        qpos = lax.broadcasted_iota(jnp.int32, (T, T), 0)
        mask = jnp.logical_and(mask, qpos >= kpos)
    acc = jnp.zeros((T, D), jnp.float32)
    for h in range(H):                                  # static head loop
        qh = qkv[:, h * dk:(h + 1) * dk]
        kh = qkv[:, D + h * dk:D + (h + 1) * dk]
        vh = qkv[:, 2 * D + h * dk:2 * D + (h + 1) * dk]
        s = lax.dot_general(qh, kh, (((1,), (1,)), ((), ())),
                            preferred_element_type=jnp.float32)
        s = jnp.where(mask, s, NEG)
        m = jnp.max(s, axis=-1, keepdims=True)
        e = jnp.exp(s - m)                              # masked -> ~0
        p = e * pl.reciprocal(jnp.sum(e, axis=-1, keepdims=True), approx=True)
        oh = jnp.dot(p, vh, preferred_element_type=jnp.float32)
        acc = acc + jnp.dot(oh, wo[h * dk:(h + 1) * dk, :],
                            preferred_element_type=jnp.float32)
    o_ref[0] = x + acc + bo_ref[...]


def _cross_attn_kernel(len_ref, x_ref, mem_ref, g_ref, b_ref, wq_ref, bq_ref,
                       wkv_ref, bkv_ref, wo_ref, bo_ref, o_ref,
                       *, H, dk, D):
    b = pl.program_id(0)
    klen = len_ref[b]
    x = x_ref[0]                                        # (Lq, D)
    mem = mem_ref[0]                                    # (Tk, D)
    Lq = x.shape[0]
    Tk = mem.shape[0]
    y = _ln(x, g_ref[...], b_ref[...])
    q = jnp.dot(y, wq_ref[...],
                preferred_element_type=jnp.float32) + bq_ref[...]
    kv = jnp.dot(mem, wkv_ref[...],
                 preferred_element_type=jnp.float32) + bkv_ref[...]
    wo = wo_ref[...]
    kpos = lax.broadcasted_iota(jnp.int32, (Lq, Tk), 1)
    mask = kpos < klen
    acc = jnp.zeros((Lq, D), jnp.float32)
    for h in range(H):
        qh = q[:, h * dk:(h + 1) * dk]
        kh = kv[:, h * dk:(h + 1) * dk]
        vh = kv[:, D + h * dk:D + (h + 1) * dk]
        s = lax.dot_general(qh, kh, (((1,), (1,)), ((), ())),
                            preferred_element_type=jnp.float32)
        s = jnp.where(mask, s, NEG)
        m = jnp.max(s, axis=-1, keepdims=True)
        e = jnp.exp(s - m)
        p = e * pl.reciprocal(jnp.sum(e, axis=-1, keepdims=True), approx=True)
        oh = jnp.dot(p, vh, preferred_element_type=jnp.float32)
        acc = acc + jnp.dot(oh, wo[h * dk:(h + 1) * dk, :],
                            preferred_element_type=jnp.float32)
    o_ref[0] = x + acc + bo_ref[...]


def _ln_pw_glu_dwconv_kernel(x_ref, g_ref, b_ref, w1_ref, b1_ref,
                             dw_ref, dwb_ref,
                             o_ref, sum_ref, sq_ref, pad_buf, *, C, K, T):
    # LN -> pointwise conv1 -> GLU -> depthwise conv over time (+ bias),
    # plus per-batch channel sum / sum-of-squares for BatchNorm statistics.
    pad = (K - 1) // 2
    x = x_ref[0]                                        # (T, C)
    y = _ln(x, g_ref[...], b_ref[...])
    z = jnp.dot(y, w1_ref[...],
                preferred_element_type=jnp.float32) + b1_ref[...]
    u = z[:, :C] * _sigmoid(z[:, C:])                   # GLU over channels
    # zero-padded time buffer lives entirely in VMEM (no HBM round trip)
    pad_buf[...] = jnp.zeros_like(pad_buf)
    pad_buf[pad:pad + T, :] = u
    up = pad_buf[...]                                   # (T + 2*pad, C)
    dw = dw_ref[...]
    acc = jnp.zeros((T, C), jnp.float32)
    for k in range(K):                                  # static tap loop
        acc = acc + up[k:k + T, :] * dw[k][None, :]
    conv = acc + dwb_ref[...]
    o_ref[0] = conv
    sum_ref[0] = jnp.sum(conv, axis=0, keepdims=True)
    sq_ref[0] = jnp.sum(conv * conv, axis=0, keepdims=True)


def _bn_swish_pw_kernel(y_ref, res_ref, scale_ref, shift_ref,
                        w_ref, bw_ref, o_ref):
    # out = res + swish(y * scale + shift) @ W + b   (BN folded into scale/shift)
    a = _swish(y_ref[...] * scale_ref[...] + shift_ref[...])
    o_ref[...] = res_ref[...] + jnp.dot(
        a, w_ref[...], preferred_element_type=jnp.float32) + bw_ref[...]


def _make_head_kernel(V, with_ln):
    # (optional LN) -> matmul -> mask lane padding -> log_softmax
    def kernel(*refs):
        if with_ln:
            x_ref, g_ref, b_ref, w_ref, bw_ref, o_ref = refs
        else:
            x_ref, w_ref, bw_ref, o_ref = refs
        x = x_ref[...]
        if with_ln:
            x = _ln(x, g_ref[...], b_ref[...])
        logits = jnp.dot(x, w_ref[...],
                         preferred_element_type=jnp.float32) + bw_ref[...]
        col = lax.broadcasted_iota(jnp.int32, logits.shape, 1)
        logits = jnp.where(col < V, logits, NEG)
        m = jnp.max(logits, axis=-1, keepdims=True)
        z = logits - m
        lse = jnp.log(jnp.sum(jnp.exp(z), axis=-1, keepdims=True))
        o_ref[...] = z - lse
    return kernel


def _embed_kernel(x_ref, w_ref, b_ref, g_ref, bg_ref, pe_ref, o_ref, *, xscale):
    x = x_ref[0]
    y = jnp.dot(x, w_ref[...], preferred_element_type=jnp.float32) + b_ref[...]
    y = _ln(y, g_ref[...], bg_ref[...])
    o_ref[0] = y * xscale + pe_ref[...]


# ------------------------------ kernel wrappers ------------------------------

def _full_spec(shape):
    return pl.BlockSpec(shape, lambda i: (0,) * len(shape))


def ff_block(x, p_ln, p_ff, *, act, scale, post_lns=()):
    lead = x.shape[:-1]
    D = x.shape[-1]
    M = int(math.prod(lead))
    H = p_ff["w1"]["w"].shape[1]
    x2 = x.reshape(M, D)
    tm = _row_tile(M)
    row = pl.BlockSpec((tm, D), lambda i: (i, 0))
    ins = [x2, p_ln["g"].reshape(1, D), p_ln["b"].reshape(1, D),
           p_ff["w1"]["w"], p_ff["w1"]["b"].reshape(1, H),
           p_ff["w2"]["w"], p_ff["w2"]["b"].reshape(1, D)]
    specs = [row, _full_spec((1, D)), _full_spec((1, D)),
             _full_spec((D, H)), _full_spec((1, H)),
             _full_spec((H, D)), _full_spec((1, D))]
    for ln in post_lns:
        ins += [ln["g"].reshape(1, D), ln["b"].reshape(1, D)]
        specs += [_full_spec((1, D)), _full_spec((1, D))]
    out = pl.pallas_call(
        _make_ff_kernel(act, scale, len(post_lns)),
        grid=(M // tm,), in_specs=specs, out_specs=row,
        out_shape=jax.ShapeDtypeStruct((M, D), jnp.float32),
        compiler_params=pltpu.CompilerParams(
            dimension_semantics=("parallel",)),
    )(*ins)
    return out.reshape(lead + (D,))


def self_attn_block(x, key_lengths, p_ln, p_attn, n_heads, *, causal):
    B, T, D = x.shape
    dk = D // n_heads
    scale = 1.0 / math.sqrt(dk)
    # fold the 1/sqrt(dk) into the (small) Q projection weights once
    wqkv = jnp.concatenate([p_attn["q"]["w"] * scale, p_attn["k"]["w"],
                            p_attn["v"]["w"]], axis=1)
    bqkv = jnp.concatenate([p_attn["q"]["b"] * scale, p_attn["k"]["b"],
                            p_attn["v"]["b"]]).reshape(1, 3 * D)
    grid_spec = pltpu.PrefetchScalarGridSpec(
        num_scalar_prefetch=1, grid=(B,),
        in_specs=[
            pl.BlockSpec((1, T, D), lambda b, lens: (b, 0, 0)),
            pl.BlockSpec((1, D), lambda b, lens: (0, 0)),
            pl.BlockSpec((1, D), lambda b, lens: (0, 0)),
            pl.BlockSpec((D, 3 * D), lambda b, lens: (0, 0)),
            pl.BlockSpec((1, 3 * D), lambda b, lens: (0, 0)),
            pl.BlockSpec((D, D), lambda b, lens: (0, 0)),
            pl.BlockSpec((1, D), lambda b, lens: (0, 0)),
        ],
        out_specs=pl.BlockSpec((1, T, D), lambda b, lens: (b, 0, 0)),
    )
    return pl.pallas_call(
        partial(_self_attn_kernel, H=n_heads, dk=dk, D=D, causal=causal),
        grid_spec=grid_spec,
        out_shape=jax.ShapeDtypeStruct((B, T, D), jnp.float32),
        compiler_params=pltpu.CompilerParams(
            dimension_semantics=("parallel",)),
    )(key_lengths.astype(jnp.int32), x,
      p_ln["g"].reshape(1, D), p_ln["b"].reshape(1, D),
      wqkv, bqkv, p_attn["o"]["w"], p_attn["o"]["b"].reshape(1, D))


def cross_attn_block(x, memory, mem_lengths, p_ln, p_attn, n_heads):
    B, Lq, D = x.shape
    Tk = memory.shape[1]
    dk = D // n_heads
    scale = 1.0 / math.sqrt(dk)
    wkv = jnp.concatenate([p_attn["k"]["w"], p_attn["v"]["w"]], axis=1)
    bkv = jnp.concatenate([p_attn["k"]["b"],
                           p_attn["v"]["b"]]).reshape(1, 2 * D)
    grid_spec = pltpu.PrefetchScalarGridSpec(
        num_scalar_prefetch=1, grid=(B,),
        in_specs=[
            pl.BlockSpec((1, Lq, D), lambda b, lens: (b, 0, 0)),
            pl.BlockSpec((1, Tk, D), lambda b, lens: (b, 0, 0)),
            pl.BlockSpec((1, D), lambda b, lens: (0, 0)),
            pl.BlockSpec((1, D), lambda b, lens: (0, 0)),
            pl.BlockSpec((D, D), lambda b, lens: (0, 0)),
            pl.BlockSpec((1, D), lambda b, lens: (0, 0)),
            pl.BlockSpec((D, 2 * D), lambda b, lens: (0, 0)),
            pl.BlockSpec((1, 2 * D), lambda b, lens: (0, 0)),
            pl.BlockSpec((D, D), lambda b, lens: (0, 0)),
            pl.BlockSpec((1, D), lambda b, lens: (0, 0)),
        ],
        out_specs=pl.BlockSpec((1, Lq, D), lambda b, lens: (b, 0, 0)),
    )
    return pl.pallas_call(
        partial(_cross_attn_kernel, H=n_heads, dk=dk, D=D),
        grid_spec=grid_spec,
        out_shape=jax.ShapeDtypeStruct((B, Lq, D), jnp.float32),
        compiler_params=pltpu.CompilerParams(
            dimension_semantics=("parallel",)),
    )(mem_lengths.astype(jnp.int32), x, memory,
      p_ln["g"].reshape(1, D), p_ln["b"].reshape(1, D),
      p_attn["q"]["w"] * scale, (p_attn["q"]["b"] * scale).reshape(1, D),
      wkv, bkv, p_attn["o"]["w"], p_attn["o"]["b"].reshape(1, D))


def conv_block(x, p_ln, p_conv, kernel_size):
    B, T, C = x.shape
    M = B * T
    K = kernel_size
    pad = (K - 1) // 2
    # (LN + pw-conv1 + GLU + depthwise conv + BN-stats) fused, per batch row.
    conv, csum, csq = pl.pallas_call(
        partial(_ln_pw_glu_dwconv_kernel, C=C, K=K, T=T),
        grid=(B,),
        in_specs=[pl.BlockSpec((1, T, C), lambda b: (b, 0, 0)),
                  pl.BlockSpec((1, C), lambda b: (0, 0)),
                  pl.BlockSpec((1, C), lambda b: (0, 0)),
                  pl.BlockSpec((C, 2 * C), lambda b: (0, 0)),
                  pl.BlockSpec((1, 2 * C), lambda b: (0, 0)),
                  pl.BlockSpec((K, C), lambda b: (0, 0)),
                  pl.BlockSpec((1, C), lambda b: (0, 0))],
        out_specs=(pl.BlockSpec((1, T, C), lambda b: (b, 0, 0)),
                   pl.BlockSpec((1, 1, C), lambda b: (b, 0, 0)),
                   pl.BlockSpec((1, 1, C), lambda b: (b, 0, 0))),
        out_shape=(jax.ShapeDtypeStruct((B, T, C), jnp.float32),
                   jax.ShapeDtypeStruct((B, 1, C), jnp.float32),
                   jax.ShapeDtypeStruct((B, 1, C), jnp.float32)),
        scratch_shapes=[pltpu.VMEM((T + 2 * pad, C), jnp.float32)],
        compiler_params=pltpu.CompilerParams(
            dimension_semantics=("parallel",)),
    )(x, p_ln["g"].reshape(1, C), p_ln["b"].reshape(1, C),
      p_conv["pw1"]["w"], p_conv["pw1"]["b"].reshape(1, 2 * C),
      p_conv["dw_w"], p_conv["dw_b"].reshape(1, C))
    # TODO(synk): BatchNorm1d uses per-forward batch statistics (training-mode,
    # fresh module); eval-mode running stats would differ.
    mean = jnp.sum(csum, axis=0) / M                    # (1, C)
    var = jnp.sum(csq, axis=0) / M - mean * mean
    scale = p_conv["bn"]["g"].reshape(1, C) * lax.rsqrt(var + EPS_BN)
    shift = p_conv["bn"]["b"].reshape(1, C) - mean * scale
    conv2 = conv.reshape(M, C)
    x2 = x.reshape(M, C)
    tm = _row_tile(M)
    row = pl.BlockSpec((tm, C), lambda i: (i, 0))
    # BN-apply + swish + pointwise conv2 + residual (fused, row-gridded)
    out = pl.pallas_call(
        _bn_swish_pw_kernel,
        grid=(M // tm,),
        in_specs=[row, row, _full_spec((1, C)), _full_spec((1, C)),
                  _full_spec((C, C)), _full_spec((1, C))],
        out_specs=row,
        out_shape=jax.ShapeDtypeStruct((M, C), jnp.float32),
        compiler_params=pltpu.CompilerParams(
            dimension_semantics=("parallel",)),
    )(conv2, x2, scale, shift, p_conv["pw2"]["w"],
      p_conv["pw2"]["b"].reshape(1, C))
    return out.reshape(B, T, C)


def head_logprobs(x, p_out, odim, p_ln=None):
    lead = x.shape[:-1]
    D = x.shape[-1]
    M = int(math.prod(lead))
    x2 = x.reshape(M, D)
    Vp = ((odim + 127) // 128) * 128            # lane-dense vocab padding
    w = jnp.pad(p_out["w"], ((0, 0), (0, Vp - odim)))
    b = jnp.pad(p_out["b"], (0, Vp - odim)).reshape(1, Vp)
    tm = _row_tile(M)
    row_in = pl.BlockSpec((tm, D), lambda i: (i, 0))
    row_out = pl.BlockSpec((tm, Vp), lambda i: (i, 0))
    ins = [x2]
    specs = [row_in]
    if p_ln is not None:
        ins += [p_ln["g"].reshape(1, D), p_ln["b"].reshape(1, D)]
        specs += [_full_spec((1, D)), _full_spec((1, D))]
    ins += [w, b]
    specs += [_full_spec((D, Vp)), _full_spec((1, Vp))]
    out = pl.pallas_call(
        _make_head_kernel(odim, p_ln is not None),
        grid=(M // tm,), in_specs=specs, out_specs=row_out,
        out_shape=jax.ShapeDtypeStruct((M, Vp), jnp.float32),
        compiler_params=pltpu.CompilerParams(
            dimension_semantics=("parallel",)),
    )(*ins)
    return out.reshape(lead + (Vp,))


def encoder_embed(x, p_embed, p_ln, pe):
    B, T, idim = x.shape
    D = p_embed["w"].shape[1]
    return pl.pallas_call(
        partial(_embed_kernel, xscale=math.sqrt(D)),
        grid=(B,),
        in_specs=[
            pl.BlockSpec((1, T, idim), lambda b: (b, 0, 0)),
            pl.BlockSpec((idim, D), lambda b: (0, 0)),
            pl.BlockSpec((1, D), lambda b: (0, 0)),
            pl.BlockSpec((1, D), lambda b: (0, 0)),
            pl.BlockSpec((1, D), lambda b: (0, 0)),
            pl.BlockSpec((T, D), lambda b: (0, 0)),
        ],
        out_specs=pl.BlockSpec((1, T, D), lambda b: (b, 0, 0)),
        out_shape=jax.ShapeDtypeStruct((B, T, D), jnp.float32),
        compiler_params=pltpu.CompilerParams(
            dimension_semantics=("parallel",)),
    )(x, p_embed["w"], p_embed["b"].reshape(1, D),
      p_ln["g"].reshape(1, D), p_ln["b"].reshape(1, D), pe)


# --------------------------- model building blocks ---------------------------

def sinusoidal_pe(T, d):
    pos = jnp.arange(T, dtype=jnp.float32)[:, None]
    div = jnp.exp(jnp.arange(0, d, 2, dtype=jnp.float32)
                  * (-math.log(10000.0) / d))
    ang = pos * div
    # interleave sin/cos without scatter
    return jnp.stack([jnp.sin(ang), jnp.cos(ang)], axis=-1).reshape(T, d)


def conformer_layer(x, lengths, p, cfg, post_lns_extra=()):
    h = cfg["aheads"]
    x = ff_block(x, p["norm_ff_macaron"], p["ff_macaron"],
                 act=_swish, scale=0.5)
    x = self_attn_block(x, lengths, p["norm_mha"], p["attn"], h, causal=False)
    x = conv_block(x, p["norm_conv"], p["conv"], cfg["cnn_kernel"])
    x = ff_block(x, p["norm_ff"], p["ff"], act=_swish, scale=0.5,
                 post_lns=(p["norm_final"],) + tuple(post_lns_extra))
    return x


def encoder_forward(p, x, lengths, cfg):
    T = x.shape[1]
    D = cfg["adim"]
    pe = sinusoidal_pe(T, D)
    x = encoder_embed(x, p["embed"], p["embed_ln"], pe)
    n = len(p["layers"])
    for i, lp in enumerate(p["layers"]):
        extra = (p["after_norm"],) if i == n - 1 else ()
        x = conformer_layer(x, lengths, lp, cfg, post_lns_extra=extra)
    return x


def decoder_forward(p, ys_in, memory, mem_lengths, cfg):
    B, L = ys_in.shape
    D = cfg["ddim"]
    h = cfg["dheads"]
    pe = sinusoidal_pe(L, D)
    x = p["embed"][ys_in] * math.sqrt(D) + pe[None]     # token embed + pos enc
    full_len = jnp.full((B,), L, jnp.int32)             # tgt mask == causal
    for lp in p["layers"]:
        x = self_attn_block(x, full_len, lp["norm1"], lp["self_attn"], h,
                            causal=True)
        x = cross_attn_block(x, memory, mem_lengths, lp["norm2"],
                             lp["src_attn"], h)
        x = ff_block(x, lp["norm3"], lp["ff"], act=_relu, scale=1.0)
    # after_norm + output linear + log_softmax fused, vocab padded to 128
    return head_logprobs(x, p["out"], cfg["odim"], p_ln=p["after_norm"])


# --------------------------------- losses -----------------------------------

def ctc_neg_log_likelihood(lp, ilens, labels, olens, blank=0):
    # TODO(synk): CTC forward DP kept in plain JAX (sequential lax.scan); no
    # clean Pallas mapping for the time-recurrent dynamic program.
    B, T, _ = lp.shape
    U = labels.shape[1]
    S = 2 * U + 1
    lab = jnp.where(labels < 0, 0, labels)
    s_idx = jnp.arange(S)
    is_label = (s_idx % 2) == 1
    lab_pos = jnp.where(is_label, (s_idx - 1) // 2, 0)
    z = jnp.where(is_label[None, :], lab[:, lab_pos], blank)          # (B, S)
    valid_s = s_idx[None, :] < (2 * olens[:, None] + 1)               # (B, S)
    z_m2 = jnp.concatenate([jnp.full((B, 2), -1, z.dtype), z[:, :-2]], axis=1)
    allow_skip = (z != blank) & (z != z_m2)

    def emit(lp_t):
        g = jnp.take_along_axis(lp_t, z, axis=1)
        return jnp.where(valid_s, g, NEG)

    g0 = emit(lp[:, 0])
    alpha0 = jnp.full((B, S), NEG, jnp.float32)
    alpha0 = alpha0.at[:, 0].set(g0[:, 0])
    alpha0 = alpha0.at[:, 1].set(jnp.where(olens > 0, g0[:, 1], NEG))

    def logsumexp3(a, b, c):
        m = jnp.maximum(jnp.maximum(a, b), c)
        dead = m <= NEG / 2
        m_safe = jnp.where(dead, 0.0, m)
        out = m_safe + jnp.log(jnp.exp(a - m_safe) + jnp.exp(b - m_safe)
                               + jnp.exp(c - m_safe))
        return jnp.where(dead, NEG, out)

    def step(alpha, xt):
        t, lp_t = xt
        s1 = jnp.concatenate(
            [jnp.full((B, 1), NEG, jnp.float32), alpha[:, :-1]], axis=1)
        s2 = jnp.concatenate(
            [jnp.full((B, 2), NEG, jnp.float32), alpha[:, :-2]], axis=1)
        s2 = jnp.where(allow_skip, s2, NEG)
        a = logsumexp3(alpha, s1, s2) + emit(lp_t)
        a = jnp.where(valid_s, a, NEG)
        a = jnp.where((t < ilens)[:, None], a, alpha)
        return a, None

    xs = (jnp.arange(1, T), jnp.transpose(lp[:, 1:], (1, 0, 2)))
    alphaT, _ = lax.scan(step, alpha0, xs)
    e1 = 2 * olens
    e2 = jnp.maximum(2 * olens - 1, 0)
    a1 = jnp.take_along_axis(alphaT, e1[:, None], axis=1)[:, 0]
    a2 = jnp.take_along_axis(alphaT, e2[:, None], axis=1)[:, 0]
    ll = jnp.where(olens > 0, jnp.logaddexp(a1, a2), a1)
    return -ll


def ctc_forward(p_ctc, hs, hlens, ys_pad, cfg):
    B = hs.shape[0]
    odim = cfg["odim"]
    logp_full = head_logprobs(hs, p_ctc, odim, p_ln=None)   # fused lin+logsmax
    lp = logp_full[..., :odim]
    olens = jnp.sum(ys_pad != cfg["ignore_id"], axis=1)
    per_sample = ctc_neg_log_likelihood(lp, hlens, ys_pad, olens)
    loss = jnp.sum(per_sample) / B                 # sum reduction / batch size
    ys_hat = jnp.argmax(lp, axis=-1)
    return loss, ys_hat


def add_sos_eos(ys_pad, sos, eos, ignore_id):
    B, U = ys_pad.shape
    olens = jnp.sum(ys_pad != ignore_id, axis=1)
    ys_in = jnp.concatenate(
        [jnp.full((B, 1), sos, ys_pad.dtype), ys_pad], axis=1)
    ys_in = jnp.where(ys_in == ignore_id, eos, ys_in)
    pos = jnp.arange(U + 1)[None, :]
    lab_ext = jnp.concatenate(
        [ys_pad, jnp.full((B, 1), ignore_id, ys_pad.dtype)], axis=1)
    ys_out = jnp.where(pos < olens[:, None], lab_ext,
                       jnp.where(pos == olens[:, None], eos, ignore_id))
    return ys_in, ys_out


def label_smoothing_loss(logp, target, odim, ignore_id, lsm_weight,
                         normalize_length=False):
    B = logp.shape[0]
    lp = logp[..., :odim].reshape(-1, odim)
    t = target.reshape(-1)
    confidence = 1.0 - lsm_weight
    smooth = lsm_weight / (odim - 1)
    ignore = t == ignore_id
    t_safe = jnp.where(ignore, 0, t)
    lp_t = jnp.take_along_axis(lp, t_safe[:, None], axis=1)[:, 0]
    lp_sum = jnp.sum(lp, axis=1)
    const = confidence * math.log(confidence)
    if smooth > 0.0:
        const += (odim - 1) * smooth * math.log(smooth)
    kl_row = const - confidence * lp_t - smooth * (lp_sum - lp_t)
    kl_row = jnp.where(ignore, 0.0, kl_row)
    total = jnp.sum(~ignore)
    denom = total if normalize_length else B
    return jnp.sum(kl_row) / denom


def th_accuracy(logp, ys_out, odim, ignore_id):
    pred_cls = jnp.argmax(logp[..., :odim], axis=-1)
    mask = ys_out != ignore_id
    num = jnp.sum((pred_cls == ys_out) & mask)
    den = jnp.sum(mask)
    return num.astype(jnp.float32) / den.astype(jnp.float32)


# ------------------------------- E2E forward --------------------------------

def e2e_forward(params, x, lengths, label, cfg):
    ignore_id = cfg["ignore_id"]
    odim = cfg["odim"]
    sos = eos = odim - 1
    lengths = lengths.astype(jnp.int32)

    # transformer_input_layer == 'linear' -> no lengths // 640 subsampling
    hs = encoder_forward(params["encoder"], x, lengths, cfg)

    loss_ctc, _ys_hat = ctc_forward(params["ctc"], hs, lengths, label, cfg)

    # proj_decoder is None because adim == ddim
    ys_in_pad, ys_out_pad = add_sos_eos(label, sos, eos, ignore_id)
    logp_dec = decoder_forward(params["decoder"], ys_in_pad, hs, lengths, cfg)

    loss_att = label_smoothing_loss(logp_dec, ys_out_pad, odim, ignore_id,
                                    cfg["lsm_weight"])
    alpha = cfg["mtlalpha"]
    loss = alpha * loss_ctc + (1.0 - alpha) * loss_att
    acc = th_accuracy(logp_dec, ys_out_pad, odim, ignore_id)
    return loss, loss_ctc, loss_att, acc


# ----------------------------- parameter init --------------------------------

def init_params(key, idim, cfg):
    keys = iter(jax.random.split(key, 4096))

    def lin(din, dout):
        return {"w": jax.random.normal(next(keys), (din, dout), jnp.float32)
                     / math.sqrt(din),
                "b": jnp.zeros((dout,), jnp.float32)}

    def ln(d):
        return {"g": jnp.ones((d,), jnp.float32),
                "b": jnp.zeros((d,), jnp.float32)}

    adim, eunits, K = cfg["adim"], cfg["eunits"], cfg["cnn_kernel"]
    ddim, dunits, odim = cfg["ddim"], cfg["dunits"], cfg["odim"]

    def attn_params(d):
        return {"q": lin(d, d), "k": lin(d, d), "v": lin(d, d), "o": lin(d, d)}

    def enc_layer():
        return {
            "norm_ff_macaron": ln(adim),
            "ff_macaron": {"w1": lin(adim, eunits), "w2": lin(eunits, adim)},
            "norm_mha": ln(adim),
            "attn": attn_params(adim),
            "norm_conv": ln(adim),
            "conv": {
                "pw1": lin(adim, 2 * adim),
                "dw_w": jax.random.normal(next(keys), (K, adim), jnp.float32)
                        / math.sqrt(K),
                "dw_b": jnp.zeros((adim,), jnp.float32),
                "bn": ln(adim),
                "pw2": lin(adim, adim),
            },
            "norm_ff": ln(adim),
            "ff": {"w1": lin(adim, eunits), "w2": lin(eunits, adim)},
            "norm_final": ln(adim),
        }

    def dec_layer():
        return {
            "norm1": ln(ddim), "self_attn": attn_params(ddim),
            "norm2": ln(ddim), "src_attn": attn_params(ddim),
            "norm3": ln(ddim),
            "ff": {"w1": lin(ddim, dunits), "w2": lin(dunits, ddim)},
        }

    return {
        "encoder": {
            "embed": lin(idim, adim),
            "embed_ln": ln(adim),
            "layers": [enc_layer() for _ in range(cfg["elayers"])],
            "after_norm": ln(adim),
        },
        "ctc": lin(adim, odim),
        "decoder": {
            "embed": jax.random.normal(next(keys), (odim, ddim), jnp.float32)
                     / math.sqrt(ddim),
            "layers": [dec_layer() for _ in range(cfg["dlayers"])],
            "after_norm": ln(ddim),
            "out": lin(ddim, odim),
        },
    }


# ---------------------------------- main -------------------------------------

if __name__ == "__main__":
    cfg = dict(adim=32, aheads=4, eunits=64, elayers=2,
               ddim=32, dheads=4, dunits=64, dlayers=2,
               odim=10, cnn_kernel=7,
               mtlalpha=0.3, lsm_weight=0.1, ignore_id=-1)

    B, T, IDIM = 2, 12, 24

    root = jax.random.PRNGKey(0)
    k_param, k_x = jax.random.split(root)
    params = init_params(k_param, IDIM, cfg)

    x = jax.random.normal(k_x, (B, T, IDIM), jnp.float32)
    lengths = jnp.array([12, 9], jnp.int32)
    label = jnp.array([[3, 5, 2, 7, 1],
                       [4, 8, 6, -1, -1]], jnp.int32)

    forward = jax.jit(partial(e2e_forward, cfg=cfg))
    loss, loss_ctc, loss_att, acc = forward(params, x, lengths, label)
    jax.block_until_ready((loss, loss_ctc, loss_att, acc))
    print("KERNEL_OK")
</pallas_src>

<mosaic_0001>
module attributes {stable_mosaic.version = 11 : i64} {
  func.func @_embed_kernel(%arg0: i32, %arg1: memref<1x12x24xf32, #tpu.memory_space<vmem>>, %arg2: memref<24x32xf32, #tpu.memory_space<vmem>>, %arg3: memref<1x32xf32, #tpu.memory_space<vmem>>, %arg4: memref<1x32xf32, #tpu.memory_space<vmem>>, %arg5: memref<1x32xf32, #tpu.memory_space<vmem>>, %arg6: memref<12x32xf32, #tpu.memory_space<vmem>>, %arg7: memref<1x12x32xf32, #tpu.memory_space<vmem>>) attributes {dimension_semantics = [#tpu.dimension_semantics<parallel>], iteration_bounds = array<i64: 2>, scalar_prefetch = 0 : i64, scratch_operands = 0 : i64, tpu.core_type = #tpu.core_type<tc>, window_params = [{transform_indices = @transform_0, window_bounds = array<i64: 1, 12, 24>}, {pipeline_mode = #tpu.pipeline_mode<synchronous>, transform_indices = @transform_1, window_bounds = array<i64: 24, 32>}, {pipeline_mode = #tpu.pipeline_mode<synchronous>, transform_indices = @transform_2, window_bounds = array<i64: 1, 32>}, {pipeline_mode = #tpu.pipeline_mode<synchronous>, transform_indices = @transform_3, window_bounds = array<i64: 1, 32>}, {pipeline_mode = #tpu.pipeline_mode<synchronous>, transform_indices = @transform_4, window_bounds = array<i64: 1, 32>}, {pipeline_mode = #tpu.pipeline_mode<synchronous>, transform_indices = @transform_5, window_bounds = array<i64: 12, 32>}, {transform_indices = @transform_6, window_bounds = array<i64: 1, 12, 32>}]} {
    %c0 = arith.constant 0 : index
    %c0_0 = arith.constant 0 : index
    %c0_1 = arith.constant 0 : index
    %0 = vector.load %arg1[%c0, %c0_0, %c0_1] : memref<1x12x24xf32, #tpu.memory_space<vmem>>, vector<1x12x24xf32>
    %1 = vector.shape_cast %0 : vector<1x12x24xf32> to vector<12x24xf32>
    %c0_2 = arith.constant 0 : index
    %c0_3 = arith.constant 0 : index
    %2 = vector.load %arg2[%c0_2, %c0_3] : memref<24x32xf32, #tpu.memory_space<vmem>>, vector<24x32xf32>
    %cst = arith.constant dense<0.000000e+00> : vector<12x32xf32>
    %3 = tpu.matmul %1, %2, %cst {dimension_numbers = #tpu.dot_dimension_numbers<[1], [0], [0], [1], [0, 0, 1, 1], [], []>} : vector<12x24xf32>, vector<24x32xf32>, vector<12x32xf32> -> vector<12x32xf32>
    %c0_4 = arith.constant 0 : index
    %c0_5 = arith.constant 0 : index
    %4 = vector.load %arg3[%c0_4, %c0_5] : memref<1x32xf32, #tpu.memory_space<vmem>>, vector<1x32xf32>
    %5 = vector.broadcast %4 : vector<1x32xf32> to vector<12x32xf32>
    %6 = arith.addf %3, %5 : vector<12x32xf32>
    %c0_6 = arith.constant 0 : index
    %c0_7 = arith.constant 0 : index
    %7 = vector.load %arg4[%c0_6, %c0_7] : memref<1x32xf32, #tpu.memory_space<vmem>>, vector<1x32xf32>
    %c0_8 = arith.constant 0 : index
    %c0_9 = arith.constant 0 : index
    %8 = vector.load %arg5[%c0_8, %c0_9] : memref<1x32xf32, #tpu.memory_space<vmem>>, vector<1x32xf32>
    %cst_10 = arith.constant dense<0.000000e+00> : vector<12xf32>
    %9 = vector.multi_reduction <add>, %6, %cst_10 [1] : vector<12x32xf32> to vector<12xf32>
    %10 = vector.shape_cast %9 : vector<12xf32> to vector<12x1xf32>
    %cst_11 = arith.constant 3.200000e+01 : f32
    %11 = vector.broadcast %cst_11 : f32 to vector<12x1xf32>
    %12 = arith.divf %10, %11 : vector<12x1xf32>
    %13 = vector.broadcast %12 : vector<12x1xf32> to vector<12x32xf32>
    %14 = arith.subf %6, %13 : vector<12x32xf32>
    %15 = arith.mulf %14, %14 : vector<12x32xf32>
    %cst_12 = arith.constant dense<0.000000e+00> : vector<12xf32>
    %16 = vector.multi_reduction <add>, %15, %cst_12 [1] : vector<12x32xf32> to vector<12xf32>
    %17 = vector.shape_cast %16 : vector<12xf32> to vector<12x1xf32>
    %cst_13 = arith.constant 3.200000e+01 : f32
    %18 = vector.broadcast %cst_13 : f32 to vector<12x1xf32>
    %19 = arith.divf %17, %18 : vector<12x1xf32>
    %20 = vector.broadcast %12 : vector<12x1xf32> to vector<12x32xf32>
    %21 = arith.subf %6, %20 : vector<12x32xf32>
    %cst_14 = arith.constant 9.99999996E-13 : f32
    %22 = vector.broadcast %cst_14 : f32 to vector<12x1xf32>
    %23 = arith.addf %19, %22 : vector<12x1xf32>
    %24 = math.rsqrt %23 : vector<12x1xf32>
    %25 = vector.broadcast %24 : vector<12x1xf32> to vector<12x32xf32>
    %26 = arith.mulf %21, %25 : vector<12x32xf32>
    %27 = vector.broadcast %7 : vector<1x32xf32> to vector<12x32xf32>
    %28 = arith.mulf %26, %27 : vector<12x32xf32>
    %29 = vector.broadcast %8 : vector<1x32xf32> to vector<12x32xf32>
    %30 = arith.addf %28, %29 : vector<12x32xf32>
    %cst_15 = arith.constant 5.65685415 : f32
    %31 = vector.broadcast %cst_15 : f32 to vector<12x32xf32>
    %32 = arith.mulf %30, %31 : vector<12x32xf32>
    %c0_16 = arith.constant 0 : index
    %c0_17 = arith.constant 0 : index
    %33 = vector.load %arg6[%c0_16, %c0_17] : memref<12x32xf32, #tpu.memory_space<vmem>>, vector<12x32xf32>
    %34 = arith.addf %32, %33 : vector<12x32xf32>
    %c0_18 = arith.constant 0 : index
    %c0_19 = arith.constant 0 : index
    %c0_20 = arith.constant 0 : index
    %35 = vector.load %arg7[%c0_18, %c0_19, %c0_20] : memref<1x12x32xf32, #tpu.memory_space<vmem>>, vector<1x12x32xf32>
    %36 = vector.shape_cast %35 : vector<1x12x32xf32> to vector<12x32xf32>
    %37 = vector.shape_cast %34 : vector<12x32xf32> to vector<1x12x32xf32>
    tpu.vector_store %arg7[%c0_18, %c0_19, %c0_20], %37 {strides = array<i32>} : memref<1x12x32xf32, #tpu.memory_space<vmem>>, vector<1x12x32xf32>,
    return
  }
  func.func @transform_0(%arg0: i32) -> (i32, i32, i32) {
    %c0_i32 = arith.constant 0 : i32
    %c0_i32_0 = arith.constant 0 : i32
    %c0_i32_1 = arith.constant 0 : i32
    return %arg0, %c0_i32, %c0_i32_0 : i32, i32, i32
  }
  func.func @transform_1(%arg0: i32) -> (i32, i32) {
    %c0_i32 = arith.constant 0 : i32
    %c0_i32_0 = arith.constant 0 : i32
    %c0_i32_1 = arith.constant 0 : i32
    return %c0_i32, %c0_i32_0 : i32, i32
  }
  func.func @transform_2(%arg0: i32) -> (i32, i32) {
    %c0_i32 = arith.constant 0 : i32
    %c0_i32_0 = arith.constant 0 : i32
    %c0_i32_1 = arith.constant 0 : i32
    return %c0_i32, %c0_i32_0 : i32, i32
  }
  func.func @transform_3(%arg0: i32) -> (i32, i32) {
    %c0_i32 = arith.constant 0 : i32
    %c0_i32_0 = arith.constant 0 : i32
    %c0_i32_1 = arith.constant 0 : i32
    return %c0_i32, %c0_i32_0 : i32, i32
  }
  func.func @transform_4(%arg0: i32) -> (i32, i32) {
    %c0_i32 = arith.constant 0 : i32
    %c0_i32_0 = arith.constant 0 : i32
    %c0_i32_1 = arith.constant 0 : i32
    return %c0_i32, %c0_i32_0 : i32, i32
  }
  func.func @transform_5(%arg0: i32) -> (i32, i32) {
    %c0_i32 = arith.constant 0 : i32
    %c0_i32_0 = arith.constant 0 : i32
    %c0_i32_1 = arith.constant 0 : i32
    return %c0_i32, %c0_i32_0 : i32, i32
  }
  func.func @transform_6(%arg0: i32) -> (i32, i32, i32) {
    %c0_i32 = arith.constant 0 : i32
    %c0_i32_0 = arith.constant 0 : i32
    %c0_i32_1 = arith.constant 0 : i32
    return %arg0, %c0_i32, %c0_i32_0 : i32, i32, i32
  }
}

module attributes {stable_mosaic.version = 11 : i64} {
  func.func @kernel(%arg0: i32, %arg1: memref<24x32xf32, #tpu.memory_space<vmem>>, %arg2: memref<1x32xf32, #tpu.memory_space<vmem>>, %arg3: memref<1x32xf32, #tpu.memory_space<vmem>>, %arg4: memref<32x64xf32, #tpu.memory_space<vmem>>, %arg5: memref<1x64xf32, #tpu.memory_space<vmem>>, %arg6: memref<64x32xf32, #tpu.memory_space<vmem>>, %arg7: memref<1x32xf32, #tpu.memory_space<vmem>>, %arg8: memref<24x32xf32, #tpu.memory_space<vmem>>) attributes {dimension_semantics = [#tpu.dimension_semantics<parallel>], iteration_bounds = array<i64: 1>, scalar_prefetch = 0 : i64, scratch_operands = 0 : i64, tpu.core_type = #tpu.core_type<tc>, window_params = [{transform_indices = @transform_0, window_bounds = array<i64: 24, 32>}, {pipeline_mode = #tpu.pipeline_mode<synchronous>, transform_indices = @transform_1, window_bounds = array<i64: 1, 32>}, {pipeline_mode = #tpu.pipeline_mode<synchronous>, transform_indices = @transform_2, window_bounds = array<i64: 1, 32>}, {pipeline_mode = #tpu.pipeline_mode<synchronous>, transform_indices = @transform_3, window_bounds = array<i64: 32, 64>}, {pipeline_mode = #tpu.pipeline_mode<synchronous>, transform_indices = @transform_4, window_bounds = array<i64: 1, 64>}, {pipeline_mode = #tpu.pipeline_mode<synchronous>, transform_indices = @transform_5, window_bounds = array<i64: 64, 32>}, {pipeline_mode = #tpu.pipeline_mode<synchronous>, transform_indices = @transform_6, window_bounds = array<i64: 1, 32>}, {transform_indices = @transform_7, window_bounds = array<i64: 24, 32>}]} {
    %c0 = arith.constant 0 : index
    %c0_0 = arith.constant 0 : index
    %0 = vector.load %arg1[%c0, %c0_0] : memref<24x32xf32, #tpu.memory_space<vmem>>, vector<24x32xf32>
    %c0_1 = arith.constant 0 : index
    %c0_2 = arith.constant 0 : index
    %1 = vector.load %arg2[%c0_1, %c0_2] : memref<1x32xf32, #tpu.memory_space<vmem>>, vector<1x32xf32>
    %c0_3 = arith.constant 0 : index
    %c0_4 = arith.constant 0 : index
    %2 = vector.load %arg3[%c0_3, %c0_4] : memref<1x32xf32, #tpu.memory_space<vmem>>, vector<1x32xf32>
    %cst = arith.constant dense<0.000000e+00> : vector<24xf32>
    %3 = vector.multi_reduction <add>, %0, %cst [1] : vector<24x32xf32> to vector<24xf32>
    %4 = vector.shape_cast %3 : vector<24xf32> to vector<24x1xf32>
    %cst_5 = arith.constant 3.200000e+01 : f32
    %5 = vector.broadcast %cst_5 : f32 to vector<24x1xf32>
    %6 = arith.divf %4, %5 : vector<24x1xf32>
    %7 = vector.broadcast %6 : vector<24x1xf32> to vector<24x32xf32>
    %8 = arith.subf %0, %7 : vector<24x32xf32>
    %9 = arith.mulf %8, %8 : vector<24x32xf32>
    %cst_6 = arith.constant dense<0.000000e+00> : vector<24xf32>
    %10 = vector.multi_reduction <add>, %9, %cst_6 [1] : vector<24x32xf32> to vector<24xf32>
    %11 = vector.shape_cast %10 : vector<24xf32> to vector<24x1xf32>
    %cst_7 = arith.constant 3.200000e+01 : f32
    %12 = vector.broadcast %cst_7 : f32 to vector<24x1xf32>
    %13 = arith.divf %11, %12 : vector<24x1xf32>
    %14 = vector.broadcast %6 : vector<24x1xf32> to vector<24x32xf32>
    %15 = arith.subf %0, %14 : vector<24x32xf32>
    %cst_8 = arith.constant 9.99999996E-13 : f32
    %16 = vector.broadcast %cst_8 : f32 to vector<24x1xf32>
    %17 = arith.addf %13, %16 : vector<24x1xf32>
    %18 = math.rsqrt %17 : vector<24x1xf32>
    %19 = vector.broadcast %18 : vector<24x1xf32> to vector<24x32xf32>
    %20 = arith.mulf %15, %19 : vector<24x32xf32>
    %21 = vector.broadcast %1 : vector<1x32xf32> to vector<24x32xf32>
    %22 = arith.mulf %20, %21 : vector<24x32xf32>
    %23 = vector.broadcast %2 : vector<1x32xf32> to vector<24x32xf32>
    %24 = arith.addf %22, %23 : vector<24x32xf32>
    %c0_9 = arith.constant 0 : index
    %c0_10 = arith.constant 0 : index
    %25 = vector.load %arg4[%c0_9, %c0_10] : memref<32x64xf32, #tpu.memory_space<vmem>>, vector<32x64xf32>
    %cst_11 = arith.constant dense<0.000000e+00> : vector<24x64xf32>
    %26 = tpu.matmul %24, %25, %cst_11 {dimension_numbers = #tpu.dot_dimension_numbers<[1], [0], [0], [1], [0, 0, 1, 1], [], []>} : vector<24x32xf32>, vector<32x64xf32>, vector<24x64xf32> -> vector<24x64xf32>
    %c0_12 = arith.constant 0 : index
    %c0_13 = arith.constant 0 : index
    %27 = vector.load %arg5[%c0_12, %c0_13] : memref<1x64xf32, #tpu.memory_space<vmem>>, vector<1x64xf32>
    %28 = vector.broadcast %27 : vector<1x64xf32> to vector<24x64xf32>
    %29 = arith.addf %26, %28 : vector<24x64xf32>
    %cst_14 = arith.constant 0.000000e+00 : f32
    %30 = vector.broadcast %cst_14 : f32 to vector<24x64xf32>
    %31 = arith.subf %30, %29 : vector<24x64xf32>
    %32 = math.exp %31 : vector<24x64xf32>
    %cst_15 = arith.constant 1.000000e+00 : f32
    %33 = vector.broadcast %cst_15 : f32 to vector<24x64xf32>
    %34 = arith.addf %33, %32 : vector<24x64xf32>
    %cst_16 = arith.constant 1.000000e+00 : f32
    %35 = vector.broadcast %cst_16 : f32 to vector<24x64xf32>
    %36 = arith.divf %35, %34 : vector<24x64xf32>
    %37 = arith.mulf %29, %36 : vector<24x64xf32>
    %c0_17 = arith.constant 0 : index
    %c0_18 = arith.constant 0 : index
    %38 = vector.load %arg6[%c0_17, %c0_18] : memref<64x32xf32, #tpu.memory_space<vmem>>, vector<64x32xf32>
    %cst_19 = arith.constant dense<0.000000e+00> : vector<24x32xf32>
    %39 = tpu.matmul %37, %38, %cst_19 {dimension_numbers = #tpu.dot_dimension_numbers<[1], [0], [0], [1], [0, 0, 1, 1], [], []>} : vector<24x64xf32>, vector<64x32xf32>, vector<24x32xf32> -> vector<24x32xf32>
    %c0_20 = arith.constant 0 : index
    %c0_21 = arith.constant 0 : index
    %40 = vector.load %arg7[%c0_20, %c0_21] : memref<1x32xf32, #tpu.memory_space<vmem>>, vector<1x32xf32>
    %41 = vector.broadcast %40 : vector<1x32xf32> to vector<24x32xf32>
    %42 = arith.addf %39, %41 : vector<24x32xf32>
    %cst_22 = arith.constant 5.000000e-01 : f32
    %43 = vector.broadcast %cst_22 : f32 to vector<24x32xf32>
    %44 = arith.mulf %43, %42 : vector<24x32xf32>
    %45 = arith.addf %0, %44 : vector<24x32xf32>
    %c0_23 = arith.constant 0 : index
    %c0_24 = arith.constant 0 : index
    %46 = vector.load %arg8[%c0_23, %c0_24] : memref<24x32xf32, #tpu.memory_space<vmem>>, vector<24x32xf32>
    tpu.vector_store %arg8[%c0_23, %c0_24], %45 {strides = array<i32>} : memref<24x32xf32, #tpu.memory_space<vmem>>, vector<24x32xf32>,
    return
  }
  func.func @transform_0(%arg0: i32) -> (i32, i32) {
    %c0_i32 = arith.constant 0 : i32
    %c0_i32_0 = arith.constant 0 : i32
    return %arg0, %c0_i32 : i32, i32
  }
  func.func @transform_1(%arg0: i32) -> (i32, i32) {
    %c0_i32 = arith.constant 0 : i32
    %c0_i32_0 = arith.constant 0 : i32
    %c0_i32_1 = arith.constant 0 : i32
    return %c0_i32, %c0_i32_0 : i32, i32
  }
  func.func @transform_2(%arg0: i32) -> (i32, i32) {
    %c0_i32 = arith.constant 0 : i32
    %c0_i32_0 = arith.constant 0 : i32
    %c0_i32_1 = arith.constant 0 : i32
    return %c0_i32, %c0_i32_0 : i32, i32
  }
  func.func @transform_3(%arg0: i32) -> (i32, i32) {
    %c0_i32 = arith.constant 0 : i32
    %c0_i32_0 = arith.constant 0 : i32
    %c0_i32_1 = arith.constant 0 : i32
    return %c0_i32, %c0_i32_0 : i32, i32
  }
  func.func @transform_4(%arg0: i32) -> (i32, i32) {
    %c0_i32 = arith.constant 0 : i32
    %c0_i32_0 = arith.constant 0 : i32
    %c0_i32_1 = arith.constant 0 : i32
    return %c0_i32, %c0_i32_0 : i32, i32
  }
  func.func @transform_5(%arg0: i32) -> (i32, i32) {
    %c0_i32 = arith.constant 0 : i32
    %c0_i32_0 = arith.constant 0 : i32
    %c0_i32_1 = arith.constant 0 : i32
    return %c0_i32, %c0_i32_0 : i32, i32
  }
  func.func @transform_6(%arg0: i32) -> (i32, i32) {
    %c0_i32 = arith.constant 0 : i32
    %c0_i32_0 = arith.constant 0 : i32
    %c0_i32_1 = arith.constant 0 : i32
    return %c0_i32, %c0_i32_0 : i32, i32
  }
  func.func @transform_7(%arg0: i32) -> (i32, i32) {
    %c0_i32 = arith.constant 0 : i32
    %c0_i32_0 = arith.constant 0 : i32
    return %arg0, %c0_i32 : i32, i32
  }
}

module attributes {stable_mosaic.version = 11 : i64} {
  func.func @_self_attn_kernel(%arg0: i32, %arg1: memref<2xi32, #tpu.memory_space<smem>>, %arg2: memref<1x12x32xf32, #tpu.memory_space<vmem>>, %arg3: memref<1x32xf32, #tpu.memory_space<vmem>>, %arg4: memref<1x32xf32, #tpu.memory_space<vmem>>, %arg5: memref<32x96xf32, #tpu.memory_space<vmem>>, %arg6: memref<1x96xf32, #tpu.memory_space<vmem>>, %arg7: memref<32x32xf32, #tpu.memory_space<vmem>>, %arg8: memref<1x32xf32, #tpu.memory_space<vmem>>, %arg9: memref<1x12x32xf32, #tpu.memory_space<vmem>>) attributes {dimension_semantics = [#tpu.dimension_semantics<parallel>], iteration_bounds = array<i64: 2>, scalar_prefetch = 1 : i64, scratch_operands = 0 : i64, tpu.core_type = #tpu.core_type<tc>, window_params = [{transform_indices = @transform_0, window_bounds = array<i64: 1, 12, 32>}, {pipeline_mode = #tpu.pipeline_mode<synchronous>, transform_indices = @transform_1, window_bounds = array<i64: 1, 32>}, {pipeline_mode = #tpu.pipeline_mode<synchronous>, transform_indices = @transform_2, window_bounds = array<i64: 1, 32>}, {pipeline_mode = #tpu.pipeline_mode<synchronous>, transform_indices = @transform_3, window_bounds = array<i64: 32, 96>}, {pipeline_mode = #tpu.pipeline_mode<synchronous>, transform_indices = @transform_4, window_bounds = array<i64: 1, 96>}, {pipeline_mode = #tpu.pipeline_mode<synchronous>, transform_indices = @transform_5, window_bounds = array<i64: 32, 32>}, {pipeline_mode = #tpu.pipeline_mode<synchronous>, transform_indices = @transform_6, window_bounds = array<i64: 1, 32>}, {transform_indices = @transform_7, window_bounds = array<i64: 1, 12, 32>}]} {
    %0 = arith.index_cast %arg0 : i32 to index
    %1 = memref.load %arg1[%0] : memref<2xi32, #tpu.memory_space<smem>>
    %c0 = arith.constant 0 : index
    %c0_0 = arith.constant 0 : index
    %c0_1 = arith.constant 0 : index
    %2 = vector.load %arg2[%c0, %c0_0, %c0_1] : memref<1x12x32xf32, #tpu.memory_space<vmem>>, vector<1x12x32xf32>
    %3 = vector.shape_cast %2 : vector<1x12x32xf32> to vector<12x32xf32>
    %c0_2 = arith.constant 0 : index
    %c0_3 = arith.constant 0 : index
    %4 = vector.load %arg3[%c0_2, %c0_3] : memref<1x32xf32, #tpu.memory_space<vmem>>, vector<1x32xf32>
    %c0_4 = arith.constant 0 : index
    %c0_5 = arith.constant 0 : index
    %5 = vector.load %arg4[%c0_4, %c0_5] : memref<1x32xf32, #tpu.memory_space<vmem>>, vector<1x32xf32>
    %cst = arith.constant dense<0.000000e+00> : vector<12xf32>
    %6 = vector.multi_reduction <add>, %3, %cst [1] : vector<12x32xf32> to vector<12xf32>
    %7 = vector.shape_cast %6 : vector<12xf32> to vector<12x1xf32>
    %cst_6 = arith.constant 3.200000e+01 : f32
    %8 = vector.broadcast %cst_6 : f32 to vector<12x1xf32>
    %9 = arith.divf %7, %8 : vector<12x1xf32>
    %10 = vector.broadcast %9 : vector<12x1xf32> to vector<12x32xf32>
    %11 = arith.subf %3, %10 : vector<12x32xf32>
    %12 = arith.mulf %11, %11 : vector<12x32xf32>
    %cst_7 = arith.constant dense<0.000000e+00> : vector<12xf32>
    %13 = vector.multi_reduction <add>, %12, %cst_7 [1] : vector<12x32xf32> to vector<12xf32>
    %14 = vector.shape_cast %13 : vector<12xf32> to vector<12x1xf32>
    %cst_8 = arith.constant 3.200000e+01 : f32
    %15 = vector.broadcast %cst_8 : f32 to vector<12x1xf32>
    %16 = arith.divf %14, %15 : vector<12x1xf32>
    %17 = vector.broadcast %9 : vector<12x1xf32> to vector<12x32xf32>
    %18 = arith.subf %3, %17 : vector<12x32xf32>
    %cst_9 = arith.constant 9.99999996E-13 : f32
    %19 = vector.broadcast %cst_9 : f32 to vector<12x1xf32>
    %20 = arith.addf %16, %19 : vector<12x1xf32>
    %21 = math.rsqrt %20 : vector<12x1xf32>
    %22 = vector.broadcast %21 : vector<12x1xf32> to vector<12x32xf32>
    %23 = arith.mulf %18, %22 : vector<12x32xf32>
    %24 = vector.broadcast %4 : vector<1x32xf32> to vector<12x32xf32>
    %25 = arith.mulf %23, %24 : vector<12x32xf32>
    %26 = vector.broadcast %5 : vector<1x32xf32> to vector<12x32xf32>
    %27 = arith.addf %25, %26 : vector<12x32xf32>
    %c0_10 = arith.constant 0 : index
    %c0_11 = arith.constant 0 : index
    %28 = vector.load %arg5[%c0_10, %c0_11] : memref<32x96xf32, #tpu.memory_space<vmem>>, vector<32x96xf32>
    %cst_12 = arith.constant dense<0.000000e+00> : vector<12x96xf32>
    %29 = tpu.matmul %27, %28, %cst_12 {dimension_numbers = #tpu.dot_dimension_numbers<[1], [0], [0], [1], [0, 0, 1, 1], [], []>} : vector<12x32xf32>, vector<32x96xf32>, vector<12x96xf32> -> vector<12x96xf32>
    %c0_13 = arith.constant 0 : index
    %c0_14 = arith.constant 0 : index
    %30 = vector.load %arg6[%c0_13, %c0_14] : memref<1x96xf32, #tpu.memory_space<vmem>>, vector<1x96xf32>
    %31 = vector.broadcast %30 : vector<1x96xf32> to vector<12x96xf32>
    %32 = arith.addf %29, %31 : vector<12x96xf32>
    %c0_15 = arith.constant 0 : index
    %c0_16 = arith.constant 0 : index
    %33 = vector.load %arg7[%c0_15, %c0_16] : memref<32x32xf32, #tpu.memory_space<vmem>>, vector<32x32xf32>
    %34 = tpu.iota {dimensions = array<i32: 1>} : vector<12x12xi32>
    %35 = vector.broadcast %1 : i32 to vector<12x12xi32>
    %36 = arith.cmpi slt, %34, %35 : vector<12x12xi32>
    %cst_17 = arith.constant 0.000000e+00 : f32
    %37 = vector.broadcast %cst_17 : f32 to vector<12x32xf32>
    %38 = vector.extract_strided_slice %32 {offsets = [0, 0], sizes = [12, 8], strides = [1, 1]} : vector<12x96xf32> to vector<12x8xf32>
    %39 = vector.extract_strided_slice %32 {offsets = [0, 32], sizes = [12, 8], strides = [1, 1]} : vector<12x96xf32> to vector<12x8xf32>
    %40 = vector.extract_strided_slice %32 {offsets = [0, 64], sizes = [12, 8], strides = [1, 1]} : vector<12x96xf32> to vector<12x8xf32>
    %cst_18 = arith.constant dense<0.000000e+00> : vector<12x12xf32>
    %41 = tpu.matmul %38, %39, %cst_18 {dimension_numbers = #tpu.dot_dimension_numbers<[1], [1], [0], [0], [0, 0, 1, 0], [], []>} : vector<12x8xf32>, vector<12x8xf32>, vector<12x12xf32> -> vector<12x12xf32>
    %cst_19 = arith.constant -1.000000e+30 : f32
    %42 = vector.broadcast %cst_19 : f32 to vector<12x12xf32>
    %43 = arith.select %36, %41, %42 : vector<12x12xi1>, vector<12x12xf32>
    %cst_20 = arith.constant dense<0xFF800000> : vector<12xf32>
    %44 = vector.multi_reduction <maximumf>, %43, %cst_20 [1] : vector<12x12xf32> to vector<12xf32>
    %45 = vector.shape_cast %44 : vector<12xf32> to vector<12x1xf32>
    %46 = vector.broadcast %45 : vector<12x1xf32> to vector<12x12xf32>
    %47 = arith.subf %43, %46 : vector<12x12xf32>
    %48 = math.exp %47 : vector<12x12xf32>
    %cst_21 = arith.constant dense<0.000000e+00> : vector<12xf32>
    %49 = vector.multi_reduction <add>, %48, %cst_21 [1] : vector<12x12xf32> to vector<12xf32>
    %50 = vector.shape_cast %49 : vector<12xf32> to vector<12x1xf32>
    %51 = tpu.reciprocal %50 {approx = true} : vector<12x1xf32> -> vector<12x1xf32>
    %52 = vector.broadcast %51 : vector<12x1xf32> to vector<12x12xf32>
    %53 = arith.mulf %48, %52 : vector<12x12xf32>
    %cst_22 = arith.constant dense<0.000000e+00> : vector<12x8xf32>
    %54 = tpu.matmul %53, %40, %cst_22 {dimension_numbers = #tpu.dot_dimension_numbers<[1], [0], [0], [1], [0, 0, 1, 1], [], []>} : vector<12x12xf32>, vector<12x8xf32>, vector<12x8xf32> -> vector<12x8xf32>
    %55 = vector.extract_strided_slice %33 {offsets = [0, 0], sizes = [8, 32], strides = [1, 1]} : vector<32x32xf32> to vector<8x32xf32>
    %cst_23 = arith.constant dense<0.000000e+00> : vector<12x32xf32>
    %56 = tpu.matmul %54, %55, %cst_23 {dimension_numbers = #tpu.dot_dimension_numbers<[1], [0], [0], [1], [0, 0, 1, 1], [], []>} : vector<12x8xf32>, vector<8x32xf32>, vector<12x32xf32> -> vector<12x32xf32>
    %57 = arith.addf %37, %56 : vector<12x32xf32>
    %58 = vector.extract_strided_slice %32 {offsets = [0, 8], sizes = [12, 8], strides = [1, 1]} : vector<12x96xf32> to vector<12x8xf32>
    %59 = vector.extract_strided_slice %32 {offsets = [0, 40], sizes = [12, 8], strides = [1, 1]} : vector<12x96xf32> to vector<12x8xf32>
    %60 = vector.extract_strided_slice %32 {offsets = [0, 72], sizes = [12, 8], strides = [1, 1]} : vector<12x96xf32> to vector<12x8xf32>
    %cst_24 = arith.constant dense<0.000000e+00> : vector<12x12xf32>
    %61 = tpu.matmul %58, %59, %cst_24 {dimension_numbers = #tpu.dot_dimension_numbers<[1], [1], [0], [0], [0, 0, 1, 0], [], []>} : vector<12x8xf32>, vector<12x8xf32>, vector<12x12xf32> -> vector<12x12xf32>
    %cst_25 = arith.constant -1.000000e+30 : f32
    %62 = vector.broadcast %cst_25 : f32 to vector<12x12xf32>
    %63 = arith.select %36, %61, %62 : vector<12x12xi1>, vector<12x12xf32>
    %cst_26 = arith.constant dense<0xFF800000> : vector<12xf32>
    %64 = vector.multi_reduction <maximumf>, %63, %cst_26 [1] : vector<12x12xf32> to vector<12xf32>
    %65 = vector.shape_cast %64 : vector<12xf32> to vector<12x1xf32>
    %66 = vector.broadcast %65 : vector<12x1xf32> to vector<12x12xf32>
    %67 = arith.subf %63, %66 : vector<12x12xf32>
    %68 = math.exp %67 : vector<12x12xf32>
    %cst_27 = arith.constant dense<0.000000e+00> : vector<12xf32>
    %69 = vector.multi_reduction <add>, %68, %cst_27 [1] : vector<12x12xf32> to vector<12xf32>
    %70 = vector.shape_cast %69 : vector<12xf32> to vector<12x1xf32>
    %71 = tpu.reciprocal %70 {approx = true} : vector<12x1xf32> -> vector<12x1xf32>
    %72 = vector.broadcast %71 : vector<12x1xf32> to vector<12x12xf32>
    %73 = arith.mulf %68, %72 : vector<12x12xf32>
    %cst_28 = arith.constant dense<0.000000e+00> : vector<12x8xf32>
    %74 = tpu.matmul %73, %60, %cst_28 {dimension_numbers = #tpu.dot_dimension_numbers<[1], [0], [0], [1], [0, 0, 1, 1], [], []>} : vector<12x12xf32>, vector<12x8xf32>, vector<12x8xf32> -> vector<12x8xf32>
    %75 = vector.extract_strided_slice %33 {offsets = [8, 0], sizes = [8, 32], strides = [1, 1]} : vector<32x32xf32> to vector<8x32xf32>
    %cst_29 = arith.constant dense<0.000000e+00> : vector<12x32xf32>
    %76 = tpu.matmul %74, %75, %cst_29 {dimension_numbers = #tpu.dot_dimension_numbers<[1], [0], [0], [1], [0, 0, 1, 1], [], []>} : vector<12x8xf32>, vector<8x32xf32>, vector<12x32xf32> -> vector<12x32xf32>
    %77 = arith.addf %57, %76 : vector<12x32xf32>
    %78 = vector.extract_strided_slice %32 {offsets = [0, 16], sizes = [12, 8], strides = [1, 1]} : vector<12x96xf32> to vector<12x8xf32>
    %79 = vector.extract_strided_slice %32 {offsets = [0, 48], sizes = [12, 8], strides = [1, 1]} : vector<12x96xf32> to vector<12x8xf32>
    %80 = vector.extract_strided_slice %32 {offsets = [0, 80], sizes = [12, 8], strides = [1, 1]} : vector<12x96xf32> to vector<12x8xf32>
    %cst_30 = arith.constant dense<0.000000e+00> : vector<12x12xf32>
    %81 = tpu.matmul %78, %79, %cst_30 {dimension_numbers = #tpu.dot_dimension_numbers<[1], [1], [0], [0], [0, 0, 1, 0], [], []>} : vector<12x8xf32>, vector<12x8xf32>, vector<12x12xf32> -> vector<12x12xf32>
    %cst_31 = arith.constant -1.000000e+30 : f32
    %82 = vector.broadcast %cst_31 : f32 to vector<12x12xf32>
    %83 = arith.select %36, %81, %82 : vector<12x12xi1>, vector<12x12xf32>
    %cst_32 = arith.constant dense<0xFF800000> : vector<12xf32>
    %84 = vector.multi_reduction <maximumf>, %83, %cst_32 [1] : vector<12x12xf32> to vector<12xf32>
    %85 = vector.shape_cast %84 : vector<12xf32> to vector<12x1xf32>
    %86 = vector.broadcast %85 : vector<12x1xf32> to vector<12x12xf32>
    %87 = arith.subf %83, %86 : vector<12x12xf32>
    %88 = math.exp %87 : vector<12x12xf32>
    %cst_33 = arith.constant dense<0.000000e+00> : vector<12xf32>
    %89 = vector.multi_reduction <add>, %88, %cst_33 [1] : vector<12x12xf32> to vector<12xf32>
    %90 = vector.shape_cast %89 : vector<12xf32> to vector<12x1xf32>
    %91 = tpu.reciprocal %90 {approx = true} : vector<12x1xf32> -> vector<12x1xf32>
    %92 = vector.broadcast %91 : vector<12x1xf32> to vector<12x12xf32>
    %93 = arith.mulf %88, %92 : vector<12x12xf32>
    %cst_34 = arith.constant dense<0.000000e+00> : vector<12x8xf32>
    %94 = tpu.matmul %93, %80, %cst_34 {dimension_numbers = #tpu.dot_dimension_numbers<[1], [0], [0], [1], [0, 0, 1, 1], [], []>} : vector<12x12xf32>, vector<12x8xf32>, vector<12x8xf32> -> vector<12x8xf32>
    %95 = vector.extract_strided_slice %33 {offsets = [16, 0], sizes = [8, 32], strides = [1, 1]} : vector<32x32xf32> to vector<8x32xf32>
    %cst_35 = arith.constant dense<0.000000e+00> : vector<12x32xf32>
    %96 = tpu.matmul %94, %95, %cst_35 {dimension_numbers = #tpu.dot_dimension_numbers<[1], [0], [0], [1], [0, 0, 1, 1], [], []>} : vector<12x8xf32>, vector<8x32xf32>, vector<12x32xf32> -> vector<12x32xf32>
    %97 = arith.addf %77, %96 : vector<12x32xf32>
    %98 = vector.extract_strided_slice %32 {offsets = [0, 24], sizes = [12, 8], strides = [1, 1]} : vector<12x96xf32> to vector<12x8xf32>
    %99 = vector.extract_strided_slice %32 {offsets = [0, 56], sizes = [12, 8], strides = [1, 1]} : vector<12x96xf32> to vector<12x8xf32>
    %100 = vector.extract_strided_slice %32 {offsets = [0, 88], sizes = [12, 8], strides = [1, 1]} : vector<12x96xf32> to vector<12x8xf32>
    %cst_36 = arith.constant dense<0.000000e+00> : vector<12x12xf32>
    %101 = tpu.matmul %98, %99, %cst_36 {dimension_numbers = #tpu.dot_dimension_numbers<[1], [1], [0], [0], [0, 0, 1, 0], [], []>} : vector<12x8xf32>, vector<12x8xf32>, vector<12x12xf32> -> vector<12x12xf32>
    %cst_37 = arith.constant -1.000000e+30 : f32
    %102 = vector.broadcast %cst_37 : f32 to vector<12x12xf32>
    %103 = arith.select %36, %101, %102 : vector<12x12xi1>, vector<12x12xf32>
    %cst_38 = arith.constant dense<0xFF800000> : vector<12xf32>
    %104 = vector.multi_reduction <maximumf>, %103, %cst_38 [1] : vector<12x12xf32> to vector<12xf32>
    %105 = vector.shape_cast %104 : vector<12xf32> to vector<12x1xf32>
    %106 = vector.broadcast %105 : vector<12x1xf32> to vector<12x12xf32>
    %107 = arith.subf %103, %106 : vector<12x12xf32>
    %108 = math.exp %107 : vector<12x12xf32>
    %cst_39 = arith.constant dense<0.000000e+00> : vector<12xf32>
    %109 = vector.multi_reduction <add>, %108, %cst_39 [1] : vector<12x12xf32> to vector<12xf32>
    %110 = vector.shape_cast %109 : vector<12xf32> to vector<12x1xf32>
    %111 = tpu.reciprocal %110 {approx = true} : vector<12x1xf32> -> vector<12x1xf32>
    %112 = vector.broadcast %111 : vector<12x1xf32> to vector<12x12xf32>
    %113 = arith.mulf %108, %112 : vector<12x12xf32>
    %cst_40 = arith.constant dense<0.000000e+00> : vector<12x8xf32>
    %114 = tpu.matmul %113, %100, %cst_40 {dimension_numbers = #tpu.dot_dimension_numbers<[1], [0], [0], [1], [0, 0, 1, 1], [], []>} : vector<12x12xf32>, vector<12x8xf32>, vector<12x8xf32> -> vector<12x8xf32>
    %115 = vector.extract_strided_slice %33 {offsets = [24, 0], sizes = [8, 32], strides = [1, 1]} : vector<32x32xf32> to vector<8x32xf32>
    %cst_41 = arith.constant dense<0.000000e+00> : vector<12x32xf32>
    %116 = tpu.matmul %114, %115, %cst_41 {dimension_numbers = #tpu.dot_dimension_numbers<[1], [0], [0], [1], [0, 0, 1, 1], [], []>} : vector<12x8xf32>, vector<8x32xf32>, vector<12x32xf32> -> vector<12x32xf32>
    %117 = arith.addf %97, %116 : vector<12x32xf32>
    %118 = arith.addf %3, %117 : vector<12x32xf32>
    %c0_42 = arith.constant 0 : index
    %c0_43 = arith.constant 0 : index
    %119 = vector.load %arg8[%c0_42, %c0_43] : memref<1x32xf32, #tpu.memory_space<vmem>>, vector<1x32xf32>
    %120 = vector.broadcast %119 : vector<1x32xf32> to vector<12x32xf32>
    %121 = arith.addf %118, %120 : vector<12x32xf32>
    %c0_44 = arith.constant 0 : index
    %c0_45 = arith.constant 0 : index
    %c0_46 = arith.constant 0 : index
    %122 = vector.load %arg9[%c0_44, %c0_45, %c0_46] : memref<1x12x32xf32, #tpu.memory_space<vmem>>, vector<1x12x32xf32>
    %123 = vector.shape_cast %122 : vector<1x12x32xf32> to vector<12x32xf32>
    %124 = vector.shape_cast %121 : vector<12x32xf32> to vector<1x12x32xf32>
    tpu.vector_store %arg9[%c0_44, %c0_45, %c0_46], %124 {strides = array<i32>} : memref<1x12x32xf32, #tpu.memory_space<vmem>>, vector<1x12x32xf32>,
    return
  }
  func.func @transform_0(%arg0: i32, %arg1: memref<2xi32, #tpu.memory_space<smem>>) -> (i32, i32, i32) {
    %c0_i32 = arith.constant 0 : i32
    %c0_i32_0 = arith.constant 0 : i32
    %c0_i32_1 = arith.constant 0 : i32
    return %arg0, %c0_i32, %c0_i32_0 : i32, i32, i32
  }
  func.func @transform_1(%arg0: i32, %arg1: memref<2xi32, #tpu.memory_space<smem>>) -> (i32, i32) {
    %c0_i32 = arith.constant 0 : i32
    %c0_i32_0 = arith.constant 0 : i32
    %c0_i32_1 = arith.constant 0 : i32
    return %c0_i32, %c0_i32_0 : i32, i32
  }
  func.func @transform_2(%arg0: i32, %arg1: memref<2xi32, #tpu.memory_space<smem>>) -> (i32, i32) {
    %c0_i32 = arith.constant 0 : i32
    %c0_i32_0 = arith.constant 0 : i32
    %c0_i32_1 = arith.constant 0 : i32
    return %c0_i32, %c0_i32_0 : i32, i32
  }
  func.func @transform_3(%arg0: i32, %arg1: memref<2xi32, #tpu.memory_space<smem>>) -> (i32, i32) {
    %c0_i32 = arith.constant 0 : i32
    %c0_i32_0 = arith.constant 0 : i32
    %c0_i32_1 = arith.constant 0 : i32
    return %c0_i32, %c0_i32_0 : i32, i32
  }
  func.func @transform_4(%arg0: i32, %arg1: memref<2xi32, #tpu.memory_space<smem>>) -> (i32, i32) {
    %c0_i32 = arith.constant 0 : i32
    %c0_i32_0 = arith.constant 0 : i32
    %c0_i32_1 = arith.constant 0 : i32
    return %c0_i32, %c0_i32_0 : i32, i32
  }
  func.func @transform_5(%arg0: i32, %arg1: memref<2xi32, #tpu.memory_space<smem>>) -> (i32, i32) {
    %c0_i32 = arith.constant 0 : i32
    %c0_i32_0 = arith.constant 0 : i32
    %c0_i32_1 = arith.constant 0 : i32
    return %c0_i32, %c0_i32_0 : i32, i32
  }
  func.func @transform_6(%arg0: i32, %arg1: memref<2xi32, #tpu.memory_space<smem>>) -> (i32, i32) {
    %c0_i32 = arith.constant 0 : i32
    %c0_i32_0 = arith.constant 0 : i32
    %c0_i32_1 = arith.constant 0 : i32
    return %c0_i32, %c0_i32_0 : i32, i32
  }
  func.func @transform_7(%arg0: i32, %arg1: memref<2xi32, #tpu.memory_space<smem>>) -> (i32, i32, i32) {
    %c0_i32 = arith.constant 0 : i32
    %c0_i32_0 = arith.constant 0 : i32
    %c0_i32_1 = arith.constant 0 : i32
    return %arg0, %c0_i32, %c0_i32_0 : i32, i32, i32
  }
}

module attributes {stable_mosaic.version = 11 : i64} {
  func.func @_bn_swish_pw_kernel(%arg0: i32, %arg1: memref<24x32xf32, #tpu.memory_space<vmem>>, %arg2: memref<24x32xf32, #tpu.memory_space<vmem>>, %arg3: memref<1x32xf32, #tpu.memory_space<vmem>>, %arg4: memref<1x32xf32, #tpu.memory_space<vmem>>, %arg5: memref<32x32xf32, #tpu.memory_space<vmem>>, %arg6: memref<1x32xf32, #tpu.memory_space<vmem>>, %arg7: memref<24x32xf32, #tpu.memory_space<vmem>>) attributes {dimension_semantics = [#tpu.dimension_semantics<parallel>], iteration_bounds = array<i64: 1>, scalar_prefetch = 0 : i64, scratch_operands = 0 : i64, tpu.core_type = #tpu.core_type<tc>, window_params = [{transform_indices = @transform_0, window_bounds = array<i64: 24, 32>}, {transform_indices = @transform_1, window_bounds = array<i64: 24, 32>}, {pipeline_mode = #tpu.pipeline_mode<synchronous>, transform_indices = @transform_2, window_bounds = array<i64: 1, 32>}, {pipeline_mode = #tpu.pipeline_mode<synchronous>, transform_indices = @transform_3, window_bounds = array<i64: 1, 32>}, {pipeline_mode = #tpu.pipeline_mode<synchronous>, transform_indices = @transform_4, window_bounds = array<i64: 32, 32>}, {pipeline_mode = #tpu.pipeline_mode<synchronous>, transform_indices = @transform_5, window_bounds = array<i64: 1, 32>}, {transform_indices = @transform_6, window_bounds = array<i64: 24, 32>}]} {
    %c0 = arith.constant 0 : index
    %c0_0 = arith.constant 0 : index
    %0 = vector.load %arg1[%c0, %c0_0] : memref<24x32xf32, #tpu.memory_space<vmem>>, vector<24x32xf32>
    %c0_1 = arith.constant 0 : index
    %c0_2 = arith.constant 0 : index
    %1 = vector.load %arg3[%c0_1, %c0_2] : memref<1x32xf32, #tpu.memory_space<vmem>>, vector<1x32xf32>
    %2 = vector.broadcast %1 : vector<1x32xf32> to vector<24x32xf32>
    %3 = arith.mulf %0, %2 : vector<24x32xf32>
    %c0_3 = arith.constant 0 : index
    %c0_4 = arith.constant 0 : index
    %4 = vector.load %arg4[%c0_3, %c0_4] : memref<1x32xf32, #tpu.memory_space<vmem>>, vector<1x32xf32>
    %5 = vector.broadcast %4 : vector<1x32xf32> to vector<24x32xf32>
    %6 = arith.addf %3, %5 : vector<24x32xf32>
    %cst = arith.constant 0.000000e+00 : f32
    %7 = vector.broadcast %cst : f32 to vector<24x32xf32>
    %8 = arith.subf %7, %6 : vector<24x32xf32>
    %9 = math.exp %8 : vector<24x32xf32>
    %cst_5 = arith.constant 1.000000e+00 : f32
    %10 = vector.broadcast %cst_5 : f32 to vector<24x32xf32>
    %11 = arith.addf %10, %9 : vector<24x32xf32>
    %cst_6 = arith.constant 1.000000e+00 : f32
    %12 = vector.broadcast %cst_6 : f32 to vector<24x32xf32>
    %13 = arith.divf %12, %11 : vector<24x32xf32>
    %14 = arith.mulf %6, %13 : vector<24x32xf32>
    %c0_7 = arith.constant 0 : index
    %c0_8 = arith.constant 0 : index
    %15 = vector.load %arg2[%c0_7, %c0_8] : memref<24x32xf32, #tpu.memory_space<vmem>>, vector<24x32xf32>
    %c0_9 = arith.constant 0 : index
    %c0_10 = arith.constant 0 : index
    %16 = vector.load %arg5[%c0_9, %c0_10] : memref<32x32xf32, #tpu.memory_space<vmem>>, vector<32x32xf32>
    %cst_11 = arith.constant dense<0.000000e+00> : vector<24x32xf32>
    %17 = tpu.matmul %14, %16, %cst_11 {dimension_numbers = #tpu.dot_dimension_numbers<[1], [0], [0], [1], [0, 0, 1, 1], [], []>} : vector<24x32xf32>, vector<32x32xf32>, vector<24x32xf32> -> vector<24x32xf32>
    %18 = arith.addf %15, %17 : vector<24x32xf32>
    %c0_12 = arith.constant 0 : index
    %c0_13 = arith.constant 0 : index
    %19 = vector.load %arg6[%c0_12, %c0_13] : memref<1x32xf32, #tpu.memory_space<vmem>>, vector<1x32xf32>
    %20 = vector.broadcast %19 : vector<1x32xf32> to vector<24x32xf32>
    %21 = arith.addf %18, %20 : vector<24x32xf32>
    %c0_14 = arith.constant 0 : index
    %c0_15 = arith.constant 0 : index
    %22 = vector.load %arg7[%c0_14, %c0_15] : memref<24x32xf32, #tpu.memory_space<vmem>>, vector<24x32xf32>
    tpu.vector_store %arg7[%c0_14, %c0_15], %21 {strides = array<i32>} : memref<24x32xf32, #tpu.memory_space<vmem>>, vector<24x32xf32>,
    return
  }
  func.func @transform_0(%arg0: i32) -> (i32, i32) {
    %c0_i32 = arith.constant 0 : i32
    %c0_i32_0 = arith.constant 0 : i32
    return %arg0, %c0_i32 : i32, i32
  }
  func.func @transform_1(%arg0: i32) -> (i32, i32) {
    %c0_i32 = arith.constant 0 : i32
    %c0_i32_0 = arith.constant 0 : i32
    return %arg0, %c0_i32 : i32, i32
  }
  func.func @transform_2(%arg0: i32) -> (i32, i32) {
    %c0_i32 = arith.constant 0 : i32
    %c0_i32_0 = arith.constant 0 : i32
    %c0_i32_1 = arith.constant 0 : i32
    return %c0_i32, %c0_i32_0 : i32, i32
  }
  func.func @transform_3(%arg0: i32) -> (i32, i32) {
    %c0_i32 = arith.constant 0 : i32
    %c0_i32_0 = arith.constant 0 : i32
    %c0_i32_1 = arith.constant 0 : i32
    return %c0_i32, %c0_i32_0 : i32, i32
  }
  func.func @transform_4(%arg0: i32) -> (i32, i32) {
    %c0_i32 = arith.constant 0 : i32
    %c0_i32_0 = arith.constant 0 : i32
    %c0_i32_1 = arith.constant 0 : i32
    return %c0_i32, %c0_i32_0 : i32, i32
  }
  func.func @transform_5(%arg0: i32) -> (i32, i32) {
    %c0_i32 = arith.constant 0 : i32
    %c0_i32_0 = arith.constant 0 : i32
    %c0_i32_1 = arith.constant 0 : i32
    return %c0_i32, %c0_i32_0 : i32, i32
  }
  func.func @transform_6(%arg0: i32) -> (i32, i32) {
    %c0_i32 = arith.constant 0 : i32
    %c0_i32_0 = arith.constant 0 : i32
    return %arg0, %c0_i32 : i32, i32
  }
}

module attributes {stable_mosaic.version = 11 : i64} {
  func.func @kernel(%arg0: i32, %arg1: memref<24x32xf32, #tpu.memory_space<vmem>>, %arg2: memref<1x32xf32, #tpu.memory_space<vmem>>, %arg3: memref<1x32xf32, #tpu.memory_space<vmem>>, %arg4: memref<32x64xf32, #tpu.memory_space<vmem>>, %arg5: memref<1x64xf32, #tpu.memory_space<vmem>>, %arg6: memref<64x32xf32, #tpu.memory_space<vmem>>, %arg7: memref<1x32xf32, #tpu.memory_space<vmem>>, %arg8: memref<1x32xf32, #tpu.memory_space<vmem>>, %arg9: memref<1x32xf32, #tpu.memory_space<vmem>>, %arg10: memref<24x32xf32, #tpu.memory_space<vmem>>) attributes {dimension_semantics = [#tpu.dimension_semantics<parallel>], iteration_bounds = array<i64: 1>, scalar_prefetch = 0 : i64, scratch_operands = 0 : i64, tpu.core_type = #tpu.core_type<tc>, window_params = [{transform_indices = @transform_0, window_bounds = array<i64: 24, 32>}, {pipeline_mode = #tpu.pipeline_mode<synchronous>, transform_indices = @transform_1, window_bounds = array<i64: 1, 32>}, {pipeline_mode = #tpu.pipeline_mode<synchronous>, transform_indices = @transform_2, window_bounds = array<i64: 1, 32>}, {pipeline_mode = #tpu.pipeline_mode<synchronous>, transform_indices = @transform_3, window_bounds = array<i64: 32, 64>}, {pipeline_mode = #tpu.pipeline_mode<synchronous>, transform_indices = @transform_4, window_bounds = array<i64: 1, 64>}, {pipeline_mode = #tpu.pipeline_mode<synchronous>, transform_indices = @transform_5, window_bounds = array<i64: 64, 32>}, {pipeline_mode = #tpu.pipeline_mode<synchronous>, transform_indices = @transform_6, window_bounds = array<i64: 1, 32>}, {pipeline_mode = #tpu.pipeline_mode<synchronous>, transform_indices = @transform_7, window_bounds = array<i64: 1, 32>}, {pipeline_mode = #tpu.pipeline_mode<synchronous>, transform_indices = @transform_8, window_bounds = array<i64: 1, 32>}, {transform_indices = @transform_9, window_bounds = array<i64: 24, 32>}]} {
    %c0 = arith.constant 0 : index
    %c0_0 = arith.constant 0 : index
    %0 = vector.load %arg1[%c0, %c0_0] : memref<24x32xf32, #tpu.memory_space<vmem>>, vector<24x32xf32>
    %c0_1 = arith.constant 0 : index
    %c0_2 = arith.constant 0 : index
    %1 = vector.load %arg2[%c0_1, %c0_2] : memref<1x32xf32, #tpu.memory_space<vmem>>, vector<1x32xf32>
    %c0_3 = arith.constant 0 : index
    %c0_4 = arith.constant 0 : index
    %2 = vector.load %arg3[%c0_3, %c0_4] : memref<1x32xf32, #tpu.memory_space<vmem>>, vector<1x32xf32>
    %cst = arith.constant dense<0.000000e+00> : vector<24xf32>
    %3 = vector.multi_reduction <add>, %0, %cst [1] : vector<24x32xf32> to vector<24xf32>
    %4 = vector.shape_cast %3 : vector<24xf32> to vector<24x1xf32>
    %cst_5 = arith.constant 3.200000e+01 : f32
    %5 = vector.broadcast %cst_5 : f32 to vector<24x1xf32>
    %6 = arith.divf %4, %5 : vector<24x1xf32>
    %7 = vector.broadcast %6 : vector<24x1xf32> to vector<24x32xf32>
    %8 = arith.subf %0, %7 : vector<24x32xf32>
    %9 = arith.mulf %8, %8 : vector<24x32xf32>
    %cst_6 = arith.constant dense<0.000000e+00> : vector<24xf32>
    %10 = vector.multi_reduction <add>, %9, %cst_6 [1] : vector<24x32xf32> to vector<24xf32>
    %11 = vector.shape_cast %10 : vector<24xf32> to vector<24x1xf32>
    %cst_7 = arith.constant 3.200000e+01 : f32
    %12 = vector.broadcast %cst_7 : f32 to vector<24x1xf32>
    %13 = arith.divf %11, %12 : vector<24x1xf32>
    %14 = vector.broadcast %6 : vector<24x1xf32> to vector<24x32xf32>
    %15 = arith.subf %0, %14 : vector<24x32xf32>
    %cst_8 = arith.constant 9.99999996E-13 : f32
    %16 = vector.broadcast %cst_8 : f32 to vector<24x1xf32>
    %17 = arith.addf %13, %16 : vector<24x1xf32>
    %18 = math.rsqrt %17 : vector<24x1xf32>
    %19 = vector.broadcast %18 : vector<24x1xf32> to vector<24x32xf32>
    %20 = arith.mulf %15, %19 : vector<24x32xf32>
    %21 = vector.broadcast %1 : vector<1x32xf32> to vector<24x32xf32>
    %22 = arith.mulf %20, %21 : vector<24x32xf32>
    %23 = vector.broadcast %2 : vector<1x32xf32> to vector<24x32xf32>
    %24 = arith.addf %22, %23 : vector<24x32xf32>
    %c0_9 = arith.constant 0 : index
    %c0_10 = arith.constant 0 : index
    %25 = vector.load %arg4[%c0_9, %c0_10] : memref<32x64xf32, #tpu.memory_space<vmem>>, vector<32x64xf32>
    %cst_11 = arith.constant dense<0.000000e+00> : vector<24x64xf32>
    %26 = tpu.matmul %24, %25, %cst_11 {dimension_numbers = #tpu.dot_dimension_numbers<[1], [0], [0], [1], [0, 0, 1, 1], [], []>} : vector<24x32xf32>, vector<32x64xf32>, vector<24x64xf32> -> vector<24x64xf32>
    %c0_12 = arith.constant 0 : index
    %c0_13 = arith.constant 0 : index
    %27 = vector.load %arg5[%c0_12, %c0_13] : memref<1x64xf32, #tpu.memory_space<vmem>>, vector<1x64xf32>
    %28 = vector.broadcast %27 : vector<1x64xf32> to vector<24x64xf32>
    %29 = arith.addf %26, %28 : vector<24x64xf32>
    %cst_14 = arith.constant 0.000000e+00 : f32
    %30 = vector.broadcast %cst_14 : f32 to vector<24x64xf32>
    %31 = arith.subf %30, %29 : vector<24x64xf32>
    %32 = math.exp %31 : vector<24x64xf32>
    %cst_15 = arith.constant 1.000000e+00 : f32
    %33 = vector.broadcast %cst_15 : f32 to vector<24x64xf32>
    %34 = arith.addf %33, %32 : vector<24x64xf32>
    %cst_16 = arith.constant 1.000000e+00 : f32
    %35 = vector.broadcast %cst_16 : f32 to vector<24x64xf32>
    %36 = arith.divf %35, %34 : vector<24x64xf32>
    %37 = arith.mulf %29, %36 : vector<24x64xf32>
    %c0_17 = arith.constant 0 : index
    %c0_18 = arith.constant 0 : index
    %38 = vector.load %arg6[%c0_17, %c0_18] : memref<64x32xf32, #tpu.memory_space<vmem>>, vector<64x32xf32>
    %cst_19 = arith.constant dense<0.000000e+00> : vector<24x32xf32>
    %39 = tpu.matmul %37, %38, %cst_19 {dimension_numbers = #tpu.dot_dimension_numbers<[1], [0], [0], [1], [0, 0, 1, 1], [], []>} : vector<24x64xf32>, vector<64x32xf32>, vector<24x32xf32> -> vector<24x32xf32>
    %c0_20 = arith.constant 0 : index
    %c0_21 = arith.constant 0 : index
    %40 = vector.load %arg7[%c0_20, %c0_21] : memref<1x32xf32, #tpu.memory_space<vmem>>, vector<1x32xf32>
    %41 = vector.broadcast %40 : vector<1x32xf32> to vector<24x32xf32>
    %42 = arith.addf %39, %41 : vector<24x32xf32>
    %cst_22 = arith.constant 5.000000e-01 : f32
    %43 = vector.broadcast %cst_22 : f32 to vector<24x32xf32>
    %44 = arith.mulf %43, %42 : vector<24x32xf32>
    %45 = arith.addf %0, %44 : vector<24x32xf32>
    %c0_23 = arith.constant 0 : index
    %c0_24 = arith.constant 0 : index
    %46 = vector.load %arg8[%c0_23, %c0_24] : memref<1x32xf32, #tpu.memory_space<vmem>>, vector<1x32xf32>
    %c0_25 = arith.constant 0 : index
    %c0_26 = arith.constant 0 : index
    %47 = vector.load %arg9[%c0_25, %c0_26] : memref<1x32xf32, #tpu.memory_space<vmem>>, vector<1x32xf32>
    %cst_27 = arith.constant dense<0.000000e+00> : vector<24xf32>
    %48 = vector.multi_reduction <add>, %45, %cst_27 [1] : vector<24x32xf32> to vector<24xf32>
    %49 = vector.shape_cast %48 : vector<24xf32> to vector<24x1xf32>
    %cst_28 = arith.constant 3.200000e+01 : f32
    %50 = vector.broadcast %cst_28 : f32 to vector<24x1xf32>
    %51 = arith.divf %49, %50 : vector<24x1xf32>
    %52 = vector.broadcast %51 : vector<24x1xf32> to vector<24x32xf32>
    %53 = arith.subf %45, %52 : vector<24x32xf32>
    %54 = arith.mulf %53, %53 : vector<24x32xf32>
    %cst_29 = arith.constant dense<0.000000e+00> : vector<24xf32>
    %55 = vector.multi_reduction <add>, %54, %cst_29 [1] : vector<24x32xf32> to vector<24xf32>
    %56 = vector.shape_cast %55 : vector<24xf32> to vector<24x1xf32>
    %cst_30 = arith.constant 3.200000e+01 : f32
    %57 = vector.broadcast %cst_30 : f32 to vector<24x1xf32>
    %58 = arith.divf %56, %57 : vector<24x1xf32>
    %59 = vector.broadcast %51 : vector<24x1xf32> to vector<24x32xf32>
    %60 = arith.subf %45, %59 : vector<24x32xf32>
    %cst_31 = arith.constant 9.99999996E-13 : f32
    %61 = vector.broadcast %cst_31 : f32 to vector<24x1xf32>
    %62 = arith.addf %58, %61 : vector<24x1xf32>
    %63 = math.rsqrt %62 : vector<24x1xf32>
    %64 = vector.broadcast %63 : vector<24x1xf32> to vector<24x32xf32>
    %65 = arith.mulf %60, %64 : vector<24x32xf32>
    %66 = vector.broadcast %46 : vector<1x32xf32> to vector<24x32xf32>
    %67 = arith.mulf %65, %66 : vector<24x32xf32>
    %68 = vector.broadcast %47 : vector<1x32xf32> to vector<24x32xf32>
    %69 = arith.addf %67, %68 : vector<24x32xf32>
    %c0_32 = arith.constant 0 : index
    %c0_33 = arith.constant 0 : index
    %70 = vector.load %arg10[%c0_32, %c0_33] : memref<24x32xf32, #tpu.memory_space<vmem>>, vector<24x32xf32>
    tpu.vector_store %arg10[%c0_32, %c0_33], %69 {strides = array<i32>} : memref<24x32xf32, #tpu.memory_space<vmem>>, vector<24x32xf32>,
    return
  }
  func.func @transform_0(%arg0: i32) -> (i32, i32) {
    %c0_i32 = arith.constant 0 : i32
    %c0_i32_0 = arith.constant 0 : i32
    return %arg0, %c0_i32 : i32, i32
  }
  func.func @transform_1(%arg0: i32) -> (i32, i32) {
    %c0_i32 = arith.constant 0 : i32
    %c0_i32_0 = arith.constant 0 : i32
    %c0_i32_1 = arith.constant 0 : i32
    return %c0_i32, %c0_i32_0 : i32, i32
  }
  func.func @transform_2(%arg0: i32) -> (i32, i32) {
    %c0_i32 = arith.constant 0 : i32
    %c0_i32_0 = arith.constant 0 : i32
    %c0_i32_1 = arith.constant 0 : i32
    return %c0_i32, %c0_i32_0 : i32, i32
  }
  func.func @transform_3(%arg0: i32) -> (i32, i32) {
    %c0_i32 = arith.constant 0 : i32
    %c0_i32_0 = arith.constant 0 : i32
    %c0_i32_1 = arith.constant 0 : i32
    return %c0_i32, %c0_i32_0 : i32, i32
  }
  func.func @transform_4(%arg0: i32) -> (i32, i32) {
    %c0_i32 = arith.constant 0 : i32
    %c0_i32_0 = arith.constant 0 : i32
    %c0_i32_1 = arith.constant 0 : i32
    return %c0_i32, %c0_i32_0 : i32, i32
  }
  func.func @transform_5(%arg0: i32) -> (i32, i32) {
    %c0_i32 = arith.constant 0 : i32
    %c0_i32_0 = arith.constant 0 : i32
    %c0_i32_1 = arith.constant 0 : i32
    return %c0_i32, %c0_i32_0 : i32, i32
  }
  func.func @transform_6(%arg0: i32) -> (i32, i32) {
    %c0_i32 = arith.constant 0 : i32
    %c0_i32_0 = arith.constant 0 : i32
    %c0_i32_1 = arith.constant 0 : i32
    return %c0_i32, %c0_i32_0 : i32, i32
  }
  func.func @transform_7(%arg0: i32) -> (i32, i32) {
    %c0_i32 = arith.constant 0 : i32
    %c0_i32_0 = arith.constant 0 : i32
    %c0_i32_1 = arith.constant 0 : i32
    return %c0_i32, %c0_i32_0 : i32, i32
  }
  func.func @transform_8(%arg0: i32) -> (i32, i32) {
    %c0_i32 = arith.constant 0 : i32
    %c0_i32_0 = arith.constant 0 : i32
    %c0_i32_1 = arith.constant 0 : i32
    return %c0_i32, %c0_i32_0 : i32, i32
  }
  func.func @transform_9(%arg0: i32) -> (i32, i32) {
    %c0_i32 = arith.constant 0 : i32
    %c0_i32_0 = arith.constant 0 : i32
    return %arg0, %c0_i32 : i32, i32
  }
}

module attributes {stable_mosaic.version = 11 : i64} {
  func.func @_ln_pw_glu_dwconv_kernel(%arg0: i32, %arg1: memref<1x12x32xf32, #tpu.memory_space<vmem>>, %arg2: memref<1x32xf32, #tpu.memory_space<vmem>>, %arg3: memref<1x32xf32, #tpu.memory_space<vmem>>, %arg4: memref<32x64xf32, #tpu.memory_space<vmem>>, %arg5: memref<1x64xf32, #tpu.memory_space<vmem>>, %arg6: memref<7x32xf32, #tpu.memory_space<vmem>>, %arg7: memref<1x32xf32, #tpu.memory_space<vmem>>, %arg8: memref<1x12x32xf32, #tpu.memory_space<vmem>>, %arg9: memref<1x1x32xf32, #tpu.memory_space<vmem>>, %arg10: memref<1x1x32xf32, #tpu.memory_space<vmem>>, %arg11: memref<18x32xf32, #tpu.memory_space<vmem>>) attributes {dimension_semantics = [#tpu.dimension_semantics<parallel>], iteration_bounds = array<i64: 2>, scalar_prefetch = 0 : i64, scratch_operands = 1 : i64, tpu.core_type = #tpu.core_type<tc>, window_params = [{transform_indices = @transform_0, window_bounds = array<i64: 1, 12, 32>}, {pipeline_mode = #tpu.pipeline_mode<synchronous>, transform_indices = @transform_1, window_bounds = array<i64: 1, 32>}, {pipeline_mode = #tpu.pipeline_mode<synchronous>, transform_indices = @transform_2, window_bounds = array<i64: 1, 32>}, {pipeline_mode = #tpu.pipeline_mode<synchronous>, transform_indices = @transform_3, window_bounds = array<i64: 32, 64>}, {pipeline_mode = #tpu.pipeline_mode<synchronous>, transform_indices = @transform_4, window_bounds = array<i64: 1, 64>}, {pipeline_mode = #tpu.pipeline_mode<synchronous>, transform_indices = @transform_5, window_bounds = array<i64: 7, 32>}, {pipeline_mode = #tpu.pipeline_mode<synchronous>, transform_indices = @transform_6, window_bounds = array<i64: 1, 32>}, {transform_indices = @transform_7, window_bounds = array<i64: 1, 12, 32>}, {transform_indices = @transform_8, window_bounds = array<i64: 1, 1, 32>}, {transform_indices = @transform_9, window_bounds = array<i64: 1, 1, 32>}]} {
    %c0 = arith.constant 0 : index
    %c0_0 = arith.constant 0 : index
    %c0_1 = arith.constant 0 : index
    %0 = vector.load %arg1[%c0, %c0_0, %c0_1] : memref<1x12x32xf32, #tpu.memory_space<vmem>>, vector<1x12x32xf32>
    %1 = vector.shape_cast %0 : vector<1x12x32xf32> to vector<12x32xf32>
    %c0_2 = arith.constant 0 : index
    %c0_3 = arith.constant 0 : index
    %2 = vector.load %arg2[%c0_2, %c0_3] : memref<1x32xf32, #tpu.memory_space<vmem>>, vector<1x32xf32>
    %c0_4 = arith.constant 0 : index
    %c0_5 = arith.constant 0 : index
    %3 = vector.load %arg3[%c0_4, %c0_5] : memref<1x32xf32, #tpu.memory_space<vmem>>, vector<1x32xf32>
    %cst = arith.constant dense<0.000000e+00> : vector<12xf32>
    %4 = vector.multi_reduction <add>, %1, %cst [1] : vector<12x32xf32> to vector<12xf32>
    %5 = vector.shape_cast %4 : vector<12xf32> to vector<12x1xf32>
    %cst_6 = arith.constant 3.200000e+01 : f32
    %6 = vector.broadcast %cst_6 : f32 to vector<12x1xf32>
    %7 = arith.divf %5, %6 : vector<12x1xf32>
    %8 = vector.broadcast %7 : vector<12x1xf32> to vector<12x32xf32>
    %9 = arith.subf %1, %8 : vector<12x32xf32>
    %10 = arith.mulf %9, %9 : vector<12x32xf32>
    %cst_7 = arith.constant dense<0.000000e+00> : vector<12xf32>
    %11 = vector.multi_reduction <add>, %10, %cst_7 [1] : vector<12x32xf32> to vector<12xf32>
    %12 = vector.shape_cast %11 : vector<12xf32> to vector<12x1xf32>
    %cst_8 = arith.constant 3.200000e+01 : f32
    %13 = vector.broadcast %cst_8 : f32 to vector<12x1xf32>
    %14 = arith.divf %12, %13 : vector<12x1xf32>
    %15 = vector.broadcast %7 : vector<12x1xf32> to vector<12x32xf32>
    %16 = arith.subf %1, %15 : vector<12x32xf32>
    %cst_9 = arith.constant 9.99999996E-13 : f32
    %17 = vector.broadcast %cst_9 : f32 to vector<12x1xf32>
    %18 = arith.addf %14, %17 : vector<12x1xf32>
    %19 = math.rsqrt %18 : vector<12x1xf32>
    %20 = vector.broadcast %19 : vector<12x1xf32> to vector<12x32xf32>
    %21 = arith.mulf %16, %20 : vector<12x32xf32>
    %22 = vector.broadcast %2 : vector<1x32xf32> to vector<12x32xf32>
    %23 = arith.mulf %21, %22 : vector<12x32xf32>
    %24 = vector.broadcast %3 : vector<1x32xf32> to vector<12x32xf32>
    %25 = arith.addf %23, %24 : vector<12x32xf32>
    %c0_10 = arith.constant 0 : index
    %c0_11 = arith.constant 0 : index
    %26 = vector.load %arg4[%c0_10, %c0_11] : memref<32x64xf32, #tpu.memory_space<vmem>>, vector<32x64xf32>
    %cst_12 = arith.constant dense<0.000000e+00> : vector<12x64xf32>
    %27 = tpu.matmul %25, %26, %cst_12 {dimension_numbers = #tpu.dot_dimension_numbers<[1], [0], [0], [1], [0, 0, 1, 1], [], []>} : vector<12x32xf32>, vector<32x64xf32>, vector<12x64xf32> -> vector<12x64xf32>
    %c0_13 = arith.constant 0 : index
    %c0_14 = arith.constant 0 : index
    %28 = vector.load %arg5[%c0_13, %c0_14] : memref<1x64xf32, #tpu.memory_space<vmem>>, vector<1x64xf32>
    %29 = vector.broadcast %28 : vector<1x64xf32> to vector<12x64xf32>
    %30 = arith.addf %27, %29 : vector<12x64xf32>
    %31 = vector.extract_strided_slice %30 {offsets = [0, 0], sizes = [12, 32], strides = [1, 1]} : vector<12x64xf32> to vector<12x32xf32>
    %32 = vector.extract_strided_slice %30 {offsets = [0, 32], sizes = [12, 32], strides = [1, 1]} : vector<12x64xf32> to vector<12x32xf32>
    %cst_15 = arith.constant 0.000000e+00 : f32
    %33 = vector.broadcast %cst_15 : f32 to vector<12x32xf32>
    %34 = arith.subf %33, %32 : vector<12x32xf32>
    %35 = math.exp %34 : vector<12x32xf32>
    %cst_16 = arith.constant 1.000000e+00 : f32
    %36 = vector.broadcast %cst_16 : f32 to vector<12x32xf32>
    %37 = arith.addf %36, %35 : vector<12x32xf32>
    %cst_17 = arith.constant 1.000000e+00 : f32
    %38 = vector.broadcast %cst_17 : f32 to vector<12x32xf32>
    %39 = arith.divf %38, %37 : vector<12x32xf32>
    %40 = arith.mulf %31, %39 : vector<12x32xf32>
    %cst_18 = arith.constant 0.000000e+00 : f32
    %41 = vector.broadcast %cst_18 : f32 to vector<18x32xf32>
    %c0_19 = arith.constant 0 : index
    %c0_20 = arith.constant 0 : index
    %42 = vector.load %arg11[%c0_19, %c0_20] : memref<18x32xf32, #tpu.memory_space<vmem>>, vector<18x32xf32>
    tpu.vector_store %arg11[%c0_19, %c0_20], %41 {strides = array<i32>} : memref<18x32xf32, #tpu.memory_space<vmem>>, vector<18x32xf32>,
    %c3 = arith.constant 3 : index
    %c0_21 = arith.constant 0 : index
    %43 = vector.load %arg11[%c3, %c0_21] : memref<18x32xf32, #tpu.memory_space<vmem>>, vector<12x32xf32>
    tpu.vector_store %arg11[%c3, %c0_21], %40 {strides = array<i32>} : memref<18x32xf32, #tpu.memory_space<vmem>>, vector<12x32xf32>,
    %c0_22 = arith.constant 0 : index
    %c0_23 = arith.constant 0 : index
    %44 = vector.load %arg11[%c0_22, %c0_23] : memref<18x32xf32, #tpu.memory_space<vmem>>, vector<18x32xf32>
    %c0_24 = arith.constant 0 : index
    %c0_25 = arith.constant 0 : index
    %45 = vector.load %arg6[%c0_24, %c0_25] : memref<7x32xf32, #tpu.memory_space<vmem>>, vector<7x32xf32>
    %cst_26 = arith.constant 0.000000e+00 : f32
    %46 = vector.broadcast %cst_26 : f32 to vector<12x32xf32>
    %47 = vector.extract_strided_slice %44 {offsets = [0, 0], sizes = [12, 32], strides = [1, 1]} : vector<18x32xf32> to vector<12x32xf32>
    %48 = vector.extract_strided_slice %45 {offsets = [0, 0], sizes = [1, 32], strides = [1, 1]} : vector<7x32xf32> to vector<1x32xf32>
    %49 = vector.shape_cast %48 : vector<1x32xf32> to vector<32xf32>
    %50 = vector.shape_cast %49 : vector<32xf32> to vector<1x32xf32>
    %51 = vector.broadcast %50 : vector<1x32xf32> to vector<12x32xf32>
    %52 = arith.mulf %47, %51 : vector<12x32xf32>
    %53 = arith.addf %46, %52 : vector<12x32xf32>
    %54 = vector.extract_strided_slice %44 {offsets = [1, 0], sizes = [12, 32], strides = [1, 1]} : vector<18x32xf32> to vector<12x32xf32>
    %55 = vector.extract_strided_slice %45 {offsets = [1, 0], sizes = [1, 32], strides = [1, 1]} : vector<7x32xf32> to vector<1x32xf32>
    %56 = vector.shape_cast %55 : vector<1x32xf32> to vector<32xf32>
    %57 = vector.shape_cast %56 : vector<32xf32> to vector<1x32xf32>
    %58 = vector.broadcast %57 : vector<1x32xf32> to vector<12x32xf32>
    %59 = arith.mulf %54, %58 : vector<12x32xf32>
    %60 = arith.addf %53, %59 : vector<12x32xf32>
    %61 = vector.extract_strided_slice %44 {offsets = [2, 0], sizes = [12, 32], strides = [1, 1]} : vector<18x32xf32> to vector<12x32xf32>
    %62 = vector.extract_strided_slice %45 {offsets = [2, 0], sizes = [1, 32], strides = [1, 1]} : vector<7x32xf32> to vector<1x32xf32>
    %63 = vector.shape_cast %62 : vector<1x32xf32> to vector<32xf32>
    %64 = vector.shape_cast %63 : vector<32xf32> to vector<1x32xf32>
    %65 = vector.broadcast %64 : vector<1x32xf32> to vector<12x32xf32>
    %66 = arith.mulf %61, %65 : vector<12x32xf32>
    %67 = arith.addf %60, %66 : vector<12x32xf32>
    %68 = vector.extract_strided_slice %44 {offsets = [3, 0], sizes = [12, 32], strides = [1, 1]} : vector<18x32xf32> to vector<12x32xf32>
    %69 = vector.extract_strided_slice %45 {offsets = [3, 0], sizes = [1, 32], strides = [1, 1]} : vector<7x32xf32> to vector<1x32xf32>
    %70 = vector.shape_cast %69 : vector<1x32xf32> to vector<32xf32>
    %71 = vector.shape_cast %70 : vector<32xf32> to vector<1x32xf32>
    %72 = vector.broadcast %71 : vector<1x32xf32> to vector<12x32xf32>
    %73 = arith.mulf %68, %72 : vector<12x32xf32>
    %74 = arith.addf %67, %73 : vector<12x32xf32>
    %75 = vector.extract_strided_slice %44 {offsets = [4, 0], sizes = [12, 32], strides = [1, 1]} : vector<18x32xf32> to vector<12x32xf32>
    %76 = vector.extract_strided_slice %45 {offsets = [4, 0], sizes = [1, 32], strides = [1, 1]} : vector<7x32xf32> to vector<1x32xf32>
    %77 = vector.shape_cast %76 : vector<1x32xf32> to vector<32xf32>
    %78 = vector.shape_cast %77 : vector<32xf32> to vector<1x32xf32>
    %79 = vector.broadcast %78 : vector<1x32xf32> to vector<12x32xf32>
    %80 = arith.mulf %75, %79 : vector<12x32xf32>
    %81 = arith.addf %74, %80 : vector<12x32xf32>
    %82 = vector.extract_strided_slice %44 {offsets = [5, 0], sizes = [12, 32], strides = [1, 1]} : vector<18x32xf32> to vector<12x32xf32>
    %83 = vector.extract_strided_slice %45 {offsets = [5, 0], sizes = [1, 32], strides = [1, 1]} : vector<7x32xf32> to vector<1x32xf32>
    %84 = vector.shape_cast %83 : vector<1x32xf32> to vector<32xf32>
    %85 = vector.shape_cast %84 : vector<32xf32> to vector<1x32xf32>
    %86 = vector.broadcast %85 : vector<1x32xf32> to vector<12x32xf32>
    %87 = arith.mulf %82, %86 : vector<12x32xf32>
    %88 = arith.addf %81, %87 : vector<12x32xf32>
    %89 = vector.extract_strided_slice %44 {offsets = [6, 0], sizes = [12, 32], strides = [1, 1]} : vector<18x32xf32> to vector<12x32xf32>
    %90 = vector.extract_strided_slice %45 {offsets = [6, 0], sizes = [1, 32], strides = [1, 1]} : vector<7x32xf32> to vector<1x32xf32>
    %91 = vector.shape_cast %90 : vector<1x32xf32> to vector<32xf32>
    %92 = vector.shape_cast %91 : vector<32xf32> to vector<1x32xf32>
    %93 = vector.broadcast %92 : vector<1x32xf32> to vector<12x32xf32>
    %94 = arith.mulf %89, %93 : vector<12x32xf32>
    %95 = arith.addf %88, %94 : vector<12x32xf32>
    %c0_27 = arith.constant 0 : index
    %c0_28 = arith.constant 0 : index
    %96 = vector.load %arg7[%c0_27, %c0_28] : memref<1x32xf32, #tpu.memory_space<vmem>>, vector<1x32xf32>
    %97 = vector.broadcast %96 : vector<1x32xf32> to vector<12x32xf32>
    %98 = arith.addf %95, %97 : vector<12x32xf32>
    %c0_29 = arith.constant 0 : index
    %c0_30 = arith.constant 0 : index
    %c0_31 = arith.constant 0 : index
    %99 = vector.load %arg8[%c0_29, %c0_30, %c0_31] : memref<1x12x32xf32, #tpu.memory_space<vmem>>, vector<1x12x32xf32>
    %100 = vector.shape_cast %99 : vector<1x12x32xf32> to vector<12x32xf32>
    %101 = vector.shape_cast %98 : vector<12x32xf32> to vector<1x12x32xf32>
    tpu.vector_store %arg8[%c0_29, %c0_30, %c0_31], %101 {strides = array<i32>} : memref<1x12x32xf32, #tpu.memory_space<vmem>>, vector<1x12x32xf32>,
    %cst_32 = arith.constant dense<0.000000e+00> : vector<32xf32>
    %102 = vector.multi_reduction <add>, %98, %cst_32 [0] : vector<12x32xf32> to vector<32xf32>
    %103 = vector.shape_cast %102 : vector<32xf32> to vector<1x32xf32>
    %c0_33 = arith.constant 0 : index
    %c0_34 = arith.constant 0 : index
    %c0_35 = arith.constant 0 : index
    %104 = vector.load %arg9[%c0_33, %c0_34, %c0_35] : memref<1x1x32xf32, #tpu.memory_space<vmem>>, vector<1x1x32xf32>
    %105 = vector.shape_cast %104 : vector<1x1x32xf32> to vector<1x32xf32>
    %106 = vector.shape_cast %103 : vector<1x32xf32> to vector<1x1x32xf32>
    tpu.vector_store %arg9[%c0_33, %c0_34, %c0_35], %106 {strides = array<i32>} : memref<1x1x32xf32, #tpu.memory_space<vmem>>, vector<1x1x32xf32>,
    %107 = arith.mulf %98, %98 : vector<12x32xf32>
    %cst_36 = arith.constant dense<0.000000e+00> : vector<32xf32>
    %108 = vector.multi_reduction <add>, %107, %cst_36 [0] : vector<12x32xf32> to vector<32xf32>
    %109 = vector.shape_cast %108 : vector<32xf32> to vector<1x32xf32>
    %c0_37 = arith.constant 0 : index
    %c0_38 = arith.constant 0 : index
    %c0_39 = arith.constant 0 : index
    %110 = vector.load %arg10[%c0_37, %c0_38, %c0_39] : memref<1x1x32xf32, #tpu.memory_space<vmem>>, vector<1x1x32xf32>
    %111 = vector.shape_cast %110 : vector<1x1x32xf32> to vector<1x32xf32>
    %112 = vector.shape_cast %109 : vector<1x32xf32> to vector<1x1x32xf32>
    tpu.vector_store %arg10[%c0_37, %c0_38, %c0_39], %112 {strides = array<i32>} : memref<1x1x32xf32, #tpu.memory_space<vmem>>, vector<1x1x32xf32>,
    return
  }
  func.func @transform_0(%arg0: i32) -> (i32, i32, i32) {
    %c0_i32 = arith.constant 0 : i32
    %c0_i32_0 = arith.constant 0 : i32
    %c0_i32_1 = arith.constant 0 : i32
    return %arg0, %c0_i32, %c0_i32_0 : i32, i32, i32
  }
  func.func @transform_1(%arg0: i32) -> (i32, i32) {
    %c0_i32 = arith.constant 0 : i32
    %c0_i32_0 = arith.constant 0 : i32
    %c0_i32_1 = arith.constant 0 : i32
    return %c0_i32, %c0_i32_0 : i32, i32
  }
  func.func @transform_2(%arg0: i32) -> (i32, i32) {
    %c0_i32 = arith.constant 0 : i32
    %c0_i32_0 = arith.constant 0 : i32
    %c0_i32_1 = arith.constant 0 : i32
    return %c0_i32, %c0_i32_0 : i32, i32
  }
  func.func @transform_3(%arg0: i32) -> (i32, i32) {
    %c0_i32 = arith.constant 0 : i32
    %c0_i32_0 = arith.constant 0 : i32
    %c0_i32_1 = arith.constant 0 : i32
    return %c0_i32, %c0_i32_0 : i32, i32
  }
  func.func @transform_4(%arg0: i32) -> (i32, i32) {
    %c0_i32 = arith.constant 0 : i32
    %c0_i32_0 = arith.constant 0 : i32
    %c0_i32_1 = arith.constant 0 : i32
    return %c0_i32, %c0_i32_0 : i32, i32
  }
  func.func @transform_5(%arg0: i32) -> (i32, i32) {
    %c0_i32 = arith.constant 0 : i32
    %c0_i32_0 = arith.constant 0 : i32
    %c0_i32_1 = arith.constant 0 : i32
    return %c0_i32, %c0_i32_0 : i32, i32
  }
  func.func @transform_6(%arg0: i32) -> (i32, i32) {
    %c0_i32 = arith.constant 0 : i32
    %c0_i32_0 = arith.constant 0 : i32
    %c0_i32_1 = arith.constant 0 : i32
    return %c0_i32, %c0_i32_0 : i32, i32
  }
  func.func @transform_7(%arg0: i32) -> (i32, i32, i32) {
    %c0_i32 = arith.constant 0 : i32
    %c0_i32_0 = arith.constant 0 : i32
    %c0_i32_1 = arith.constant 0 : i32
    return %arg0, %c0_i32, %c0_i32_0 : i32, i32, i32
  }
  func.func @transform_8(%arg0: i32) -> (i32, i32, i32) {
    %c0_i32 = arith.constant 0 : i32
    %c0_i32_0 = arith.constant 0 : i32
    %c0_i32_1 = arith.constant 0 : i32
    return %arg0, %c0_i32, %c0_i32_0 : i32, i32, i32
  }
  func.func @transform_9(%arg0: i32) -> (i32, i32, i32) {
    %c0_i32 = arith.constant 0 : i32
    %c0_i32_0 = arith.constant 0 : i32
    %c0_i32_1 = arith.constant 0 : i32
    return %arg0, %c0_i32, %c0_i32_0 : i32, i32, i32
  }
}

module attributes {stable_mosaic.version = 11 : i64} {
  func.func @kernel(%arg0: i32, %arg1: memref<24x32xf32, #tpu.memory_space<vmem>>, %arg2: memref<1x32xf32, #tpu.memory_space<vmem>>, %arg3: memref<1x32xf32, #tpu.memory_space<vmem>>, %arg4: memref<32x64xf32, #tpu.memory_space<vmem>>, %arg5: memref<1x64xf32, #tpu.memory_space<vmem>>, %arg6: memref<64x32xf32, #tpu.memory_space<vmem>>, %arg7: memref<1x32xf32, #tpu.memory_space<vmem>>, %arg8: memref<1x32xf32, #tpu.memory_space<vmem>>, %arg9: memref<1x32xf32, #tpu.memory_space<vmem>>, %arg10: memref<1x32xf32, #tpu.memory_space<vmem>>, %arg11: memref<1x32xf32, #tpu.memory_space<vmem>>, %arg12: memref<24x32xf32, #tpu.memory_space<vmem>>) attributes {dimension_semantics = [#tpu.dimension_semantics<parallel>], iteration_bounds = array<i64: 1>, scalar_prefetch = 0 : i64, scratch_operands = 0 : i64, tpu.core_type = #tpu.core_type<tc>, window_params = [{transform_indices = @transform_0, window_bounds = array<i64: 24, 32>}, {pipeline_mode = #tpu.pipeline_mode<synchronous>, transform_indices = @transform_1, window_bounds = array<i64: 1, 32>}, {pipeline_mode = #tpu.pipeline_mode<synchronous>, transform_indices = @transform_2, window_bounds = array<i64: 1, 32>}, {pipeline_mode = #tpu.pipeline_mode<synchronous>, transform_indices = @transform_3, window_bounds = array<i64: 32, 64>}, {pipeline_mode = #tpu.pipeline_mode<synchronous>, transform_indices = @transform_4, window_bounds = array<i64: 1, 64>}, {pipeline_mode = #tpu.pipeline_mode<synchronous>, transform_indices = @transform_5, window_bounds = array<i64: 64, 32>}, {pipeline_mode = #tpu.pipeline_mode<synchronous>, transform_indices = @transform_6, window_bounds = array<i64: 1, 32>}, {pipeline_mode = #tpu.pipeline_mode<synchronous>, transform_indices = @transform_7, window_bounds = array<i64: 1, 32>}, {pipeline_mode = #tpu.pipeline_mode<synchronous>, transform_indices = @transform_8, window_bounds = array<i64: 1, 32>}, {pipeline_mode = #tpu.pipeline_mode<synchronous>, transform_indices = @transform_9, window_bounds = array<i64: 1, 32>}, {pipeline_mode = #tpu.pipeline_mode<synchronous>, transform_indices = @transform_10, window_bounds = array<i64: 1, 32>}, {transform_indices = @transform_11, window_bounds = array<i64: 24, 32>}]} {
    %c0 = arith.constant 0 : index
    %c0_0 = arith.constant 0 : index
    %0 = vector.load %arg1[%c0, %c0_0] : memref<24x32xf32, #tpu.memory_space<vmem>>, vector<24x32xf32>
    %c0_1 = arith.constant 0 : index
    %c0_2 = arith.constant 0 : index
    %1 = vector.load %arg2[%c0_1, %c0_2] : memref<1x32xf32, #tpu.memory_space<vmem>>, vector<1x32xf32>
    %c0_3 = arith.constant 0 : index
    %c0_4 = arith.constant 0 : index
    %2 = vector.load %arg3[%c0_3, %c0_4] : memref<1x32xf32, #tpu.memory_space<vmem>>, vector<1x32xf32>
    %cst = arith.constant dense<0.000000e+00> : vector<24xf32>
    %3 = vector.multi_reduction <add>, %0, %cst [1] : vector<24x32xf32> to vector<24xf32>
    %4 = vector.shape_cast %3 : vector<24xf32> to vector<24x1xf32>
    %cst_5 = arith.constant 3.200000e+01 : f32
    %5 = vector.broadcast %cst_5 : f32 to vector<24x1xf32>
    %6 = arith.divf %4, %5 : vector<24x1xf32>
    %7 = vector.broadcast %6 : vector<24x1xf32> to vector<24x32xf32>
    %8 = arith.subf %0, %7 : vector<24x32xf32>
    %9 = arith.mulf %8, %8 : vector<24x32xf32>
    %cst_6 = arith.constant dense<0.000000e+00> : vector<24xf32>
    %10 = vector.multi_reduction <add>, %9, %cst_6 [1] : vector<24x32xf32> to vector<24xf32>
    %11 = vector.shape_cast %10 : vector<24xf32> to vector<24x1xf32>
    %cst_7 = arith.constant 3.200000e+01 : f32
    %12 = vector.broadcast %cst_7 : f32 to vector<24x1xf32>
    %13 = arith.divf %11, %12 : vector<24x1xf32>
    %14 = vector.broadcast %6 : vector<24x1xf32> to vector<24x32xf32>
    %15 = arith.subf %0, %14 : vector<24x32xf32>
    %cst_8 = arith.constant 9.99999996E-13 : f32
    %16 = vector.broadcast %cst_8 : f32 to vector<24x1xf32>
    %17 = arith.addf %13, %16 : vector<24x1xf32>
    %18 = math.rsqrt %17 : vector<24x1xf32>
    %19 = vector.broadcast %18 : vector<24x1xf32> to vector<24x32xf32>
    %20 = arith.mulf %15, %19 : vector<24x32xf32>
    %21 = vector.broadcast %1 : vector<1x32xf32> to vector<24x32xf32>
    %22 = arith.mulf %20, %21 : vector<24x32xf32>
    %23 = vector.broadcast %2 : vector<1x32xf32> to vector<24x32xf32>
    %24 = arith.addf %22, %23 : vector<24x32xf32>
    %c0_9 = arith.constant 0 : index
    %c0_10 = arith.constant 0 : index
    %25 = vector.load %arg4[%c0_9, %c0_10] : memref<32x64xf32, #tpu.memory_space<vmem>>, vector<32x64xf32>
    %cst_11 = arith.constant dense<0.000000e+00> : vector<24x64xf32>
    %26 = tpu.matmul %24, %25, %cst_11 {dimension_numbers = #tpu.dot_dimension_numbers<[1], [0], [0], [1], [0, 0, 1, 1], [], []>} : vector<24x32xf32>, vector<32x64xf32>, vector<24x64xf32> -> vector<24x64xf32>
    %c0_12 = arith.constant 0 : index
    %c0_13 = arith.constant 0 : index
    %27 = vector.load %arg5[%c0_12, %c0_13] : memref<1x64xf32, #tpu.memory_space<vmem>>, vector<1x64xf32>
    %28 = vector.broadcast %27 : vector<1x64xf32> to vector<24x64xf32>
    %29 = arith.addf %26, %28 : vector<24x64xf32>
    %cst_14 = arith.constant 0.000000e+00 : f32
    %30 = vector.broadcast %cst_14 : f32 to vector<24x64xf32>
    %31 = arith.subf %30, %29 : vector<24x64xf32>
    %32 = math.exp %31 : vector<24x64xf32>
    %cst_15 = arith.constant 1.000000e+00 : f32
    %33 = vector.broadcast %cst_15 : f32 to vector<24x64xf32>
    %34 = arith.addf %33, %32 : vector<24x64xf32>
    %cst_16 = arith.constant 1.000000e+00 : f32
    %35 = vector.broadcast %cst_16 : f32 to vector<24x64xf32>
    %36 = arith.divf %35, %34 : vector<24x64xf32>
    %37 = arith.mulf %29, %36 : vector<24x64xf32>
    %c0_17 = arith.constant 0 : index
    %c0_18 = arith.constant 0 : index
    %38 = vector.load %arg6[%c0_17, %c0_18] : memref<64x32xf32, #tpu.memory_space<vmem>>, vector<64x32xf32>
    %cst_19 = arith.constant dense<0.000000e+00> : vector<24x32xf32>
    %39 = tpu.matmul %37, %38, %cst_19 {dimension_numbers = #tpu.dot_dimension_numbers<[1], [0], [0], [1], [0, 0, 1, 1], [], []>} : vector<24x64xf32>, vector<64x32xf32>, vector<24x32xf32> -> vector<24x32xf32>
    %c0_20 = arith.constant 0 : index
    %c0_21 = arith.constant 0 : index
    %40 = vector.load %arg7[%c0_20, %c0_21] : memref<1x32xf32, #tpu.memory_space<vmem>>, vector<1x32xf32>
    %41 = vector.broadcast %40 : vector<1x32xf32> to vector<24x32xf32>
    %42 = arith.addf %39, %41 : vector<24x32xf32>
    %cst_22 = arith.constant 5.000000e-01 : f32
    %43 = vector.broadcast %cst_22 : f32 to vector<24x32xf32>
    %44 = arith.mulf %43, %42 : vector<24x32xf32>
    %45 = arith.addf %0, %44 : vector<24x32xf32>
    %c0_23 = arith.constant 0 : index
    %c0_24 = arith.constant 0 : index
    %46 = vector.load %arg8[%c0_23, %c0_24] : memref<1x32xf32, #tpu.memory_space<vmem>>, vector<1x32xf32>
    %c0_25 = arith.constant 0 : index
    %c0_26 = arith.constant 0 : index
    %47 = vector.load %arg9[%c0_25, %c0_26] : memref<1x32xf32, #tpu.memory_space<vmem>>, vector<1x32xf32>
    %cst_27 = arith.constant dense<0.000000e+00> : vector<24xf32>
    %48 = vector.multi_reduction <add>, %45, %cst_27 [1] : vector<24x32xf32> to vector<24xf32>
    %49 = vector.shape_cast %48 : vector<24xf32> to vector<24x1xf32>
    %cst_28 = arith.constant 3.200000e+01 : f32
    %50 = vector.broadcast %cst_28 : f32 to vector<24x1xf32>
    %51 = arith.divf %49, %50 : vector<24x1xf32>
    %52 = vector.broadcast %51 : vector<24x1xf32> to vector<24x32xf32>
    %53 = arith.subf %45, %52 : vector<24x32xf32>
    %54 = arith.mulf %53, %53 : vector<24x32xf32>
    %cst_29 = arith.constant dense<0.000000e+00> : vector<24xf32>
    %55 = vector.multi_reduction <add>, %54, %cst_29 [1] : vector<24x32xf32> to vector<24xf32>
    %56 = vector.shape_cast %55 : vector<24xf32> to vector<24x1xf32>
    %cst_30 = arith.constant 3.200000e+01 : f32
    %57 = vector.broadcast %cst_30 : f32 to vector<24x1xf32>
    %58 = arith.divf %56, %57 : vector<24x1xf32>
    %59 = vector.broadcast %51 : vector<24x1xf32> to vector<24x32xf32>
    %60 = arith.subf %45, %59 : vector<24x32xf32>
    %cst_31 = arith.constant 9.99999996E-13 : f32
    %61 = vector.broadcast %cst_31 : f32 to vector<24x1xf32>
    %62 = arith.addf %58, %61 : vector<24x1xf32>
    %63 = math.rsqrt %62 : vector<24x1xf32>
    %64 = vector.broadcast %63 : vector<24x1xf32> to vector<24x32xf32>
    %65 = arith.mulf %60, %64 : vector<24x32xf32>
    %66 = vector.broadcast %46 : vector<1x32xf32> to vector<24x32xf32>
    %67 = arith.mulf %65, %66 : vector<24x32xf32>
    %68 = vector.broadcast %47 : vector<1x32xf32> to vector<24x32xf32>
    %69 = arith.addf %67, %68 : vector<24x32xf32>
    %c0_32 = arith.constant 0 : index
    %c0_33 = arith.constant 0 : index
    %70 = vector.load %arg10[%c0_32, %c0_33] : memref<1x32xf32, #tpu.memory_space<vmem>>, vector<1x32xf32>
    %c0_34 = arith.constant 0 : index
    %c0_35 = arith.constant 0 : index
    %71 = vector.load %arg11[%c0_34, %c0_35] : memref<1x32xf32, #tpu.memory_space<vmem>>, vector<1x32xf32>
    %cst_36 = arith.constant dense<0.000000e+00> : vector<24xf32>
    %72 = vector.multi_reduction <add>, %69, %cst_36 [1] : vector<24x32xf32> to vector<24xf32>
    %73 = vector.shape_cast %72 : vector<24xf32> to vector<24x1xf32>
    %cst_37 = arith.constant 3.200000e+01 : f32
    %74 = vector.broadcast %cst_37 : f32 to vector<24x1xf32>
    %75 = arith.divf %73, %74 : vector<24x1xf32>
    %76 = vector.broadcast %75 : vector<24x1xf32> to vector<24x32xf32>
    %77 = arith.subf %69, %76 : vector<24x32xf32>
    %78 = arith.mulf %77, %77 : vector<24x32xf32>
    %cst_38 = arith.constant dense<0.000000e+00> : vector<24xf32>
    %79 = vector.multi_reduction <add>, %78, %cst_38 [1] : vector<24x32xf32> to vector<24xf32>
    %80 = vector.shape_cast %79 : vector<24xf32> to vector<24x1xf32>
    %cst_39 = arith.constant 3.200000e+01 : f32
    %81 = vector.broadcast %cst_39 : f32 to vector<24x1xf32>
    %82 = arith.divf %80, %81 : vector<24x1xf32>
    %83 = vector.broadcast %75 : vector<24x1xf32> to vector<24x32xf32>
    %84 = arith.subf %69, %83 : vector<24x32xf32>
    %cst_40 = arith.constant 9.99999996E-13 : f32
    %85 = vector.broadcast %cst_40 : f32 to vector<24x1xf32>
    %86 = arith.addf %82, %85 : vector<24x1xf32>
    %87 = math.rsqrt %86 : vector<24x1xf32>
    %88 = vector.broadcast %87 : vector<24x1xf32> to vector<24x32xf32>
    %89 = arith.mulf %84, %88 : vector<24x32xf32>
    %90 = vector.broadcast %70 : vector<1x32xf32> to vector<24x32xf32>
    %91 = arith.mulf %89, %90 : vector<24x32xf32>
    %92 = vector.broadcast %71 : vector<1x32xf32> to vector<24x32xf32>
    %93 = arith.addf %91, %92 : vector<24x32xf32>
    %c0_41 = arith.constant 0 : index
    %c0_42 = arith.constant 0 : index
    %94 = vector.load %arg12[%c0_41, %c0_42] : memref<24x32xf32, #tpu.memory_space<vmem>>, vector<24x32xf32>
    tpu.vector_store %arg12[%c0_41, %c0_42], %93 {strides = array<i32>} : memref<24x32xf32, #tpu.memory_space<vmem>>, vector<24x32xf32>,
    return
  }
  func.func @transform_0(%arg0: i32) -> (i32, i32) {
    %c0_i32 = arith.constant 0 : i32
    %c0_i32_0 = arith.constant 0 : i32
    return %arg0, %c0_i32 : i32, i32
  }
  func.func @transform_1(%arg0: i32) -> (i32, i32) {
    %c0_i32 = arith.constant 0 : i32
    %c0_i32_0 = arith.constant 0 : i32
    %c0_i32_1 = arith.constant 0 : i32
    return %c0_i32, %c0_i32_0 : i32, i32
  }
  func.func @transform_2(%arg0: i32) -> (i32, i32) {
    %c0_i32 = arith.constant 0 : i32
    %c0_i32_0 = arith.constant 0 : i32
    %c0_i32_1 = arith.constant 0 : i32
    return %c0_i32, %c0_i32_0 : i32, i32
  }
  func.func @transform_3(%arg0: i32) -> (i32, i32) {
    %c0_i32 = arith.constant 0 : i32
    %c0_i32_0 = arith.constant 0 : i32
    %c0_i32_1 = arith.constant 0 : i32
    return %c0_i32, %c0_i32_0 : i32, i32
  }
  func.func @transform_4(%arg0: i32) -> (i32, i32) {
    %c0_i32 = arith.constant 0 : i32
    %c0_i32_0 = arith.constant 0 : i32
    %c0_i32_1 = arith.constant 0 : i32
    return %c0_i32, %c0_i32_0 : i32, i32
  }
  func.func @transform_5(%arg0: i32) -> (i32, i32) {
    %c0_i32 = arith.constant 0 : i32
    %c0_i32_0 = arith.constant 0 : i32
    %c0_i32_1 = arith.constant 0 : i32
    return %c0_i32, %c0_i32_0 : i32, i32
  }
  func.func @transform_6(%arg0: i32) -> (i32, i32) {
    %c0_i32 = arith.constant 0 : i32
    %c0_i32_0 = arith.constant 0 : i32
    %c0_i32_1 = arith.constant 0 : i32
    return %c0_i32, %c0_i32_0 : i32, i32
  }
  func.func @transform_7(%arg0: i32) -> (i32, i32) {
    %c0_i32 = arith.constant 0 : i32
    %c0_i32_0 = arith.constant 0 : i32
    %c0_i32_1 = arith.constant 0 : i32
    return %c0_i32, %c0_i32_0 : i32, i32
  }
  func.func @transform_8(%arg0: i32) -> (i32, i32) {
    %c0_i32 = arith.constant 0 : i32
    %c0_i32_0 = arith.constant 0 : i32
    %c0_i32_1 = arith.constant 0 : i32
    return %c0_i32, %c0_i32_0 : i32, i32
  }
  func.func @transform_9(%arg0: i32) -> (i32, i32) {
    %c0_i32 = arith.constant 0 : i32
    %c0_i32_0 = arith.constant 0 : i32
    %c0_i32_1 = arith.constant 0 : i32
    return %c0_i32, %c0_i32_0 : i32, i32
  }
  func.func @transform_10(%arg0: i32) -> (i32, i32) {
    %c0_i32 = arith.constant 0 : i32
    %c0_i32_0 = arith.constant 0 : i32
    %c0_i32_1 = arith.constant 0 : i32
    return %c0_i32, %c0_i32_0 : i32, i32
  }
  func.func @transform_11(%arg0: i32) -> (i32, i32) {
    %c0_i32 = arith.constant 0 : i32
    %c0_i32_0 = arith.constant 0 : i32
    return %arg0, %c0_i32 : i32, i32
  }
}

module attributes {stable_mosaic.version = 11 : i64} {
  func.func @kernel(%arg0: i32, %arg1: memref<24x32xf32, #tpu.memory_space<vmem>>, %arg2: memref<32x128xf32, #tpu.memory_space<vmem>>, %arg3: memref<1x128xf32, #tpu.memory_space<vmem>>, %arg4: memref<24x128xf32, #tpu.memory_space<vmem>>) attributes {dimension_semantics = [#tpu.dimension_semantics<parallel>], iteration_bounds = array<i64: 1>, scalar_prefetch = 0 : i64, scratch_operands = 0 : i64, tpu.core_type = #tpu.core_type<tc>, window_params = [{transform_indices = @transform_0, window_bounds = array<i64: 24, 32>}, {pipeline_mode = #tpu.pipeline_mode<synchronous>, transform_indices = @transform_1, window_bounds = array<i64: 32, 128>}, {pipeline_mode = #tpu.pipeline_mode<synchronous>, transform_indices = @transform_2, window_bounds = array<i64: 1, 128>}, {transform_indices = @transform_3, window_bounds = array<i64: 24, 128>}]} {
    %c0 = arith.constant 0 : index
    %c0_0 = arith.constant 0 : index
    %0 = vector.load %arg1[%c0, %c0_0] : memref<24x32xf32, #tpu.memory_space<vmem>>, vector<24x32xf32>
    %c0_1 = arith.constant 0 : index
    %c0_2 = arith.constant 0 : index
    %1 = vector.load %arg2[%c0_1, %c0_2] : memref<32x128xf32, #tpu.memory_space<vmem>>, vector<32x128xf32>
    %cst = arith.constant dense<0.000000e+00> : vector<24x128xf32>
    %2 = tpu.matmul %0, %1, %cst {dimension_numbers = #tpu.dot_dimension_numbers<[1], [0], [0], [1], [0, 0, 1, 1], [], []>} : vector<24x32xf32>, vector<32x128xf32>, vector<24x128xf32> -> vector<24x128xf32>
    %c0_3 = arith.constant 0 : index
    %c0_4 = arith.constant 0 : index
    %3 = vector.load %arg3[%c0_3, %c0_4] : memref<1x128xf32, #tpu.memory_space<vmem>>, vector<1x128xf32>
    %4 = vector.broadcast %3 : vector<1x128xf32> to vector<24x128xf32>
    %5 = arith.addf %2, %4 : vector<24x128xf32>
    %6 = tpu.iota {dimensions = array<i32: 1>} : vector<24x128xi32>
    %c10_i32 = arith.constant 10 : i32
    %7 = vector.broadcast %c10_i32 : i32 to vector<24x128xi32>
    %8 = arith.cmpi slt, %6, %7 : vector<24x128xi32>
    %cst_5 = arith.constant -1.000000e+30 : f32
    %9 = vector.broadcast %cst_5 : f32 to vector<24x128xf32>
    %10 = arith.select %8, %5, %9 : vector<24x128xi1>, vector<24x128xf32>
    %cst_6 = arith.constant dense<0xFF800000> : vector<24xf32>
    %11 = vector.multi_reduction <maximumf>, %10, %cst_6 [1] : vector<24x128xf32> to vector<24xf32>
    %12 = vector.shape_cast %11 : vector<24xf32> to vector<24x1xf32>
    %13 = vector.broadcast %12 : vector<24x1xf32> to vector<24x128xf32>
    %14 = arith.subf %10, %13 : vector<24x128xf32>
    %15 = math.exp %14 : vector<24x128xf32>
    %cst_7 = arith.constant dense<0.000000e+00> : vector<24xf32>
    %16 = vector.multi_reduction <add>, %15, %cst_7 [1] : vector<24x128xf32> to vector<24xf32>
    %17 = vector.shape_cast %16 : vector<24xf32> to vector<24x1xf32>
    %18 = math.log %17 : vector<24x1xf32>
    %19 = vector.broadcast %18 : vector<24x1xf32> to vector<24x128xf32>
    %20 = arith.subf %14, %19 : vector<24x128xf32>
    %c0_8 = arith.constant 0 : index
    %c0_9 = arith.constant 0 : index
    %21 = vector.load %arg4[%c0_8, %c0_9] : memref<24x128xf32, #tpu.memory_space<vmem>>, vector<24x128xf32>
    tpu.vector_store %arg4[%c0_8, %c0_9], %20 {strides = array<i32>} : memref<24x128xf32, #tpu.memory_space<vmem>>, vector<24x128xf32>,
    return
  }
  func.func @transform_0(%arg0: i32) -> (i32, i32) {
    %c0_i32 = arith.constant 0 : i32
    %c0_i32_0 = arith.constant 0 : i32
    return %arg0, %c0_i32 : i32, i32
  }
  func.func @transform_1(%arg0: i32) -> (i32, i32) {
    %c0_i32 = arith.constant 0 : i32
    %c0_i32_0 = arith.constant 0 : i32
    %c0_i32_1 = arith.constant 0 : i32
    return %c0_i32, %c0_i32_0 : i32, i32
  }
  func.func @transform_2(%arg0: i32) -> (i32, i32) {
    %c0_i32 = arith.constant 0 : i32
    %c0_i32_0 = arith.constant 0 : i32
    %c0_i32_1 = arith.constant 0 : i32
    return %c0_i32, %c0_i32_0 : i32, i32
  }
  func.func @transform_3(%arg0: i32) -> (i32, i32) {
    %c0_i32 = arith.constant 0 : i32
    %c0_i32_0 = arith.constant 0 : i32
    return %arg0, %c0_i32 : i32, i32
  }
}

module attributes {stable_mosaic.version = 11 : i64} {
  func.func @_self_attn_kernel(%arg0: i32, %arg1: memref<2xi32, #tpu.memory_space<smem>>, %arg2: memref<1x6x32xf32, #tpu.memory_space<vmem>>, %arg3: memref<1x32xf32, #tpu.memory_space<vmem>>, %arg4: memref<1x32xf32, #tpu.memory_space<vmem>>, %arg5: memref<32x96xf32, #tpu.memory_space<vmem>>, %arg6: memref<1x96xf32, #tpu.memory_space<vmem>>, %arg7: memref<32x32xf32, #tpu.memory_space<vmem>>, %arg8: memref<1x32xf32, #tpu.memory_space<vmem>>, %arg9: memref<1x6x32xf32, #tpu.memory_space<vmem>>) attributes {dimension_semantics = [#tpu.dimension_semantics<parallel>], iteration_bounds = array<i64: 2>, scalar_prefetch = 1 : i64, scratch_operands = 0 : i64, tpu.core_type = #tpu.core_type<tc>, window_params = [{transform_indices = @transform_0, window_bounds = array<i64: 1, 6, 32>}, {pipeline_mode = #tpu.pipeline_mode<synchronous>, transform_indices = @transform_1, window_bounds = array<i64: 1, 32>}, {pipeline_mode = #tpu.pipeline_mode<synchronous>, transform_indices = @transform_2, window_bounds = array<i64: 1, 32>}, {pipeline_mode = #tpu.pipeline_mode<synchronous>, transform_indices = @transform_3, window_bounds = array<i64: 32, 96>}, {pipeline_mode = #tpu.pipeline_mode<synchronous>, transform_indices = @transform_4, window_bounds = array<i64: 1, 96>}, {pipeline_mode = #tpu.pipeline_mode<synchronous>, transform_indices = @transform_5, window_bounds = array<i64: 32, 32>}, {pipeline_mode = #tpu.pipeline_mode<synchronous>, transform_indices = @transform_6, window_bounds = array<i64: 1, 32>}, {transform_indices = @transform_7, window_bounds = array<i64: 1, 6, 32>}]} {
    %0 = arith.index_cast %arg0 : i32 to index
    %1 = memref.load %arg1[%0] : memref<2xi32, #tpu.memory_space<smem>>
    %c0 = arith.constant 0 : index
    %c0_0 = arith.constant 0 : index
    %c0_1 = arith.constant 0 : index
    %2 = vector.load %arg2[%c0, %c0_0, %c0_1] : memref<1x6x32xf32, #tpu.memory_space<vmem>>, vector<1x6x32xf32>
    %3 = vector.shape_cast %2 : vector<1x6x32xf32> to vector<6x32xf32>
    %c0_2 = arith.constant 0 : index
    %c0_3 = arith.constant 0 : index
    %4 = vector.load %arg3[%c0_2, %c0_3] : memref<1x32xf32, #tpu.memory_space<vmem>>, vector<1x32xf32>
    %c0_4 = arith.constant 0 : index
    %c0_5 = arith.constant 0 : index
    %5 = vector.load %arg4[%c0_4, %c0_5] : memref<1x32xf32, #tpu.memory_space<vmem>>, vector<1x32xf32>
    %cst = arith.constant dense<0.000000e+00> : vector<6xf32>
    %6 = vector.multi_reduction <add>, %3, %cst [1] : vector<6x32xf32> to vector<6xf32>
    %7 = vector.shape_cast %6 : vector<6xf32> to vector<6x1xf32>
    %cst_6 = arith.constant 3.200000e+01 : f32
    %8 = vector.broadcast %cst_6 : f32 to vector<6x1xf32>
    %9 = arith.divf %7, %8 : vector<6x1xf32>
    %10 = vector.broadcast %9 : vector<6x1xf32> to vector<6x32xf32>
    %11 = arith.subf %3, %10 : vector<6x32xf32>
    %12 = arith.mulf %11, %11 : vector<6x32xf32>
    %cst_7 = arith.constant dense<0.000000e+00> : vector<6xf32>
    %13 = vector.multi_reduction <add>, %12, %cst_7 [1] : vector<6x32xf32> to vector<6xf32>
    %14 = vector.shape_cast %13 : vector<6xf32> to vector<6x1xf32>
    %cst_8 = arith.constant 3.200000e+01 : f32
    %15 = vector.broadcast %cst_8 : f32 to vector<6x1xf32>
    %16 = arith.divf %14, %15 : vector<6x1xf32>
    %17 = vector.broadcast %9 : vector<6x1xf32> to vector<6x32xf32>
    %18 = arith.subf %3, %17 : vector<6x32xf32>
    %cst_9 = arith.constant 9.99999996E-13 : f32
    %19 = vector.broadcast %cst_9 : f32 to vector<6x1xf32>
    %20 = arith.addf %16, %19 : vector<6x1xf32>
    %21 = math.rsqrt %20 : vector<6x1xf32>
    %22 = vector.broadcast %21 : vector<6x1xf32> to vector<6x32xf32>
    %23 = arith.mulf %18, %22 : vector<6x32xf32>
    %24 = vector.broadcast %4 : vector<1x32xf32> to vector<6x32xf32>
    %25 = arith.mulf %23, %24 : vector<6x32xf32>
    %26 = vector.broadcast %5 : vector<1x32xf32> to vector<6x32xf32>
    %27 = arith.addf %25, %26 : vector<6x32xf32>
    %c0_10 = arith.constant 0 : index
    %c0_11 = arith.constant 0 : index
    %28 = vector.load %arg5[%c0_10, %c0_11] : memref<32x96xf32, #tpu.memory_space<vmem>>, vector<32x96xf32>
    %cst_12 = arith.constant dense<0.000000e+00> : vector<6x96xf32>
    %29 = tpu.matmul %27, %28, %cst_12 {dimension_numbers = #tpu.dot_dimension_numbers<[1], [0], [0], [1], [0, 0, 1, 1], [], []>} : vector<6x32xf32>, vector<32x96xf32>, vector<6x96xf32> -> vector<6x96xf32>
    %c0_13 = arith.constant 0 : index
    %c0_14 = arith.constant 0 : index
    %30 = vector.load %arg6[%c0_13, %c0_14] : memref<1x96xf32, #tpu.memory_space<vmem>>, vector<1x96xf32>
    %31 = vector.broadcast %30 : vector<1x96xf32> to vector<6x96xf32>
    %32 = arith.addf %29, %31 : vector<6x96xf32>
    %c0_15 = arith.constant 0 : index
    %c0_16 = arith.constant 0 : index
    %33 = vector.load %arg7[%c0_15, %c0_16] : memref<32x32xf32, #tpu.memory_space<vmem>>, vector<32x32xf32>
    %34 = tpu.iota {dimensions = array<i32: 1>} : vector<6x6xi32>
    %35 = vector.broadcast %1 : i32 to vector<6x6xi32>
    %36 = arith.cmpi slt, %34, %35 : vector<6x6xi32>
    %37 = tpu.iota {dimensions = array<i32: 0>} : vector<6x6xi32>
    %38 = arith.cmpi sge, %37, %34 : vector<6x6xi32>
    %39 = arith.andi %36, %38 : vector<6x6xi1>
    %cst_17 = arith.constant 0.000000e+00 : f32
    %40 = vector.broadcast %cst_17 : f32 to vector<6x32xf32>
    %41 = vector.extract_strided_slice %32 {offsets = [0, 0], sizes = [6, 8], strides = [1, 1]} : vector<6x96xf32> to vector<6x8xf32>
    %42 = vector.extract_strided_slice %32 {offsets = [0, 32], sizes = [6, 8], strides = [1, 1]} : vector<6x96xf32> to vector<6x8xf32>
    %43 = vector.extract_strided_slice %32 {offsets = [0, 64], sizes = [6, 8], strides = [1, 1]} : vector<6x96xf32> to vector<6x8xf32>
    %cst_18 = arith.constant dense<0.000000e+00> : vector<6x6xf32>
    %44 = tpu.matmul %41, %42, %cst_18 {dimension_numbers = #tpu.dot_dimension_numbers<[1], [1], [0], [0], [0, 0, 1, 0], [], []>} : vector<6x8xf32>, vector<6x8xf32>, vector<6x6xf32> -> vector<6x6xf32>
    %cst_19 = arith.constant -1.000000e+30 : f32
    %45 = vector.broadcast %cst_19 : f32 to vector<6x6xf32>
    %46 = arith.select %39, %44, %45 : vector<6x6xi1>, vector<6x6xf32>
    %cst_20 = arith.constant dense<0xFF800000> : vector<6xf32>
    %47 = vector.multi_reduction <maximumf>, %46, %cst_20 [1] : vector<6x6xf32> to vector<6xf32>
    %48 = vector.shape_cast %47 : vector<6xf32> to vector<6x1xf32>
    %49 = vector.broadcast %48 : vector<6x1xf32> to vector<6x6xf32>
    %50 = arith.subf %46, %49 : vector<6x6xf32>
    %51 = math.exp %50 : vector<6x6xf32>
    %cst_21 = arith.constant dense<0.000000e+00> : vector<6xf32>
    %52 = vector.multi_reduction <add>, %51, %cst_21 [1] : vector<6x6xf32> to vector<6xf32>
    %53 = vector.shape_cast %52 : vector<6xf32> to vector<6x1xf32>
    %54 = tpu.reciprocal %53 {approx = true} : vector<6x1xf32> -> vector<6x1xf32>
    %55 = vector.broadcast %54 : vector<6x1xf32> to vector<6x6xf32>
    %56 = arith.mulf %51, %55 : vector<6x6xf32>
    %cst_22 = arith.constant dense<0.000000e+00> : vector<6x8xf32>
    %57 = tpu.matmul %56, %43, %cst_22 {dimension_numbers = #tpu.dot_dimension_numbers<[1], [0], [0], [1], [0, 0, 1, 1], [], []>} : vector<6x6xf32>, vector<6x8xf32>, vector<6x8xf32> -> vector<6x8xf32>
    %58 = vector.extract_strided_slice %33 {offsets = [0, 0], sizes = [8, 32], strides = [1, 1]} : vector<32x32xf32> to vector<8x32xf32>
    %cst_23 = arith.constant dense<0.000000e+00> : vector<6x32xf32>
    %59 = tpu.matmul %57, %58, %cst_23 {dimension_numbers = #tpu.dot_dimension_numbers<[1], [0], [0], [1], [0, 0, 1, 1], [], []>} : vector<6x8xf32>, vector<8x32xf32>, vector<6x32xf32> -> vector<6x32xf32>
    %60 = arith.addf %40, %59 : vector<6x32xf32>
    %61 = vector.extract_strided_slice %32 {offsets = [0, 8], sizes = [6, 8], strides = [1, 1]} : vector<6x96xf32> to vector<6x8xf32>
    %62 = vector.extract_strided_slice %32 {offsets = [0, 40], sizes = [6, 8], strides = [1, 1]} : vector<6x96xf32> to vector<6x8xf32>
    %63 = vector.extract_strided_slice %32 {offsets = [0, 72], sizes = [6, 8], strides = [1, 1]} : vector<6x96xf32> to vector<6x8xf32>
    %cst_24 = arith.constant dense<0.000000e+00> : vector<6x6xf32>
    %64 = tpu.matmul %61, %62, %cst_24 {dimension_numbers = #tpu.dot_dimension_numbers<[1], [1], [0], [0], [0, 0, 1, 0], [], []>} : vector<6x8xf32>, vector<6x8xf32>, vector<6x6xf32> -> vector<6x6xf32>
    %cst_25 = arith.constant -1.000000e+30 : f32
    %65 = vector.broadcast %cst_25 : f32 to vector<6x6xf32>
    %66 = arith.select %39, %64, %65 : vector<6x6xi1>, vector<6x6xf32>
    %cst_26 = arith.constant dense<0xFF800000> : vector<6xf32>
    %67 = vector.multi_reduction <maximumf>, %66, %cst_26 [1] : vector<6x6xf32> to vector<6xf32>
    %68 = vector.shape_cast %67 : vector<6xf32> to vector<6x1xf32>
    %69 = vector.broadcast %68 : vector<6x1xf32> to vector<6x6xf32>
    %70 = arith.subf %66, %69 : vector<6x6xf32>
    %71 = math.exp %70 : vector<6x6xf32>
    %cst_27 = arith.constant dense<0.000000e+00> : vector<6xf32>
    %72 = vector.multi_reduction <add>, %71, %cst_27 [1] : vector<6x6xf32> to vector<6xf32>
    %73 = vector.shape_cast %72 : vector<6xf32> to vector<6x1xf32>
    %74 = tpu.reciprocal %73 {approx = true} : vector<6x1xf32> -> vector<6x1xf32>
    %75 = vector.broadcast %74 : vector<6x1xf32> to vector<6x6xf32>
    %76 = arith.mulf %71, %75 : vector<6x6xf32>
    %cst_28 = arith.constant dense<0.000000e+00> : vector<6x8xf32>
    %77 = tpu.matmul %76, %63, %cst_28 {dimension_numbers = #tpu.dot_dimension_numbers<[1], [0], [0], [1], [0, 0, 1, 1], [], []>} : vector<6x6xf32>, vector<6x8xf32>, vector<6x8xf32> -> vector<6x8xf32>
    %78 = vector.extract_strided_slice %33 {offsets = [8, 0], sizes = [8, 32], strides = [1, 1]} : vector<32x32xf32> to vector<8x32xf32>
    %cst_29 = arith.constant dense<0.000000e+00> : vector<6x32xf32>
    %79 = tpu.matmul %77, %78, %cst_29 {dimension_numbers = #tpu.dot_dimension_numbers<[1], [0], [0], [1], [0, 0, 1, 1], [], []>} : vector<6x8xf32>, vector<8x32xf32>, vector<6x32xf32> -> vector<6x32xf32>
    %80 = arith.addf %60, %79 : vector<6x32xf32>
    %81 = vector.extract_strided_slice %32 {offsets = [0, 16], sizes = [6, 8], strides = [1, 1]} : vector<6x96xf32> to vector<6x8xf32>
    %82 = vector.extract_strided_slice %32 {offsets = [0, 48], sizes = [6, 8], strides = [1, 1]} : vector<6x96xf32> to vector<6x8xf32>
    %83 = vector.extract_strided_slice %32 {offsets = [0, 80], sizes = [6, 8], strides = [1, 1]} : vector<6x96xf32> to vector<6x8xf32>
    %cst_30 = arith.constant dense<0.000000e+00> : vector<6x6xf32>
    %84 = tpu.matmul %81, %82, %cst_30 {dimension_numbers = #tpu.dot_dimension_numbers<[1], [1], [0], [0], [0, 0, 1, 0], [], []>} : vector<6x8xf32>, vector<6x8xf32>, vector<6x6xf32> -> vector<6x6xf32>
    %cst_31 = arith.constant -1.000000e+30 : f32
    %85 = vector.broadcast %cst_31 : f32 to vector<6x6xf32>
    %86 = arith.select %39, %84, %85 : vector<6x6xi1>, vector<6x6xf32>
    %cst_32 = arith.constant dense<0xFF800000> : vector<6xf32>
    %87 = vector.multi_reduction <maximumf>, %86, %cst_32 [1] : vector<6x6xf32> to vector<6xf32>
    %88 = vector.shape_cast %87 : vector<6xf32> to vector<6x1xf32>
    %89 = vector.broadcast %88 : vector<6x1xf32> to vector<6x6xf32>
    %90 = arith.subf %86, %89 : vector<6x6xf32>
    %91 = math.exp %90 : vector<6x6xf32>
    %cst_33 = arith.constant dense<0.000000e+00> : vector<6xf32>
    %92 = vector.multi_reduction <add>, %91, %cst_33 [1] : vector<6x6xf32> to vector<6xf32>
    %93 = vector.shape_cast %92 : vector<6xf32> to vector<6x1xf32>
    %94 = tpu.reciprocal %93 {approx = true} : vector<6x1xf32> -> vector<6x1xf32>
    %95 = vector.broadcast %94 : vector<6x1xf32> to vector<6x6xf32>
    %96 = arith.mulf %91, %95 : vector<6x6xf32>
    %cst_34 = arith.constant dense<0.000000e+00> : vector<6x8xf32>
    %97 = tpu.matmul %96, %83, %cst_34 {dimension_numbers = #tpu.dot_dimension_numbers<[1], [0], [0], [1], [0, 0, 1, 1], [], []>} : vector<6x6xf32>, vector<6x8xf32>, vector<6x8xf32> -> vector<6x8xf32>
    %98 = vector.extract_strided_slice %33 {offsets = [16, 0], sizes = [8, 32], strides = [1, 1]} : vector<32x32xf32> to vector<8x32xf32>
    %cst_35 = arith.constant dense<0.000000e+00> : vector<6x32xf32>
    %99 = tpu.matmul %97, %98, %cst_35 {dimension_numbers = #tpu.dot_dimension_numbers<[1], [0], [0], [1], [0, 0, 1, 1], [], []>} : vector<6x8xf32>, vector<8x32xf32>, vector<6x32xf32> -> vector<6x32xf32>
    %100 = arith.addf %80, %99 : vector<6x32xf32>
    %101 = vector.extract_strided_slice %32 {offsets = [0, 24], sizes = [6, 8], strides = [1, 1]} : vector<6x96xf32> to vector<6x8xf32>
    %102 = vector.extract_strided_slice %32 {offsets = [0, 56], sizes = [6, 8], strides = [1, 1]} : vector<6x96xf32> to vector<6x8xf32>
    %103 = vector.extract_strided_slice %32 {offsets = [0, 88], sizes = [6, 8], strides = [1, 1]} : vector<6x96xf32> to vector<6x8xf32>
    %cst_36 = arith.constant dense<0.000000e+00> : vector<6x6xf32>
    %104 = tpu.matmul %101, %102, %cst_36 {dimension_numbers = #tpu.dot_dimension_numbers<[1], [1], [0], [0], [0, 0, 1, 0], [], []>} : vector<6x8xf32>, vector<6x8xf32>, vector<6x6xf32> -> vector<6x6xf32>
    %cst_37 = arith.constant -1.000000e+30 : f32
    %105 = vector.broadcast %cst_37 : f32 to vector<6x6xf32>
    %106 = arith.select %39, %104, %105 : vector<6x6xi1>, vector<6x6xf32>
    %cst_38 = arith.constant dense<0xFF800000> : vector<6xf32>
    %107 = vector.multi_reduction <maximumf>, %106, %cst_38 [1] : vector<6x6xf32> to vector<6xf32>
    %108 = vector.shape_cast %107 : vector<6xf32> to vector<6x1xf32>
    %109 = vector.broadcast %108 : vector<6x1xf32> to vector<6x6xf32>
    %110 = arith.subf %106, %109 : vector<6x6xf32>
    %111 = math.exp %110 : vector<6x6xf32>
    %cst_39 = arith.constant dense<0.000000e+00> : vector<6xf32>
    %112 = vector.multi_reduction <add>, %111, %cst_39 [1] : vector<6x6xf32> to vector<6xf32>
    %113 = vector.shape_cast %112 : vector<6xf32> to vector<6x1xf32>
    %114 = tpu.reciprocal %113 {approx = true} : vector<6x1xf32> -> vector<6x1xf32>
    %115 = vector.broadcast %114 : vector<6x1xf32> to vector<6x6xf32>
    %116 = arith.mulf %111, %115 : vector<6x6xf32>
    %cst_40 = arith.constant dense<0.000000e+00> : vector<6x8xf32>
    %117 = tpu.matmul %116, %103, %cst_40 {dimension_numbers = #tpu.dot_dimension_numbers<[1], [0], [0], [1], [0, 0, 1, 1], [], []>} : vector<6x6xf32>, vector<6x8xf32>, vector<6x8xf32> -> vector<6x8xf32>
    %118 = vector.extract_strided_slice %33 {offsets = [24, 0], sizes = [8, 32], strides = [1, 1]} : vector<32x32xf32> to vector<8x32xf32>
    %cst_41 = arith.constant dense<0.000000e+00> : vector<6x32xf32>
    %119 = tpu.matmul %117, %118, %cst_41 {dimension_numbers = #tpu.dot_dimension_numbers<[1], [0], [0], [1], [0, 0, 1, 1], [], []>} : vector<6x8xf32>, vector<8x32xf32>, vector<6x32xf32> -> vector<6x32xf32>
    %120 = arith.addf %100, %119 : vector<6x32xf32>
    %121 = arith.addf %3, %120 : vector<6x32xf32>
    %c0_42 = arith.constant 0 : index
    %c0_43 = arith.constant 0 : index
    %122 = vector.load %arg8[%c0_42, %c0_43] : memref<1x32xf32, #tpu.memory_space<vmem>>, vector<1x32xf32>
    %123 = vector.broadcast %122 : vector<1x32xf32> to vector<6x32xf32>
    %124 = arith.addf %121, %123 : vector<6x32xf32>
    %c0_44 = arith.constant 0 : index
    %c0_45 = arith.constant 0 : index
    %c0_46 = arith.constant 0 : index
    %125 = vector.load %arg9[%c0_44, %c0_45, %c0_46] : memref<1x6x32xf32, #tpu.memory_space<vmem>>, vector<1x6x32xf32>
    %126 = vector.shape_cast %125 : vector<1x6x32xf32> to vector<6x32xf32>
    %127 = vector.shape_cast %124 : vector<6x32xf32> to vector<1x6x32xf32>
    tpu.vector_store %arg9[%c0_44, %c0_45, %c0_46], %127 {strides = array<i32>} : memref<1x6x32xf32, #tpu.memory_space<vmem>>, vector<1x6x32xf32>,
    return
  }
  func.func @transform_0(%arg0: i32, %arg1: memref<2xi32, #tpu.memory_space<smem>>) -> (i32, i32, i32) {
    %c0_i32 = arith.constant 0 : i32
    %c0_i32_0 = arith.constant 0 : i32
    %c0_i32_1 = arith.constant 0 : i32
    return %arg0, %c0_i32, %c0_i32_0 : i32, i32, i32
  }
  func.func @transform_1(%arg0: i32, %arg1: memref<2xi32, #tpu.memory_space<smem>>) -> (i32, i32) {
    %c0_i32 = arith.constant 0 : i32
    %c0_i32_0 = arith.constant 0 : i32
    %c0_i32_1 = arith.constant 0 : i32
    return %c0_i32, %c0_i32_0 : i32, i32
  }
  func.func @transform_2(%arg0: i32, %arg1: memref<2xi32, #tpu.memory_space<smem>>) -> (i32, i32) {
    %c0_i32 = arith.constant 0 : i32
    %c0_i32_0 = arith.constant 0 : i32
    %c0_i32_1 = arith.constant 0 : i32
    return %c0_i32, %c0_i32_0 : i32, i32
  }
  func.func @transform_3(%arg0: i32, %arg1: memref<2xi32, #tpu.memory_space<smem>>) -> (i32, i32) {
    %c0_i32 = arith.constant 0 : i32
    %c0_i32_0 = arith.constant 0 : i32
    %c0_i32_1 = arith.constant 0 : i32
    return %c0_i32, %c0_i32_0 : i32, i32
  }
  func.func @transform_4(%arg0: i32, %arg1: memref<2xi32, #tpu.memory_space<smem>>) -> (i32, i32) {
    %c0_i32 = arith.constant 0 : i32
    %c0_i32_0 = arith.constant 0 : i32
    %c0_i32_1 = arith.constant 0 : i32
    return %c0_i32, %c0_i32_0 : i32, i32
  }
  func.func @transform_5(%arg0: i32, %arg1: memref<2xi32, #tpu.memory_space<smem>>) -> (i32, i32) {
    %c0_i32 = arith.constant 0 : i32
    %c0_i32_0 = arith.constant 0 : i32
    %c0_i32_1 = arith.constant 0 : i32
    return %c0_i32, %c0_i32_0 : i32, i32
  }
  func.func @transform_6(%arg0: i32, %arg1: memref<2xi32, #tpu.memory_space<smem>>) -> (i32, i32) {
    %c0_i32 = arith.constant 0 : i32
    %c0_i32_0 = arith.constant 0 : i32
    %c0_i32_1 = arith.constant 0 : i32
    return %c0_i32, %c0_i32_0 : i32, i32
  }
  func.func @transform_7(%arg0: i32, %arg1: memref<2xi32, #tpu.memory_space<smem>>) -> (i32, i32, i32) {
    %c0_i32 = arith.constant 0 : i32
    %c0_i32_0 = arith.constant 0 : i32
    %c0_i32_1 = arith.constant 0 : i32
    return %arg0, %c0_i32, %c0_i32_0 : i32, i32, i32
  }
}

module attributes {stable_mosaic.version = 11 : i64} {
  func.func @_cross_attn_kernel(%arg0: i32, %arg1: memref<2xi32, #tpu.memory_space<smem>>, %arg2: memref<1x6x32xf32, #tpu.memory_space<vmem>>, %arg3: memref<1x12x32xf32, #tpu.memory_space<vmem>>, %arg4: memref<1x32xf32, #tpu.memory_space<vmem>>, %arg5: memref<1x32xf32, #tpu.memory_space<vmem>>, %arg6: memref<32x32xf32, #tpu.memory_space<vmem>>, %arg7: memref<1x32xf32, #tpu.memory_space<vmem>>, %arg8: memref<32x64xf32, #tpu.memory_space<vmem>>, %arg9: memref<1x64xf32, #tpu.memory_space<vmem>>, %arg10: memref<32x32xf32, #tpu.memory_space<vmem>>, %arg11: memref<1x32xf32, #tpu.memory_space<vmem>>, %arg12: memref<1x6x32xf32, #tpu.memory_space<vmem>>) attributes {dimension_semantics = [#tpu.dimension_semantics<parallel>], iteration_bounds = array<i64: 2>, scalar_prefetch = 1 : i64, scratch_operands = 0 : i64, tpu.core_type = #tpu.core_type<tc>, window_params = [{transform_indices = @transform_0, window_bounds = array<i64: 1, 6, 32>}, {transform_indices = @transform_1, window_bounds = array<i64: 1, 12, 32>}, {pipeline_mode = #tpu.pipeline_mode<synchronous>, transform_indices = @transform_2, window_bounds = array<i64: 1, 32>}, {pipeline_mode = #tpu.pipeline_mode<synchronous>, transform_indices = @transform_3, window_bounds = array<i64: 1, 32>}, {pipeline_mode = #tpu.pipeline_mode<synchronous>, transform_indices = @transform_4, window_bounds = array<i64: 32, 32>}, {pipeline_mode = #tpu.pipeline_mode<synchronous>, transform_indices = @transform_5, window_bounds = array<i64: 1, 32>}, {pipeline_mode = #tpu.pipeline_mode<synchronous>, transform_indices = @transform_6, window_bounds = array<i64: 32, 64>}, {pipeline_mode = #tpu.pipeline_mode<synchronous>, transform_indices = @transform_7, window_bounds = array<i64: 1, 64>}, {pipeline_mode = #tpu.pipeline_mode<synchronous>, transform_indices = @transform_8, window_bounds = array<i64: 32, 32>}, {pipeline_mode = #tpu.pipeline_mode<synchronous>, transform_indices = @transform_9, window_bounds = array<i64: 1, 32>}, {transform_indices = @transform_10, window_bounds = array<i64: 1, 6, 32>}]} {
    %0 = arith.index_cast %arg0 : i32 to index
    %1 = memref.load %arg1[%0] : memref<2xi32, #tpu.memory_space<smem>>
    %c0 = arith.constant 0 : index
    %c0_0 = arith.constant 0 : index
    %c0_1 = arith.constant 0 : index
    %2 = vector.load %arg2[%c0, %c0_0, %c0_1] : memref<1x6x32xf32, #tpu.memory_space<vmem>>, vector<1x6x32xf32>
    %3 = vector.shape_cast %2 : vector<1x6x32xf32> to vector<6x32xf32>
    %c0_2 = arith.constant 0 : index
    %c0_3 = arith.constant 0 : index
    %c0_4 = arith.constant 0 : index
    %4 = vector.load %arg3[%c0_2, %c0_3, %c0_4] : memref<1x12x32xf32, #tpu.memory_space<vmem>>, vector<1x12x32xf32>
    %5 = vector.shape_cast %4 : vector<1x12x32xf32> to vector<12x32xf32>
    %c0_5 = arith.constant 0 : index
    %c0_6 = arith.constant 0 : index
    %6 = vector.load %arg4[%c0_5, %c0_6] : memref<1x32xf32, #tpu.memory_space<vmem>>, vector<1x32xf32>
    %c0_7 = arith.constant 0 : index
    %c0_8 = arith.constant 0 : index
    %7 = vector.load %arg5[%c0_7, %c0_8] : memref<1x32xf32, #tpu.memory_space<vmem>>, vector<1x32xf32>
    %cst = arith.constant dense<0.000000e+00> : vector<6xf32>
    %8 = vector.multi_reduction <add>, %3, %cst [1] : vector<6x32xf32> to vector<6xf32>
    %9 = vector.shape_cast %8 : vector<6xf32> to vector<6x1xf32>
    %cst_9 = arith.constant 3.200000e+01 : f32
    %10 = vector.broadcast %cst_9 : f32 to vector<6x1xf32>
    %11 = arith.divf %9, %10 : vector<6x1xf32>
    %12 = vector.broadcast %11 : vector<6x1xf32> to vector<6x32xf32>
    %13 = arith.subf %3, %12 : vector<6x32xf32>
    %14 = arith.mulf %13, %13 : vector<6x32xf32>
    %cst_10 = arith.constant dense<0.000000e+00> : vector<6xf32>
    %15 = vector.multi_reduction <add>, %14, %cst_10 [1] : vector<6x32xf32> to vector<6xf32>
    %16 = vector.shape_cast %15 : vector<6xf32> to vector<6x1xf32>
    %cst_11 = arith.constant 3.200000e+01 : f32
    %17 = vector.broadcast %cst_11 : f32 to vector<6x1xf32>
    %18 = arith.divf %16, %17 : vector<6x1xf32>
    %19 = vector.broadcast %11 : vector<6x1xf32> to vector<6x32xf32>
    %20 = arith.subf %3, %19 : vector<6x32xf32>
    %cst_12 = arith.constant 9.99999996E-13 : f32
    %21 = vector.broadcast %cst_12 : f32 to vector<6x1xf32>
    %22 = arith.addf %18, %21 : vector<6x1xf32>
    %23 = math.rsqrt %22 : vector<6x1xf32>
    %24 = vector.broadcast %23 : vector<6x1xf32> to vector<6x32xf32>
    %25 = arith.mulf %20, %24 : vector<6x32xf32>
    %26 = vector.broadcast %6 : vector<1x32xf32> to vector<6x32xf32>
    %27 = arith.mulf %25, %26 : vector<6x32xf32>
    %28 = vector.broadcast %7 : vector<1x32xf32> to vector<6x32xf32>
    %29 = arith.addf %27, %28 : vector<6x32xf32>
    %c0_13 = arith.constant 0 : index
    %c0_14 = arith.constant 0 : index
    %30 = vector.load %arg6[%c0_13, %c0_14] : memref<32x32xf32, #tpu.memory_space<vmem>>, vector<32x32xf32>
    %cst_15 = arith.constant dense<0.000000e+00> : vector<6x32xf32>
    %31 = tpu.matmul %29, %30, %cst_15 {dimension_numbers = #tpu.dot_dimension_numbers<[1], [0], [0], [1], [0, 0, 1, 1], [], []>} : vector<6x32xf32>, vector<32x32xf32>, vector<6x32xf32> -> vector<6x32xf32>
    %c0_16 = arith.constant 0 : index
    %c0_17 = arith.constant 0 : index
    %32 = vector.load %arg7[%c0_16, %c0_17] : memref<1x32xf32, #tpu.memory_space<vmem>>, vector<1x32xf32>
    %33 = vector.broadcast %32 : vector<1x32xf32> to vector<6x32xf32>
    %34 = arith.addf %31, %33 : vector<6x32xf32>
    %c0_18 = arith.constant 0 : index
    %c0_19 = arith.constant 0 : index
    %35 = vector.load %arg8[%c0_18, %c0_19] : memref<32x64xf32, #tpu.memory_space<vmem>>, vector<32x64xf32>
    %cst_20 = arith.constant dense<0.000000e+00> : vector<12x64xf32>
    %36 = tpu.matmul %5, %35, %cst_20 {dimension_numbers = #tpu.dot_dimension_numbers<[1], [0], [0], [1], [0, 0, 1, 1], [], []>} : vector<12x32xf32>, vector<32x64xf32>, vector<12x64xf32> -> vector<12x64xf32>
    %c0_21 = arith.constant 0 : index
    %c0_22 = arith.constant 0 : index
    %37 = vector.load %arg9[%c0_21, %c0_22] : memref<1x64xf32, #tpu.memory_space<vmem>>, vector<1x64xf32>
    %38 = vector.broadcast %37 : vector<1x64xf32> to vector<12x64xf32>
    %39 = arith.addf %36, %38 : vector<12x64xf32>
    %c0_23 = arith.constant 0 : index
    %c0_24 = arith.constant 0 : index
    %40 = vector.load %arg10[%c0_23, %c0_24] : memref<32x32xf32, #tpu.memory_space<vmem>>, vector<32x32xf32>
    %41 = tpu.iota {dimensions = array<i32: 1>} : vector<6x12xi32>
    %42 = vector.broadcast %1 : i32 to vector<6x12xi32>
    %43 = arith.cmpi slt, %41, %42 : vector<6x12xi32>
    %cst_25 = arith.constant 0.000000e+00 : f32
    %44 = vector.broadcast %cst_25 : f32 to vector<6x32xf32>
    %45 = vector.extract_strided_slice %34 {offsets = [0, 0], sizes = [6, 8], strides = [1, 1]} : vector<6x32xf32> to vector<6x8xf32>
    %46 = vector.extract_strided_slice %39 {offsets = [0, 0], sizes = [12, 8], strides = [1, 1]} : vector<12x64xf32> to vector<12x8xf32>
    %47 = vector.extract_strided_slice %39 {offsets = [0, 32], sizes = [12, 8], strides = [1, 1]} : vector<12x64xf32> to vector<12x8xf32>
    %cst_26 = arith.constant dense<0.000000e+00> : vector<6x12xf32>
    %48 = tpu.matmul %45, %46, %cst_26 {dimension_numbers = #tpu.dot_dimension_numbers<[1], [1], [0], [0], [0, 0, 1, 0], [], []>} : vector<6x8xf32>, vector<12x8xf32>, vector<6x12xf32> -> vector<6x12xf32>
    %cst_27 = arith.constant -1.000000e+30 : f32
    %49 = vector.broadcast %cst_27 : f32 to vector<6x12xf32>
    %50 = arith.select %43, %48, %49 : vector<6x12xi1>, vector<6x12xf32>
    %cst_28 = arith.constant dense<0xFF800000> : vector<6xf32>
    %51 = vector.multi_reduction <maximumf>, %50, %cst_28 [1] : vector<6x12xf32> to vector<6xf32>
    %52 = vector.shape_cast %51 : vector<6xf32> to vector<6x1xf32>
    %53 = vector.broadcast %52 : vector<6x1xf32> to vector<6x12xf32>
    %54 = arith.subf %50, %53 : vector<6x12xf32>
    %55 = math.exp %54 : vector<6x12xf32>
    %cst_29 = arith.constant dense<0.000000e+00> : vector<6xf32>
    %56 = vector.multi_reduction <add>, %55, %cst_29 [1] : vector<6x12xf32> to vector<6xf32>
    %57 = vector.shape_cast %56 : vector<6xf32> to vector<6x1xf32>
    %58 = tpu.reciprocal %57 {approx = true} : vector<6x1xf32> -> vector<6x1xf32>
    %59 = vector.broadcast %58 : vector<6x1xf32> to vector<6x12xf32>
    %60 = arith.mulf %55, %59 : vector<6x12xf32>
    %cst_30 = arith.constant dense<0.000000e+00> : vector<6x8xf32>
    %61 = tpu.matmul %60, %47, %cst_30 {dimension_numbers = #tpu.dot_dimension_numbers<[1], [0], [0], [1], [0, 0, 1, 1], [], []>} : vector<6x12xf32>, vector<12x8xf32>, vector<6x8xf32> -> vector<6x8xf32>
    %62 = vector.extract_strided_slice %40 {offsets = [0, 0], sizes = [8, 32], strides = [1, 1]} : vector<32x32xf32> to vector<8x32xf32>
    %cst_31 = arith.constant dense<0.000000e+00> : vector<6x32xf32>
    %63 = tpu.matmul %61, %62, %cst_31 {dimension_numbers = #tpu.dot_dimension_numbers<[1], [0], [0], [1], [0, 0, 1, 1], [], []>} : vector<6x8xf32>, vector<8x32xf32>, vector<6x32xf32> -> vector<6x32xf32>
    %64 = arith.addf %44, %63 : vector<6x32xf32>
    %65 = vector.extract_strided_slice %34 {offsets = [0, 8], sizes = [6, 8], strides = [1, 1]} : vector<6x32xf32> to vector<6x8xf32>
    %66 = vector.extract_strided_slice %39 {offsets = [0, 8], sizes = [12, 8], strides = [1, 1]} : vector<12x64xf32> to vector<12x8xf32>
    %67 = vector.extract_strided_slice %39 {offsets = [0, 40], sizes = [12, 8], strides = [1, 1]} : vector<12x64xf32> to vector<12x8xf32>
    %cst_32 = arith.constant dense<0.000000e+00> : vector<6x12xf32>
    %68 = tpu.matmul %65, %66, %cst_32 {dimension_numbers = #tpu.dot_dimension_numbers<[1], [1], [0], [0], [0, 0, 1, 0], [], []>} : vector<6x8xf32>, vector<12x8xf32>, vector<6x12xf32> -> vector<6x12xf32>
    %cst_33 = arith.constant -1.000000e+30 : f32
    %69 = vector.broadcast %cst_33 : f32 to vector<6x12xf32>
    %70 = arith.select %43, %68, %69 : vector<6x12xi1>, vector<6x12xf32>
    %cst_34 = arith.constant dense<0xFF800000> : vector<6xf32>
    %71 = vector.multi_reduction <maximumf>, %70, %cst_34 [1] : vector<6x12xf32> to vector<6xf32>
    %72 = vector.shape_cast %71 : vector<6xf32> to vector<6x1xf32>
    %73 = vector.broadcast %72 : vector<6x1xf32> to vector<6x12xf32>
    %74 = arith.subf %70, %73 : vector<6x12xf32>
    %75 = math.exp %74 : vector<6x12xf32>
    %cst_35 = arith.constant dense<0.000000e+00> : vector<6xf32>
    %76 = vector.multi_reduction <add>, %75, %cst_35 [1] : vector<6x12xf32> to vector<6xf32>
    %77 = vector.shape_cast %76 : vector<6xf32> to vector<6x1xf32>
    %78 = tpu.reciprocal %77 {approx = true} : vector<6x1xf32> -> vector<6x1xf32>
    %79 = vector.broadcast %78 : vector<6x1xf32> to vector<6x12xf32>
    %80 = arith.mulf %75, %79 : vector<6x12xf32>
    %cst_36 = arith.constant dense<0.000000e+00> : vector<6x8xf32>
    %81 = tpu.matmul %80, %67, %cst_36 {dimension_numbers = #tpu.dot_dimension_numbers<[1], [0], [0], [1], [0, 0, 1, 1], [], []>} : vector<6x12xf32>, vector<12x8xf32>, vector<6x8xf32> -> vector<6x8xf32>
    %82 = vector.extract_strided_slice %40 {offsets = [8, 0], sizes = [8, 32], strides = [1, 1]} : vector<32x32xf32> to vector<8x32xf32>
    %cst_37 = arith.constant dense<0.000000e+00> : vector<6x32xf32>
    %83 = tpu.matmul %81, %82, %cst_37 {dimension_numbers = #tpu.dot_dimension_numbers<[1], [0], [0], [1], [0, 0, 1, 1], [], []>} : vector<6x8xf32>, vector<8x32xf32>, vector<6x32xf32> -> vector<6x32xf32>
    %84 = arith.addf %64, %83 : vector<6x32xf32>
    %85 = vector.extract_strided_slice %34 {offsets = [0, 16], sizes = [6, 8], strides = [1, 1]} : vector<6x32xf32> to vector<6x8xf32>
    %86 = vector.extract_strided_slice %39 {offsets = [0, 16], sizes = [12, 8], strides = [1, 1]} : vector<12x64xf32> to vector<12x8xf32>
    %87 = vector.extract_strided_slice %39 {offsets = [0, 48], sizes = [12, 8], strides = [1, 1]} : vector<12x64xf32> to vector<12x8xf32>
    %cst_38 = arith.constant dense<0.000000e+00> : vector<6x12xf32>
    %88 = tpu.matmul %85, %86, %cst_38 {dimension_numbers = #tpu.dot_dimension_numbers<[1], [1], [0], [0], [0, 0, 1, 0], [], []>} : vector<6x8xf32>, vector<12x8xf32>, vector<6x12xf32> -> vector<6x12xf32>
    %cst_39 = arith.constant -1.000000e+30 : f32
    %89 = vector.broadcast %cst_39 : f32 to vector<6x12xf32>
    %90 = arith.select %43, %88, %89 : vector<6x12xi1>, vector<6x12xf32>
    %cst_40 = arith.constant dense<0xFF800000> : vector<6xf32>
    %91 = vector.multi_reduction <maximumf>, %90, %cst_40 [1] : vector<6x12xf32> to vector<6xf32>
    %92 = vector.shape_cast %91 : vector<6xf32> to vector<6x1xf32>
    %93 = vector.broadcast %92 : vector<6x1xf32> to vector<6x12xf32>
    %94 = arith.subf %90, %93 : vector<6x12xf32>
    %95 = math.exp %94 : vector<6x12xf32>
    %cst_41 = arith.constant dense<0.000000e+00> : vector<6xf32>
    %96 = vector.multi_reduction <add>, %95, %cst_41 [1] : vector<6x12xf32> to vector<6xf32>
    %97 = vector.shape_cast %96 : vector<6xf32> to vector<6x1xf32>
    %98 = tpu.reciprocal %97 {approx = true} : vector<6x1xf32> -> vector<6x1xf32>
    %99 = vector.broadcast %98 : vector<6x1xf32> to vector<6x12xf32>
    %100 = arith.mulf %95, %99 : vector<6x12xf32>
    %cst_42 = arith.constant dense<0.000000e+00> : vector<6x8xf32>
    %101 = tpu.matmul %100, %87, %cst_42 {dimension_numbers = #tpu.dot_dimension_numbers<[1], [0], [0], [1], [0, 0, 1, 1], [], []>} : vector<6x12xf32>, vector<12x8xf32>, vector<6x8xf32> -> vector<6x8xf32>
    %102 = vector.extract_strided_slice %40 {offsets = [16, 0], sizes = [8, 32], strides = [1, 1]} : vector<32x32xf32> to vector<8x32xf32>
    %cst_43 = arith.constant dense<0.000000e+00> : vector<6x32xf32>
    %103 = tpu.matmul %101, %102, %cst_43 {dimension_numbers = #tpu.dot_dimension_numbers<[1], [0], [0], [1], [0, 0, 1, 1], [], []>} : vector<6x8xf32>, vector<8x32xf32>, vector<6x32xf32> -> vector<6x32xf32>
    %104 = arith.addf %84, %103 : vector<6x32xf32>
    %105 = vector.extract_strided_slice %34 {offsets = [0, 24], sizes = [6, 8], strides = [1, 1]} : vector<6x32xf32> to vector<6x8xf32>
    %106 = vector.extract_strided_slice %39 {offsets = [0, 24], sizes = [12, 8], strides = [1, 1]} : vector<12x64xf32> to vector<12x8xf32>
    %107 = vector.extract_strided_slice %39 {offsets = [0, 56], sizes = [12, 8], strides = [1, 1]} : vector<12x64xf32> to vector<12x8xf32>
    %cst_44 = arith.constant dense<0.000000e+00> : vector<6x12xf32>
    %108 = tpu.matmul %105, %106, %cst_44 {dimension_numbers = #tpu.dot_dimension_numbers<[1], [1], [0], [0], [0, 0, 1, 0], [], []>} : vector<6x8xf32>, vector<12x8xf32>, vector<6x12xf32> -> vector<6x12xf32>
    %cst_45 = arith.constant -1.000000e+30 : f32
    %109 = vector.broadcast %cst_45 : f32 to vector<6x12xf32>
    %110 = arith.select %43, %108, %109 : vector<6x12xi1>, vector<6x12xf32>
    %cst_46 = arith.constant dense<0xFF800000> : vector<6xf32>
    %111 = vector.multi_reduction <maximumf>, %110, %cst_46 [1] : vector<6x12xf32> to vector<6xf32>
    %112 = vector.shape_cast %111 : vector<6xf32> to vector<6x1xf32>
    %113 = vector.broadcast %112 : vector<6x1xf32> to vector<6x12xf32>
    %114 = arith.subf %110, %113 : vector<6x12xf32>
    %115 = math.exp %114 : vector<6x12xf32>
    %cst_47 = arith.constant dense<0.000000e+00> : vector<6xf32>
    %116 = vector.multi_reduction <add>, %115, %cst_47 [1] : vector<6x12xf32> to vector<6xf32>
    %117 = vector.shape_cast %116 : vector<6xf32> to vector<6x1xf32>
    %118 = tpu.reciprocal %117 {approx = true} : vector<6x1xf32> -> vector<6x1xf32>
    %119 = vector.broadcast %118 : vector<6x1xf32> to vector<6x12xf32>
    %120 = arith.mulf %115, %119 : vector<6x12xf32>
    %cst_48 = arith.constant dense<0.000000e+00> : vector<6x8xf32>
    %121 = tpu.matmul %120, %107, %cst_48 {dimension_numbers = #tpu.dot_dimension_numbers<[1], [0], [0], [1], [0, 0, 1, 1], [], []>} : vector<6x12xf32>, vector<12x8xf32>, vector<6x8xf32> -> vector<6x8xf32>
    %122 = vector.extract_strided_slice %40 {offsets = [24, 0], sizes = [8, 32], strides = [1, 1]} : vector<32x32xf32> to vector<8x32xf32>
    %cst_49 = arith.constant dense<0.000000e+00> : vector<6x32xf32>
    %123 = tpu.matmul %121, %122, %cst_49 {dimension_numbers = #tpu.dot_dimension_numbers<[1], [0], [0], [1], [0, 0, 1, 1], [], []>} : vector<6x8xf32>, vector<8x32xf32>, vector<6x32xf32> -> vector<6x32xf32>
    %124 = arith.addf %104, %123 : vector<6x32xf32>
    %125 = arith.addf %3, %124 : vector<6x32xf32>
    %c0_50 = arith.constant 0 : index
    %c0_51 = arith.constant 0 : index
    %126 = vector.load %arg11[%c0_50, %c0_51] : memref<1x32xf32, #tpu.memory_space<vmem>>, vector<1x32xf32>
    %127 = vector.broadcast %126 : vector<1x32xf32> to vector<6x32xf32>
    %128 = arith.addf %125, %127 : vector<6x32xf32>
    %c0_52 = arith.constant 0 : index
    %c0_53 = arith.constant 0 : index
    %c0_54 = arith.constant 0 : index
    %129 = vector.load %arg12[%c0_52, %c0_53, %c0_54] : memref<1x6x32xf32, #tpu.memory_space<vmem>>, vector<1x6x32xf32>
    %130 = vector.shape_cast %129 : vector<1x6x32xf32> to vector<6x32xf32>
    %131 = vector.shape_cast %128 : vector<6x32xf32> to vector<1x6x32xf32>
    tpu.vector_store %arg12[%c0_52, %c0_53, %c0_54], %131 {strides = array<i32>} : memref<1x6x32xf32, #tpu.memory_space<vmem>>, vector<1x6x32xf32>,
    return
  }
  func.func @transform_0(%arg0: i32, %arg1: memref<2xi32, #tpu.memory_space<smem>>) -> (i32, i32, i32) {
    %c0_i32 = arith.constant 0 : i32
    %c0_i32_0 = arith.constant 0 : i32
    %c0_i32_1 = arith.constant 0 : i32
    return %arg0, %c0_i32, %c0_i32_0 : i32, i32, i32
  }
  func.func @transform_1(%arg0: i32, %arg1: memref<2xi32, #tpu.memory_space<smem>>) -> (i32, i32, i32) {
    %c0_i32 = arith.constant 0 : i32
    %c0_i32_0 = arith.constant 0 : i32
    %c0_i32_1 = arith.constant 0 : i32
    return %arg0, %c0_i32, %c0_i32_0 : i32, i32, i32
  }
  func.func @transform_2(%arg0: i32, %arg1: memref<2xi32, #tpu.memory_space<smem>>) -> (i32, i32) {
    %c0_i32 = arith.constant 0 : i32
    %c0_i32_0 = arith.constant 0 : i32
    %c0_i32_1 = arith.constant 0 : i32
    return %c0_i32, %c0_i32_0 : i32, i32
  }
  func.func @transform_3(%arg0: i32, %arg1: memref<2xi32, #tpu.memory_space<smem>>) -> (i32, i32) {
    %c0_i32 = arith.constant 0 : i32
    %c0_i32_0 = arith.constant 0 : i32
    %c0_i32_1 = arith.constant 0 : i32
    return %c0_i32, %c0_i32_0 : i32, i32
  }
  func.func @transform_4(%arg0: i32, %arg1: memref<2xi32, #tpu.memory_space<smem>>) -> (i32, i32) {
    %c0_i32 = arith.constant 0 : i32
    %c0_i32_0 = arith.constant 0 : i32
    %c0_i32_1 = arith.constant 0 : i32
    return %c0_i32, %c0_i32_0 : i32, i32
  }
  func.func @transform_5(%arg0: i32, %arg1: memref<2xi32, #tpu.memory_space<smem>>) -> (i32, i32) {
    %c0_i32 = arith.constant 0 : i32
    %c0_i32_0 = arith.constant 0 : i32
    %c0_i32_1 = arith.constant 0 : i32
    return %c0_i32, %c0_i32_0 : i32, i32
  }
  func.func @transform_6(%arg0: i32, %arg1: memref<2xi32, #tpu.memory_space<smem>>) -> (i32, i32) {
    %c0_i32 = arith.constant 0 : i32
    %c0_i32_0 = arith.constant 0 : i32
    %c0_i32_1 = arith.constant 0 : i32
    return %c0_i32, %c0_i32_0 : i32, i32
  }
  func.func @transform_7(%arg0: i32, %arg1: memref<2xi32, #tpu.memory_space<smem>>) -> (i32, i32) {
    %c0_i32 = arith.constant 0 : i32
    %c0_i32_0 = arith.constant 0 : i32
    %c0_i32_1 = arith.constant 0 : i32
    return %c0_i32, %c0_i32_0 : i32, i32
  }
  func.func @transform_8(%arg0: i32, %arg1: memref<2xi32, #tpu.memory_space<smem>>) -> (i32, i32) {
    %c0_i32 = arith.constant 0 : i32
    %c0_i32_0 = arith.constant 0 : i32
    %c0_i32_1 = arith.constant 0 : i32
    return %c0_i32, %c0_i32_0 : i32, i32
  }
  func.func @transform_9(%arg0: i32, %arg1: memref<2xi32, #tpu.memory_space<smem>>) -> (i32, i32) {
    %c0_i32 = arith.constant 0 : i32
    %c0_i32_0 = arith.constant 0 : i32
    %c0_i32_1 = arith.constant 0 : i32
    return %c0_i32, %c0_i32_0 : i32, i32
  }
  func.func @transform_10(%arg0: i32, %arg1: memref<2xi32, #tpu.memory_space<smem>>) -> (i32, i32, i32) {
    %c0_i32 = arith.constant 0 : i32
    %c0_i32_0 = arith.constant 0 : i32
    %c0_i32_1 = arith.constant 0 : i32
    return %arg0, %c0_i32, %c0_i32_0 : i32, i32, i32
  }
}

module attributes {stable_mosaic.version = 11 : i64} {
  func.func @kernel(%arg0: i32, %arg1: memref<12x32xf32, #tpu.memory_space<vmem>>, %arg2: memref<1x32xf32, #tpu.memory_space<vmem>>, %arg3: memref<1x32xf32, #tpu.memory_space<vmem>>, %arg4: memref<32x64xf32, #tpu.memory_space<vmem>>, %arg5: memref<1x64xf32, #tpu.memory_space<vmem>>, %arg6: memref<64x32xf32, #tpu.memory_space<vmem>>, %arg7: memref<1x32xf32, #tpu.memory_space<vmem>>, %arg8: memref<12x32xf32, #tpu.memory_space<vmem>>) attributes {dimension_semantics = [#tpu.dimension_semantics<parallel>], iteration_bounds = array<i64: 1>, scalar_prefetch = 0 : i64, scratch_operands = 0 : i64, tpu.core_type = #tpu.core_type<tc>, window_params = [{transform_indices = @transform_0, window_bounds = array<i64: 12, 32>}, {pipeline_mode = #tpu.pipeline_mode<synchronous>, transform_indices = @transform_1, window_bounds = array<i64: 1, 32>}, {pipeline_mode = #tpu.pipeline_mode<synchronous>, transform_indices = @transform_2, window_bounds = array<i64: 1, 32>}, {pipeline_mode = #tpu.pipeline_mode<synchronous>, transform_indices = @transform_3, window_bounds = array<i64: 32, 64>}, {pipeline_mode = #tpu.pipeline_mode<synchronous>, transform_indices = @transform_4, window_bounds = array<i64: 1, 64>}, {pipeline_mode = #tpu.pipeline_mode<synchronous>, transform_indices = @transform_5, window_bounds = array<i64: 64, 32>}, {pipeline_mode = #tpu.pipeline_mode<synchronous>, transform_indices = @transform_6, window_bounds = array<i64: 1, 32>}, {transform_indices = @transform_7, window_bounds = array<i64: 12, 32>}]} {
    %c0 = arith.constant 0 : index
    %c0_0 = arith.constant 0 : index
    %0 = vector.load %arg1[%c0, %c0_0] : memref<12x32xf32, #tpu.memory_space<vmem>>, vector<12x32xf32>
    %c0_1 = arith.constant 0 : index
    %c0_2 = arith.constant 0 : index
    %1 = vector.load %arg2[%c0_1, %c0_2] : memref<1x32xf32, #tpu.memory_space<vmem>>, vector<1x32xf32>
    %c0_3 = arith.constant 0 : index
    %c0_4 = arith.constant 0 : index
    %2 = vector.load %arg3[%c0_3, %c0_4] : memref<1x32xf32, #tpu.memory_space<vmem>>, vector<1x32xf32>
    %cst = arith.constant dense<0.000000e+00> : vector<12xf32>
    %3 = vector.multi_reduction <add>, %0, %cst [1] : vector<12x32xf32> to vector<12xf32>
    %4 = vector.shape_cast %3 : vector<12xf32> to vector<12x1xf32>
    %cst_5 = arith.constant 3.200000e+01 : f32
    %5 = vector.broadcast %cst_5 : f32 to vector<12x1xf32>
    %6 = arith.divf %4, %5 : vector<12x1xf32>
    %7 = vector.broadcast %6 : vector<12x1xf32> to vector<12x32xf32>
    %8 = arith.subf %0, %7 : vector<12x32xf32>
    %9 = arith.mulf %8, %8 : vector<12x32xf32>
    %cst_6 = arith.constant dense<0.000000e+00> : vector<12xf32>
    %10 = vector.multi_reduction <add>, %9, %cst_6 [1] : vector<12x32xf32> to vector<12xf32>
    %11 = vector.shape_cast %10 : vector<12xf32> to vector<12x1xf32>
    %cst_7 = arith.constant 3.200000e+01 : f32
    %12 = vector.broadcast %cst_7 : f32 to vector<12x1xf32>
    %13 = arith.divf %11, %12 : vector<12x1xf32>
    %14 = vector.broadcast %6 : vector<12x1xf32> to vector<12x32xf32>
    %15 = arith.subf %0, %14 : vector<12x32xf32>
    %cst_8 = arith.constant 9.99999996E-13 : f32
    %16 = vector.broadcast %cst_8 : f32 to vector<12x1xf32>
    %17 = arith.addf %13, %16 : vector<12x1xf32>
    %18 = math.rsqrt %17 : vector<12x1xf32>
    %19 = vector.broadcast %18 : vector<12x1xf32> to vector<12x32xf32>
    %20 = arith.mulf %15, %19 : vector<12x32xf32>
    %21 = vector.broadcast %1 : vector<1x32xf32> to vector<12x32xf32>
    %22 = arith.mulf %20, %21 : vector<12x32xf32>
    %23 = vector.broadcast %2 : vector<1x32xf32> to vector<12x32xf32>
    %24 = arith.addf %22, %23 : vector<12x32xf32>
    %c0_9 = arith.constant 0 : index
    %c0_10 = arith.constant 0 : index
    %25 = vector.load %arg4[%c0_9, %c0_10] : memref<32x64xf32, #tpu.memory_space<vmem>>, vector<32x64xf32>
    %cst_11 = arith.constant dense<0.000000e+00> : vector<12x64xf32>
    %26 = tpu.matmul %24, %25, %cst_11 {dimension_numbers = #tpu.dot_dimension_numbers<[1], [0], [0], [1], [0, 0, 1, 1], [], []>} : vector<12x32xf32>, vector<32x64xf32>, vector<12x64xf32> -> vector<12x64xf32>
    %c0_12 = arith.constant 0 : index
    %c0_13 = arith.constant 0 : index
    %27 = vector.load %arg5[%c0_12, %c0_13] : memref<1x64xf32, #tpu.memory_space<vmem>>, vector<1x64xf32>
    %28 = vector.broadcast %27 : vector<1x64xf32> to vector<12x64xf32>
    %29 = arith.addf %26, %28 : vector<12x64xf32>
    %cst_14 = arith.constant 0.000000e+00 : f32
    %30 = vector.broadcast %cst_14 : f32 to vector<12x64xf32>
    %31 = arith.maximumf %29, %30 : vector<12x64xf32>
    %c0_15 = arith.constant 0 : index
    %c0_16 = arith.constant 0 : index
    %32 = vector.load %arg6[%c0_15, %c0_16] : memref<64x32xf32, #tpu.memory_space<vmem>>, vector<64x32xf32>
    %cst_17 = arith.constant dense<0.000000e+00> : vector<12x32xf32>
    %33 = tpu.matmul %31, %32, %cst_17 {dimension_numbers = #tpu.dot_dimension_numbers<[1], [0], [0], [1], [0, 0, 1, 1], [], []>} : vector<12x64xf32>, vector<64x32xf32>, vector<12x32xf32> -> vector<12x32xf32>
    %c0_18 = arith.constant 0 : index
    %c0_19 = arith.constant 0 : index
    %34 = vector.load %arg7[%c0_18, %c0_19] : memref<1x32xf32, #tpu.memory_space<vmem>>, vector<1x32xf32>
    %35 = vector.broadcast %34 : vector<1x32xf32> to vector<12x32xf32>
    %36 = arith.addf %33, %35 : vector<12x32xf32>
    %cst_20 = arith.constant 1.000000e+00 : f32
    %37 = vector.broadcast %cst_20 : f32 to vector<12x32xf32>
    %38 = arith.mulf %37, %36 : vector<12x32xf32>
    %39 = arith.addf %0, %38 : vector<12x32xf32>
    %c0_21 = arith.constant 0 : index
    %c0_22 = arith.constant 0 : index
    %40 = vector.load %arg8[%c0_21, %c0_22] : memref<12x32xf32, #tpu.memory_space<vmem>>, vector<12x32xf32>
    tpu.vector_store %arg8[%c0_21, %c0_22], %39 {strides = array<i32>} : memref<12x32xf32, #tpu.memory_space<vmem>>, vector<12x32xf32>,
    return
  }
  func.func @transform_0(%arg0: i32) -> (i32, i32) {
    %c0_i32 = arith.constant 0 : i32
    %c0_i32_0 = arith.constant 0 : i32
    return %arg0, %c0_i32 : i32, i32
  }
  func.func @transform_1(%arg0: i32) -> (i32, i32) {
    %c0_i32 = arith.constant 0 : i32
    %c0_i32_0 = arith.constant 0 : i32
    %c0_i32_1 = arith.constant 0 : i32
    return %c0_i32, %c0_i32_0 : i32, i32
  }
  func.func @transform_2(%arg0: i32) -> (i32, i32) {
    %c0_i32 = arith.constant 0 : i32
    %c0_i32_0 = arith.constant 0 : i32
    %c0_i32_1 = arith.constant 0 : i32
    return %c0_i32, %c0_i32_0 : i32, i32
  }
  func.func @transform_3(%arg0: i32) -> (i32, i32) {
    %c0_i32 = arith.constant 0 : i32
    %c0_i32_0 = arith.constant 0 : i32
    %c0_i32_1 = arith.constant 0 : i32
    return %c0_i32, %c0_i32_0 : i32, i32
  }
  func.func @transform_4(%arg0: i32) -> (i32, i32) {
    %c0_i32 = arith.constant 0 : i32
    %c0_i32_0 = arith.constant 0 : i32
    %c0_i32_1 = arith.constant 0 : i32
    return %c0_i32, %c0_i32_0 : i32, i32
  }
  func.func @transform_5(%arg0: i32) -> (i32, i32) {
    %c0_i32 = arith.constant 0 : i32
    %c0_i32_0 = arith.constant 0 : i32
    %c0_i32_1 = arith.constant 0 : i32
    return %c0_i32, %c0_i32_0 : i32, i32
  }
  func.func @transform_6(%arg0: i32) -> (i32, i32) {
    %c0_i32 = arith.constant 0 : i32
    %c0_i32_0 = arith.constant 0 : i32
    %c0_i32_1 = arith.constant 0 : i32
    return %c0_i32, %c0_i32_0 : i32, i32
  }
  func.func @transform_7(%arg0: i32) -> (i32, i32) {
    %c0_i32 = arith.constant 0 : i32
    %c0_i32_0 = arith.constant 0 : i32
    return %arg0, %c0_i32 : i32, i32
  }
}

module attributes {stable_mosaic.version = 11 : i64} {
  func.func @kernel(%arg0: i32, %arg1: memref<12x32xf32, #tpu.memory_space<vmem>>, %arg2: memref<1x32xf32, #tpu.memory_space<vmem>>, %arg3: memref<1x32xf32, #tpu.memory_space<vmem>>, %arg4: memref<32x128xf32, #tpu.memory_space<vmem>>, %arg5: memref<1x128xf32, #tpu.memory_space<vmem>>, %arg6: memref<12x128xf32, #tpu.memory_space<vmem>>) attributes {dimension_semantics = [#tpu.dimension_semantics<parallel>], iteration_bounds = array<i64: 1>, scalar_prefetch = 0 : i64, scratch_operands = 0 : i64, tpu.core_type = #tpu.core_type<tc>, window_params = [{transform_indices = @transform_0, window_bounds = array<i64: 12, 32>}, {pipeline_mode = #tpu.pipeline_mode<synchronous>, transform_indices = @transform_1, window_bounds = array<i64: 1, 32>}, {pipeline_mode = #tpu.pipeline_mode<synchronous>, transform_indices = @transform_2, window_bounds = array<i64: 1, 32>}, {pipeline_mode = #tpu.pipeline_mode<synchronous>, transform_indices = @transform_3, window_bounds = array<i64: 32, 128>}, {pipeline_mode = #tpu.pipeline_mode<synchronous>, transform_indices = @transform_4, window_bounds = array<i64: 1, 128>}, {transform_indices = @transform_5, window_bounds = array<i64: 12, 128>}]} {
    %c0 = arith.constant 0 : index
    %c0_0 = arith.constant 0 : index
    %0 = vector.load %arg1[%c0, %c0_0] : memref<12x32xf32, #tpu.memory_space<vmem>>, vector<12x32xf32>
    %c0_1 = arith.constant 0 : index
    %c0_2 = arith.constant 0 : index
    %1 = vector.load %arg2[%c0_1, %c0_2] : memref<1x32xf32, #tpu.memory_space<vmem>>, vector<1x32xf32>
    %c0_3 = arith.constant 0 : index
    %c0_4 = arith.constant 0 : index
    %2 = vector.load %arg3[%c0_3, %c0_4] : memref<1x32xf32, #tpu.memory_space<vmem>>, vector<1x32xf32>
    %cst = arith.constant dense<0.000000e+00> : vector<12xf32>
    %3 = vector.multi_reduction <add>, %0, %cst [1] : vector<12x32xf32> to vector<12xf32>
    %4 = vector.shape_cast %3 : vector<12xf32> to vector<12x1xf32>
    %cst_5 = arith.constant 3.200000e+01 : f32
    %5 = vector.broadcast %cst_5 : f32 to vector<12x1xf32>
    %6 = arith.divf %4, %5 : vector<12x1xf32>
    %7 = vector.broadcast %6 : vector<12x1xf32> to vector<12x32xf32>
    %8 = arith.subf %0, %7 : vector<12x32xf32>
    %9 = arith.mulf %8, %8 : vector<12x32xf32>
    %cst_6 = arith.constant dense<0.000000e+00> : vector<12xf32>
    %10 = vector.multi_reduction <add>, %9, %cst_6 [1] : vector<12x32xf32> to vector<12xf32>
    %11 = vector.shape_cast %10 : vector<12xf32> to vector<12x1xf32>
    %cst_7 = arith.constant 3.200000e+01 : f32
    %12 = vector.broadcast %cst_7 : f32 to vector<12x1xf32>
    %13 = arith.divf %11, %12 : vector<12x1xf32>
    %14 = vector.broadcast %6 : vector<12x1xf32> to vector<12x32xf32>
    %15 = arith.subf %0, %14 : vector<12x32xf32>
    %cst_8 = arith.constant 9.99999996E-13 : f32
    %16 = vector.broadcast %cst_8 : f32 to vector<12x1xf32>
    %17 = arith.addf %13, %16 : vector<12x1xf32>
    %18 = math.rsqrt %17 : vector<12x1xf32>
    %19 = vector.broadcast %18 : vector<12x1xf32> to vector<12x32xf32>
    %20 = arith.mulf %15, %19 : vector<12x32xf32>
    %21 = vector.broadcast %1 : vector<1x32xf32> to vector<12x32xf32>
    %22 = arith.mulf %20, %21 : vector<12x32xf32>
    %23 = vector.broadcast %2 : vector<1x32xf32> to vector<12x32xf32>
    %24 = arith.addf %22, %23 : vector<12x32xf32>
    %c0_9 = arith.constant 0 : index
    %c0_10 = arith.constant 0 : index
    %25 = vector.load %arg4[%c0_9, %c0_10] : memref<32x128xf32, #tpu.memory_space<vmem>>, vector<32x128xf32>
    %cst_11 = arith.constant dense<0.000000e+00> : vector<12x128xf32>
    %26 = tpu.matmul %24, %25, %cst_11 {dimension_numbers = #tpu.dot_dimension_numbers<[1], [0], [0], [1], [0, 0, 1, 1], [], []>} : vector<12x32xf32>, vector<32x128xf32>, vector<12x128xf32> -> vector<12x128xf32>
    %c0_12 = arith.constant 0 : index
    %c0_13 = arith.constant 0 : index
    %27 = vector.load %arg5[%c0_12, %c0_13] : memref<1x128xf32, #tpu.memory_space<vmem>>, vector<1x128xf32>
    %28 = vector.broadcast %27 : vector<1x128xf32> to vector<12x128xf32>
    %29 = arith.addf %26, %28 : vector<12x128xf32>
    %30 = tpu.iota {dimensions = array<i32: 1>} : vector<12x128xi32>
    %c10_i32 = arith.constant 10 : i32
    %31 = vector.broadcast %c10_i32 : i32 to vector<12x128xi32>
    %32 = arith.cmpi slt, %30, %31 : vector<12x128xi32>
    %cst_14 = arith.constant -1.000000e+30 : f32
    %33 = vector.broadcast %cst_14 : f32 to vector<12x128xf32>
    %34 = arith.select %32, %29, %33 : vector<12x128xi1>, vector<12x128xf32>
    %cst_15 = arith.constant dense<0xFF800000> : vector<12xf32>
    %35 = vector.multi_reduction <maximumf>, %34, %cst_15 [1] : vector<12x128xf32> to vector<12xf32>
    %36 = vector.shape_cast %35 : vector<12xf32> to vector<12x1xf32>
    %37 = vector.broadcast %36 : vector<12x1xf32> to vector<12x128xf32>
    %38 = arith.subf %34, %37 : vector<12x128xf32>
    %39 = math.exp %38 : vector<12x128xf32>
    %cst_16 = arith.constant dense<0.000000e+00> : vector<12xf32>
    %40 = vector.multi_reduction <add>, %39, %cst_16 [1] : vector<12x128xf32> to vector<12xf32>
    %41 = vector.shape_cast %40 : vector<12xf32> to vector<12x1xf32>
    %42 = math.log %41 : vector<12x1xf32>
    %43 = vector.broadcast %42 : vector<12x1xf32> to vector<12x128xf32>
    %44 = arith.subf %38, %43 : vector<12x128xf32>
    %c0_17 = arith.constant 0 : index
    %c0_18 = arith.constant 0 : index
    %45 = vector.load %arg6[%c0_17, %c0_18] : memref<12x128xf32, #tpu.memory_space<vmem>>, vector<12x128xf32>
    tpu.vector_store %arg6[%c0_17, %c0_18], %44 {strides = array<i32>} : memref<12x128xf32, #tpu.memory_space<vmem>>, vector<12x128xf32>,
    return
  }
  func.func @transform_0(%arg0: i32) -> (i32, i32) {
    %c0_i32 = arith.constant 0 : i32
    %c0_i32_0 = arith.constant 0 : i32
    return %arg0, %c0_i32 : i32, i32
  }
  func.func @transform_1(%arg0: i32) -> (i32, i32) {
    %c0_i32 = arith.constant 0 : i32
    %c0_i32_0 = arith.constant 0 : i32
    %c0_i32_1 = arith.constant 0 : i32
    return %c0_i32, %c0_i32_0 : i32, i32
  }
  func.func @transform_2(%arg0: i32) -> (i32, i32) {
    %c0_i32 = arith.constant 0 : i32
    %c0_i32_0 = arith.constant 0 : i32
    %c0_i32_1 = arith.constant 0 : i32
    return %c0_i32, %c0_i32_0 : i32, i32
  }
  func.func @transform_3(%arg0: i32) -> (i32, i32) {
    %c0_i32 = arith.constant 0 : i32
    %c0_i32_0 = arith.constant 0 : i32
    %c0_i32_1 = arith.constant 0 : i32
    return %c0_i32, %c0_i32_0 : i32, i32
  }
  func.func @transform_4(%arg0: i32) -> (i32, i32) {
    %c0_i32 = arith.constant 0 : i32
    %c0_i32_0 = arith.constant 0 : i32
    %c0_i32_1 = arith.constant 0 : i32
    return %c0_i32, %c0_i32_0 : i32, i32
  }
  func.func @transform_5(%arg0: i32) -> (i32, i32) {
    %c0_i32 = arith.constant 0 : i32
    %c0_i32_0 = arith.constant 0 : i32
    return %arg0, %c0_i32 : i32, i32
  }
}

</mosaic_0001>

<bundles_post_ra>
// kernel: e2e_forward.19
= control target key start
LH: loop header
LB: loop body
LE: loop exit
PB: predicated region body
PF: predicated region fallthrough
CT: control target
= control target key end

     0   :  { %s543_s21 = smov 0   ;;  %s597_s0 = inlined_call_operand.vmem [shape: f32[2,12,24], index: 0, kind: input, shape index: {}]   ;;  %s598_s1 = inlined_call_operand.vmem [shape: f32[24,32], index: 1, kind: input, shape index: {}]   ;;  %s599_s2 = inlined_call_operand.vmem [shape: f32[1,32], index: 2, kind: input, shape index: {}]   ;;  %s600_s3 = inlined_call_operand.vmem [shape: f32[1,32], index: 3, kind: input, shape index: {}]   ;;  %s601_s4 = inlined_call_operand.vmem [shape: f32[1,32], index: 4, kind: input, shape index: {}]   ;;  %s602_s5 = inlined_call_operand.vmem [shape: f32[12,32], index: 5, kind: input, shape index: {}]   ;;  %s603_s6 = inlined_call_operand.vmem [shape: f32[2,12,32], index: 6, kind: output, shape index: {}]  }
   0x1 LB: > { %s456_s22 = sadd.s32 4294967295, %s506_s21   ;;  %p460_p0 = scmp.ge.s32.totalorder %s506_s21, 1  ;;  %s506_s21 = sphi %s543_s21, %s16_s21  }
   0x2   : > { %p212_p1 = scmp.lt.s32.totalorder %s506_s21, 3 }
   0x4   : > { %p213_p2 = pnand %p460_p0, %p212_p1 }
   0x5   : > { %p242_p3 = scmp.lt.s32.totalorder (!%p213_p2), %s456_s22, 1 }
   0x6   : > { %216 = sbr.rel (%p213_p2) target bundleno = 532 (0x214), region = 44 }
   0xb   : > { %v256_v0 = vld [vmem:[%s598_s1 + $0x10] sm:$0xff]  ;;  %v255_v1 = vld [vmem:[%s598_s1 + $0x8] sm:$0xff]  ;;  %v254_v2 = vld [vmem:[%s598_s1] sm:$0xff]  ;;  %s605_s22 = smov (!%p242_p3, %s456_s22), 1  ;;  %vm264_vm0 = vcmask 195584   ;;  %vm348_vm1 = vcmask 261120  }
   0xc   : > { %479 = vmatprep.subr.mxu0 %v256_v0  ;;  %s472_s29 = sshll.u32 %s605_s22, 4  ;;  %v465_v6 = vld [vmem:[%s599_s2] ss:$0 sm:$0xff]  ;;  %vm352_vm2 = vcmask 257024   ;;  %v396_v41 = vld [vmem:[%s602_s5 + $0x8] sm:$0xf] }
   0xd   : > { %480 = vmatpush3.msra.mxu0 %v256_v0  ;;  %s246_s8 = scalar_lea.vmem %s597_s0, %s472_s29  ;;  %v468_v29 = vld [vmem:[%s600_s3] ss:$0 sm:$0xff]  ;;  %s251_s19 = scalar_lea.vmem %s603_s6, %s472_s29 }
   0xe   : > { %481 = vmatprep.subr.mxu0 %v255_v1  ;;  %v252_v3 = vld [vmem:[%s246_s8] sm:$0xff]  ;;  %v253_v4 = vld [vmem:[%s246_s8 + $0x8] sm:$0xf] }
   0xf   : > { %482 = vmatpush3.msra.mxu0 %v255_v1  ;;  %485 = vmatprep.mubr.msk.f32.mxu0 %vm264_vm0, %v252_v3  ;;  %v469_v31 = vld [vmem:[%s601_s4] ss:$0 sm:$0xff] }
  0x10   : > { %483 = vmatprep.subr.mxu0 %v254_v2  ;;  %v395_v36 = vld [vmem:[%s602_s5] sm:$0xff] }
  0x11   : > { %484 = vmatpush3.msra.mxu0 %v254_v2 }
  0x12   : > { %486 = vmatmul.mubr.msk.f32.vlgmr.msra.gmra.mxu0 %vm264_vm0, %v253_v4 }
  0xd2   : > { %v487_v5 = vpop.f32.mrf.mxu0 }
  0xd3   : > { %v343_v9 = vadd.f32 %v487_v5, %v465_v6 }
  0xd4   : > { %v337_v7 = vpop.f32.mrf.mxu0 }
  0xd5   : > { %v338_v8 = vadd.f32 %v465_v6, %v337_v7  ;;  %v353_v11 = vsel %vm352_vm2, %v343_v9, 0.0 }
  0xd7   : > { %v349_v10 = vsel %vm348_vm1, %v338_v8, 0.0 }
  0xd8   : > { %350 = vadd.xlane.f32.xlu0 %v349_v10 }
  0xdc   : > { %354 = vadd.xlane.f32.xlu0 %v353_v11 }
 0x161   : > { %v351_v12 = vpop.xlane.xlu0 %350 }
 0x162   : > { %v357_v13 = vmul.f32 0.03125, %v351_v12 }
 0x164   : > { %v359_v14 = vsub.f32 %v338_v8, %v357_v13 }
 0x165   : > { %v355_v15 = vpop.xlane.xlu0 %354 }
 0x166   : > { %v358_v16 = vmul.f32 0.03125, %v355_v15  ;;  %v361_v17 = vmul.f32 %v359_v14, %v359_v14 }
 0x168   : > { %v360_v18 = vsub.f32 %v343_v9, %v358_v16  ;;  %v363_v19 = vsel %vm348_vm1, %v361_v17, 0.0 }
 0x169   : > { %364 = vadd.xlane.f32.xlu1 %v363_v19 }
 0x16a   : > { %v362_v20 = vmul.f32 %v360_v18, %v360_v18 }
 0x16c   : > { %v366_v21 = vsel %vm352_vm2, %v362_v20, 0.0 }
 0x16d   : > { %367 = vadd.xlane.f32.xlu1 %v366_v21 }
 0x1f2   : > { %v365_v22 = vpop.xlane.xlu1 %364 }
 0x1f3   : > { %v369_v23 = vmul.f32 0.03125, %v365_v22 }
 0x1f5   : > { %v371_v24 = vadd.f32 1e-12, %v369_v23 }
 0x1f6   : > { %v368_v25 = vpop.xlane.xlu1 %367 }
 0x1f7   : > { %496 = vrsqrt.f32 %v371_v24  ;;  %v370_v26 = vmul.f32 0.03125, %v368_v25 }
 0x1f9   : > { %v372_v27 = vadd.f32 1e-12, %v370_v26 }
 0x1fb   : > { %498 = vrsqrt.f32 %v372_v27 }
 0x204   : > { %v497_v28 = vpop.eup %496 }
 0x205   : > { %v375_v30 = vmul.f32 %v497_v28, %v359_v14 }
 0x207   : > { %v383_v32 = vmul.f32 %v468_v29, %v375_v30 }
 0x208   : > { %v499_v33 = vpop.eup %498 }
 0x209   : > { %v391_v34 = vadd.f32 %v469_v31, %v383_v32  ;;  %v376_v35 = vmul.f32 %v499_v33, %v360_v18 }
 0x20b   : > { %v393_v37 = vmul.f32 5.656854, %v391_v34  ;;  %v384_v38 = vmul.f32 %v468_v29, %v376_v35 }
 0x20d   : > { %v397_v39 = vadd.f32 %v395_v36, %v393_v37  ;;  %v392_v40 = vadd.f32 %v469_v31, %v384_v38 }
 0x20f   : > { %399 = vst.msk [vmem:[%s251_s19] sm:$0xff] %vm348_vm1, %v397_v39  ;;  %v394_v42 = vmul.f32 5.656854, %v392_v40 }
 0x211   : > { %v398_v43 = vadd.f32 %v396_v41, %v394_v42 }
 0x213   : > { %400 = vst.msk [vmem:[%s251_s19 + $0x8] sm:$0xf] %vm352_vm2, %v398_v43 }
 0x214 PF: > { %s16_s21 = sadd.s32 1, %s506_s21  }
 0x215   : > { %p13_p4 = scmp.ge.s32.totalorder %s16_s21, 4  }
 0x217   :  { %15 = sbr.rel (!%p13_p4) target bundleno = 1 (0x1), region = 74 }

// kernel: e2e_forward.20
= control target key start
LH: loop header
LB: loop body
LE: loop exit
PB: predicated region body
PF: predicated region fallthrough
CT: control target
= control target key end

     0   :  { %vm31_vm0 = vcmask 261120   ;;  %v419_v21 = vmov 0.0   ;;  %vm420_vm1 = vmmov 0   ;;  %vm226_vm2 = vcmask 523264   ;;  %s578_s0 = inlined_call_operand.vmem [shape: f32[24,32], index: 0, kind: input, shape index: {}]   ;;  %s579_s3 = inlined_call_operand.vmem [shape: f32[32,64], index: 3, kind: input, shape index: {}]   ;;  %s580_s1 = inlined_call_operand.vmem [shape: f32[1,32], index: 1, kind: input, shape index: {}]   ;;  %s581_s2 = inlined_call_operand.vmem [shape: f32[1,32], index: 2, kind: input, shape index: {}]   ;;  %s582_s5 = inlined_call_operand.vmem [shape: f32[64,32], index: 5, kind: input, shape index: {}]   ;;  %s583_s4 = inlined_call_operand.vmem [shape: f32[1,64], index: 4, kind: input, shape index: {}]   ;;  %s584_s6 = inlined_call_operand.vmem [shape: f32[1,32], index: 6, kind: input, shape index: {}]   ;;  %s585_s7 = inlined_call_operand.vmem [shape: f32[24,32], index: 7, kind: output, shape index: {}]  }
   0x1   :  { %v464_v0 = vld [vmem:[%s578_s0] sm:$0xff]  ;;  %v469_v1 = vld [vmem:[%s578_s0 + $0x10] sm:$0xff]  ;;  %v474_v2 = vld [vmem:[%s578_s0 + $0x8] sm:$0xff]  ;;  %357 = vmatprep.subr.mxu0 %v419_v21  ;;  %365 = vmatprep.mubr.msk.f32.mxu0 %vm420_vm1, %v419_v21 }
   0x2   :  { %v32_v3 = vsel %vm31_vm0, %v464_v0, 0.0  ;;  %v38_v4 = vsel %vm31_vm0, %v469_v1, 0.0  ;;  %v35_v5 = vsel %vm31_vm0, %v474_v2, 0.0  ;;  %v93_v22 = vld [vmem:[%s579_s3 + $0x18] sm:$0xff]  ;;  %v92_v23 = vld [vmem:[%s579_s3 + $0x10] sm:$0xff]  ;;  %374 = vmatprep.subr.mxu1 %v419_v21  ;;  %v91_v24 = vld [vmem:[%s579_s3 + $0x8] sm:$0xff]  ;;  %390 = vmatprep.mubr.msk.f32.mxu1 %vm420_vm1, %v419_v21 }
   0x3   :  { %33 = vadd.xlane.f32.xlu0 %v32_v3  ;;  %39 = vadd.xlane.f32.xlu1 %v38_v4  ;;  %v90_v25 = vld [vmem:[%s579_s3] sm:$0xff]  ;;  %v218_v49 = vld [vmem:[%s582_s5 + $0x38] sm:$0xff]  ;;  %v217_v50 = vld [vmem:[%s582_s5 + $0x30] sm:$0xff] }
   0x4   :  { %358 = vmatpush3.msra.mxu0 %v93_v22  ;;  %v329_v36 = vld [vmem:[%s580_s1] ss:$0 sm:$0xff]  ;;  %375 = vmatpush3.msra.mxu1 %v218_v49  ;;  %v216_v51 = vld [vmem:[%s582_s5 + $0x28] sm:$0xff]  ;;  %v214_v53 = vld [vmem:[%s582_s5 + $0x18] sm:$0xff] }
   0x5   :  { %359 = vmatprep.subr.mxu0 %v419_v21  ;;  %v330_v38 = vld [vmem:[%s581_s2] ss:$0 sm:$0xff]  ;;  %376 = vmatprep.subr.mxu1 %v419_v21  ;;  %v213_v54 = vld [vmem:[%s582_s5 + $0x10] sm:$0xff]  ;;  %v212_v55 = vld [vmem:[%s582_s5 + $0x8] sm:$0xff] }
   0x6   :  { %360 = vmatpush3.msra.mxu0 %v92_v23  ;;  %377 = vmatpush3.msra.mxu1 %v217_v50  ;;  %v215_v52 = vld [vmem:[%s582_s5 + $0x20] sm:$0xff] }
   0x7   :  { %36 = vadd.xlane.f32.xlu0 %v35_v5  ;;  %361 = vmatprep.subr.mxu0 %v419_v21  ;;  %v211_v56 = vld [vmem:[%s582_s5] sm:$0xff] }
   0x8   :  { %362 = vmatpush3.msra.mxu0 %v91_v24  ;;  %378 = vmatprep.subr.mxu1 %v419_v21  ;;  %v331_v57 = vld [vmem:[%s583_s4] ss:$0 sm:$0xff] }
   0x9   :  { %363 = vmatprep.subr.mxu0 %v419_v21  ;;  %379 = vmatpush3.msra.mxu1 %v216_v51 }
   0xa   :  { %364 = vmatpush3.msra.mxu0 %v90_v25  ;;  %380 = vmatprep.subr.mxu1 %v419_v21  ;;  %v335_v25 = vld [vmem:[%s584_s6] ss:$0 sm:$0xff] }
   0xb   :  { %381 = vmatpush3.msra.mxu1 %v215_v52 }
   0xc   :  { %382 = vmatprep.subr.mxu1 %v419_v21 }
   0xd   :  { %383 = vmatpush3.msra.mxu1 %v214_v53 }
   0xe   :  { %384 = vmatprep.subr.mxu1 %v419_v21 }
   0xf   :  { %385 = vmatpush3.msra.mxu1 %v213_v54 }
  0x10   :  { %386 = vmatprep.subr.mxu1 %v419_v21 }
  0x11   :  { %387 = vmatpush3.msra.mxu1 %v212_v55 }
  0x12   :  { %388 = vmatprep.subr.mxu1 %v419_v21 }
  0x13   :  { %389 = vmatpush3.msra.mxu1 %v211_v56 }
  0x8c   :  { %v34_v6 = vpop.xlane.xlu0 %33  ;;  %v40_v7 = vpop.xlane.xlu1 %39 }
  0x8d   :  { %v42_v8 = vmul.f32 0.03125, %v34_v6  ;;  %v44_v9 = vmul.f32 0.03125, %v40_v7 }
  0x8f   :  { %v45_v10 = vsub.f32 %v464_v0, %v42_v8  ;;  %v47_v11 = vsub.f32 %v469_v1, %v44_v9 }
  0x90   :  { %v37_v12 = vpop.xlane.xlu0 %36 }
  0x91   :  { %v43_v13 = vmul.f32 0.03125, %v37_v12  ;;  %v48_v14 = vmul.f32 %v45_v10, %v45_v10  ;;  %v50_v15 = vmul.f32 %v47_v11, %v47_v11 }
  0x93   :  { %v46_v16 = vsub.f32 %v474_v2, %v43_v13  ;;  %v51_v17 = vsel %vm31_vm0, %v48_v14, 0.0  ;;  %v57_v18 = vsel %vm31_vm0, %v50_v15, 0.0 }
  0x94   :  { %52 = vadd.xlane.f32.xlu1 %v51_v17 }
  0x95   :  { %v49_v19 = vmul.f32 %v46_v16, %v46_v16 }
  0x97   :  { %v54_v20 = vsel %vm31_vm0, %v49_v19, 0.0 }
  0x98   :  { %58 = vadd.xlane.f32.xlu1 %v57_v18  ;;  %55 = vadd.xlane.f32.xlu0 %v54_v20 }
 0x11d   :  { %v53_v26 = vpop.xlane.xlu1 %52 }
 0x11e   :  { %v60_v27 = vmul.f32 0.03125, %v53_v26 }
 0x120   :  { %v63_v28 = vadd.f32 1e-12, %v60_v27 }
 0x121   :  { %v59_v29 = vpop.xlane.xlu1 %58  ;;  %v56_v30 = vpop.xlane.xlu0 %55 }
 0x122   :  { %401 = vrsqrt.f32 %v63_v28  ;;  %v62_v31 = vmul.f32 0.03125, %v59_v29  ;;  %v61_v32 = vmul.f32 0.03125, %v56_v30 }
 0x124   :  { %v65_v33 = vadd.f32 1e-12, %v62_v31  ;;  %v64_v34 = vadd.f32 1e-12, %v61_v32 }
 0x126   :  { %403 = vrsqrt.f32 %v65_v33 }
 0x127   :  { %405 = vrsqrt.f32 %v64_v34 }
 0x12f   :  { %v402_v35 = vpop.eup %401 }
 0x130   :  { %v69_v37 = vmul.f32 %v402_v35, %v45_v10 }
 0x132   :  { %v78_v39 = vmul.f32 %v329_v36, %v69_v37 }
 0x133   :  { %v404_v40 = vpop.eup %403 }
 0x134   :  { %v406_v41 = vpop.eup %405  ;;  %v87_v42 = vadd.f32 %v330_v38, %v78_v39  ;;  %v71_v44 = vmul.f32 %v404_v40, %v47_v11 }
 0x135   :  { %v70_v43 = vmul.f32 %v406_v41, %v46_v16 }
 0x136   :  { %366 = vmatmul.mubr.msk.f32.vlgmr.msra.gmra.mxu0 %vm31_vm0, %v87_v42  ;;  %v80_v47 = vmul.f32 %v329_v36, %v71_v44 }
 0x137   :  { %368 = vmatprep.mubr.msk.f32.mxu0 %vm420_vm1, %v419_v21  ;;  %v79_v45 = vmul.f32 %v329_v36, %v70_v43 }
 0x138   :  { %v89_v48 = vadd.f32 %v330_v38, %v80_v47 }
 0x139   :  { %v88_v46 = vadd.f32 %v330_v38, %v79_v45 }
 0x13b   :  { %369 = vmatmul.mubr.msk.f32.gmra.mxu0 %vm31_vm0, %v88_v46 }
 0x13c   :  { %371 = vmatprep.mubr.msk.f32.mxu0 %vm420_vm1, %v419_v21 }
 0x13f   :  { %372 = vmatmul.mubr.msk.f32.gmra.mxu0 %vm31_vm0, %v89_v48 }
 0x1f6   :  { %v176_v58 = vpop.f32.mrf.mxu0 }
 0x1f7   :  { %v177_v59 = vadd.f32 %v331_v57, %v176_v58 }
 0x1f8   :  { %v367_v60 = vpop.f32.mrf.mxu0 }
 0x1f9   :  { %v190_v61 = vsub.f32 0.0, %v177_v59 }
 0x1fb   :  { %v193_v62 = vmul.f32 1.442695, %v190_v61  ;;  %v181_v63 = vpop.f32.mrf.mxu0 }
 0x1fc   :  { %v182_v3 = vadd.f32 %v331_v57, %v181_v63 }
 0x1fd   :  { %407 = vpow2.f32 %v193_v62  ;;  %v370_v4 = vpop.f32.mrf.mxu0 }
 0x1fe   :  { %v191_v5 = vsub.f32 0.0, %v182_v3 }
 0x1ff   :  { %v186_v6 = vpop.f32.mrf.mxu0 }
 0x200   :  { %v195_v7 = vmul.f32 1.442695, %v191_v5  ;;  %v187_v8 = vadd.f32 %v331_v57, %v186_v6 }
 0x201   :  { %v373_v9 = vpop.f32.mrf.mxu0 }
 0x202   :  { %409 = vpow2.f32 %v195_v7  ;;  %v192_v10 = vsub.f32 0.0, %v187_v8 }
 0x204   :  { %v197_v11 = vmul.f32 1.442695, %v192_v10 }
 0x206   :  { %411 = vpow2.f32 %v197_v11 }
 0x20a   :  { %v408_v12 = vpop.eup %407 }
 0x20b   :  { %v199_v13 = vadd.f32 1.0, %v408_v12 }
 0x20d   :  { %413 = vrcp.f32 %v199_v13 }
 0x20f   :  { %v410_v14 = vpop.eup %409 }
 0x210   :  { %v200_v15 = vadd.f32 1.0, %v410_v14 }
 0x212   :  { %415 = vrcp.f32 %v200_v15 }
 0x213   :  { %v412_v16 = vpop.eup %411 }
 0x214   :  { %v201_v17 = vadd.f32 1.0, %v412_v16 }
 0x216   :  { %417 = vrcp.f32 %v201_v17 }
 0x21a   :  { %v414_v18 = vpop.eup %413 }
 0x21b   :  { %v208_v19 = vmul.f32 %v414_v18, %v177_v59 }
 0x21d   :  { %391 = vmatmul.mubr.msk.f32.vlgmr.msra.gmra.mxu1 %vm226_vm2, %v208_v19 }
 0x21e   :  { %393 = vmatprep.mubr.msk.f32.mxu1 %vm420_vm1, %v419_v21 }
 0x21f   :  { %v416_v20 = vpop.eup %415 }
 0x220   :  { %v209_v22 = vmul.f32 %v416_v20, %v182_v3 }
 0x222   :  { %394 = vmatmul.mubr.msk.f32.gmra.mxu1 %vm226_vm2, %v209_v22 }
 0x223   :  { %v418_v23 = vpop.eup %417  ;;  %396 = vmatprep.mubr.msk.f32.mxu1 %vm420_vm1, %v419_v21 }
 0x224   :  { %v210_v24 = vmul.f32 %v418_v23, %v187_v8 }
 0x226   :  { %397 = vmatmul.mubr.msk.f32.gmra.mxu1 %vm226_vm2, %v210_v24 }
 0x2dd   :  { %v302_v26 = vpop.f32.mrf.mxu1 }
 0x2de   :  { %v303_v27 = vadd.f32 %v335_v25, %v302_v26 }
 0x2df   :  { %v392_v28 = vpop.f32.mrf.mxu1 }
 0x2e0   :  { %v316_v29 = vmul.f32 0.5, %v303_v27 }
 0x2e2   :  { %v319_v30 = vadd.f32 %v316_v29, %v464_v0  ;;  %v307_v31 = vpop.f32.mrf.mxu1 }
 0x2e3   :  { %v308_v32 = vadd.f32 %v335_v25, %v307_v31 }
 0x2e4   :  { %322 = vst.msk [vmem:[%s585_s7] sm:$0xff] %vm31_vm0, %v319_v30  ;;  %v395_v21 = vpop.f32.mrf.mxu1 }
 0x2e5   :  { %v317_v33 = vmul.f32 0.5, %v308_v32 }
 0x2e6   :  { %v312_v34 = vpop.f32.mrf.mxu1 }
 0x2e7   :  { %v320_v35 = vadd.f32 %v317_v33, %v474_v2  ;;  %v313_v36 = vadd.f32 %v335_v25, %v312_v34 }
 0x2e8   :  { %v398_v37 = vpop.f32.mrf.mxu1 }
 0x2e9   :  { %323 = vst.msk [vmem:[%s585_s7 + $0x8] sm:$0xff] %vm31_vm0, %v320_v35  ;;  %v318_v0 = vmul.f32 0.5, %v313_v36 }
 0x2eb   :  { %v321_v38 = vadd.f32 %v318_v0, %v469_v1 }
 0x2ed   :  { %324 = vst.msk [vmem:[%s585_s7 + $0x10] sm:$0xff] %vm31_vm0, %v321_v38 }

// kernel: e2e_forward.23
= control target key start
LH: loop header
LB: loop body
LE: loop exit
PB: predicated region body
PF: predicated region fallthrough
CT: control target
= control target key end

     0   :  { %v236_v0 = vmov 0.0   ;;  %vm237_vm0 = vmmov 0   ;;  %vm74_vm1 = vcmask 261120   ;;  %s330_s4 = inlined_call_operand.vmem [shape: f32[32,32], index: 4, kind: input, shape index: {}]   ;;  %s331_s0 = inlined_call_operand.vmem [shape: f32[24,32], index: 0, kind: input, shape index: {}]   ;;  %s332_s2 = inlined_call_operand.vmem [shape: f32[1,32], index: 2, kind: input, shape index: {}]   ;;  %s333_s3 = inlined_call_operand.vmem [shape: f32[1,32], index: 3, kind: input, shape index: {}]   ;;  %s334_s1 = inlined_call_operand.vmem [shape: f32[24,32], index: 1, kind: input, shape index: {}]   ;;  %s335_s5 = inlined_call_operand.vmem [shape: f32[1,32], index: 5, kind: input, shape index: {}]   ;;  %s336_s6 = inlined_call_operand.vmem [shape: f32[24,32], index: 6, kind: output, shape index: {}]  }
   0x1   :  { %214 = vmatprep.subr.mxu1 %v236_v0  ;;  %v73_v1 = vld [vmem:[%s330_s4 + $0x18] sm:$0xff]  ;;  %197 = vmatprep.subr.mxu0 %v236_v0  ;;  %v72_v2 = vld [vmem:[%s330_s4 + $0x10] sm:$0xff]  ;;  %v71_v3 = vld [vmem:[%s330_s4 + $0x8] sm:$0xff] }
   0x2   :  { %218 = vmatpush3.msra.mxu1 %v73_v1  ;;  %198 = vmatpush3.msra.mxu0 %v73_v1  ;;  %v24_v4 = vld [vmem:[%s331_s0 + $0x8] sm:$0xff]  ;;  %v184_v5 = vld [vmem:[%s332_s2] ss:$0 sm:$0xff]  ;;  %v25_v9 = vld [vmem:[%s331_s0 + $0x10] sm:$0xff] }
   0x3   :  { %215 = vmatprep.subr.mxu1 %v236_v0  ;;  %199 = vmatprep.subr.mxu0 %v236_v0  ;;  %v34_v6 = vmul.f32 %v184_v5, %v24_v4  ;;  %v185_v7 = vld [vmem:[%s333_s3] ss:$0 sm:$0xff]  ;;  %v35_v11 = vmul.f32 %v184_v5, %v25_v9  ;;  %v68_v34 = vld [vmem:[%s334_s1 + $0x8] sm:$0xff]  ;;  %v69_v42 = vld [vmem:[%s334_s1 + $0x10] sm:$0xff] }
   0x4   :  { %v23_v8 = vld [vmem:[%s331_s0] sm:$0xff]  ;;  %219 = vmatpush3.msra.mxu1 %v72_v2  ;;  %200 = vmatpush3.msra.mxu0 %v72_v2 }
   0x5   :  { %v33_v10 = vmul.f32 %v184_v5, %v23_v8  ;;  %216 = vmatprep.subr.mxu1 %v236_v0  ;;  %201 = vmatprep.subr.mxu0 %v236_v0  ;;  %v70_v12 = vld [vmem:[%s330_s4] sm:$0xff]  ;;  %v44_v13 = vadd.f32 %v185_v7, %v34_v6  ;;  %v45_v15 = vadd.f32 %v185_v7, %v35_v11 }
   0x6   :  { %220 = vmatpush3.msra.mxu1 %v71_v3  ;;  %202 = vmatpush3.msra.mxu0 %v71_v3  ;;  %v67_v35 = vld [vmem:[%s334_s1] sm:$0xff] }
   0x7   :  { %v43_v14 = vadd.f32 %v185_v7, %v33_v10  ;;  %217 = vmatprep.subr.mxu1 %v236_v0  ;;  %208 = vmatprep.mubr.msk.f32.mxu1 %vm237_vm0, %v236_v0  ;;  %v47_v16 = vsub.f32 0.0, %v44_v13  ;;  %v48_v18 = vsub.f32 0.0, %v45_v15  ;;  %v189_v37 = vld [vmem:[%s335_s5] ss:$0 sm:$0xff] }
   0x8   :  { %221 = vmatpush3.msra.mxu1 %v70_v12  ;;  %203 = vmatprep.subr.mxu0 %v236_v0 }
   0x9   :  { %v46_v17 = vsub.f32 0.0, %v43_v14  ;;  %v51_v19 = vmul.f32 1.442695, %v47_v16  ;;  %204 = vmatpush3.msra.mxu0 %v70_v12  ;;  %205 = vmatprep.mubr.msk.f32.mxu0 %vm237_vm0, %v236_v0  ;;  %v53_v21 = vmul.f32 1.442695, %v48_v18 }
   0xb   :  { %v49_v20 = vmul.f32 1.442695, %v46_v17  ;;  %224 = vpow2.f32 %v51_v19 }
   0xd   :  { %226 = vpow2.f32 %v49_v20 }
   0xe   :  { %228 = vpow2.f32 %v53_v21 }
  0x18   :  { %v225_v22 = vpop.eup %224 }
  0x19   :  { %v56_v24 = vadd.f32 1.0, %v225_v22 }
  0x1a   :  { %v227_v23 = vpop.eup %226 }
  0x1b   :  { %v229_v25 = vpop.eup %228  ;;  %v55_v26 = vadd.f32 1.0, %v227_v23  ;;  %230 = vrcp.f32 %v56_v24 }
  0x1c   :  { %v57_v27 = vadd.f32 1.0, %v229_v25 }
  0x1d   :  { %232 = vrcp.f32 %v55_v26 }
  0x1e   :  { %234 = vrcp.f32 %v57_v27 }
  0x28   :  { %v231_v28 = vpop.eup %230 }
  0x29   :  { %v65_v30 = vmul.f32 %v231_v28, %v44_v13 }
  0x2a   :  { %v233_v29 = vpop.eup %232 }
  0x2b   :  { %v235_v31 = vpop.eup %234  ;;  %v64_v32 = vmul.f32 %v233_v29, %v43_v14  ;;  %209 = vmatmul.mubr.msk.f32.vlgmr.msra.gmra.mxu1 %vm74_vm1, %v65_v30 }
  0x2c   :  { %v66_v33 = vmul.f32 %v235_v31, %v45_v15  ;;  %211 = vmatprep.mubr.msk.f32.mxu1 %vm237_vm0, %v236_v0 }
  0x2d   :  { %206 = vmatmul.mubr.msk.f32.vlgmr.msra.gmra.mxu0 %vm74_vm1, %v64_v32 }
  0x2f   :  { %212 = vmatmul.mubr.msk.f32.gmra.mxu1 %vm74_vm1, %v66_v33 }
  0xeb   :  { %v155_v36 = vpop.f32.mrf.mxu1 }
  0xec   :  { %v165_v38 = vadd.f32 %v155_v36, %v68_v34 }
  0xed   :  { %v150_v39 = vpop.f32.mrf.mxu0  ;;  %v210_v41 = vpop.f32.mrf.mxu1 }
  0xee   :  { %v164_v40 = vadd.f32 %v150_v39, %v67_v35  ;;  %v175_v43 = vadd.f32 %v189_v37, %v165_v38 }
  0xef   :  { %v207_v44 = vpop.f32.mrf.mxu0  ;;  %v160_v46 = vpop.f32.mrf.mxu1 }
  0xf0   :  { %v174_v45 = vadd.f32 %v189_v37, %v164_v40  ;;  %178 = vst.msk [vmem:[%s336_s6 + $0x8] sm:$0xff] %vm74_vm1, %v175_v43  ;;  %v166_v47 = vadd.f32 %v160_v46, %v69_v42 }
  0xf1   :  { %v213_v48 = vpop.f32.mrf.mxu1 }
  0xf2   :  { %177 = vst.msk [vmem:[%s336_s6] sm:$0xff] %vm74_vm1, %v174_v45  ;;  %v176_v49 = vadd.f32 %v189_v37, %v166_v47 }
  0xf4   :  { %179 = vst.msk [vmem:[%s336_s6 + $0x10] sm:$0xff] %vm74_vm1, %v176_v49 }

// kernel: e2e_forward.24
= control target key start
LH: loop header
LB: loop body
LE: loop exit
PB: predicated region body
PF: predicated region fallthrough
CT: control target
= control target key end

     0   :  { %vm37_vm0 = vcmask 261120   ;;  %v492_v21 = vmov 0.0   ;;  %vm493_vm1 = vmmov 0   ;;  %vm232_vm2 = vcmask 523264   ;;  %s673_s0 = inlined_call_operand.vmem [shape: f32[24,32], index: 0, kind: input, shape index: {}]   ;;  %s674_s3 = inlined_call_operand.vmem [shape: f32[32,64], index: 3, kind: input, shape index: {}]   ;;  %s675_s1 = inlined_call_operand.vmem [shape: f32[1,32], index: 1, kind: input, shape index: {}]   ;;  %s676_s2 = inlined_call_operand.vmem [shape: f32[1,32], index: 2, kind: input, shape index: {}]   ;;  %s677_s5 = inlined_call_operand.vmem [shape: f32[64,32], index: 5, kind: input, shape index: {}]   ;;  %s678_s4 = inlined_call_operand.vmem [shape: f32[1,64], index: 4, kind: input, shape index: {}]   ;;  %s679_s6 = inlined_call_operand.vmem [shape: f32[1,32], index: 6, kind: input, shape index: {}]   ;;  %s680_s7 = inlined_call_operand.vmem [shape: f32[1,32], index: 7, kind: input, shape index: {}]   ;;  %s681_s8 = inlined_call_operand.vmem [shape: f32[1,32], index: 8, kind: input, shape index: {}]   ;;  %s682_s9 = inlined_call_operand.vmem [shape: f32[24,32], index: 9, kind: output, shape index: {}]  }
   0x1   :  { %v547_v0 = vld [vmem:[%s673_s0] sm:$0xff]  ;;  %v552_v1 = vld [vmem:[%s673_s0 + $0x10] sm:$0xff]  ;;  %v557_v2 = vld [vmem:[%s673_s0 + $0x8] sm:$0xff]  ;;  %424 = vmatprep.subr.mxu0 %v492_v21  ;;  %432 = vmatprep.mubr.msk.f32.mxu0 %vm493_vm1, %v492_v21 }
   0x2   :  { %v38_v3 = vsel %vm37_vm0, %v547_v0, 0.0  ;;  %v44_v4 = vsel %vm37_vm0, %v552_v1, 0.0  ;;  %v41_v5 = vsel %vm37_vm0, %v557_v2, 0.0  ;;  %v99_v22 = vld [vmem:[%s674_s3 + $0x18] sm:$0xff]  ;;  %v98_v23 = vld [vmem:[%s674_s3 + $0x10] sm:$0xff]  ;;  %441 = vmatprep.subr.mxu1 %v492_v21  ;;  %v97_v24 = vld [vmem:[%s674_s3 + $0x8] sm:$0xff]  ;;  %457 = vmatprep.mubr.msk.f32.mxu1 %vm493_vm1, %v492_v21 }
   0x3   :  { %39 = vadd.xlane.f32.xlu0 %v38_v3  ;;  %45 = vadd.xlane.f32.xlu1 %v44_v4  ;;  %v96_v25 = vld [vmem:[%s674_s3] sm:$0xff]  ;;  %v224_v49 = vld [vmem:[%s677_s5 + $0x38] sm:$0xff]  ;;  %v223_v50 = vld [vmem:[%s677_s5 + $0x30] sm:$0xff] }
   0x4   :  { %425 = vmatpush3.msra.mxu0 %v99_v22  ;;  %v394_v36 = vld [vmem:[%s675_s1] ss:$0 sm:$0xff]  ;;  %442 = vmatpush3.msra.mxu1 %v224_v49  ;;  %v222_v51 = vld [vmem:[%s677_s5 + $0x28] sm:$0xff]  ;;  %v220_v53 = vld [vmem:[%s677_s5 + $0x18] sm:$0xff] }
   0x5   :  { %426 = vmatprep.subr.mxu0 %v492_v21  ;;  %v395_v38 = vld [vmem:[%s676_s2] ss:$0 sm:$0xff]  ;;  %443 = vmatprep.subr.mxu1 %v492_v21  ;;  %v219_v54 = vld [vmem:[%s677_s5 + $0x10] sm:$0xff]  ;;  %v218_v55 = vld [vmem:[%s677_s5 + $0x8] sm:$0xff] }
   0x6   :  { %427 = vmatpush3.msra.mxu0 %v98_v23  ;;  %444 = vmatpush3.msra.mxu1 %v223_v50  ;;  %v221_v52 = vld [vmem:[%s677_s5 + $0x20] sm:$0xff] }
   0x7   :  { %42 = vadd.xlane.f32.xlu0 %v41_v5  ;;  %428 = vmatprep.subr.mxu0 %v492_v21  ;;  %v217_v56 = vld [vmem:[%s677_s5] sm:$0xff] }
   0x8   :  { %429 = vmatpush3.msra.mxu0 %v97_v24  ;;  %445 = vmatprep.subr.mxu1 %v492_v21  ;;  %v396_v57 = vld [vmem:[%s678_s4] ss:$0 sm:$0xff] }
   0x9   :  { %430 = vmatprep.subr.mxu0 %v492_v21  ;;  %446 = vmatpush3.msra.mxu1 %v222_v51 }
   0xa   :  { %431 = vmatpush3.msra.mxu0 %v96_v25  ;;  %447 = vmatprep.subr.mxu1 %v492_v21  ;;  %v400_v25 = vld [vmem:[%s679_s6] ss:$0 sm:$0xff] }
   0xb   :  { %448 = vmatpush3.msra.mxu1 %v221_v52 }
   0xc   :  { %449 = vmatprep.subr.mxu1 %v492_v21 }
   0xd   :  { %450 = vmatpush3.msra.mxu1 %v220_v53 }
   0xe   :  { %451 = vmatprep.subr.mxu1 %v492_v21 }
   0xf   :  { %452 = vmatpush3.msra.mxu1 %v219_v54 }
  0x10   :  { %453 = vmatprep.subr.mxu1 %v492_v21 }
  0x11   :  { %454 = vmatpush3.msra.mxu1 %v218_v55 }
  0x12   :  { %455 = vmatprep.subr.mxu1 %v492_v21 }
  0x13   :  { %456 = vmatpush3.msra.mxu1 %v217_v56 }
  0x8c   :  { %v40_v6 = vpop.xlane.xlu0 %39  ;;  %v46_v7 = vpop.xlane.xlu1 %45 }
  0x8d   :  { %v48_v8 = vmul.f32 0.03125, %v40_v6  ;;  %v50_v9 = vmul.f32 0.03125, %v46_v7 }
  0x8f   :  { %v51_v10 = vsub.f32 %v547_v0, %v48_v8  ;;  %v53_v11 = vsub.f32 %v552_v1, %v50_v9 }
  0x90   :  { %v43_v12 = vpop.xlane.xlu0 %42 }
  0x91   :  { %v49_v13 = vmul.f32 0.03125, %v43_v12  ;;  %v54_v14 = vmul.f32 %v51_v10, %v51_v10  ;;  %v56_v15 = vmul.f32 %v53_v11, %v53_v11 }
  0x93   :  { %v52_v16 = vsub.f32 %v557_v2, %v49_v13  ;;  %v57_v17 = vsel %vm37_vm0, %v54_v14, 0.0  ;;  %v63_v18 = vsel %vm37_vm0, %v56_v15, 0.0 }
  0x94   :  { %58 = vadd.xlane.f32.xlu1 %v57_v17 }
  0x95   :  { %v55_v19 = vmul.f32 %v52_v16, %v52_v16 }
  0x97   :  { %v60_v20 = vsel %vm37_vm0, %v55_v19, 0.0 }
  0x98   :  { %64 = vadd.xlane.f32.xlu1 %v63_v18  ;;  %61 = vadd.xlane.f32.xlu0 %v60_v20 }
 0x11d   :  { %v59_v26 = vpop.xlane.xlu1 %58 }
 0x11e   :  { %v66_v27 = vmul.f32 0.03125, %v59_v26 }
 0x120   :  { %v69_v28 = vadd.f32 1e-12, %v66_v27 }
 0x121   :  { %v65_v29 = vpop.xlane.xlu1 %64  ;;  %v62_v30 = vpop.xlane.xlu0 %61 }
 0x122   :  { %468 = vrsqrt.f32 %v69_v28  ;;  %v68_v31 = vmul.f32 0.03125, %v65_v29  ;;  %v67_v32 = vmul.f32 0.03125, %v62_v30 }
 0x124   :  { %v71_v33 = vadd.f32 1e-12, %v68_v31  ;;  %v70_v34 = vadd.f32 1e-12, %v67_v32 }
 0x126   :  { %470 = vrsqrt.f32 %v71_v33 }
 0x127   :  { %472 = vrsqrt.f32 %v70_v34 }
 0x12f   :  { %v469_v35 = vpop.eup %468 }
 0x130   :  { %v75_v37 = vmul.f32 %v469_v35, %v51_v10 }
 0x132   :  { %v84_v39 = vmul.f32 %v394_v36, %v75_v37 }
 0x133   :  { %v471_v40 = vpop.eup %470 }
 0x134   :  { %v473_v41 = vpop.eup %472  ;;  %v93_v42 = vadd.f32 %v395_v38, %v84_v39  ;;  %v77_v44 = vmul.f32 %v471_v40, %v53_v11 }
 0x135   :  { %v76_v43 = vmul.f32 %v473_v41, %v52_v16 }
 0x136   :  { %433 = vmatmul.mubr.msk.f32.vlgmr.msra.gmra.mxu0 %vm37_vm0, %v93_v42  ;;  %v86_v47 = vmul.f32 %v394_v36, %v77_v44 }
 0x137   :  { %435 = vmatprep.mubr.msk.f32.mxu0 %vm493_vm1, %v492_v21  ;;  %v85_v45 = vmul.f32 %v394_v36, %v76_v43 }
 0x138   :  { %v95_v48 = vadd.f32 %v395_v38, %v86_v47 }
 0x139   :  { %v94_v46 = vadd.f32 %v395_v38, %v85_v45 }
 0x13b   :  { %436 = vmatmul.mubr.msk.f32.gmra.mxu0 %vm37_vm0, %v94_v46 }
 0x13c   :  { %438 = vmatprep.mubr.msk.f32.mxu0 %vm493_vm1, %v492_v21 }
 0x13f   :  { %439 = vmatmul.mubr.msk.f32.gmra.mxu0 %vm37_vm0, %v95_v48 }
 0x1f6   :  { %v182_v58 = vpop.f32.mrf.mxu0 }
 0x1f7   :  { %v183_v59 = vadd.f32 %v396_v57, %v182_v58 }
 0x1f8   :  { %v434_v60 = vpop.f32.mrf.mxu0 }
 0x1f9   :  { %v196_v61 = vsub.f32 0.0, %v183_v59 }
 0x1fb   :  { %v199_v62 = vmul.f32 1.442695, %v196_v61  ;;  %v187_v63 = vpop.f32.mrf.mxu0 }
 0x1fc   :  { %v188_v3 = vadd.f32 %v396_v57, %v187_v63 }
 0x1fd   :  { %474 = vpow2.f32 %v199_v62  ;;  %v437_v4 = vpop.f32.mrf.mxu0 }
 0x1fe   :  { %v197_v5 = vsub.f32 0.0, %v188_v3  ;;  %v404_v4 = vld [vmem:[%s680_s7] ss:$0 sm:$0xff] }
 0x1ff   :  { %v192_v6 = vpop.f32.mrf.mxu0 }
 0x200   :  { %v201_v7 = vmul.f32 1.442695, %v197_v5  ;;  %v193_v8 = vadd.f32 %v396_v57, %v192_v6  ;;  %v405_v6 = vld [vmem:[%s681_s8] ss:$0 sm:$0xff] }
 0x201   :  { %v440_v9 = vpop.f32.mrf.mxu0 }
 0x202   :  { %476 = vpow2.f32 %v201_v7  ;;  %v198_v10 = vsub.f32 0.0, %v193_v8 }
 0x204   :  { %v203_v11 = vmul.f32 1.442695, %v198_v10 }
 0x206   :  { %478 = vpow2.f32 %v203_v11 }
 0x20a   :  { %v475_v12 = vpop.eup %474 }
 0x20b   :  { %v205_v13 = vadd.f32 1.0, %v475_v12 }
 0x20d   :  { %480 = vrcp.f32 %v205_v13 }
 0x20f   :  { %v477_v14 = vpop.eup %476 }
 0x210   :  { %v206_v15 = vadd.f32 1.0, %v477_v14 }
 0x212   :  { %482 = vrcp.f32 %v206_v15 }
 0x213   :  { %v479_v16 = vpop.eup %478 }
 0x214   :  { %v207_v17 = vadd.f32 1.0, %v479_v16 }
 0x216   :  { %484 = vrcp.f32 %v207_v17 }
 0x21a   :  { %v481_v18 = vpop.eup %480 }
 0x21b   :  { %v214_v19 = vmul.f32 %v481_v18, %v183_v59 }
 0x21d   :  { %458 = vmatmul.mubr.msk.f32.vlgmr.msra.gmra.mxu1 %vm232_vm2, %v214_v19 }
 0x21e   :  { %460 = vmatprep.mubr.msk.f32.mxu1 %vm493_vm1, %v492_v21 }
 0x21f   :  { %v483_v20 = vpop.eup %482 }
 0x220   :  { %v215_v22 = vmul.f32 %v483_v20, %v188_v3 }
 0x222   :  { %461 = vmatmul.mubr.msk.f32.gmra.mxu1 %vm232_vm2, %v215_v22 }
 0x223   :  { %v485_v23 = vpop.eup %484  ;;  %463 = vmatprep.mubr.msk.f32.mxu1 %vm493_vm1, %v492_v21 }
 0x224   :  { %v216_v24 = vmul.f32 %v485_v23, %v193_v8 }
 0x226   :  { %464 = vmatmul.mubr.msk.f32.gmra.mxu1 %vm232_vm2, %v216_v24 }
 0x2dd   :  { %v308_v26 = vpop.f32.mrf.mxu1 }
 0x2de   :  { %v309_v27 = vadd.f32 %v400_v25, %v308_v26 }
 0x2df   :  { %v459_v28 = vpop.f32.mrf.mxu1 }
 0x2e0   :  { %v322_v29 = vmul.f32 0.5, %v309_v27 }
 0x2e2   :  { %v313_v30 = vpop.f32.mrf.mxu1  ;;  %v325_v31 = vadd.f32 %v322_v29, %v547_v0 }
 0x2e3   :  { %v314_v32 = vadd.f32 %v400_v25, %v313_v30 }
 0x2e4   :  { %v462_v33 = vpop.f32.mrf.mxu1  ;;  %v330_v34 = vsel %vm37_vm0, %v325_v31, 0.0 }
 0x2e5   :  { %v323_v35 = vmul.f32 0.5, %v314_v32  ;;  %331 = vadd.xlane.f32.xlu0 %v330_v34 }
 0x2e6   :  { %v318_v21 = vpop.f32.mrf.mxu1 }
 0x2e7   :  { %v319_v36 = vadd.f32 %v400_v25, %v318_v21  ;;  %v326_v37 = vadd.f32 %v323_v35, %v557_v2 }
 0x2e8   :  { %v465_v38 = vpop.f32.mrf.mxu1 }
 0x2e9   :  { %v324_v39 = vmul.f32 0.5, %v319_v36  ;;  %v333_v40 = vsel %vm37_vm0, %v326_v37, 0.0 }
 0x2ea   :  { %334 = vadd.xlane.f32.xlu1 %v333_v40 }
 0x2eb   :  { %v327_v41 = vadd.f32 %v324_v39, %v552_v1 }
 0x2ed   :  { %v336_v42 = vsel %vm37_vm0, %v327_v41, 0.0 }
 0x2ee   :  { %337 = vadd.xlane.f32.xlu0 %v336_v42 }
 0x36e   :  { %v332_v0 = vpop.xlane.xlu0 %331 }
 0x36f   :  { %v339_v43 = vmul.f32 0.03125, %v332_v0 }
 0x371   :  { %v342_v44 = vsub.f32 %v325_v31, %v339_v43 }
 0x373   :  { %v335_v45 = vpop.xlane.xlu1 %334  ;;  %v345_v46 = vmul.f32 %v342_v44, %v342_v44 }
 0x374   :  { %v340_v47 = vmul.f32 0.03125, %v335_v45 }
 0x375   :  { %v348_v48 = vsel %vm37_vm0, %v345_v46, 0.0 }
 0x376   :  { %v343_v49 = vsub.f32 %v326_v37, %v340_v47  ;;  %349 = vadd.xlane.f32.xlu1 %v348_v48 }
 0x377   :  { %v338_v2 = vpop.xlane.xlu0 %337 }
 0x378   :  { %v341_v50 = vmul.f32 0.03125, %v338_v2  ;;  %v346_v51 = vmul.f32 %v343_v49, %v343_v49 }
 0x37a   :  { %v344_v52 = vsub.f32 %v327_v41, %v341_v50  ;;  %v351_v53 = vsel %vm37_vm0, %v346_v51, 0.0 }
 0x37b   :  { %352 = vadd.xlane.f32.xlu0 %v351_v53 }
 0x37c   :  { %v347_v1 = vmul.f32 %v344_v52, %v344_v52 }
 0x37e   :  { %v354_v54 = vsel %vm37_vm0, %v347_v1, 0.0 }
 0x37f   :  { %355 = vadd.xlane.f32.xlu1 %v354_v54 }
 0x3ff   :  { %v350_v55 = vpop.xlane.xlu1 %349 }
 0x400   :  { %v357_v56 = vmul.f32 0.03125, %v350_v55 }
 0x402   :  { %v360_v57 = vadd.f32 1e-12, %v357_v56 }
 0x404   :  { %486 = vrsqrt.f32 %v360_v57  ;;  %v353_v58 = vpop.xlane.xlu0 %352 }
 0x405   :  { %v358_v59 = vmul.f32 0.03125, %v353_v58 }
 0x407   :  { %v361_v60 = vadd.f32 1e-12, %v358_v59 }
 0x408   :  { %v356_v61 = vpop.xlane.xlu1 %355 }
 0x409   :  { %488 = vrsqrt.f32 %v361_v60  ;;  %v359_v62 = vmul.f32 0.03125, %v356_v61 }
 0x40b   :  { %v362_v63 = vadd.f32 1e-12, %v359_v62 }
 0x40d   :  { %490 = vrsqrt.f32 %v362_v63 }
 0x411   :  { %v487_v3 = vpop.eup %486 }
 0x412   :  { %v366_v5 = vmul.f32 %v487_v3, %v342_v44 }
 0x414   :  { %v375_v7 = vmul.f32 %v404_v4, %v366_v5 }
 0x416   :  { %v489_v8 = vpop.eup %488  ;;  %v384_v9 = vadd.f32 %v405_v6, %v375_v7 }
 0x417   :  { %v367_v10 = vmul.f32 %v489_v8, %v343_v49 }
 0x418   :  { %387 = vst.msk [vmem:[%s682_s9] sm:$0xff] %vm37_vm0, %v384_v9 }
 0x419   :  { %v376_v11 = vmul.f32 %v404_v4, %v367_v10 }
 0x41a   :  { %v491_v12 = vpop.eup %490 }
 0x41b   :  { %v385_v13 = vadd.f32 %v405_v6, %v376_v11  ;;  %v368_v14 = vmul.f32 %v491_v12, %v344_v52 }
 0x41d   :  { %388 = vst.msk [vmem:[%s682_s9 + $0x8] sm:$0xff] %vm37_vm0, %v385_v13  ;;  %v377_v15 = vmul.f32 %v404_v4, %v368_v14 }
 0x41f   :  { %v386_v16 = vadd.f32 %v405_v6, %v377_v15 }
 0x421   :  { %389 = vst.msk [vmem:[%s682_s9 + $0x10] sm:$0xff] %vm37_vm0, %v386_v16 }

// kernel: e2e_forward.22
= control target key start
LH: loop header
LB: loop body
LE: loop exit
PB: predicated region body
PF: predicated region fallthrough
CT: control target
= control target key end

     0   :  { %s892_s30 = smov 0   ;;  %s972_s0 = inlined_call_operand.vmem [shape: f32[2,12,32], index: 0, kind: input, shape index: {}]   ;;  %s973_s1 = inlined_call_operand.vmem [shape: f32[1,32], index: 1, kind: input, shape index: {}]   ;;  %s974_s2 = inlined_call_operand.vmem [shape: f32[1,32], index: 2, kind: input, shape index: {}]   ;;  %s975_s3 = inlined_call_operand.vmem [shape: f32[32,64], index: 3, kind: input, shape index: {}]   ;;  %s976_s4 = inlined_call_operand.vmem [shape: f32[1,64], index: 4, kind: input, shape index: {}]   ;;  %s977_s5 = inlined_call_operand.vmem [shape: f32[7,32], index: 5, kind: input, shape index: {}]   ;;  %s978_s6 = inlined_call_operand.vmem [shape: f32[1,32], index: 6, kind: input, shape index: {}]   ;;  %s979_s7 = inlined_call_operand.vmem [shape: f32[2,12,32], index: 7, kind: output, shape index: {0}]   ;;  %s980_s8 = inlined_call_operand.vmem [shape: f32[2,1,32], index: 8, kind: output, shape index: {1}]   ;;  %s981_s9 = inlined_call_operand.vmem [shape: f32[2,1,32], index: 9, kind: output, shape index: {2}]  }
   0x1 LB: > { %s774_s10 = sadd.s32 4294967295, %s838_s30   ;;  %p778_p0 = scmp.ge.s32.totalorder %s838_s30, 1  ;;  %s838_s30 = sphi %s892_s30, %s20_s30  }
   0x2   : > { %p292_p1 = scmp.lt.s32.totalorder %s838_s30, 3 }
   0x4   : > { %p293_p2 = pnand %p778_p0, %p292_p1 }
   0x5   : > { %p334_p3 = scmp.lt.s32.totalorder (!%p293_p2), %s774_s10, 1  ;;  %s841_s29 = smov (!%p293_p2), 96  }
   0x6   : > { %296 = sbr.rel (%p293_p2) target bundleno = 720 (0x2d0), region = 48 }
   0xb   : > { %s983_s10 = smov (!%p334_p3, %s774_s10), 1  ;;  %vm354_vm0 = vcmask 261120   ;;  %vm358_vm1 = vcmask 257024   ;;  %v402_v14 = vld [vmem:[%s975_s3 + $0x18] sm:$0xff]  ;;  %v401_v15 = vld [vmem:[%s975_s3 + $0x10] sm:$0xff]  ;;  %v400_v16 = vld [vmem:[%s975_s3 + $0x8] sm:$0xff]  ;;  %v523_v50 = vlaneseq }
   0xc   : > { %s791_s11 = sshll.u32 %s983_s10, 4  ;;  %799 = vmatprep.subr.mxu0 %v402_v14  ;;  %v399_v17 = vld [vmem:[%s975_s3] sm:$0xff]  ;;  %vm515_vm2 = vcmask 254976   ;;  %v840_v34 = vmov 0.0   ;;  %vm539_vm3 = vcmask 1046528   ;;  %vm555_vm4 = vcmask 1045504   ;;  %s346_s20 = scalar_lea.vmem %s980_s8, %s983_s10 }
   0xd   : > { %s338_s14 = scalar_lea.vmem %s972_s0, %s791_s11  ;;  %800 = vmatpush3.msra.mxu0 %v402_v14  ;;  %v783_v25 = vld [vmem:[%s973_s1] ss:$0 sm:$0xff]  ;;  %513 = vst.msk [vmem:[#allocation2] sm:$0xff] %vm354_vm0, %v840_v34  ;;  %514 = vst.msk [vmem:[#allocation2 + $0x8] sm:$0xff] %vm354_vm0, %v840_v34  ;;  %v524_v51 = vshrl.u32 %v523_v50, 7  ;;  %vm571_vm5 = vcmask 1044480   ;;  %s343_s18 = scalar_lea.vmem %s979_s7, %s791_s11 }
   0xe   : > { %v350_v0 = vld [vmem:[%s338_s14] sm:$0xff]  ;;  %v351_v1 = vld [vmem:[%s338_s14 + $0x8] sm:$0xf]  ;;  %801 = vmatprep.subr.mxu0 %v401_v15  ;;  %516 = vst.msk [vmem:[#allocation2 + $0x10] sm:$0x3] %vm515_vm2, %v840_v34  ;;  %vm587_vm6 = vcmask 1043456   ;;  %s349_s23 = scalar_lea.vmem %s981_s9, %s983_s10 }
   0xf   : > { %v355_v2 = vsel %vm354_vm0, %v350_v0, 0.0  ;;  %v359_v3 = vsel %vm358_vm1, %v351_v1, 0.0  ;;  %802 = vmatpush3.msra.mxu0 %v401_v15  ;;  %v784_v27 = vld [vmem:[%s974_s2] ss:$0 sm:$0xff]  ;;  %v597_v52 = vsub.s32 5, %v524_v51  ;;  %v617_v59 = vsub.s32 6, %v524_v51 }
  0x10   : > { %356 = vadd.xlane.f32.xlu0 %v355_v2  ;;  %803 = vmatprep.subr.mxu0 %v400_v16  ;;  %v785_v35 = vld [vmem:[%s976_s4] ss:$0 sm:$0xff]  ;;  %v525_v61 = vsub.s32 0, %v524_v51  ;;  %v533_v62 = vsub.s32 1, %v524_v51  ;;  %v549_v63 = vsub.s32 2, %v524_v51  ;;  %vm605_vm7 = vcmask 1042432  }
  0x11   : > { %804 = vmatpush3.msra.mxu0 %v400_v16  ;;  %v522_v54 = vld [vmem:[%s977_s5] sm:$0x7f]  ;;  %vm625_vm8 = vcmask 1041408   ;;  %vm655_vm9 = vcmask 253952  }
  0x12   : > { %805 = vmatprep.subr.mxu0 %v399_v17  ;;  %v598_v58 = vrot.slane %v522_v54, %v597_v52 }
  0x13   : > { %806 = vmatpush3.msra.mxu0 %v399_v17 }
  0x14   : > { %360 = vadd.xlane.f32.xlu0 %v359_v3  ;;  %v618_v3 = vrot.slane %v522_v54, %v617_v59 }
  0x15   : > { %v521_v60 = vld [vmem:[#allocation2 + $0x10] sm:$0x3] }
  0x16   : > { %v601_v2 = vmul.f32 %v598_v58, %v521_v60 }
  0x99   : > { %v357_v4 = vpop.xlane.xlu0 %356 }
  0x9a   : > { %v363_v5 = vmul.f32 0.03125, %v357_v4  ;;  %v526_v4 = vrot.slane %v522_v54, %v525_v61 }
  0x9c   : > { %v365_v6 = vsub.f32 %v350_v0, %v363_v5  ;;  %v565_v0 = vsub.s32 3, %v524_v51  ;;  %v534_v5 = vrot.slane %v522_v54, %v533_v62 }
  0x9d   : > { %v361_v7 = vpop.xlane.xlu0 %360 }
  0x9e   : > { %v364_v8 = vmul.f32 0.03125, %v361_v7  ;;  %v367_v9 = vmul.f32 %v365_v6, %v365_v6  ;;  %v566_v7 = vrot.slane %v522_v54, %v565_v0 }
  0xa0   : > { %v366_v10 = vsub.f32 %v351_v1, %v364_v8  ;;  %v369_v11 = vsel %vm354_vm0, %v367_v9, 0.0  ;;  %v581_v1 = vsub.s32 4, %v524_v51  ;;  %v609_v9 = vrot.slane %v601_v2, 5 }
  0xa1   : > { %370 = vadd.xlane.f32.xlu1 %v369_v11 }
  0xa2   : > { %v368_v12 = vmul.f32 %v366_v10, %v366_v10  ;;  %v582_v8 = vrot.slane %v522_v54, %v581_v1 }
  0xa4   : > { %v372_v13 = vsel %vm358_vm1, %v368_v12, 0.0 }
  0xa5   : > { %373 = vadd.xlane.f32.xlu1 %v372_v13 }
 0x12a   : > { %v371_v18 = vpop.xlane.xlu1 %370 }
 0x12b   : > { %v375_v19 = vmul.f32 0.03125, %v371_v18 }
 0x12d   : > { %v377_v20 = vadd.f32 1e-12, %v375_v19 }
 0x12e   : > { %v374_v21 = vpop.xlane.xlu1 %373 }
 0x12f   : > { %820 = vrsqrt.f32 %v377_v20  ;;  %v376_v22 = vmul.f32 0.03125, %v374_v21 }
 0x131   : > { %v378_v23 = vadd.f32 1e-12, %v376_v22 }
 0x133   : > { %822 = vrsqrt.f32 %v378_v23 }
 0x13c   : > { %v821_v24 = vpop.eup %820 }
 0x13d   : > { %v381_v26 = vmul.f32 %v821_v24, %v365_v6  ;;  %v550_v6 = vrot.slane %v522_v54, %v549_v63 }
 0x13f   : > { %v389_v28 = vmul.f32 %v783_v25, %v381_v26 }
 0x140   : > { %v823_v29 = vpop.eup %822 }
 0x141   : > { %v382_v30 = vmul.f32 %v823_v29, %v366_v10  ;;  %v397_v31 = vadd.f32 %v784_v27, %v389_v28  ;;  %v621_v10 = vmul.f32 %v618_v3, %v521_v60 }
 0x143   : > { %v390_v32 = vmul.f32 %v783_v25, %v382_v30  ;;  %807 = vmatprep.mubr.msk.f32.mxu0 %vm354_vm0, %v397_v31 }
 0x145   : > { %v398_v33 = vadd.f32 %v784_v27, %v390_v32 }
 0x147   : > { %808 = vmatmul.mubr.msk.f32.vlgmr.msra.gmra.mxu0 %vm354_vm0, %v398_v33 }
 0x207   : > { %v809_v36 = vpop.f32.mrf.mxu0 }
 0x208   : > { %v488_v37 = vadd.f32 %v809_v36, %v785_v35 }
 0x209   : > { %v482_v38 = vpop.f32.mrf.mxu0 }
 0x20a   : > { %v492_v39 = vsub.f32 0.0, %v488_v37  ;;  %v483_v40 = vadd.f32 %v785_v35, %v482_v38 }
 0x20c   : > { %v495_v41 = vmul.f32 1.442695, %v492_v39  ;;  %v491_v42 = vsub.f32 0.0, %v483_v40 }
 0x20e   : > { %824 = vpow2.f32 %v495_v41  ;;  %v493_v43 = vmul.f32 1.442695, %v491_v42 }
 0x210   : > { %826 = vpow2.f32 %v493_v43 }
 0x21b   : > { %v825_v44 = vpop.eup %824 }
 0x21c   : > { %v498_v45 = vadd.f32 1.0, %v825_v44 }
 0x21d   : > { %v827_v46 = vpop.eup %826 }
 0x21e   : > { %828 = vrcp.f32 %v498_v45  ;;  %v497_v47 = vadd.f32 1.0, %v827_v46  ;;  %v629_v45 = vrot.slane %v621_v10, 6 }
 0x220   : > { %830 = vrcp.f32 %v497_v47 }
 0x22b   : > { %v829_v48 = vpop.eup %828 }
 0x22c   : > { %507 = vrot.lane.b32.xlu1 %v829_v48, %s841_s29 }
 0x22d   : > { %v831_v49 = vpop.eup %830 }
 0x22e   : > { %505 = vrot.lane.b32.xlu0 %v831_v49, %s841_s29 }
 0x29e   : > { %v508_v53 = vpop.permute.xlu1 %507 }
 0x29f   : > { %v512_v55 = vmul.f32 %v508_v53, %v488_v37 }
 0x2a0   : > { %v506_v56 = vpop.permute.xlu0 %505 }
 0x2a1   : > { %518 = vst.msk [vmem:[#allocation2 + $0xb] sm:$0xf] %vm358_vm1, %v512_v55  ;;  %v511_v57 = vmul.f32 %v506_v56, %v483_v40  ;;  %v788_v55 = vld [vmem:[%s978_s6] ss:$0 sm:$0xff] }
 0x2a3   : > { %517 = vst.msk [vmem:[#allocation2 + $0x3] sm:$0xff] %vm354_vm0, %v511_v57 }
 0x2aa   : > { %v519_v11 = vld [vmem:[#allocation2] sm:$0xff]  ;;  %v520_v12 = vld [vmem:[#allocation2 + $0x8] sm:$0xff] }
 0x2ab   : > { %v528_v13 = vmul.f32 %v526_v4, %v520_v12  ;;  %v535_v14 = vmul.f32 %v534_v5, %v519_v11  ;;  %v536_v15 = vmul.f32 %v534_v5, %v520_v12  ;;  %v551_v16 = vmul.f32 %v550_v6, %v519_v11 }
 0x2ac   : > { %v552_v17 = vmul.f32 %v550_v6, %v520_v12  ;;  %v567_v18 = vmul.f32 %v566_v7, %v519_v11  ;;  %v568_v19 = vmul.f32 %v566_v7, %v520_v12  ;;  %v583_v22 = vmul.f32 %v582_v8, %v519_v11 }
 0x2ad   : > { %v540_v20 = vrot.slane %v535_v14, 1  ;;  %v541_v21 = vrot.slane %v536_v15, 1  ;;  %v584_v23 = vmul.f32 %v582_v8, %v520_v12  ;;  %v527_v24 = vmul.f32 %v526_v4, %v519_v11 }
 0x2ae   : > { %v556_v25 = vrot.slane %v551_v16, 2  ;;  %v557_v26 = vrot.slane %v552_v17, 2  ;;  %v572_v29 = vrot.slane %v567_v18, 3  ;;  %v573_v30 = vrot.slane %v568_v19, 3 }
 0x2af   : > { %v542_v27 = vsel %vm539_vm3, %v540_v20, %v541_v21  ;;  %v546_v28 = vadd.f32 %v541_v21, %v528_v13  ;;  %v588_v32 = vrot.slane %v583_v22, 4  ;;  %v589_v33 = vrot.slane %v584_v23, 4 }
 0x2b0   : > { %v545_v31 = vadd.f32 %v542_v27, %v527_v24  ;;  %v599_v34 = vmul.f32 %v598_v58, %v519_v11  ;;  %v558_v35 = vsel %vm555_vm4, %v556_v25, %v557_v26  ;;  %v600_v37 = vmul.f32 %v598_v58, %v520_v12 }
 0x2b1   : > { %v562_v36 = vadd.f32 %v557_v26, %v546_v28  ;;  %v619_v38 = vmul.f32 %v618_v3, %v519_v11  ;;  %v620_v40 = vmul.f32 %v618_v3, %v520_v12  ;;  %v574_v41 = vsel %vm571_vm5, %v572_v29, %v573_v30 }
 0x2b2   : > { %v561_v39 = vadd.f32 %v558_v35, %v545_v31  ;;  %v606_v43 = vrot.slane %v599_v34, 5  ;;  %v607_v44 = vrot.slane %v600_v37, 5  ;;  %v590_v48 = vsel %vm587_vm6, %v588_v32, %v589_v33 }
 0x2b3   : > { %v578_v42 = vadd.f32 %v573_v30, %v562_v36  ;;  %v627_v47 = vrot.slane %v620_v40, 6  ;;  %v626_v50 = vrot.slane %v619_v38, 6 }
 0x2b4   : > { %v577_v46 = vadd.f32 %v574_v41, %v561_v39  ;;  %v610_v52 = vsel %vm605_vm7, %v607_v44, %v609_v9  ;;  %v608_v53 = vsel %vm605_vm7, %v606_v43, %v607_v44 }
 0x2b5   : > { %v594_v49 = vadd.f32 %v589_v33, %v578_v42  ;;  %v630_v57 = vsel %vm625_vm8, %v627_v47, %v629_v45  ;;  %v628_v58 = vsel %vm625_vm8, %v626_v50, %v627_v47 }
 0x2b6   : > { %v593_v51 = vadd.f32 %v590_v48, %v577_v46 }
 0x2b7   : > { %v614_v54 = vadd.f32 %v610_v52, %v594_v49 }
 0x2b8   : > { %v613_v56 = vadd.f32 %v608_v53, %v593_v51 }
 0x2b9   : > { %v634_v59 = vadd.f32 %v630_v57, %v614_v54 }
 0x2ba   : > { %v633_v60 = vadd.f32 %v628_v58, %v613_v56 }
 0x2bb   : > { %v643_v61 = vadd.f32 %v788_v55, %v634_v59 }
 0x2bc   : > { %v642_v62 = vadd.f32 %v788_v55, %v633_v60 }
 0x2bd   : > { %645 = vst.msk [vmem:[%s343_s18 + $0x8] sm:$0xf] %vm358_vm1, %v643_v61  ;;  %v647_v63 = vsel %vm358_vm1, %v643_v61, 0.0  ;;  %v658_v0 = vmul.f32 %v643_v61, %v643_v61 }
 0x2be   : > { %644 = vst.msk [vmem:[%s343_s18] sm:$0xff] %vm354_vm0, %v642_v62  ;;  %v646_v1 = vsel %vm354_vm0, %v642_v62, 0.0  ;;  %v657_v2 = vmul.f32 %v642_v62, %v642_v62 }
 0x2bf   : > { %v648_v3 = vadd.f32 %v647_v63, %v646_v1  ;;  %v660_v4 = vsel %vm358_vm1, %v658_v0, 0.0 }
 0x2c0   : > { %v659_v5 = vsel %vm354_vm0, %v657_v2, 0.0 }
 0x2c1   : > { %v649_v6 = vrot.slane %v648_v3, 4  ;;  %v661_v7 = vadd.f32 %v660_v4, %v659_v5 }
 0x2c3   : > { %v650_v8 = vadd.f32 %v649_v6, %v648_v3  ;;  %v662_v9 = vrot.slane %v661_v7, 4 }
 0x2c5   : > { %v651_v10 = vrot.slane %v650_v8, 2  ;;  %v663_v11 = vadd.f32 %v662_v9, %v661_v7 }
 0x2c7   : > { %v652_v12 = vadd.f32 %v651_v10, %v650_v8  ;;  %v664_v13 = vrot.slane %v663_v11, 2 }
 0x2c9   : > { %v653_v14 = vrot.slane %v652_v12, 1  ;;  %v665_v15 = vadd.f32 %v664_v13, %v663_v11 }
 0x2cb   : > { %v654_v16 = vadd.f32 %v653_v14, %v652_v12  ;;  %v666_v17 = vrot.slane %v665_v15, 1 }
 0x2cd   : > { %656 = vst.msk [vmem:[%s346_s20] sm:$0x1] %vm655_vm9, %v654_v16  ;;  %v667_v18 = vadd.f32 %v666_v17, %v665_v15 }
 0x2cf   : > { %668 = vst.msk [vmem:[%s349_s23] sm:$0x1] %vm655_vm9, %v667_v18 }
 0x2d0 PF: > { %s20_s30 = sadd.s32 1, %s838_s30  }
 0x2d1   : > { %p17_p4 = scmp.ge.s32.totalorder %s20_s30, 4  }
 0x2d3   :  { %19 = sbr.rel (!%p17_p4) target bundleno = 1 (0x1), region = 102 }

// kernel: e2e_forward.21
= control target key start
LH: loop header
LB: loop body
LE: loop exit
PB: predicated region body
PF: predicated region fallthrough
CT: control target
= control target key end

     0   :  { %s2177_s0 = inlined_call_operand.vmem [shape: s32[2], index: 0, kind: input, shape index: {}]   ;;  %s2178_s1 = inlined_call_operand.vmem [shape: f32[2,12,32], index: 1, kind: input, shape index: {}]   ;;  %s2179_s2 = inlined_call_operand.vmem [shape: f32[1,32], index: 2, kind: input, shape index: {}]   ;;  %s2180_s3 = inlined_call_operand.vmem [shape: f32[1,32], index: 3, kind: input, shape index: {}]   ;;  %s2181_s4 = inlined_call_operand.vmem [shape: f32[32,96], index: 4, kind: input, shape index: {}]   ;;  %s2182_s5 = inlined_call_operand.vmem [shape: f32[1,96], index: 5, kind: input, shape index: {}]   ;;  %s2183_s6 = inlined_call_operand.vmem [shape: f32[32,32], index: 6, kind: input, shape index: {}]   ;;  %s2184_s7 = inlined_call_operand.vmem [shape: f32[1,32], index: 7, kind: input, shape index: {}]   ;;  %s2185_s8 = inlined_call_operand.vmem [shape: f32[2,12,32], index: 8, kind: output, shape index: {}]  }
   0x1   :  { %s13_s29 = sshll.u32 %s2177_s0, 4  ;;  %s14_s29 = int_to_ptr.vmem [resolvable:$true] %s13_s29 }
   0x2   :  { %s1894_s30 = scalar_lea.vmem %s14_s29, 16  ;;  %p1899_p1 = scmp.lt.s32.totalorder %s14_s29, %s14_s29 }
   0x3   :  { %p1895_p0 = scmp.ne.s32.totalorder %s14_s29, %s1894_s30  ;;  %p1900_p2 = scmp.lt.s32.totalorder %s1894_s30, %s1894_s30 }
   0x5   :  { %p1901_p3 = por %p1900_p2, %p1899_p1 }
   0x7   :  { %p1902_p4 = pnand %p1901_p3, %p1895_p0 }
   0x9   :  { %1905 = shalt.err (!%p1902_p4)  }
   0xa   :  { %s1916_s9 = smov [#allocation3]  }
   0xb   :  { %16 = dma.vmem_to_smem %s14_s29, 16, %s1916_s9, [#allocation2] }
   0xc   :  { %1910 = dma.done.wait [#allocation2], 16 }
   0xd   :  { %1911 = vsyncadd [#allocation2], 4294967280 }
   0xe   :  { %18 = sfence }
   0xf   :  { %s1976_s10 = smov 0  }
  0x10 LB: > { %s1982_s0 = sadd.s32 4294967295, %s1914_s10   ;;  %p1650_p5 = scmp.ge.s32.totalorder %s1914_s10, 1  ;;  %s1914_s10 = sphi %s1976_s10, %s24_s10  }
  0x11   : > { %p244_p6 = scmp.lt.s32.totalorder %s1914_s10, 3 }
  0x13   : > { %p245_p7 = pnand %p1650_p5, %p244_p6 }
  0x14   : > { %p276_p8 = scmp.lt.s32.totalorder (!%p245_p7), %s1982_s0, 1  ;;  %s1917_s30 = smov (!%p245_p7), 96  }
  0x15   : > { %248 = sbr.rel (%p245_p7) target bundleno = 2503 (0x9c7), region = 48  ;;  %s1918_s9 = smov (!%p245_p7), 120  }
  0x16   : > { %s1919_s13 = smov (!%p245_p7), 88   ;;  %s286_s14 = sld [smem:[#allocation3 + %s1982_s0]] (!%p245_p7) }
  0x17   : > { %s1922_s16 = smov (!%p245_p7), 80   ;;  %s1923_s17 = smov (!%p245_p7), 112  }
  0x18   : > { %s1924_s18 = smov (!%p245_p7), 72   ;;  %s1925_s19 = smov (!%p245_p7), 104  }
  0x19   : > { %s1926_s24 = smov (!%p245_p7), 48   ;;  %s1927_s25 = smov (!%p245_p7), 40  }
  0x1a   : > { %s1988_s11 = scalar_select %p276_p8, %s1982_s0, 1  ;;  %vm291_vm0 = vcmask 261120   ;;  %vm295_vm1 = vcmask 257024   ;;  %v339_v14 = vld [vmem:[%s2181_s4 + $0x18] sm:$0xff]  ;;  %v338_v15 = vld [vmem:[%s2181_s4 + $0x10] sm:$0xff]  ;;  %v337_v16 = vld [vmem:[%s2181_s4 + $0x8] sm:$0xff]  ;;  %v432_v45 = vlaneseq }
  0x1b   : > { %1751 = vmatprep.subr.mxu0 %v339_v14  ;;  %v336_v17 = vld [vmem:[%s2181_s4] sm:$0xff]  ;;  %vm442_vm2 = vcmask 64512   ;;  %vm532_vm4 = vcmask 93184   ;;  %vm528_vm5 = vcmask 97280   ;;  %s1920_s0 = smov 64   ;;  %vm563_vm6 = vcmask 1043456  }
  0x1c   : > { %s1699_s12 = sshll.u32 %s1988_s11, 4  ;;  %1752 = vmatpush3.msra.mxu0 %v339_v14  ;;  %v1655_v25 = vld [vmem:[%s2179_s2] ss:$0 sm:$0xff]  ;;  %v433_v46 = vand.u32 127, %v432_v45  ;;  %v434_v47 = vstv %s286_s14  ;;  %v430_v48 = vld [vmem:[%s2183_s6 + $0x10] sm:$0xff] }
  0x1d   : > { %s280_s15 = scalar_lea.vmem %s2178_s1, %s1699_s12  ;;  %1753 = vmatprep.subr.mxu0 %v338_v15  ;;  %v1656_v27 = vld [vmem:[%s2180_s3] ss:$0 sm:$0xff] }
  0x1e   : > { %v1996_v0 = vld [vmem:[%s280_s15] sm:$0xff]  ;;  %v1998_v1 = vld [vmem:[%s280_s15 + $0x8] sm:$0xf]  ;;  %1754 = vmatpush3.msra.mxu0 %v338_v15  ;;  %vm2056_vm3 = vcmp.lt.s32.totalorder %v433_v46, %v434_v47  ;;  %s1921_s15 = smov 56  }
  0x1f   : > { %v292_v2 = vsel %vm291_vm0, %v1996_v0, 0.0  ;;  %v296_v3 = vsel %vm295_vm1, %v1998_v1, 0.0  ;;  %1755 = vmatprep.subr.mxu0 %v337_v16  ;;  %v1657_v34 = vld [vmem:[%s2182_s5] ss:$0 sm:$0xff] }
  0x20   : > { %293 = vadd.xlane.f32.xlu0 %v292_v2  ;;  %1756 = vmatpush3.msra.mxu0 %v337_v16 }
  0x21   : > { %1757 = vmatprep.subr.mxu0 %v336_v17 }
  0x22   : > { %1758 = vmatpush3.msra.mxu0 %v336_v17 }
  0x24   : > { %297 = vadd.xlane.f32.xlu0 %v296_v3 }
  0xa9   : > { %v294_v4 = vpop.xlane.xlu0 %293 }
  0xaa   : > { %v300_v5 = vmul.f32 0.03125, %v294_v4 }
  0xac   : > { %v302_v6 = vsub.f32 %v1996_v0, %v300_v5 }
  0xad   : > { %v298_v7 = vpop.xlane.xlu0 %297 }
  0xae   : > { %v301_v8 = vmul.f32 0.03125, %v298_v7  ;;  %v304_v9 = vmul.f32 %v302_v6, %v302_v6 }
  0xb0   : > { %v303_v10 = vsub.f32 %v1998_v1, %v301_v8  ;;  %v306_v11 = vsel %vm291_vm0, %v304_v9, 0.0 }
  0xb1   : > { %307 = vadd.xlane.f32.xlu1 %v306_v11 }
  0xb2   : > { %v305_v12 = vmul.f32 %v303_v10, %v303_v10 }
  0xb4   : > { %v309_v13 = vsel %vm295_vm1, %v305_v12, 0.0 }
  0xb5   : > { %310 = vadd.xlane.f32.xlu1 %v309_v13 }
 0x13a   : > { %v308_v18 = vpop.xlane.xlu1 %307 }
 0x13b   : > { %v312_v19 = vmul.f32 0.03125, %v308_v18 }
 0x13d   : > { %v314_v20 = vadd.f32 1e-12, %v312_v19 }
 0x13e   : > { %v311_v21 = vpop.xlane.xlu1 %310 }
 0x13f   : > { %1858 = vrsqrt.f32 %v314_v20  ;;  %v313_v22 = vmul.f32 0.03125, %v311_v21 }
 0x141   : > { %v315_v23 = vadd.f32 1e-12, %v313_v22 }
 0x143   : > { %1860 = vrsqrt.f32 %v315_v23 }
 0x14c   : > { %v1859_v24 = vpop.eup %1858 }
 0x14d   : > { %v318_v26 = vmul.f32 %v1859_v24, %v302_v6 }
 0x14f   : > { %v326_v28 = vmul.f32 %v1655_v25, %v318_v26 }
 0x150   : > { %v1861_v29 = vpop.eup %1860 }
 0x151   : > { %v319_v30 = vmul.f32 %v1861_v29, %v303_v10  ;;  %v334_v31 = vadd.f32 %v1656_v27, %v326_v28 }
 0x153   : > { %v327_v32 = vmul.f32 %v1655_v25, %v319_v30  ;;  %1759 = vmatprep.mubr.msk.f32.mxu0 %vm291_vm0, %v334_v31 }
 0x155   : > { %v335_v33 = vadd.f32 %v1656_v27, %v327_v32 }
 0x157   : > { %1760 = vmatmul.mubr.msk.f32.vlgmr.msra.gmra.mxu0 %vm291_vm0, %v335_v33  ;;  %v429_v33 = vld [vmem:[%s2183_s6 + $0x8] sm:$0xff] }
 0x217   : > { %v1761_v35 = vpop.f32.mrf.mxu0 }
 0x218   : > { %v2031_v36 = vadd.f32 %v1761_v35, %v1657_v34 }
 0x219   : > { %v419_v37 = vpop.f32.mrf.mxu0 }
 0x21a   : > { %v2033_v38 = vadd.f32 %v1657_v34, %v419_v37  ;;  %440 = vrot.lane.b32.xlu0 %v2031_v36, %s1917_s30 }
 0x21c   : > { %438 = vrot.lane.b32.xlu1 %v2033_v38, %s1917_s30  ;;  %1766 = vmatprep.mubr.msk.f32.mxu1 %vm442_vm2, %v2033_v38 }
 0x21e   : > { %641 = vrot.lane.b32.xlu0 %v2033_v38, %s1918_s9 }
 0x220   : > { %647 = vrot.lane.b32.xlu1 %v2031_v36, %s1919_s13 }
 0x224   : > { %645 = vrot.lane.b32.xlu1 %v2033_v38, %s1919_s13 }
 0x228   : > { %643 = vrot.lane.b32.xlu1 %v2031_v36, %s1918_s9 }
 0x28c   : > { %v441_v39 = vpop.permute.xlu0 %440 }
 0x28d   : > { %1762 = vmatprep.subr.msk.mxu1 %vm442_vm2, %v441_v39 }
 0x28e   : > { %1763 = vmatpush3.xpose.msk.msra.mxu1 %vm442_vm2, %v441_v39  ;;  %v439_v40 = vpop.permute.xlu1 %438  ;;  %v428_v39 = vld [vmem:[%s2183_s6] sm:$0xff] }
 0x28f   : > { %1764 = vmatprep.subr.msk.mxu1 %vm442_vm2, %v439_v40 }
 0x290   : > { %v642_v42 = vpop.permute.xlu0 %641 }
 0x292   : > { %1765 = vmatpush3.xpose.msk.msra.mxu1 %vm442_vm2, %v439_v40  ;;  %v648_v41 = vpop.permute.xlu1 %647 }
 0x293   : > { %1776 = vmatprep.subr.msk.mxu1 %vm442_vm2, %v648_v41 }
 0x295   : > { %1767 = vmatmul.mubr.msk.f32.vlgmr.msra.gmra.mxu1 %vm442_vm2, %v2031_v36 }
 0x296   : > { %v646_v43 = vpop.permute.xlu1 %645  ;;  %1777 = vmatpush3.xpose.msk.msra.mxu1 %vm442_vm2, %v648_v41  ;;  %1780 = vmatprep.mubr.msk.f32.mxu1 %vm442_vm2, %v642_v42 }
 0x297   : > { %1778 = vmatprep.subr.msk.mxu1 %vm442_vm2, %v646_v43 }
 0x29a   : > { %1779 = vmatpush3.xpose.msk.msra.mxu1 %vm442_vm2, %v646_v43  ;;  %v644_v44 = vpop.permute.xlu1 %643 }
 0x29b   : > { %1795 = vmatprep.subr.mxu1 %v428_v39 }
 0x29d   : > { %1781 = vmatmul.mubr.msk.f32.vlgmr.msra.gmra.mxu1 %vm442_vm2, %v644_v44 }
 0x29e   : > { %1796 = vmatpush3.msra.mxu1 %v428_v39 }
 0x355   : > { %v1768_v49 = vpop.f32.mrf.mxu1 }
 0x356   : > { %v527_v50 = vsel %vm2056_vm3, %v1768_v49, -1e+30 }
 0x357   : > { %v517_v51 = vpop.f32.mrf.mxu1  ;;  %v533_v52 = vsel %vm532_vm4, %v527_v50, -inf }
 0x358   : > { %v526_v53 = vsel %vm2056_vm3, %v517_v51, -1e+30  ;;  %534 = vmax.xlane.f32.xlu1 %v533_v52 }
 0x359   : > { %v529_v54 = vsel %vm528_vm5, %v526_v53, -inf }
 0x35a   : > { %530 = vmax.xlane.f32.xlu0 %v529_v54 }
 0x35d   : > { %v1782_v55 = vpop.f32.mrf.mxu1 }
 0x35e   : > { %v733_v59 = vsel %vm2056_vm3, %v1782_v55, -1e+30 }
 0x35f   : > { %v723_v56 = vpop.f32.mrf.mxu1  ;;  %v737_v60 = vsel %vm532_vm4, %v733_v59, -inf }
 0x360   : > { %v732_v57 = vsel %vm2056_vm3, %v723_v56, -1e+30 }
 0x361   : > { %v734_v58 = vsel %vm528_vm5, %v732_v57, -inf }
 0x362   : > { %735 = vmax.xlane.f32.xlu0 %v734_v58 }
 0x366   : > { %738 = vmax.xlane.f32.xlu0 %v737_v60 }
 0x3e1   : > { %v535_v61 = vpop.xlane.xlu1 %534 }
 0x3e2   : > { %v537_v62 = vsub.f32 %v527_v50, %v535_v61 }
 0x3e3   : > { %v531_v63 = vpop.xlane.xlu0 %530 }
 0x3e4   : > { %v540_v2 = vmul.f32 1.442695, %v537_v62  ;;  %v536_v3 = vsub.f32 %v526_v53, %v531_v63 }
 0x3e6   : > { %1862 = vpow2.f32 %v540_v2  ;;  %v538_v4 = vmul.f32 1.442695, %v536_v3 }
 0x3e8   : > { %1864 = vpow2.f32 %v538_v4 }
 0x3eb   : > { %v736_v5 = vpop.xlane.xlu0 %735 }
 0x3ec   : > { %v740_v6 = vsub.f32 %v732_v57, %v736_v5 }
 0x3ee   : > { %v742_v7 = vmul.f32 1.442695, %v740_v6 }
 0x3ef   : > { %v739_v8 = vpop.xlane.xlu0 %738 }
 0x3f0   : > { %1866 = vpow2.f32 %v742_v7  ;;  %v741_v9 = vsub.f32 %v733_v59, %v739_v8 }
 0x3f2   : > { %v744_v10 = vmul.f32 1.442695, %v741_v9 }
 0x3f3   : > { %v1863_v11 = vpop.eup %1862 }
 0x3f4   : > { %1868 = vpow2.f32 %v744_v10  ;;  %v545_v12 = vsel %vm532_vm4, %v1863_v11, 0.0 }
 0x3f5   : > { %v1865_v13 = vpop.eup %1864  ;;  %546 = vadd.xlane.f32.xlu1 %v545_v12 }
 0x3f6   : > { %v542_v14 = vsel %vm528_vm5, %v1865_v13, 0.0 }
 0x3f7   : > { %543 = vadd.xlane.f32.xlu0 %v542_v14 }
 0x3fd   : > { %v1867_v15 = vpop.eup %1866 }
 0x3fe   : > { %v746_v16 = vsel %vm528_vm5, %v1867_v15, 0.0 }
 0x3ff   : > { %747 = vadd.xlane.f32.xlu0 %v746_v16 }
 0x401   : > { %v1869_v17 = vpop.eup %1868 }
 0x402   : > { %v749_v18 = vsel %vm532_vm4, %v1869_v17, 0.0 }
 0x403   : > { %750 = vadd.xlane.f32.xlu1 %v749_v18 }
 0x414   : > { %552 = vrot.lane.b32.xlu1 %v2033_v38, %s1920_s0 }
 0x415   : > { %554 = vrot.lane.b32.xlu0 %v2031_v36, %s1920_s0  ;;  %s285_s0 = scalar_lea.vmem %s2185_s8, %s1699_s12 }
 0x418   : > { %758 = vrot.lane.b32.xlu1 %v2031_v36, %s1921_s15 }
 0x419   : > { %1012 = vrot.lane.b32.xlu0 %v2031_v36, %s1922_s16 }
 0x41c   : > { %756 = vrot.lane.b32.xlu1 %v2033_v38, %s1921_s15 }
 0x41d   : > { %1006 = vrot.lane.b32.xlu0 %v2033_v38, %s1923_s17 }
 0x420   : > { %1010 = vrot.lane.b32.xlu1 %v2033_v38, %s1922_s16 }
 0x421   : > { %1298 = vrot.lane.b32.xlu0 %v2031_v36, %s1924_s18 }
 0x424   : > { %1008 = vrot.lane.b32.xlu1 %v2031_v36, %s1923_s17 }
 0x425   : > { %1292 = vrot.lane.b32.xlu0 %v2033_v38, %s1925_s19 }
 0x428   : > { %1296 = vrot.lane.b32.xlu1 %v2033_v38, %s1924_s18 }
 0x42c   : > { %1294 = vrot.lane.b32.xlu1 %v2031_v36, %s1925_s19 }
 0x47e   : > { %v547_v19 = vpop.xlane.xlu1 %546 }
 0x47f   : > { %1870 = vrcp.f32 %v547_v19 }
 0x480   : > { %v544_v20 = vpop.xlane.xlu0 %543 }
 0x481   : > { %1872 = vrcp.f32 %v544_v20 }
 0x488   : > { %v748_v21 = vpop.xlane.xlu0 %747 }
 0x489   : > { %1874 = vrcp.f32 %v748_v21 }
 0x48c   : > { %v751_v22 = vpop.xlane.xlu1 %750  ;;  %v555_v23 = vpop.permute.xlu0 %554 }
 0x48d   : > { %v1871_v24 = vpop.eup %1870  ;;  %1876 = vrcp.f32 %v751_v22  ;;  %1769 = vmatprep.subr.msk.mxu0 %vm563_vm6, %v555_v23 }
 0x48e   : > { %v1873_v25 = vpop.eup %1872  ;;  %1770 = vmatpush3.msk.msra.mxu0 %vm563_vm6, %v555_v23  ;;  %v551_v28 = vmul.f32 %v1871_v24, %v1863_v11 }
 0x48f   : > { %v550_v26 = vmul.f32 %v1873_v25, %v1865_v13 }
 0x490   : > { %v553_v27 = vpop.permute.xlu1 %552  ;;  %v1013_v37 = vpop.permute.xlu0 %1012 }
 0x491   : > { %1771 = vmatprep.subr.mxu0 %v553_v27  ;;  %1773 = vmatprep.mubr.msk.f32.mxu0 %vm528_vm5, %v550_v26 }
 0x492   : > { %1772 = vmatpush3.msra.mxu0 %v553_v27 }
 0x493   : > { %1774 = vmatmul.mubr.msk.f32.vlgmr.msra.gmra.mxu0 %vm528_vm5, %v551_v28 }
 0x494   : > { %v759_v29 = vpop.permute.xlu1 %758  ;;  %v1007_v42 = vpop.permute.xlu0 %1006 }
 0x495   : > { %1783 = vmatprep.subr.msk.mxu0 %vm563_vm6, %v759_v29 }
 0x496   : > { %v1875_v30 = vpop.eup %1874  ;;  %1784 = vmatpush3.msk.msra.mxu0 %vm563_vm6, %v759_v29 }
 0x497   : > { %v754_v31 = vmul.f32 %v1875_v30, %v1867_v15 }
 0x498   : > { %v757_v32 = vpop.permute.xlu1 %756  ;;  %v1299_v46 = vpop.permute.xlu0 %1298 }
 0x499   : > { %1785 = vmatprep.subr.mxu0 %v757_v32  ;;  %1787 = vmatprep.mubr.msk.f32.mxu0 %vm528_vm5, %v754_v31 }
 0x49a   : > { %v1877_v34 = vpop.eup %1876  ;;  %1786 = vmatpush3.msra.mxu0 %v757_v32 }
 0x49b   : > { %1790 = vmatprep.subr.mxu0 %v429_v33  ;;  %v755_v35 = vmul.f32 %v1877_v34, %v1869_v17 }
 0x49c   : > { %v1011_v44 = vpop.permute.xlu1 %1010  ;;  %v1293_v49 = vpop.permute.xlu0 %1292 }
 0x49d   : > { %1788 = vmatmul.mubr.msk.f32.vlgmr.msra.gmra.mxu0 %vm528_vm5, %v755_v35 }
 0x49e   : > { %1791 = vmatpush3.msra.mxu0 %v429_v33 }
 0x49f   : > { %1800 = vmatprep.subr.msk.mxu0 %vm442_vm2, %v1013_v37 }
 0x4a0   : > { %v1009_v47 = vpop.permute.xlu1 %1008 }
 0x4a4   : > { %v1297_v50 = vpop.permute.xlu1 %1296 }
 0x4a8   : > { %v1295_v51 = vpop.permute.xlu1 %1294 }
 0x553   : > { %v1775_v40 = vpop.f32.mrf.mxu0 }
 0x555   : > { %v632_v41 = vpop.f32.mrf.mxu0 }
 0x556   : > { %1797 = vmatprep.mubr.msk.f32.mxu1 %vm442_vm2, %v632_v41 }
 0x557   : > { %1798 = vmatmul.mubr.msk.f32.vlgmr.msra.gmra.mxu1 %vm442_vm2, %v1775_v40 }
 0x55d   : > { %v1789_v43 = vpop.f32.mrf.mxu0 }
 0x55f   : > { %v835_v45 = vpop.f32.mrf.mxu0 }
 0x560   : > { %1792 = vmatprep.mubr.msk.f32.mxu0 %vm442_vm2, %v835_v45  ;;  %v431_v45 = vld [vmem:[%s2183_s6 + $0x18] sm:$0xff] }
 0x561   : > { %1793 = vmatmul.mubr.msk.f32.vlgmr.msra.gmra.mxu0 %vm442_vm2, %v1789_v43 }
 0x562   : > { %1801 = vmatpush3.xpose.msk.msra.mxu0 %vm442_vm2, %v1013_v37  ;;  %1804 = vmatprep.mubr.msk.f32.mxu0 %vm442_vm2, %v1007_v42 }
 0x563   : > { %1802 = vmatprep.subr.msk.mxu0 %vm442_vm2, %v1011_v44 }
 0x566   : > { %1803 = vmatpush3.xpose.msk.msra.mxu0 %vm442_vm2, %v1011_v44 }
 0x567   : > { %1819 = vmatprep.subr.msk.mxu0 %vm442_vm2, %v1299_v46 }
 0x569   : > { %1805 = vmatmul.mubr.msk.f32.vlgmr.msra.gmra.mxu0 %vm442_vm2, %v1009_v47 }
 0x56a   : > { %1820 = vmatpush3.xpose.msk.msra.mxu0 %vm442_vm2, %v1299_v46  ;;  %1823 = vmatprep.mubr.msk.f32.mxu0 %vm442_vm2, %v1293_v49 }
 0x56b   : > { %1821 = vmatprep.subr.msk.mxu0 %vm442_vm2, %v1297_v50 }
 0x56e   : > { %1822 = vmatpush3.xpose.msk.msra.mxu0 %vm442_vm2, %v1297_v50 }
 0x571   : > { %1824 = vmatmul.mubr.msk.f32.vlgmr.msra.gmra.mxu0 %vm442_vm2, %v1295_v51 }
 0x617   : > { %v1799_v52 = vpop.f32.mrf.mxu1 }
 0x619   : > { %v997_v35 = vpop.f32.mrf.mxu1 }
 0x621   : > { %v1794_v53 = vpop.f32.mrf.mxu0 }
 0x622   : > { %v2118_v54 = vadd.f32 %v1799_v52, %v1794_v53 }
 0x623   : > { %v2120_v55 = vpop.f32.mrf.mxu0 }
 0x624   : > { %v998_v47 = vadd.f32 %v997_v35, %v2120_v55 }
 0x629   : > { %v1806_v56 = vpop.f32.mrf.mxu0 }
 0x62a   : > { %v1098_v57 = vsel %vm2056_vm3, %v1806_v56, -1e+30 }
 0x62b   : > { %v1088_v58 = vpop.f32.mrf.mxu0  ;;  %v1102_v59 = vsel %vm532_vm4, %v1098_v57, -inf }
 0x62c   : > { %v1097_v60 = vsel %vm2056_vm3, %v1088_v58, -1e+30  ;;  %1103 = vmax.xlane.f32.xlu1 %v1102_v59  ;;  %v1696_v58 = vld [vmem:[%s2184_s7] ss:$0 sm:$0xff] }
 0x62d   : > { %v1099_v61 = vsel %vm528_vm5, %v1097_v60, -inf }
 0x62e   : > { %1100 = vmax.xlane.f32.xlu0 %v1099_v61 }
 0x631   : > { %v1825_v62 = vpop.f32.mrf.mxu0 }
 0x632   : > { %v1384_v18 = vsel %vm2056_vm3, %v1825_v62, -1e+30 }
 0x633   : > { %v1374_v63 = vpop.f32.mrf.mxu0  ;;  %v1388_v19 = vsel %vm532_vm4, %v1384_v18, -inf }
 0x634   : > { %v1383_v2 = vsel %vm2056_vm3, %v1374_v63, -1e+30 }
 0x635   : > { %v1385_v3 = vsel %vm528_vm5, %v1383_v2, -inf }
 0x63d   : > { %1121 = vrot.lane.b32.xlu1 %v2033_v38, %s1926_s24 }
 0x661   : > { %1386 = vmax.xlane.f32.xlu1 %v1385_v3 }
 0x6b5   : > { %v1104_v4 = vpop.xlane.xlu1 %1103 }
 0x6b6   : > { %v1106_v5 = vsub.f32 %v1098_v57, %v1104_v4 }
 0x6b7   : > { %v1101_v6 = vpop.xlane.xlu0 %1100 }
 0x6b8   : > { %v1109_v7 = vmul.f32 1.442695, %v1106_v5  ;;  %v1105_v8 = vsub.f32 %v1097_v60, %v1101_v6 }
 0x6b9   : > { %v1122_v14 = vpop.permute.xlu1 %1121 }
 0x6ba   : > { %1878 = vpow2.f32 %v1109_v7  ;;  %v1107_v9 = vmul.f32 1.442695, %v1105_v8 }
 0x6bc   : > { %1880 = vpow2.f32 %v1107_v9 }
 0x6c7   : > { %v1879_v10 = vpop.eup %1878 }
 0x6c8   : > { %v1114_v11 = vsel %vm532_vm4, %v1879_v10, 0.0 }
 0x6c9   : > { %v1881_v12 = vpop.eup %1880  ;;  %1115 = vadd.xlane.f32.xlu0 %v1114_v11 }
 0x6ca   : > { %v1111_v13 = vsel %vm528_vm5, %v1881_v12, 0.0 }
 0x6cd   : > { %1112 = vadd.xlane.f32.xlu0 %v1111_v13 }
 0x6e3   : > { %1123 = vrot.lane.b32.xlu0 %v2031_v36, %s1926_s24 }
 0x6ea   : > { %v1387_v15 = vpop.xlane.xlu1 %1386 }
 0x6eb   : > { %v1391_v16 = vsub.f32 %v1383_v2, %v1387_v15 }
 0x6ed   : > { %v1393_v17 = vmul.f32 1.442695, %v1391_v16 }
 0x6ef   : > { %1882 = vpow2.f32 %v1393_v17 }
 0x6fc   : > { %v1883_v20 = vpop.eup %1882 }
 0x6fd   : > { %v1397_v21 = vsel %vm528_vm5, %v1883_v20, 0.0 }
 0x702   : > { %1389 = vmax.xlane.f32.xlu0 %v1388_v19 }
 0x706   : > { %1398 = vadd.xlane.f32.xlu0 %v1397_v21 }
 0x71c   : > { %1409 = vrot.lane.b32.xlu0 %v2031_v36, %s1927_s25 }
 0x752   : > { %v1116_v22 = vpop.xlane.xlu0 %1115 }
 0x753   : > { %1884 = vrcp.f32 %v1116_v22 }
 0x756   : > { %v1113_v23 = vpop.xlane.xlu0 %1112 }
 0x757   : > { %1886 = vrcp.f32 %v1113_v23 }
 0x75a   : > { %v1124_v24 = vpop.permute.xlu0 %1123 }
 0x75b   : > { %1807 = vmatprep.subr.msk.mxu1 %vm563_vm6, %v1124_v24 }
 0x75c   : > { %1808 = vmatpush3.msk.msra.mxu1 %vm563_vm6, %v1124_v24 }
 0x75d   : > { %1809 = vmatprep.subr.mxu1 %v1122_v14 }
 0x75e   : > { %1810 = vmatpush3.msra.mxu1 %v1122_v14 }
 0x75f   : > { %1814 = vmatprep.subr.mxu1 %v430_v48 }
 0x760   : > { %v1885_v25 = vpop.eup %1884 }
 0x761   : > { %v1120_v36 = vmul.f32 %v1885_v25, %v1879_v10 }
 0x764   : > { %v1887_v26 = vpop.eup %1886 }
 0x765   : > { %v1119_v27 = vmul.f32 %v1887_v26, %v1881_v12 }
 0x767   : > { %1811 = vmatprep.mubr.msk.f32.mxu1 %vm528_vm5, %v1119_v27 }
 0x768   : > { %1812 = vmatmul.mubr.msk.f32.vlgmr.msra.gmra.mxu1 %vm528_vm5, %v1120_v36 }
 0x769   : > { %1815 = vmatpush3.msra.mxu1 %v430_v48 }
 0x78b   : > { %v1390_v28 = vpop.xlane.xlu0 %1389 }
 0x78c   : > { %v1392_v29 = vsub.f32 %v1384_v18, %v1390_v28 }
 0x78e   : > { %v1395_v30 = vmul.f32 1.442695, %v1392_v29 }
 0x78f   : > { %v1399_v31 = vpop.xlane.xlu0 %1398 }
 0x790   : > { %1888 = vpow2.f32 %v1395_v30 }
 0x791   : > { %1890 = vrcp.f32 %v1399_v31 }
 0x793   : > { %v1410_v32 = vpop.permute.xlu0 %1409 }
 0x794   : > { %1826 = vmatprep.subr.msk.mxu1 %vm563_vm6, %v1410_v32 }
 0x79d   : > { %v1889_v33 = vpop.eup %1888 }
 0x79e   : > { %v1400_v34 = vsel %vm532_vm4, %v1889_v33, 0.0  ;;  %v1891_v37 = vpop.eup %1890 }
 0x79f   : > { %1401 = vadd.xlane.f32.xlu1 %v1400_v34  ;;  %v1405_v42 = vmul.f32 %v1891_v37, %v1883_v20 }
 0x7b0   : > { %1407 = vrot.lane.b32.xlu1 %v2033_v38, %s1927_s25 }
 0x828   : > { %v1813_v39 = vpop.f32.mrf.mxu1  ;;  %v1402_v40 = vpop.xlane.xlu1 %1401 }
 0x829   : > { %1892 = vrcp.f32 %v1402_v40 }
 0x82a   : > { %v1200_v41 = vpop.f32.mrf.mxu1 }
 0x82b   : > { %1816 = vmatprep.mubr.msk.f32.mxu1 %vm442_vm2, %v1200_v41 }
 0x82c   : > { %1817 = vmatmul.mubr.msk.f32.vlgmr.msra.gmra.mxu1 %vm442_vm2, %v1813_v39  ;;  %v1408_v43 = vpop.permute.xlu1 %1407 }
 0x82d   : > { %1827 = vmatpush3.msk.msra.mxu1 %vm563_vm6, %v1410_v32  ;;  %1830 = vmatprep.mubr.msk.f32.mxu1 %vm528_vm5, %v1405_v42 }
 0x82e   : > { %1828 = vmatprep.subr.mxu1 %v1408_v43 }
 0x82f   : > { %1829 = vmatpush3.msra.mxu1 %v1408_v43 }
 0x830   : > { %1833 = vmatprep.subr.mxu1 %v431_v45 }
 0x836   : > { %v1893_v38 = vpop.eup %1892 }
 0x837   : > { %v1406_v44 = vmul.f32 %v1893_v38, %v1889_v33 }
 0x839   : > { %1831 = vmatmul.mubr.msk.f32.vlgmr.msra.gmra.mxu1 %vm528_vm5, %v1406_v44 }
 0x83a   : > { %1834 = vmatpush3.msra.mxu1 %v431_v45 }
 0x8ec   : > { %v1818_v46 = vpop.f32.mrf.mxu1 }
 0x8ed   : > { %v1291_v49 = vadd.f32 %v1818_v46, %v2118_v54 }
 0x8ee   : > { %v1281_v50 = vpop.f32.mrf.mxu1 }
 0x8ef   : > { %v1290_v51 = vadd.f32 %v1281_v50, %v998_v47 }
 0x8f9   : > { %v1832_v52 = vpop.f32.mrf.mxu1 }
 0x8fb   : > { %v1486_v53 = vpop.f32.mrf.mxu1 }
 0x8fc   : > { %1835 = vmatprep.mubr.msk.f32.mxu1 %vm442_vm2, %v1486_v53 }
 0x8fd   : > { %1836 = vmatmul.mubr.msk.f32.vlgmr.msra.gmra.mxu1 %vm442_vm2, %v1832_v52 }
 0x9bd   : > { %v1837_v56 = vpop.f32.mrf.mxu1 }
 0x9be   : > { %v1577_v57 = vadd.f32 %v1837_v56, %v1291_v49 }
 0x9bf   : > { %v1567_v59 = vpop.f32.mrf.mxu1 }
 0x9c0   : > { %v1579_v60 = vadd.f32 %v1577_v57, %v1998_v1  ;;  %v1576_v55 = vadd.f32 %v1567_v59, %v1290_v51 }
 0x9c2   : > { %v1588_v54 = vadd.f32 %v1696_v58, %v1579_v60  ;;  %v1578_v61 = vadd.f32 %v1576_v55, %v1996_v0 }
 0x9c4   : > { %1590 = vst.msk [vmem:[%s285_s0 + $0x8] sm:$0xf] %vm295_vm1, %v1588_v54  ;;  %v1587_v62 = vadd.f32 %v1696_v58, %v1578_v61 }
 0x9c6   : > { %1589 = vst.msk [vmem:[%s285_s0] sm:$0xff] %vm291_vm0, %v1587_v62 }
 0x9c7 PF: > { %s24_s10 = sadd.s32 1, %s1914_s10  }
 0x9c8   : > { %p21_p9 = scmp.ge.s32.totalorder %s24_s10, 4  }
 0x9ca   :  { %23 = sbr.rel (!%p21_p9) target bundleno = 16 (0x10), region = 78 }

// kernel: e2e_forward.29
= control target key start
LH: loop header
LB: loop body
LE: loop exit
PB: predicated region body
PF: predicated region fallthrough
CT: control target
= control target key end

     0   :  { %vm43_vm0 = vcmask 261120   ;;  %v565_v21 = vmov 0.0   ;;  %vm566_vm1 = vmmov 0   ;;  %vm238_vm2 = vcmask 523264   ;;  %s768_s0 = inlined_call_operand.vmem [shape: f32[24,32], index: 0, kind: input, shape index: {}]   ;;  %s769_s3 = inlined_call_operand.vmem [shape: f32[32,64], index: 3, kind: input, shape index: {}]   ;;  %s770_s1 = inlined_call_operand.vmem [shape: f32[1,32], index: 1, kind: input, shape index: {}]   ;;  %s771_s2 = inlined_call_operand.vmem [shape: f32[1,32], index: 2, kind: input, shape index: {}]   ;;  %s772_s5 = inlined_call_operand.vmem [shape: f32[64,32], index: 5, kind: input, shape index: {}]   ;;  %s773_s4 = inlined_call_operand.vmem [shape: f32[1,64], index: 4, kind: input, shape index: {}]   ;;  %s774_s6 = inlined_call_operand.vmem [shape: f32[1,32], index: 6, kind: input, shape index: {}]   ;;  %s775_s7 = inlined_call_operand.vmem [shape: f32[1,32], index: 7, kind: input, shape index: {}]   ;;  %s776_s8 = inlined_call_operand.vmem [shape: f32[1,32], index: 8, kind: input, shape index: {}]   ;;  %s777_s9 = inlined_call_operand.vmem [shape: f32[1,32], index: 9, kind: input, shape index: {}]   ;;  %s778_s10 = inlined_call_operand.vmem [shape: f32[1,32], index: 10, kind: input, shape index: {}]   ;;  %s779_s11 = inlined_call_operand.vmem [shape: f32[24,32], index: 11, kind: output, shape index: {}]  }
   0x1   :  { %v630_v0 = vld [vmem:[%s768_s0] sm:$0xff]  ;;  %v635_v1 = vld [vmem:[%s768_s0 + $0x10] sm:$0xff]  ;;  %v640_v2 = vld [vmem:[%s768_s0 + $0x8] sm:$0xff]  ;;  %491 = vmatprep.subr.mxu0 %v565_v21  ;;  %499 = vmatprep.mubr.msk.f32.mxu0 %vm566_vm1, %v565_v21 }
   0x2   :  { %v44_v3 = vsel %vm43_vm0, %v630_v0, 0.0  ;;  %v50_v4 = vsel %vm43_vm0, %v635_v1, 0.0  ;;  %v47_v5 = vsel %vm43_vm0, %v640_v2, 0.0  ;;  %v105_v22 = vld [vmem:[%s769_s3 + $0x18] sm:$0xff]  ;;  %v104_v23 = vld [vmem:[%s769_s3 + $0x10] sm:$0xff]  ;;  %508 = vmatprep.subr.mxu1 %v565_v21  ;;  %v103_v24 = vld [vmem:[%s769_s3 + $0x8] sm:$0xff]  ;;  %524 = vmatprep.mubr.msk.f32.mxu1 %vm566_vm1, %v565_v21 }
   0x3   :  { %45 = vadd.xlane.f32.xlu0 %v44_v3  ;;  %51 = vadd.xlane.f32.xlu1 %v50_v4  ;;  %v102_v25 = vld [vmem:[%s769_s3] sm:$0xff]  ;;  %v230_v49 = vld [vmem:[%s772_s5 + $0x38] sm:$0xff]  ;;  %v229_v50 = vld [vmem:[%s772_s5 + $0x30] sm:$0xff] }
   0x4   :  { %492 = vmatpush3.msra.mxu0 %v105_v22  ;;  %v459_v36 = vld [vmem:[%s770_s1] ss:$0 sm:$0xff]  ;;  %509 = vmatpush3.msra.mxu1 %v230_v49  ;;  %v228_v51 = vld [vmem:[%s772_s5 + $0x28] sm:$0xff]  ;;  %v226_v53 = vld [vmem:[%s772_s5 + $0x18] sm:$0xff] }
   0x5   :  { %493 = vmatprep.subr.mxu0 %v565_v21  ;;  %v460_v38 = vld [vmem:[%s771_s2] ss:$0 sm:$0xff]  ;;  %510 = vmatprep.subr.mxu1 %v565_v21  ;;  %v225_v54 = vld [vmem:[%s772_s5 + $0x10] sm:$0xff]  ;;  %v224_v55 = vld [vmem:[%s772_s5 + $0x8] sm:$0xff] }
   0x6   :  { %494 = vmatpush3.msra.mxu0 %v104_v23  ;;  %511 = vmatpush3.msra.mxu1 %v229_v50  ;;  %v227_v52 = vld [vmem:[%s772_s5 + $0x20] sm:$0xff] }
   0x7   :  { %48 = vadd.xlane.f32.xlu0 %v47_v5  ;;  %495 = vmatprep.subr.mxu0 %v565_v21  ;;  %v223_v56 = vld [vmem:[%s772_s5] sm:$0xff] }
   0x8   :  { %496 = vmatpush3.msra.mxu0 %v103_v24  ;;  %512 = vmatprep.subr.mxu1 %v565_v21  ;;  %v461_v57 = vld [vmem:[%s773_s4] ss:$0 sm:$0xff] }
   0x9   :  { %497 = vmatprep.subr.mxu0 %v565_v21  ;;  %513 = vmatpush3.msra.mxu1 %v228_v51 }
   0xa   :  { %498 = vmatpush3.msra.mxu0 %v102_v25  ;;  %514 = vmatprep.subr.mxu1 %v565_v21  ;;  %v465_v25 = vld [vmem:[%s774_s6] ss:$0 sm:$0xff] }
   0xb   :  { %515 = vmatpush3.msra.mxu1 %v227_v52 }
   0xc   :  { %516 = vmatprep.subr.mxu1 %v565_v21 }
   0xd   :  { %517 = vmatpush3.msra.mxu1 %v226_v53 }
   0xe   :  { %518 = vmatprep.subr.mxu1 %v565_v21 }
   0xf   :  { %519 = vmatpush3.msra.mxu1 %v225_v54 }
  0x10   :  { %520 = vmatprep.subr.mxu1 %v565_v21 }
  0x11   :  { %521 = vmatpush3.msra.mxu1 %v224_v55 }
  0x12   :  { %522 = vmatprep.subr.mxu1 %v565_v21 }
  0x13   :  { %523 = vmatpush3.msra.mxu1 %v223_v56 }
  0x8c   :  { %v46_v6 = vpop.xlane.xlu0 %45  ;;  %v52_v7 = vpop.xlane.xlu1 %51 }
  0x8d   :  { %v54_v8 = vmul.f32 0.03125, %v46_v6  ;;  %v56_v9 = vmul.f32 0.03125, %v52_v7 }
  0x8f   :  { %v57_v10 = vsub.f32 %v630_v0, %v54_v8  ;;  %v59_v11 = vsub.f32 %v635_v1, %v56_v9 }
  0x90   :  { %v49_v12 = vpop.xlane.xlu0 %48 }
  0x91   :  { %v55_v13 = vmul.f32 0.03125, %v49_v12  ;;  %v60_v14 = vmul.f32 %v57_v10, %v57_v10  ;;  %v62_v15 = vmul.f32 %v59_v11, %v59_v11 }
  0x93   :  { %v58_v16 = vsub.f32 %v640_v2, %v55_v13  ;;  %v63_v17 = vsel %vm43_vm0, %v60_v14, 0.0  ;;  %v69_v18 = vsel %vm43_vm0, %v62_v15, 0.0 }
  0x94   :  { %64 = vadd.xlane.f32.xlu1 %v63_v17 }
  0x95   :  { %v61_v19 = vmul.f32 %v58_v16, %v58_v16 }
  0x97   :  { %v66_v20 = vsel %vm43_vm0, %v61_v19, 0.0 }
  0x98   :  { %70 = vadd.xlane.f32.xlu1 %v69_v18  ;;  %67 = vadd.xlane.f32.xlu0 %v66_v20 }
 0x11d   :  { %v65_v26 = vpop.xlane.xlu1 %64 }
 0x11e   :  { %v72_v27 = vmul.f32 0.03125, %v65_v26 }
 0x120   :  { %v75_v28 = vadd.f32 1e-12, %v72_v27 }
 0x121   :  { %v71_v29 = vpop.xlane.xlu1 %70  ;;  %v68_v30 = vpop.xlane.xlu0 %67 }
 0x122   :  { %535 = vrsqrt.f32 %v75_v28  ;;  %v74_v31 = vmul.f32 0.03125, %v71_v29  ;;  %v73_v32 = vmul.f32 0.03125, %v68_v30 }
 0x124   :  { %v77_v33 = vadd.f32 1e-12, %v74_v31  ;;  %v76_v34 = vadd.f32 1e-12, %v73_v32 }
 0x126   :  { %537 = vrsqrt.f32 %v77_v33 }
 0x127   :  { %539 = vrsqrt.f32 %v76_v34 }
 0x12f   :  { %v536_v35 = vpop.eup %535 }
 0x130   :  { %v81_v37 = vmul.f32 %v536_v35, %v57_v10 }
 0x132   :  { %v90_v39 = vmul.f32 %v459_v36, %v81_v37 }
 0x133   :  { %v538_v40 = vpop.eup %537 }
 0x134   :  { %v540_v41 = vpop.eup %539  ;;  %v99_v42 = vadd.f32 %v460_v38, %v90_v39  ;;  %v83_v44 = vmul.f32 %v538_v40, %v59_v11 }
 0x135   :  { %v82_v43 = vmul.f32 %v540_v41, %v58_v16 }
 0x136   :  { %500 = vmatmul.mubr.msk.f32.vlgmr.msra.gmra.mxu0 %vm43_vm0, %v99_v42  ;;  %v92_v47 = vmul.f32 %v459_v36, %v83_v44 }
 0x137   :  { %502 = vmatprep.mubr.msk.f32.mxu0 %vm566_vm1, %v565_v21  ;;  %v91_v45 = vmul.f32 %v459_v36, %v82_v43 }
 0x138   :  { %v101_v48 = vadd.f32 %v460_v38, %v92_v47 }
 0x139   :  { %v100_v46 = vadd.f32 %v460_v38, %v91_v45 }
 0x13b   :  { %503 = vmatmul.mubr.msk.f32.gmra.mxu0 %vm43_vm0, %v100_v46 }
 0x13c   :  { %505 = vmatprep.mubr.msk.f32.mxu0 %vm566_vm1, %v565_v21 }
 0x13f   :  { %506 = vmatmul.mubr.msk.f32.gmra.mxu0 %vm43_vm0, %v101_v48 }
 0x1f6   :  { %v188_v58 = vpop.f32.mrf.mxu0 }
 0x1f7   :  { %v189_v59 = vadd.f32 %v461_v57, %v188_v58 }
 0x1f8   :  { %v501_v60 = vpop.f32.mrf.mxu0 }
 0x1f9   :  { %v202_v61 = vsub.f32 0.0, %v189_v59 }
 0x1fb   :  { %v205_v62 = vmul.f32 1.442695, %v202_v61  ;;  %v193_v63 = vpop.f32.mrf.mxu0 }
 0x1fc   :  { %v194_v3 = vadd.f32 %v461_v57, %v193_v63 }
 0x1fd   :  { %541 = vpow2.f32 %v205_v62  ;;  %v504_v4 = vpop.f32.mrf.mxu0 }
 0x1fe   :  { %v203_v5 = vsub.f32 0.0, %v194_v3  ;;  %v469_v4 = vld [vmem:[%s775_s7] ss:$0 sm:$0xff] }
 0x1ff   :  { %v198_v6 = vpop.f32.mrf.mxu0 }
 0x200   :  { %v207_v7 = vmul.f32 1.442695, %v203_v5  ;;  %v199_v8 = vadd.f32 %v461_v57, %v198_v6  ;;  %v470_v6 = vld [vmem:[%s776_s8] ss:$0 sm:$0xff] }
 0x201   :  { %v507_v9 = vpop.f32.mrf.mxu0 }
 0x202   :  { %543 = vpow2.f32 %v207_v7  ;;  %v204_v10 = vsub.f32 0.0, %v199_v8 }
 0x204   :  { %v209_v11 = vmul.f32 1.442695, %v204_v10 }
 0x206   :  { %545 = vpow2.f32 %v209_v11 }
 0x20a   :  { %v542_v12 = vpop.eup %541 }
 0x20b   :  { %v211_v13 = vadd.f32 1.0, %v542_v12 }
 0x20d   :  { %547 = vrcp.f32 %v211_v13 }
 0x20f   :  { %v544_v14 = vpop.eup %543 }
 0x210   :  { %v212_v15 = vadd.f32 1.0, %v544_v14 }
 0x212   :  { %549 = vrcp.f32 %v212_v15 }
 0x213   :  { %v546_v16 = vpop.eup %545 }
 0x214   :  { %v213_v17 = vadd.f32 1.0, %v546_v16 }
 0x216   :  { %551 = vrcp.f32 %v213_v17 }
 0x21a   :  { %v548_v18 = vpop.eup %547 }
 0x21b   :  { %v220_v19 = vmul.f32 %v548_v18, %v189_v59 }
 0x21d   :  { %525 = vmatmul.mubr.msk.f32.vlgmr.msra.gmra.mxu1 %vm238_vm2, %v220_v19 }
 0x21e   :  { %527 = vmatprep.mubr.msk.f32.mxu1 %vm566_vm1, %v565_v21 }
 0x21f   :  { %v550_v20 = vpop.eup %549 }
 0x220   :  { %v221_v22 = vmul.f32 %v550_v20, %v194_v3 }
 0x222   :  { %528 = vmatmul.mubr.msk.f32.gmra.mxu1 %vm238_vm2, %v221_v22 }
 0x223   :  { %v552_v23 = vpop.eup %551  ;;  %530 = vmatprep.mubr.msk.f32.mxu1 %vm566_vm1, %v565_v21 }
 0x224   :  { %v222_v24 = vmul.f32 %v552_v23, %v199_v8 }
 0x226   :  { %531 = vmatmul.mubr.msk.f32.gmra.mxu1 %vm238_vm2, %v222_v24 }
 0x2dd   :  { %v314_v26 = vpop.f32.mrf.mxu1 }
 0x2de   :  { %v315_v27 = vadd.f32 %v465_v25, %v314_v26 }
 0x2df   :  { %v526_v28 = vpop.f32.mrf.mxu1 }
 0x2e0   :  { %v328_v29 = vmul.f32 0.5, %v315_v27 }
 0x2e2   :  { %v319_v30 = vpop.f32.mrf.mxu1  ;;  %v331_v31 = vadd.f32 %v328_v29, %v630_v0 }
 0x2e3   :  { %v320_v32 = vadd.f32 %v465_v25, %v319_v30 }
 0x2e4   :  { %v529_v33 = vpop.f32.mrf.mxu1  ;;  %v336_v34 = vsel %vm43_vm0, %v331_v31, 0.0 }
 0x2e5   :  { %v329_v35 = vmul.f32 0.5, %v320_v32  ;;  %337 = vadd.xlane.f32.xlu0 %v336_v34 }
 0x2e6   :  { %v324_v21 = vpop.f32.mrf.mxu1 }
 0x2e7   :  { %v325_v36 = vadd.f32 %v465_v25, %v324_v21  ;;  %v332_v37 = vadd.f32 %v329_v35, %v640_v2 }
 0x2e8   :  { %v532_v38 = vpop.f32.mrf.mxu1 }
 0x2e9   :  { %v330_v39 = vmul.f32 0.5, %v325_v36  ;;  %v339_v40 = vsel %vm43_vm0, %v332_v37, 0.0 }
 0x2ea   :  { %340 = vadd.xlane.f32.xlu1 %v339_v40 }
 0x2eb   :  { %v333_v41 = vadd.f32 %v330_v39, %v635_v1 }
 0x2ed   :  { %v342_v42 = vsel %vm43_vm0, %v333_v41, 0.0 }
 0x2ee   :  { %343 = vadd.xlane.f32.xlu0 %v342_v42 }
 0x36e   :  { %v338_v0 = vpop.xlane.xlu0 %337 }
 0x36f   :  { %v345_v43 = vmul.f32 0.03125, %v338_v0 }
 0x371   :  { %v348_v44 = vsub.f32 %v331_v31, %v345_v43 }
 0x373   :  { %v341_v45 = vpop.xlane.xlu1 %340  ;;  %v351_v46 = vmul.f32 %v348_v44, %v348_v44 }
 0x374   :  { %v346_v47 = vmul.f32 0.03125, %v341_v45 }
 0x375   :  { %v354_v48 = vsel %vm43_vm0, %v351_v46, 0.0  ;;  %v472_v46 = vld [vmem:[%s778_s10] ss:$0 sm:$0xff] }
 0x376   :  { %v349_v49 = vsub.f32 %v332_v37, %v346_v47  ;;  %355 = vadd.xlane.f32.xlu1 %v354_v48 }
 0x377   :  { %v344_v2 = vpop.xlane.xlu0 %343 }
 0x378   :  { %v347_v50 = vmul.f32 0.03125, %v344_v2  ;;  %v352_v51 = vmul.f32 %v349_v49, %v349_v49 }
 0x37a   :  { %v350_v52 = vsub.f32 %v333_v41, %v347_v50  ;;  %v357_v53 = vsel %vm43_vm0, %v352_v51, 0.0 }
 0x37b   :  { %358 = vadd.xlane.f32.xlu0 %v357_v53 }
 0x37c   :  { %v353_v1 = vmul.f32 %v350_v52, %v350_v52 }
 0x37e   :  { %v360_v54 = vsel %vm43_vm0, %v353_v1, 0.0 }
 0x37f   :  { %361 = vadd.xlane.f32.xlu1 %v360_v54 }
 0x3ff   :  { %v356_v55 = vpop.xlane.xlu1 %355 }
 0x400   :  { %v363_v56 = vmul.f32 0.03125, %v356_v55 }
 0x402   :  { %v366_v57 = vadd.f32 1e-12, %v363_v56 }
 0x404   :  { %553 = vrsqrt.f32 %v366_v57  ;;  %v359_v58 = vpop.xlane.xlu0 %358 }
 0x405   :  { %v364_v59 = vmul.f32 0.03125, %v359_v58 }
 0x407   :  { %v367_v60 = vadd.f32 1e-12, %v364_v59 }
 0x408   :  { %v362_v61 = vpop.xlane.xlu1 %361 }
 0x409   :  { %555 = vrsqrt.f32 %v367_v60  ;;  %v365_v62 = vmul.f32 0.03125, %v362_v61 }
 0x40b   :  { %v368_v63 = vadd.f32 1e-12, %v365_v62 }
 0x40d   :  { %557 = vrsqrt.f32 %v368_v63 }
 0x411   :  { %v554_v3 = vpop.eup %553 }
 0x412   :  { %v372_v5 = vmul.f32 %v554_v3, %v348_v44  ;;  %v471_v44 = vld [vmem:[%s777_s9] ss:$0 sm:$0xff] }
 0x414   :  { %v381_v7 = vmul.f32 %v469_v4, %v372_v5 }
 0x416   :  { %v556_v8 = vpop.eup %555  ;;  %v390_v9 = vadd.f32 %v470_v6, %v381_v7 }
 0x417   :  { %v373_v10 = vmul.f32 %v556_v8, %v349_v49 }
 0x418   :  { %v395_v11 = vsel %vm43_vm0, %v390_v9, 0.0 }
 0x419   :  { %396 = vadd.xlane.f32.xlu0 %v395_v11  ;;  %v382_v12 = vmul.f32 %v469_v4, %v373_v10 }
 0x41a   :  { %v558_v13 = vpop.eup %557 }
 0x41b   :  { %v391_v14 = vadd.f32 %v470_v6, %v382_v12  ;;  %v374_v15 = vmul.f32 %v558_v13, %v350_v52 }
 0x41d   :  { %v398_v16 = vsel %vm43_vm0, %v391_v14, 0.0  ;;  %v383_v17 = vmul.f32 %v469_v4, %v374_v15 }
 0x41e   :  { %399 = vadd.xlane.f32.xlu1 %v398_v16 }
 0x41f   :  { %v392_v18 = vadd.f32 %v470_v6, %v383_v17 }
 0x421   :  { %v401_v19 = vsel %vm43_vm0, %v392_v18, 0.0 }
 0x422   :  { %402 = vadd.xlane.f32.xlu0 %v401_v19 }
 0x4a2   :  { %v397_v20 = vpop.xlane.xlu0 %396 }
 0x4a3   :  { %v404_v22 = vmul.f32 0.03125, %v397_v20 }
 0x4a5   :  { %v407_v23 = vsub.f32 %v390_v9, %v404_v22 }
 0x4a7   :  { %v400_v24 = vpop.xlane.xlu1 %399  ;;  %v410_v25 = vmul.f32 %v407_v23, %v407_v23 }
 0x4a8   :  { %v405_v26 = vmul.f32 0.03125, %v400_v24 }
 0x4a9   :  { %v413_v27 = vsel %vm43_vm0, %v410_v25, 0.0 }
 0x4aa   :  { %v408_v28 = vsub.f32 %v391_v14, %v405_v26  ;;  %414 = vadd.xlane.f32.xlu1 %v413_v27 }
 0x4ab   :  { %v403_v29 = vpop.xlane.xlu0 %402 }
 0x4ac   :  { %v406_v30 = vmul.f32 0.03125, %v403_v29  ;;  %v411_v31 = vmul.f32 %v408_v28, %v408_v28 }
 0x4ae   :  { %v409_v32 = vsub.f32 %v392_v18, %v406_v30  ;;  %v416_v33 = vsel %vm43_vm0, %v411_v31, 0.0 }
 0x4af   :  { %417 = vadd.xlane.f32.xlu0 %v416_v33 }
 0x4b0   :  { %v412_v34 = vmul.f32 %v409_v32, %v409_v32 }
 0x4b2   :  { %v419_v35 = vsel %vm43_vm0, %v412_v34, 0.0 }
 0x4b3   :  { %420 = vadd.xlane.f32.xlu1 %v419_v35 }
 0x533   :  { %v415_v21 = vpop.xlane.xlu1 %414 }
 0x534   :  { %v422_v36 = vmul.f32 0.03125, %v415_v21 }
 0x536   :  { %v425_v37 = vadd.f32 1e-12, %v422_v36 }
 0x538   :  { %559 = vrsqrt.f32 %v425_v37  ;;  %v418_v38 = vpop.xlane.xlu0 %417 }
 0x539   :  { %v423_v39 = vmul.f32 0.03125, %v418_v38 }
 0x53b   :  { %v426_v40 = vadd.f32 1e-12, %v423_v39 }
 0x53c   :  { %v421_v41 = vpop.xlane.xlu1 %420 }
 0x53d   :  { %561 = vrsqrt.f32 %v426_v40  ;;  %v424_v42 = vmul.f32 0.03125, %v421_v41 }
 0x53f   :  { %v427_v0 = vadd.f32 1e-12, %v424_v42 }
 0x541   :  { %563 = vrsqrt.f32 %v427_v0 }
 0x545   :  { %v560_v43 = vpop.eup %559 }
 0x546   :  { %v431_v45 = vmul.f32 %v560_v43, %v407_v23 }
 0x548   :  { %v440_v47 = vmul.f32 %v471_v44, %v431_v45 }
 0x54a   :  { %v562_v48 = vpop.eup %561  ;;  %v449_v49 = vadd.f32 %v472_v46, %v440_v47 }
 0x54b   :  { %v432_v2 = vmul.f32 %v562_v48, %v408_v28 }
 0x54c   :  { %452 = vst.msk [vmem:[%s779_s11] sm:$0xff] %vm43_vm0, %v449_v49 }
 0x54d   :  { %v441_v50 = vmul.f32 %v471_v44, %v432_v2 }
 0x54e   :  { %v564_v51 = vpop.eup %563 }
 0x54f   :  { %v450_v52 = vadd.f32 %v472_v46, %v441_v50  ;;  %v433_v53 = vmul.f32 %v564_v51, %v409_v32 }
 0x551   :  { %453 = vst.msk [vmem:[%s779_s11 + $0x8] sm:$0xff] %vm43_vm0, %v450_v52  ;;  %v442_v1 = vmul.f32 %v471_v44, %v433_v53 }
 0x553   :  { %v451_v54 = vadd.f32 %v472_v46, %v442_v1 }
 0x555   :  { %454 = vst.msk [vmem:[%s779_s11 + $0x10] sm:$0xff] %vm43_vm0, %v451_v54 }

// kernel: e2e_forward.30
= control target key start
LH: loop header
LB: loop body
LE: loop exit
PB: predicated region body
PF: predicated region fallthrough
CT: control target
= control target key end

     0   :  { %v211_v0 = vmov 0.0   ;;  %vm28_vm0 = vcmask 261120   ;;  %vm212_vm1 = vmmov 0   ;;  %v118_v8 = vlaneseq  ;;  %s266_s1 = inlined_call_operand.vmem [shape: f32[32,128], index: 1, kind: input, shape index: {}]   ;;  %s267_s0 = inlined_call_operand.vmem [shape: f32[24,32], index: 0, kind: input, shape index: {}]   ;;  %s268_s2 = inlined_call_operand.vmem [shape: f32[1,128], index: 2, kind: input, shape index: {}]   ;;  %s269_s3 = inlined_call_operand.vmem [shape: f32[24,128], index: 3, kind: output, shape index: {}]  }
   0x1   :  { %172 = vmatprep.subr.mxu0 %v211_v0  ;;  %189 = vmatprep.subr.mxu1 %v211_v0  ;;  %v20_v1 = vld [vmem:[%s266_s1 + $0x18] sm:$0xff]  ;;  %v19_v2 = vld [vmem:[%s266_s1 + $0x10] sm:$0xff]  ;;  %v18_v3 = vld [vmem:[%s266_s1 + $0x8] sm:$0xff] }
   0x2   :  { %173 = vmatpush3.msra.mxu0 %v20_v1  ;;  %193 = vmatpush3.msra.mxu1 %v20_v1  ;;  %v17_v4 = vld [vmem:[%s266_s1] sm:$0xff]  ;;  %v15_v6 = vld [vmem:[%s267_s0 + $0x8] sm:$0xff]  ;;  %v16_v7 = vld [vmem:[%s267_s0 + $0x10] sm:$0xff]  ;;  %v119_v9 = vand.u32 127, %v118_v8 }
   0x3   :  { %174 = vmatprep.subr.mxu0 %v211_v0  ;;  %190 = vmatprep.subr.mxu1 %v211_v0  ;;  %v14_v5 = vld [vmem:[%s267_s0] sm:$0xff] }
   0x4   :  { %175 = vmatpush3.msra.mxu0 %v19_v2  ;;  %194 = vmatpush3.msra.mxu1 %v19_v2  ;;  %v161_v10 = vld [vmem:[%s268_s2] ss:$0 sm:$0xff]  ;;  %vm120_vm2 = vcmp.lt.s32.totalorder %v119_v9, 10 }
   0x5   :  { %176 = vmatprep.subr.mxu0 %v211_v0  ;;  %191 = vmatprep.subr.mxu1 %v211_v0 }
   0x6   :  { %177 = vmatpush3.msra.mxu0 %v18_v3  ;;  %195 = vmatpush3.msra.mxu1 %v18_v3 }
   0x7   :  { %178 = vmatprep.subr.mxu0 %v211_v0  ;;  %192 = vmatprep.subr.mxu1 %v211_v0 }
   0x8   :  { %179 = vmatpush3.msra.mxu0 %v17_v4  ;;  %196 = vmatpush3.msra.mxu1 %v17_v4 }
   0x9   :  { %180 = vmatprep.mubr.msk.f32.mxu0 %vm212_vm1, %v211_v0  ;;  %183 = vmatprep.mubr.msk.f32.mxu1 %vm212_vm1, %v211_v0 }
   0xa   :  { %181 = vmatmul.mubr.msk.f32.vlgmr.msra.gmra.mxu0 %vm28_vm0, %v14_v5  ;;  %184 = vmatmul.mubr.msk.f32.vlgmr.msra.gmra.mxu1 %vm28_vm0, %v15_v6 }
   0xb   :  { %186 = vmatprep.mubr.msk.f32.mxu1 %vm212_vm1, %v211_v0 }
   0xe   :  { %187 = vmatmul.mubr.msk.f32.gmra.mxu1 %vm28_vm0, %v16_v7 }
  0xca   :  { %v104_v11 = vpop.f32.mrf.mxu0  ;;  %v109_v12 = vpop.f32.mrf.mxu1 }
  0xcb   :  { %v105_v13 = vadd.f32 %v161_v10, %v104_v11  ;;  %v110_v16 = vadd.f32 %v161_v10, %v109_v12 }
  0xcc   :  { %v182_v14 = vpop.f32.mrf.mxu0  ;;  %v185_v15 = vpop.f32.mrf.mxu1 }
  0xcd   :  { %v121_v17 = vsel %vm120_vm2, %v105_v13, -1e+30  ;;  %v122_v22 = vsel %vm120_vm2, %v110_v16, -1e+30 }
  0xce   :  { %v114_v18 = vpop.f32.mrf.mxu1  ;;  %124 = vmax.xlane.f32.xlu0 %v121_v17 }
  0xcf   :  { %v115_v19 = vadd.f32 %v161_v10, %v114_v18 }
  0xd0   :  { %v188_v20 = vpop.f32.mrf.mxu1 }
  0xd1   :  { %v123_v21 = vsel %vm120_vm2, %v115_v19, -1e+30 }
  0xd2   :  { %128 = vmax.xlane.f32.xlu1 %v123_v21  ;;  %126 = vmax.xlane.f32.xlu0 %v122_v22 }
 0x157   :  { %v125_v23 = vpop.xlane.xlu0 %124 }
 0x158   :  { %v130_v24 = vsub.f32 %v121_v17, %v125_v23 }
 0x15a   :  { %v133_v25 = vmul.f32 1.442695, %v130_v24 }
 0x15b   :  { %v129_v26 = vpop.xlane.xlu1 %128  ;;  %v127_v27 = vpop.xlane.xlu0 %126 }
 0x15c   :  { %199 = vpow2.f32 %v133_v25  ;;  %v132_v28 = vsub.f32 %v123_v21, %v129_v26  ;;  %v131_v29 = vsub.f32 %v122_v22, %v127_v27 }
 0x15e   :  { %v137_v30 = vmul.f32 1.442695, %v132_v28  ;;  %v135_v31 = vmul.f32 1.442695, %v131_v29 }
 0x160   :  { %201 = vpow2.f32 %v137_v30 }
 0x161   :  { %203 = vpow2.f32 %v135_v31 }
 0x169   :  { %v200_v32 = vpop.eup %199 }
 0x16a   :  { %139 = vadd.xlane.f32.xlu1 %v200_v32 }
 0x16d   :  { %v202_v33 = vpop.eup %201 }
 0x16e   :  { %v204_v34 = vpop.eup %203  ;;  %143 = vadd.xlane.f32.xlu1 %v202_v33 }
 0x16f   :  { %141 = vadd.xlane.f32.xlu0 %v204_v34 }
 0x1f3   :  { %v140_v35 = vpop.xlane.xlu1 %139 }
 0x1f4   :  { %205 = vlog2.f32 %v140_v35 }
 0x1f7   :  { %v144_v36 = vpop.xlane.xlu1 %143 }
 0x1f8   :  { %207 = vlog2.f32 %v144_v36  ;;  %v142_v37 = vpop.xlane.xlu0 %141 }
 0x1f9   :  { %209 = vlog2.f32 %v142_v37 }
 0x201   :  { %v206_v38 = vpop.eup %205 }
 0x202   :  { %v146_v39 = vmul.f32 0.6931472, %v206_v38 }
 0x204   :  { %v151_v40 = vsub.f32 %v130_v24, %v146_v39 }
 0x205   :  { %v208_v41 = vpop.eup %207 }
 0x206   :  { %v210_v42 = vpop.eup %209  ;;  %154 = vst [vmem:[%s269_s3] sm:$0xff] %v151_v40  ;;  %v150_v43 = vmul.f32 0.6931472, %v208_v41 }
 0x207   :  { %v148_v44 = vmul.f32 0.6931472, %v210_v42 }
 0x208   :  { %v153_v45 = vsub.f32 %v132_v28, %v150_v43 }
 0x209   :  { %v152_v46 = vsub.f32 %v131_v29, %v148_v44 }
 0x20a   :  { %156 = vst [vmem:[%s269_s3 + $0x10] sm:$0xff] %v153_v45 }
 0x20b   :  { %155 = vst [vmem:[%s269_s3 + $0x8] sm:$0xff] %v152_v46 }

// kernel: e2e_forward.33
= control target key start
LH: loop header
LB: loop body
LE: loop exit
PB: predicated region body
PF: predicated region fallthrough
CT: control target
= control target key end

     0   :  { %vm30_vm0 = vcmask 261120   ;;  %vm34_vm1 = vcmask 257024   ;;  %vm184_vm2 = vcmask 523264   ;;  %s450_s0 = inlined_call_operand.vmem [shape: f32[12,32], index: 0, kind: input, shape index: {}]   ;;  %s451_s3 = inlined_call_operand.vmem [shape: f32[32,64], index: 3, kind: input, shape index: {}]   ;;  %s452_s5 = inlined_call_operand.vmem [shape: f32[64,32], index: 5, kind: input, shape index: {}]   ;;  %s453_s1 = inlined_call_operand.vmem [shape: f32[1,32], index: 1, kind: input, shape index: {}]   ;;  %s454_s2 = inlined_call_operand.vmem [shape: f32[1,32], index: 2, kind: input, shape index: {}]   ;;  %s455_s4 = inlined_call_operand.vmem [shape: f32[1,64], index: 4, kind: input, shape index: {}]   ;;  %s456_s6 = inlined_call_operand.vmem [shape: f32[1,32], index: 6, kind: input, shape index: {}]   ;;  %s457_s7 = inlined_call_operand.vmem [shape: f32[12,32], index: 7, kind: output, shape index: {}]  }
   0x1   :  { %v375_v0 = vld [vmem:[%s450_s0] sm:$0xff]  ;;  %v380_v1 = vld [vmem:[%s450_s0 + $0x8] sm:$0xf]  ;;  %v78_v14 = vld [vmem:[%s451_s3 + $0x18] sm:$0xff] }
   0x2   :  { %v31_v2 = vsel %vm30_vm0, %v375_v0, 0.0  ;;  %v35_v3 = vsel %vm34_vm1, %v380_v1, 0.0  ;;  %v77_v15 = vld [vmem:[%s451_s3 + $0x10] sm:$0xff]  ;;  %298 = vmatprep.subr.mxu0 %v78_v14  ;;  %v76_v16 = vld [vmem:[%s451_s3 + $0x8] sm:$0xff]  ;;  %v75_v17 = vld [vmem:[%s451_s3] sm:$0xff] }
   0x3   :  { %32 = vadd.xlane.f32.xlu0 %v31_v2  ;;  %299 = vmatpush3.msra.mxu0 %v78_v14  ;;  %v176_v18 = vld [vmem:[%s452_s5 + $0x38] sm:$0xff]  ;;  %v175_v19 = vld [vmem:[%s452_s5 + $0x30] sm:$0xff]  ;;  %v174_v20 = vld [vmem:[%s452_s5 + $0x28] sm:$0xff] }
   0x4   :  { %300 = vmatprep.subr.mxu0 %v77_v15  ;;  %309 = vmatprep.subr.mxu1 %v176_v18  ;;  %v173_v21 = vld [vmem:[%s452_s5 + $0x20] sm:$0xff]  ;;  %v172_v38 = vld [vmem:[%s452_s5 + $0x18] sm:$0xff]  ;;  %v171_v39 = vld [vmem:[%s452_s5 + $0x10] sm:$0xff] }
   0x5   :  { %301 = vmatpush3.msra.mxu0 %v77_v15  ;;  %310 = vmatpush3.msra.mxu1 %v176_v18  ;;  %v274_v29 = vld [vmem:[%s453_s1] ss:$0 sm:$0xff]  ;;  %v170_v40 = vld [vmem:[%s452_s5 + $0x8] sm:$0xff] }
   0x6   :  { %302 = vmatprep.subr.mxu0 %v76_v16  ;;  %311 = vmatprep.subr.mxu1 %v175_v19  ;;  %v275_v31 = vld [vmem:[%s454_s2] ss:$0 sm:$0xff] }
   0x7   :  { %36 = vadd.xlane.f32.xlu0 %v35_v3  ;;  %303 = vmatpush3.msra.mxu0 %v76_v16  ;;  %v169_v41 = vld [vmem:[%s452_s5] sm:$0xff] }
   0x8   :  { %304 = vmatprep.subr.mxu0 %v75_v17  ;;  %312 = vmatpush3.msra.mxu1 %v175_v19  ;;  %v276_v42 = vld [vmem:[%s455_s4] ss:$0 sm:$0xff] }
   0x9   :  { %305 = vmatpush3.msra.mxu0 %v75_v17  ;;  %313 = vmatprep.subr.mxu1 %v174_v20  ;;  %v279_v49 = vld [vmem:[%s456_s6] ss:$0 sm:$0xff] }
   0xa   :  { %314 = vmatpush3.msra.mxu1 %v174_v20 }
   0xb   :  { %315 = vmatprep.subr.mxu1 %v173_v21 }
   0xc   :  { %316 = vmatpush3.msra.mxu1 %v173_v21 }
   0xd   :  { %317 = vmatprep.subr.mxu1 %v172_v38 }
   0xe   :  { %318 = vmatpush3.msra.mxu1 %v172_v38 }
   0xf   :  { %319 = vmatprep.subr.mxu1 %v171_v39 }
  0x10   :  { %320 = vmatpush3.msra.mxu1 %v171_v39 }
  0x11   :  { %321 = vmatprep.subr.mxu1 %v170_v40 }
  0x12   :  { %322 = vmatpush3.msra.mxu1 %v170_v40 }
  0x13   :  { %323 = vmatprep.subr.mxu1 %v169_v41 }
  0x14   :  { %324 = vmatpush3.msra.mxu1 %v169_v41 }
  0x8c   :  { %v33_v4 = vpop.xlane.xlu0 %32 }
  0x8d   :  { %v39_v5 = vmul.f32 0.03125, %v33_v4 }
  0x8f   :  { %v41_v6 = vsub.f32 %v375_v0, %v39_v5 }
  0x90   :  { %v37_v7 = vpop.xlane.xlu0 %36 }
  0x91   :  { %v40_v8 = vmul.f32 0.03125, %v37_v7  ;;  %v43_v9 = vmul.f32 %v41_v6, %v41_v6 }
  0x93   :  { %v42_v10 = vsub.f32 %v380_v1, %v40_v8  ;;  %v45_v11 = vsel %vm30_vm0, %v43_v9, 0.0 }
  0x94   :  { %46 = vadd.xlane.f32.xlu1 %v45_v11 }
  0x95   :  { %v44_v12 = vmul.f32 %v42_v10, %v42_v10 }
  0x97   :  { %v48_v13 = vsel %vm34_vm1, %v44_v12, 0.0 }
  0x98   :  { %49 = vadd.xlane.f32.xlu1 %v48_v13 }
 0x11d   :  { %v47_v22 = vpop.xlane.xlu1 %46 }
 0x11e   :  { %v51_v23 = vmul.f32 0.03125, %v47_v22 }
 0x120   :  { %v53_v24 = vadd.f32 1e-12, %v51_v23 }
 0x121   :  { %v50_v25 = vpop.xlane.xlu1 %49 }
 0x122   :  { %328 = vrsqrt.f32 %v53_v24  ;;  %v52_v26 = vmul.f32 0.03125, %v50_v25 }
 0x124   :  { %v54_v27 = vadd.f32 1e-12, %v52_v26 }
 0x126   :  { %330 = vrsqrt.f32 %v54_v27 }
 0x12f   :  { %v329_v28 = vpop.eup %328 }
 0x130   :  { %v57_v30 = vmul.f32 %v329_v28, %v41_v6 }
 0x132   :  { %v65_v32 = vmul.f32 %v274_v29, %v57_v30 }
 0x133   :  { %v331_v33 = vpop.eup %330 }
 0x134   :  { %v58_v34 = vmul.f32 %v331_v33, %v42_v10  ;;  %v73_v35 = vadd.f32 %v275_v31, %v65_v32 }
 0x136   :  { %v66_v36 = vmul.f32 %v274_v29, %v58_v34  ;;  %306 = vmatprep.mubr.msk.f32.mxu0 %vm30_vm0, %v73_v35 }
 0x138   :  { %v74_v37 = vadd.f32 %v275_v31, %v66_v36 }
 0x13a   :  { %307 = vmatmul.mubr.msk.f32.vlgmr.msra.gmra.mxu0 %vm30_vm0, %v74_v37 }
 0x1fa   :  { %v308_v43 = vpop.f32.mrf.mxu0 }
 0x1fb   :  { %v164_v44 = vadd.f32 %v308_v43, %v276_v42 }
 0x1fc   :  { %v158_v45 = vpop.f32.mrf.mxu0 }
 0x1fd   :  { %v159_v46 = vadd.f32 %v276_v42, %v158_v45  ;;  %v168_v48 = vmax.f32 %v164_v44, 0.0 }
 0x1ff   :  { %v167_v47 = vmax.f32 %v159_v46, 0.0 }
 0x201   :  { %325 = vmatprep.mubr.msk.f32.mxu1 %vm184_vm2, %v167_v47 }
 0x202   :  { %326 = vmatmul.mubr.msk.f32.vlgmr.msra.gmra.mxu1 %vm184_vm2, %v168_v48 }
 0x2c2   :  { %v327_v50 = vpop.f32.mrf.mxu1 }
 0x2c3   :  { %v263_v51 = vadd.f32 %v327_v50, %v279_v49 }
 0x2c4   :  { %v257_v52 = vpop.f32.mrf.mxu1 }
 0x2c5   :  { %v267_v53 = vadd.f32 %v263_v51, %v380_v1  ;;  %v258_v54 = vadd.f32 %v279_v49, %v257_v52 }
 0x2c7   :  { %269 = vst.msk [vmem:[%s457_s7 + $0x8] sm:$0xf] %vm34_vm1, %v267_v53  ;;  %v266_v55 = vadd.f32 %v258_v54, %v375_v0 }
 0x2c9   :  { %268 = vst.msk [vmem:[%s457_s7] sm:$0xff] %vm30_vm0, %v266_v55 }

// kernel: e2e_forward.37
= control target key start
LH: loop header
LB: loop body
LE: loop exit
PB: predicated region body
PF: predicated region fallthrough
CT: control target
= control target key end

     0   :  { %vm24_vm0 = vcmask 261120   ;;  %vm28_vm1 = vcmask 257024   ;;  %v161_v34 = vlaneseq  ;;  %vm168_vm3 = vcmask 1043456   ;;  %s298_s0 = inlined_call_operand.vmem [shape: f32[12,32], index: 0, kind: input, shape index: {}]   ;;  %s299_s3 = inlined_call_operand.vmem [shape: f32[32,128], index: 3, kind: input, shape index: {}]   ;;  %s300_s1 = inlined_call_operand.vmem [shape: f32[1,32], index: 1, kind: input, shape index: {}]   ;;  %s301_s2 = inlined_call_operand.vmem [shape: f32[1,32], index: 2, kind: input, shape index: {}]   ;;  %s302_s4 = inlined_call_operand.vmem [shape: f32[1,128], index: 4, kind: input, shape index: {}]   ;;  %s303_s5 = inlined_call_operand.vmem [shape: f32[12,128], index: 5, kind: output, shape index: {}]  }
   0x1   :  { %v20_v0 = vld [vmem:[%s298_s0] sm:$0xff]  ;;  %v21_v1 = vld [vmem:[%s298_s0 + $0x8] sm:$0xf]  ;;  %v72_v14 = vld [vmem:[%s299_s3 + $0x18] sm:$0xff] }
   0x2   :  { %v25_v2 = vsel %vm24_vm0, %v20_v0, 0.0  ;;  %v29_v3 = vsel %vm28_vm1, %v21_v1, 0.0  ;;  %v71_v15 = vld [vmem:[%s299_s3 + $0x10] sm:$0xff]  ;;  %206 = vmatprep.subr.mxu0 %v72_v14  ;;  %v70_v16 = vld [vmem:[%s299_s3 + $0x8] sm:$0xff]  ;;  %v69_v17 = vld [vmem:[%s299_s3] sm:$0xff]  ;;  %v162_v35 = vand.u32 127, %v161_v34 }
   0x3   :  { %26 = vadd.xlane.f32.xlu0 %v25_v2  ;;  %207 = vmatpush3.msra.mxu0 %v72_v14  ;;  %v195_v25 = vld [vmem:[%s300_s1] ss:$0 sm:$0xff] }
   0x4   :  { %208 = vmatprep.subr.mxu0 %v71_v15  ;;  %v196_v27 = vld [vmem:[%s301_s2] ss:$0 sm:$0xff]  ;;  %vm163_vm2 = vcmp.lt.s32.totalorder %v162_v35, 10 }
   0x5   :  { %209 = vmatpush3.msra.mxu0 %v71_v15  ;;  %v197_v36 = vld [vmem:[%s302_s4] ss:$0 sm:$0xff] }
   0x6   :  { %210 = vmatprep.subr.mxu0 %v70_v16 }
   0x7   :  { %30 = vadd.xlane.f32.xlu0 %v29_v3  ;;  %211 = vmatpush3.msra.mxu0 %v70_v16 }
   0x8   :  { %212 = vmatprep.subr.mxu0 %v69_v17 }
   0x9   :  { %213 = vmatpush3.msra.mxu0 %v69_v17 }
  0x8c   :  { %v27_v4 = vpop.xlane.xlu0 %26 }
  0x8d   :  { %v33_v5 = vmul.f32 0.03125, %v27_v4 }
  0x8f   :  { %v35_v6 = vsub.f32 %v20_v0, %v33_v5 }
  0x90   :  { %v31_v7 = vpop.xlane.xlu0 %30 }
  0x91   :  { %v34_v8 = vmul.f32 0.03125, %v31_v7  ;;  %v37_v9 = vmul.f32 %v35_v6, %v35_v6 }
  0x93   :  { %v36_v10 = vsub.f32 %v21_v1, %v34_v8  ;;  %v39_v11 = vsel %vm24_vm0, %v37_v9, 0.0 }
  0x94   :  { %40 = vadd.xlane.f32.xlu1 %v39_v11 }
  0x95   :  { %v38_v12 = vmul.f32 %v36_v10, %v36_v10 }
  0x97   :  { %v42_v13 = vsel %vm28_vm1, %v38_v12, 0.0 }
  0x98   :  { %43 = vadd.xlane.f32.xlu1 %v42_v13 }
 0x11d   :  { %v41_v18 = vpop.xlane.xlu1 %40 }
 0x11e   :  { %v45_v19 = vmul.f32 0.03125, %v41_v18 }
 0x120   :  { %v47_v20 = vadd.f32 1e-12, %v45_v19 }
 0x121   :  { %v44_v21 = vpop.xlane.xlu1 %43 }
 0x122   :  { %217 = vrsqrt.f32 %v47_v20  ;;  %v46_v22 = vmul.f32 0.03125, %v44_v21 }
 0x124   :  { %v48_v23 = vadd.f32 1e-12, %v46_v22 }
 0x126   :  { %219 = vrsqrt.f32 %v48_v23 }
 0x12f   :  { %v218_v24 = vpop.eup %217 }
 0x130   :  { %v51_v26 = vmul.f32 %v218_v24, %v35_v6 }
 0x132   :  { %v59_v28 = vmul.f32 %v195_v25, %v51_v26 }
 0x133   :  { %v220_v29 = vpop.eup %219 }
 0x134   :  { %v52_v30 = vmul.f32 %v220_v29, %v36_v10  ;;  %v67_v31 = vadd.f32 %v196_v27, %v59_v28 }
 0x136   :  { %v60_v32 = vmul.f32 %v195_v25, %v52_v30  ;;  %214 = vmatprep.mubr.msk.f32.mxu0 %vm24_vm0, %v67_v31 }
 0x138   :  { %v68_v33 = vadd.f32 %v196_v27, %v60_v32 }
 0x13a   :  { %215 = vmatmul.mubr.msk.f32.vlgmr.msra.gmra.mxu0 %vm24_vm0, %v68_v33 }
 0x1fa   :  { %v216_v37 = vpop.f32.mrf.mxu0 }
 0x1fb   :  { %v158_v38 = vadd.f32 %v216_v37, %v197_v36 }
 0x1fc   :  { %v152_v39 = vpop.f32.mrf.mxu0 }
 0x1fd   :  { %v153_v40 = vadd.f32 %v197_v36, %v152_v39  ;;  %v165_v41 = vsel %vm163_vm2, %v158_v38, -1e+30 }
 0x1fe   :  { %v169_v42 = vsel %vm168_vm3, %v165_v41, -inf }
 0x1ff   :  { %170 = vmax.xlane.f32.xlu0 %v169_v42  ;;  %v164_v43 = vsel %vm163_vm2, %v153_v40, -1e+30 }
 0x200   :  { %166 = vmax.xlane.f32.xlu1 %v164_v43 }
 0x288   :  { %v171_v44 = vpop.xlane.xlu0 %170 }
 0x289   :  { %v173_v45 = vsub.f32 %v165_v41, %v171_v44  ;;  %v167_v46 = vpop.xlane.xlu1 %166 }
 0x28a   :  { %v172_v47 = vsub.f32 %v164_v43, %v167_v46 }
 0x28b   :  { %v176_v48 = vmul.f32 1.442695, %v173_v45 }
 0x28c   :  { %v174_v49 = vmul.f32 1.442695, %v172_v47 }
 0x28d   :  { %221 = vpow2.f32 %v176_v48 }
 0x28e   :  { %223 = vpow2.f32 %v174_v49 }
 0x29a   :  { %v222_v50 = vpop.eup %221 }
 0x29b   :  { %v224_v51 = vpop.eup %223  ;;  %v180_v52 = vsel %vm168_vm3, %v222_v50, 0.0 }
 0x29c   :  { %181 = vadd.xlane.f32.xlu1 %v180_v52  ;;  %178 = vadd.xlane.f32.xlu0 %v224_v51 }
 0x325   :  { %v179_v53 = vpop.xlane.xlu0 %178  ;;  %v182_v54 = vpop.xlane.xlu1 %181 }
 0x326   :  { %225 = vlog2.f32 %v179_v53 }
 0x327   :  { %227 = vlog2.f32 %v182_v54 }
 0x333   :  { %v226_v55 = vpop.eup %225 }
 0x334   :  { %v228_v56 = vpop.eup %227  ;;  %v184_v57 = vmul.f32 0.6931472, %v226_v55 }
 0x335   :  { %v186_v58 = vmul.f32 0.6931472, %v228_v56 }
 0x336   :  { %v187_v59 = vsub.f32 %v172_v47, %v184_v57 }
 0x337   :  { %v188_v60 = vsub.f32 %v173_v45, %v186_v58 }
 0x338   :  { %189 = vst [vmem:[%s303_s5] sm:$0xff] %v187_v59 }
 0x339   :  { %190 = vst [vmem:[%s303_s5 + $0x8] sm:$0xf] %v188_v60 }

// kernel: e2e_forward.31
= control target key start
LH: loop header
LB: loop body
LE: loop exit
PB: predicated region body
PF: predicated region fallthrough
CT: control target
= control target key end

     0   :  { %s1866_s0 = inlined_call_operand.vmem [shape: s32[2], index: 0, kind: input, shape index: {}]   ;;  %s1867_s1 = inlined_call_operand.vmem [shape: f32[2,6,32], index: 1, kind: input, shape index: {}]   ;;  %s1868_s2 = inlined_call_operand.vmem [shape: f32[1,32], index: 2, kind: input, shape index: {}]   ;;  %s1869_s3 = inlined_call_operand.vmem [shape: f32[1,32], index: 3, kind: input, shape index: {}]   ;;  %s1870_s4 = inlined_call_operand.vmem [shape: f32[32,96], index: 4, kind: input, shape index: {}]   ;;  %s1871_s5 = inlined_call_operand.vmem [shape: f32[1,96], index: 5, kind: input, shape index: {}]   ;;  %s1872_s6 = inlined_call_operand.vmem [shape: f32[32,32], index: 6, kind: input, shape index: {}]   ;;  %s1873_s7 = inlined_call_operand.vmem [shape: f32[1,32], index: 7, kind: input, shape index: {}]   ;;  %s1874_s8 = inlined_call_operand.vmem [shape: f32[2,6,32], index: 8, kind: output, shape index: {}]  }
   0x1   :  { %s13_s29 = sshll.u32 %s1866_s0, 4  ;;  %s14_s29 = int_to_ptr.vmem [resolvable:$true] %s13_s29 }
   0x2   :  { %s1613_s30 = scalar_lea.vmem %s14_s29, 16  ;;  %p1618_p1 = scmp.lt.s32.totalorder %s14_s29, %s14_s29 }
   0x3   :  { %p1614_p0 = scmp.ne.s32.totalorder %s14_s29, %s1613_s30  ;;  %p1619_p2 = scmp.lt.s32.totalorder %s1613_s30, %s1613_s30 }
   0x5   :  { %p1620_p3 = por %p1619_p2, %p1618_p1 }
   0x7   :  { %p1621_p4 = pnand %p1620_p3, %p1614_p0 }
   0x9   :  { %1624 = shalt.err (!%p1621_p4)  }
   0xa   :  { %s1635_s9 = smov [#allocation3]  }
   0xb   :  { %16 = dma.vmem_to_smem %s14_s29, 16, %s1635_s9, [#allocation2] }
   0xc   :  { %1629 = dma.done.wait [#allocation2], 16 }
   0xd   :  { %1630 = vsyncadd [#allocation2], 4294967280 }
   0xe   :  { %18 = sfence }
   0xf   :  { %s1697_s10 = smov 0  }
  0x10 LB: > { %s1703_s0 = sadd.s32 4294967295, %s1633_s10   ;;  %p1443_p5 = scmp.ge.s32.totalorder %s1633_s10, 1  ;;  %s1633_s10 = sphi %s1697_s10, %s24_s10  }
  0x11   : > { %p243_p6 = scmp.lt.s32.totalorder %s1633_s10, 3 }
  0x13   : > { %p244_p7 = pnand %p1443_p5, %p243_p6 }
  0x14   : > { %p273_p8 = scmp.lt.s32.totalorder (!%p244_p7), %s1703_s0, 1  ;;  %s1638_s30 = smov (!%p244_p7), 120  }
  0x15   : > { %247 = sbr.rel (%p244_p7) target bundleno = 2768 (0xad0), region = 48  ;;  %s1639_s9 = smov (!%p244_p7), 96  }
  0x16   : > { %s1640_s13 = smov (!%p244_p7), 88   ;;  %s281_s14 = sld [smem:[#allocation3 + %s1703_s0]] (!%p244_p7) }
  0x17   : > { %s1643_s16 = smov (!%p244_p7), 80   ;;  %s1644_s17 = smov (!%p244_p7), 112  }
  0x18   : > { %s1645_s22 = smov (!%p244_p7), 48   ;;  %s1646_s23 = smov (!%p244_p7), 104  }
  0x19   : > { %s1647_s24 = smov (!%p244_p7), 72   ;;  %s1648_s27 = smov (!%p244_p7), 40  }
  0x1a   : > { %s1709_s11 = scalar_select %p273_p8, %s1703_s0, 1  ;;  %vm285_vm0 = vcmask 259072   ;;  %v317_v7 = vld [vmem:[%s1870_s4 + $0x18] sm:$0xff]  ;;  %v1636_v8 = vmov 0.0   ;;  %v316_v9 = vld [vmem:[%s1870_s4 + $0x10] sm:$0xff]  ;;  %vm1637_vm1 = vmmov 0   ;;  %v403_v28 = vlaneseq }
  0x1b   : > { %1502 = vmatprep.subr.mxu0 %v1636_v8  ;;  %1510 = vmatprep.mubr.msk.f32.mxu0 %vm1637_vm1, %v1636_v8  ;;  %v315_v10 = vld [vmem:[%s1870_s4 + $0x8] sm:$0xff]  ;;  %v314_v11 = vld [vmem:[%s1870_s4] sm:$0xff]  ;;  %vm325_vm2 = vcmask 261120   ;;  %vm414_vm3 = vcmask 64512   ;;  %vm490_vm7 = vcmask 46080   ;;  %s1641_s0 = smov 56  }
  0x1c   : > { %s1444_s12 = sshll.u32 %s1709_s11, 3  ;;  %1503 = vmatpush3.msra.mxu0 %v317_v7  ;;  %1513 = vmatprep.subr.mxu1 %v1636_v8  ;;  %v1446_v16 = vld [vmem:[%s1868_s2] ss:$0 sm:$0xff]  ;;  %v404_v29 = vand.u32 127, %v403_v28  ;;  %v408_v30 = vshrl.u32 %v403_v28, 7  ;;  %v405_v31 = vstv %s281_s14  ;;  %vm508_vm8 = vcmask 1045504  }
  0x1d   : > { %s276_s15 = scalar_lea.vmem %s1867_s1, %s1444_s12  ;;  %1504 = vmatprep.subr.mxu0 %v1636_v8  ;;  %1515 = vmatprep.mubr.msk.f32.mxu1 %vm1637_vm1, %v1636_v8  ;;  %v1447_v18 = vld [vmem:[%s1869_s3] ss:$0 sm:$0xff]  ;;  %vm504_vm9 = vcmask 48128   ;;  %v400_v60 = vld [vmem:[%s1872_s6 + $0x8] sm:$0xff] }
  0x1e   : > { %v1717_v0 = vld [vmem:[%s276_s15] sm:$0x3f]  ;;  %1505 = vmatpush3.msra.mxu0 %v316_v9  ;;  %vm406_vm4 = vcmp.lt.s32.totalorder %v404_v29, %v405_v31  ;;  %vm409_vm5 = vcmp.ge.s32.totalorder %v408_v30, %v404_v29  ;;  %s1642_s15 = smov 64  }
  0x1f   : > { %v286_v1 = vsel %vm285_vm0, %v1717_v0, 0.0  ;;  %1506 = vmatprep.subr.mxu0 %v1636_v8  ;;  %v1448_v21 = vld [vmem:[%s1871_s5] ss:$0 sm:$0xff]  ;;  %vm1773_vm6 = vmand %vm406_vm4, %vm409_vm5 }
  0x20   : > { %287 = vadd.xlane.f32.xlu0 %v286_v1  ;;  %1507 = vmatpush3.msra.mxu0 %v315_v10  ;;  %v399_v59 = vld [vmem:[%s1872_s6] sm:$0xff] }
  0x21   : > { %1508 = vmatprep.subr.mxu0 %v1636_v8 }
  0x22   : > { %1509 = vmatpush3.msra.mxu0 %v314_v11 }
  0x23   : > { %1523 = vmatprep.subr.mxu0 %v1636_v8 }
  0xa9   : > { %v288_v2 = vpop.xlane.xlu0 %287 }
  0xaa   : > { %v290_v3 = vmul.f32 0.03125, %v288_v2 }
  0xac   : > { %v291_v4 = vsub.f32 %v1717_v0, %v290_v3 }
  0xae   : > { %v292_v5 = vmul.f32 %v291_v4, %v291_v4 }
  0xb0   : > { %v293_v6 = vsel %vm285_vm0, %v292_v5, 0.0 }
  0xb1   : > { %294 = vadd.xlane.f32.xlu0 %v293_v6 }
 0x13a   : > { %v295_v12 = vpop.xlane.xlu0 %294 }
 0x13b   : > { %v296_v13 = vmul.f32 0.03125, %v295_v12 }
 0x13d   : > { %v297_v14 = vadd.f32 1e-12, %v296_v13 }
 0x13f   : > { %1595 = vrsqrt.f32 %v297_v14 }
 0x14c   : > { %v1596_v15 = vpop.eup %1595 }
 0x14d   : > { %v299_v17 = vmul.f32 %v1596_v15, %v291_v4 }
 0x14f   : > { %v306_v19 = vmul.f32 %v1446_v16, %v299_v17 }
 0x151   : > { %v313_v20 = vadd.f32 %v1447_v18, %v306_v19 }
 0x153   : > { %1511 = vmatmul.mubr.msk.f32.vlgmr.msra.gmra.mxu0 %vm325_vm2, %v313_v20 }
 0x154   : > { %1525 = vmatprep.mubr.msk.f32.mxu0 %vm1637_vm1, %v1636_v8 }
 0x213   : > { %v395_v22 = vpop.f32.mrf.mxu0 }
 0x214   : > { %v1756_v23 = vadd.f32 %v1448_v21, %v395_v22 }
 0x215   : > { %v1512_v24 = vpop.f32.mrf.mxu0 }
 0x216   : > { %581 = vrot.lane.b32.xlu0 %v1756_v23, %s1638_s30  ;;  %412 = vrot.lane.b32.xlu1 %v1756_v23, %s1639_s9 }
 0x21a   : > { %583 = vrot.lane.b32.xlu1 %v1756_v23, %s1640_s13 }
 0x288   : > { %v413_v25 = vpop.permute.xlu1 %412  ;;  %v582_v27 = vpop.permute.xlu0 %581 }
 0x289   : > { %1514 = vmatpush3.xpose.msk.msra.mxu1 %vm414_vm3, %v413_v25 }
 0x28a   : > { %1518 = vmatprep.subr.mxu1 %v1636_v8 }
 0x28c   : > { %1516 = vmatmul.mubr.msk.f32.vlgmr.msra.gmra.mxu1 %vm414_vm3, %v1756_v23  ;;  %v584_v26 = vpop.permute.xlu1 %583 }
 0x28d   : > { %1524 = vmatpush3.xpose.msk.msra.mxu0 %vm414_vm3, %v584_v26  ;;  %1520 = vmatprep.mubr.msk.f32.mxu1 %vm1637_vm1, %v1636_v8  ;;  %v401_v26 = vld [vmem:[%s1872_s6 + $0x10] sm:$0xff] }
 0x28e   : > { %1533 = vmatprep.subr.mxu0 %v1636_v8 }
 0x290   : > { %1526 = vmatmul.mubr.msk.f32.vlgmr.msra.gmra.mxu0 %vm414_vm3, %v582_v27 }
 0x291   : > { %1535 = vmatprep.mubr.msk.f32.mxu0 %vm1637_vm1, %v1636_v8  ;;  %1534 = vmatpush3.msra.mxu0 %v400_v60 }
 0x292   : > { %1543 = vmatprep.subr.mxu0 %v1636_v8 }
 0x34c   : > { %v485_v33 = vpop.f32.mrf.mxu1 }
 0x34d   : > { %v489_v34 = vsel %vm1773_vm6, %v485_v33, -1e+30 }
 0x34e   : > { %v1517_v35 = vpop.f32.mrf.mxu1  ;;  %v491_v36 = vsel %vm490_vm7, %v489_v34, -inf }
 0x34f   : > { %492 = vmax.xlane.f32.xlu1 %v491_v36 }
 0x350   : > { %v655_v37 = vpop.f32.mrf.mxu0 }
 0x351   : > { %v659_v38 = vsel %vm1773_vm6, %v655_v37, -1e+30 }
 0x352   : > { %v1527_v39 = vpop.f32.mrf.mxu0  ;;  %v660_v40 = vsel %vm490_vm7, %v659_v38, -inf }
 0x353   : > { %661 = vmax.xlane.f32.xlu0 %v660_v40 }
 0x369   : > { %671 = vrot.lane.b32.xlu0 %v1756_v23, %s1641_s0  ;;  %s280_s0 = scalar_lea.vmem %s1874_s8, %s1444_s12 }
 0x3d8   : > { %v493_v41 = vpop.xlane.xlu1 %492 }
 0x3d9   : > { %v494_v42 = vsub.f32 %v489_v34, %v493_v41 }
 0x3db   : > { %v495_v43 = vmul.f32 1.442695, %v494_v42 }
 0x3dc   : > { %v662_v44 = vpop.xlane.xlu0 %661 }
 0x3dd   : > { %1597 = vpow2.f32 %v495_v43  ;;  %v663_v45 = vsub.f32 %v659_v38, %v662_v44 }
 0x3df   : > { %v664_v46 = vmul.f32 1.442695, %v663_v45 }
 0x3e0   : > { %v672_v56 = vpop.permute.xlu0 %671 }
 0x3e1   : > { %1599 = vpow2.f32 %v664_v46 }
 0x3ea   : > { %v1598_v47 = vpop.eup %1597 }
 0x3eb   : > { %v497_v48 = vsel %vm490_vm7, %v1598_v47, 0.0 }
 0x3ec   : > { %498 = vadd.xlane.f32.xlu1 %v497_v48  ;;  %v1470_v48 = vld [vmem:[%s1873_s7] ss:$0 sm:$0xff] }
 0x3ee   : > { %v1600_v49 = vpop.eup %1599 }
 0x3ef   : > { %v666_v50 = vsel %vm490_vm7, %v1600_v49, 0.0 }
 0x3f0   : > { %667 = vadd.xlane.f32.xlu1 %v666_v50 }
 0x401   : > { %502 = vrot.lane.b32.xlu1 %v1756_v23, %s1642_s15 }
 0x405   : > { %896 = vrot.lane.b32.xlu1 %v1756_v23, %s1643_s16 }
 0x409   : > { %894 = vrot.lane.b32.xlu1 %v1756_v23, %s1644_s17 }
 0x475   : > { %v499_v51 = vpop.xlane.xlu1 %498 }
 0x476   : > { %1601 = vrcp.f32 %v499_v51 }
 0x479   : > { %v668_v52 = vpop.xlane.xlu1 %667 }
 0x47a   : > { %1603 = vrcp.f32 %v668_v52 }
 0x47d   : > { %v503_v53 = vpop.permute.xlu1 %502 }
 0x47e   : > { %1519 = vmatpush3.msk.msra.mxu1 %vm508_vm8, %v503_v53 }
 0x47f   : > { %1528 = vmatprep.subr.mxu1 %v1636_v8 }
 0x481   : > { %v897_v62 = vpop.permute.xlu1 %896 }
 0x483   : > { %v1602_v54 = vpop.eup %1601 }
 0x484   : > { %v501_v55 = vmul.f32 %v1602_v54, %v1598_v47 }
 0x485   : > { %v895_v3 = vpop.permute.xlu1 %894 }
 0x486   : > { %1521 = vmatmul.mubr.msk.f32.vlgmr.msra.gmra.mxu1 %vm504_vm9, %v501_v55 }
 0x487   : > { %v1604_v57 = vpop.eup %1603  ;;  %1529 = vmatpush3.msk.msra.mxu1 %vm508_vm8, %v672_v56  ;;  %1530 = vmatprep.mubr.msk.f32.mxu1 %vm1637_vm1, %v1636_v8 }
 0x488   : > { %v670_v58 = vmul.f32 %v1604_v57, %v1600_v49  ;;  %1538 = vmatprep.subr.mxu1 %v1636_v8 }
 0x48a   : > { %1531 = vmatmul.mubr.msk.f32.vlgmr.msra.gmra.mxu1 %vm504_vm9, %v670_v58 }
 0x48b   : > { %1540 = vmatprep.mubr.msk.f32.mxu1 %vm1637_vm1, %v1636_v8  ;;  %1539 = vmatpush3.msra.mxu1 %v399_v59 }
 0x48c   : > { %1548 = vmatprep.subr.mxu1 %v1636_v8 }
 0x546   : > { %v577_v61 = vpop.f32.mrf.mxu1 }
 0x547   : > { %1541 = vmatmul.mubr.msk.f32.vlgmr.msra.gmra.mxu1 %vm414_vm3, %v577_v61 }
 0x548   : > { %v1522_v63 = vpop.f32.mrf.mxu1  ;;  %1550 = vmatprep.mubr.msk.f32.mxu1 %vm1637_vm1, %v1636_v8 }
 0x54a   : > { %v744_v1 = vpop.f32.mrf.mxu1 }
 0x54b   : > { %1536 = vmatmul.mubr.msk.f32.vlgmr.msra.gmra.mxu0 %vm414_vm3, %v744_v1 }
 0x54c   : > { %1544 = vmatpush3.xpose.msk.msra.mxu0 %vm414_vm3, %v897_v62  ;;  %v1532_v2 = vpop.f32.mrf.mxu1  ;;  %1545 = vmatprep.mubr.msk.f32.mxu0 %vm1637_vm1, %v1636_v8 }
 0x54d   : > { %1553 = vmatprep.subr.mxu0 %v1636_v8 }
 0x54f   : > { %1546 = vmatmul.mubr.msk.f32.vlgmr.msra.gmra.mxu0 %vm414_vm3, %v895_v3 }
 0x550   : > { %1555 = vmatprep.mubr.msk.f32.mxu0 %vm1637_vm1, %v1636_v8  ;;  %1554 = vmatpush3.msra.mxu0 %v401_v26 }
 0x551   : > { %1563 = vmatprep.subr.mxu0 %v1636_v8 }
 0x607   : > { %v890_v4 = vpop.f32.mrf.mxu1 }
 0x609   : > { %v1542_v5 = vpop.f32.mrf.mxu1 }
 0x60b   : > { %v817_v6 = vpop.f32.mrf.mxu0 }
 0x60c   : > { %v891_v7 = vadd.f32 %v890_v4, %v817_v6 }
 0x60d   : > { %v1537_v9 = vpop.f32.mrf.mxu0 }
 0x60f   : > { %v968_v10 = vpop.f32.mrf.mxu0 }
 0x610   : > { %v972_v11 = vsel %vm1773_vm6, %v968_v10, -1e+30 }
 0x611   : > { %v1547_v12 = vpop.f32.mrf.mxu0  ;;  %v973_v13 = vsel %vm490_vm7, %v972_v11, -inf }
 0x612   : > { %974 = vmax.xlane.f32.xlu1 %v973_v13 }
 0x623   : > { %984 = vrot.lane.b32.xlu1 %v1756_v23, %s1645_s22 }
 0x627   : > { %1135 = vrot.lane.b32.xlu1 %v1756_v23, %s1646_s23 }
 0x69b   : > { %v975_v14 = vpop.xlane.xlu1 %974 }
 0x69c   : > { %v976_v15 = vsub.f32 %v972_v11, %v975_v14 }
 0x69e   : > { %v977_v16 = vmul.f32 1.442695, %v976_v15 }
 0x69f   : > { %v985_v17 = vpop.permute.xlu1 %984 }
 0x6a0   : > { %1605 = vpow2.f32 %v977_v16  ;;  %1549 = vmatpush3.msk.msra.mxu1 %vm508_vm8, %v985_v17 }
 0x6a1   : > { %1558 = vmatprep.subr.mxu1 %v1636_v8 }
 0x6a3   : > { %v1136_v25 = vpop.permute.xlu1 %1135 }
 0x6ad   : > { %v1606_v18 = vpop.eup %1605 }
 0x6ae   : > { %v979_v19 = vsel %vm490_vm7, %v1606_v18, 0.0 }
 0x6af   : > { %980 = vadd.xlane.f32.xlu0 %v979_v19 }
 0x6c5   : > { %1137 = vrot.lane.b32.xlu0 %v1756_v23, %s1647_s24 }
 0x738   : > { %v981_v20 = vpop.xlane.xlu0 %980 }
 0x739   : > { %1607 = vrcp.f32 %v981_v20 }
 0x73c   : > { %v1138_v24 = vpop.permute.xlu0 %1137 }
 0x746   : > { %v1608_v21 = vpop.eup %1607 }
 0x747   : > { %v983_v22 = vmul.f32 %v1608_v21, %v1606_v18 }
 0x749   : > { %1551 = vmatmul.mubr.msk.f32.vlgmr.msra.gmra.mxu1 %vm504_vm9, %v983_v22 }
 0x74a   : > { %1559 = vmatpush3.xpose.msk.msra.mxu1 %vm414_vm3, %v1138_v24  ;;  %1560 = vmatprep.mubr.msk.f32.mxu1 %vm1637_vm1, %v1636_v8 }
 0x74b   : > { %1568 = vmatprep.subr.mxu1 %v1636_v8 }
 0x74d   : > { %1561 = vmatmul.mubr.msk.f32.vlgmr.msra.gmra.mxu1 %vm414_vm3, %v1136_v25 }
 0x74e   : > { %1570 = vmatprep.mubr.msk.f32.mxu1 %vm1637_vm1, %v1636_v8 }
 0x809   : > { %v1057_v27 = vpop.f32.mrf.mxu1 }
 0x80a   : > { %1556 = vmatmul.mubr.msk.f32.vlgmr.msra.gmra.mxu0 %vm414_vm3, %v1057_v27 }
 0x80b   : > { %v1552_v28 = vpop.f32.mrf.mxu1  ;;  %1565 = vmatprep.mubr.msk.f32.mxu0 %vm1637_vm1, %v1636_v8  ;;  %v402_v8 = vld [vmem:[%s1872_s6 + $0x18] sm:$0xff] }
 0x80c   : > { %1569 = vmatpush3.msra.mxu1 %v402_v8 }
 0x80d   : > { %v1209_v29 = vpop.f32.mrf.mxu1 }
 0x80e   : > { %v1213_v30 = vsel %vm1773_vm6, %v1209_v29, -1e+30 }
 0x80f   : > { %v1562_v31 = vpop.f32.mrf.mxu1  ;;  %v1214_v33 = vsel %vm490_vm7, %v1213_v30, -inf }
 0x810   : > { %1215 = vmax.xlane.f32.xlu1 %v1214_v33 }
 0x899   : > { %v1216_v34 = vpop.xlane.xlu1 %1215 }
 0x89a   : > { %v1217_v35 = vsub.f32 %v1213_v30, %v1216_v34 }
 0x89c   : > { %v1218_v36 = vmul.f32 1.442695, %v1217_v35 }
 0x89e   : > { %1609 = vpow2.f32 %v1218_v36 }
 0x8ab   : > { %v1610_v37 = vpop.eup %1609 }
 0x8ac   : > { %v1220_v38 = vsel %vm490_vm7, %v1610_v37, 0.0 }
 0x8ad   : > { %1221 = vadd.xlane.f32.xlu0 %v1220_v38 }
 0x8c3   : > { %1225 = vrot.lane.b32.xlu0 %v1756_v23, %s1648_s27 }
 0x8ca   : > { %v1130_v32 = vpop.f32.mrf.mxu0 }
 0x8cb   : > { %v1134_v39 = vadd.f32 %v1130_v32, %v891_v7 }
 0x8cc   : > { %v1557_v40 = vpop.f32.mrf.mxu0 }
 0x936   : > { %v1222_v41 = vpop.xlane.xlu0 %1221 }
 0x937   : > { %1611 = vrcp.f32 %v1222_v41 }
 0x93a   : > { %v1226_v42 = vpop.permute.xlu0 %1225 }
 0x93b   : > { %1564 = vmatpush3.msk.msra.mxu0 %vm508_vm8, %v1226_v42 }
 0x944   : > { %v1612_v43 = vpop.eup %1611 }
 0x945   : > { %v1224_v44 = vmul.f32 %v1612_v43, %v1610_v37 }
 0x947   : > { %1566 = vmatmul.mubr.msk.f32.vlgmr.msra.gmra.mxu0 %vm504_vm9, %v1224_v44 }
 0xa07   : > { %v1298_v45 = vpop.f32.mrf.mxu0 }
 0xa08   : > { %1571 = vmatmul.mubr.msk.f32.vlgmr.msra.gmra.mxu1 %vm414_vm3, %v1298_v45 }
 0xa09   : > { %v1567_v23 = vpop.f32.mrf.mxu0 }
 0xac8   : > { %v1371_v46 = vpop.f32.mrf.mxu1 }
 0xac9   : > { %v1375_v47 = vadd.f32 %v1371_v46, %v1134_v39 }
 0xaca   : > { %v1572_v49 = vpop.f32.mrf.mxu1 }
 0xacb   : > { %v1376_v50 = vadd.f32 %v1375_v47, %v1717_v0 }
 0xacd   : > { %v1384_v51 = vadd.f32 %v1470_v48, %v1376_v50 }
 0xacf   : > { %1385 = vst.msk [vmem:[%s280_s0] sm:$0x3f] %vm285_vm0, %v1384_v51 }
 0xad0 PF: > { %s24_s10 = sadd.s32 1, %s1633_s10  }
 0xad1   : > { %p21_p9 = scmp.ge.s32.totalorder %s24_s10, 4  }
 0xad3   :  { %23 = sbr.rel (!%p21_p9) target bundleno = 16 (0x10), region = 78 }

// kernel: e2e_forward.32
= control target key start
LH: loop header
LB: loop body
LE: loop exit
PB: predicated region body
PF: predicated region fallthrough
CT: control target
= control target key end

     0   :  { %s2205_s0 = inlined_call_operand.vmem [shape: s32[2], index: 0, kind: input, shape index: {}]   ;;  %s2206_s1 = inlined_call_operand.vmem [shape: f32[2,6,32], index: 1, kind: input, shape index: {}]   ;;  %s2207_s2 = inlined_call_operand.vmem [shape: f32[2,12,32], index: 2, kind: input, shape index: {}]   ;;  %s2208_s3 = inlined_call_operand.vmem [shape: f32[1,32], index: 3, kind: input, shape index: {}]   ;;  %s2209_s4 = inlined_call_operand.vmem [shape: f32[1,32], index: 4, kind: input, shape index: {}]   ;;  %s2210_s5 = inlined_call_operand.vmem [shape: f32[32,32], index: 5, kind: input, shape index: {}]   ;;  %s2211_s6 = inlined_call_operand.vmem [shape: f32[1,32], index: 6, kind: input, shape index: {}]   ;;  %s2212_s7 = inlined_call_operand.vmem [shape: f32[32,64], index: 7, kind: input, shape index: {}]   ;;  %s2213_s8 = inlined_call_operand.vmem [shape: f32[1,64], index: 8, kind: input, shape index: {}]   ;;  %s2214_s9 = inlined_call_operand.vmem [shape: f32[32,32], index: 9, kind: input, shape index: {}]   ;;  %s2215_s10 = inlined_call_operand.vmem [shape: f32[1,32], index: 10, kind: input, shape index: {}]   ;;  %s2216_s11 = inlined_call_operand.vmem [shape: f32[2,6,32], index: 11, kind: output, shape index: {}]  }
   0x1   :  { %s16_s19 = sshll.u32 %s2205_s0, 4  ;;  %s17_s19 = int_to_ptr.vmem [resolvable:$true] %s16_s19 }
   0x2   :  { %s1889_s20 = scalar_lea.vmem %s17_s19, 16  ;;  %p1894_p1 = scmp.lt.s32.totalorder %s17_s19, %s17_s19 }
   0x3   :  { %p1890_p0 = scmp.ne.s32.totalorder %s17_s19, %s1889_s20  ;;  %p1895_p2 = scmp.lt.s32.totalorder %s1889_s20, %s1889_s20 }
   0x5   :  { %p1896_p3 = por %p1895_p2, %p1894_p1 }
   0x7   :  { %p1897_p4 = pnand %p1896_p3, %p1890_p0 }
   0x9   :  { %1900 = shalt.err (!%p1897_p4)  }
   0xa   :  { %s1911_s21 = smov [#allocation3]  }
   0xb   :  { %19 = dma.vmem_to_smem %s17_s19, 16, %s1911_s21, [#allocation2] }
   0xc   :  { %1905 = dma.done.wait [#allocation2], 16 }
   0xd   :  { %1906 = vsyncadd [#allocation2], 4294967280 }
   0xe   :  { %21 = sfence }
   0xf   :  { %s1984_s22 = smov 0  }
  0x10 LB: > { %s1990_s0 = sadd.s32 4294967295, %s1909_s22   ;;  %p1672_p5 = scmp.ge.s32.totalorder %s1909_s22, 1  ;;  %s1909_s22 = sphi %s1984_s22, %s27_s22  }
  0x11   : > { %p328_p6 = scmp.lt.s32.totalorder %s1909_s22, 3 }
  0x13   : > { %p329_p7 = pnand %p1672_p5, %p328_p6 }
  0x14   : > { %p369_p8 = scmp.lt.s32.totalorder (!%p329_p7), %s1990_s0, 1  ;;  %s1914_s19 = smov (!%p329_p7), 96  }
  0x15   : > { %332 = sbr.rel (%p329_p7) target bundleno = 2851 (0xb23), region = 60  ;;  %s1915_s25 = smov (!%p329_p7), 120  }
  0x16   : > { %s382_s26 = sld [smem:[#allocation3 + %s1990_s0]] (!%p329_p7)  ;;  %s1916_s28 = smov (!%p329_p7), 88  }
  0x17   : > { %s1917_s29 = smov (!%p329_p7), 112   ;;  %s1918_s30 = smov (!%p329_p7), 104  }
  0x18   : > { %s1919_s14 = smov (!%p329_p7), 80   ;;  %s1920_s15 = smov (!%p329_p7), 72  }
  0x1a   : > { %s1996_s23 = scalar_select %p369_p8, %s1990_s0, 1  ;;  %vm388_vm0 = vcmask 259072   ;;  %v505_v7 = vld [vmem:[%s2212_s7 + $0x18] sm:$0xff]  ;;  %v504_v8 = vld [vmem:[%s2212_s7 + $0x10] sm:$0xff]  ;;  %vm428_vm1 = vcmask 261120   ;;  %v1912_v9 = vmov 0.0   ;;  %v598_v37 = vlaneseq }
  0x1b   : > { %1766 = vmatprep.subr.mxu1 %v505_v7  ;;  %1755 = vmatprep.subr.mxu0 %v1912_v9  ;;  %v420_v10 = vld [vmem:[%s2210_s5 + $0x18] sm:$0xff]  ;;  %v503_v11 = vld [vmem:[%s2212_s7 + $0x8] sm:$0xff]  ;;  %v419_v13 = vld [vmem:[%s2210_s5 + $0x10] sm:$0xff]  ;;  %vm1913_vm2 = vmmov 0   ;;  %vm602_vm3 = vcmask 64512   ;;  %vm704_vm4 = vcmask 1043456  }
  0x1c   : > { %s1673_s24 = sshll.u32 %s1996_s23, 3  ;;  %s1711_s13 = sshll.u32 %s1996_s23, 4  ;;  %1767 = vmatpush3.msra.mxu1 %v505_v7  ;;  %1756 = vmatpush3.msra.mxu0 %v420_v10  ;;  %v502_v14 = vld [vmem:[%s2212_s7] sm:$0xff]  ;;  %v418_v15 = vld [vmem:[%s2210_s5 + $0x8] sm:$0xff]  ;;  %v599_v38 = vand.u32 127, %v598_v37  ;;  %v600_v39 = vstv %s382_s26  ;;  %vm683_vm6 = vcmask 95232  }
  0x1d   : > { %s372_s27 = scalar_lea.vmem %s2206_s1, %s1673_s24  ;;  %s377_s16 = scalar_lea.vmem %s2207_s2, %s1711_s13  ;;  %1768 = vmatprep.subr.mxu1 %v504_v8  ;;  %1757 = vmatprep.subr.mxu0 %v1912_v9  ;;  %v417_v17 = vld [vmem:[%s2210_s5] sm:$0xff]  ;;  %vm700_vm7 = vcmask 97280  }
  0x1e   : > { %v2004_v0 = vld [vmem:[%s372_s27] sm:$0x3f]  ;;  %1769 = vmatpush3.msra.mxu1 %v504_v8  ;;  %1758 = vmatpush3.msra.mxu0 %v419_v13  ;;  %v385_v16 = vld [vmem:[%s377_s16 + $0x8] sm:$0xf]  ;;  %vm2086_vm5 = vcmp.lt.s32.totalorder %v599_v38, %v600_v39  ;;  %s381_s0 = scalar_lea.vmem %s2216_s11, %s1673_s24 }
  0x1f   : > { %v389_v1 = vsel %vm388_vm0, %v2004_v0, 0.0  ;;  %v384_v12 = vld [vmem:[%s377_s16] sm:$0xff]  ;;  %1770 = vmatprep.subr.mxu1 %v503_v11  ;;  %1759 = vmatprep.subr.mxu0 %v1912_v9 }
  0x20   : > { %390 = vadd.xlane.f32.xlu0 %v389_v1  ;;  %1774 = vmatprep.mubr.msk.f32.mxu1 %vm428_vm1, %v384_v12  ;;  %v1677_v22 = vld [vmem:[%s2208_s3] ss:$0 sm:$0xff] }
  0x21   : > { %1771 = vmatpush3.msra.mxu1 %v503_v11  ;;  %1760 = vmatpush3.msra.mxu0 %v418_v15  ;;  %v1678_v24 = vld [vmem:[%s2209_s4] ss:$0 sm:$0xff] }
  0x22   : > { %1772 = vmatprep.subr.mxu1 %v502_v14  ;;  %1761 = vmatprep.subr.mxu0 %v1912_v9  ;;  %v1681_v27 = vld [vmem:[%s2213_s8] ss:$0 sm:$0xff] }
  0x23   : > { %1773 = vmatpush3.msra.mxu1 %v502_v14  ;;  %1762 = vmatpush3.msra.mxu0 %v417_v17  ;;  %v1679_v33 = vld [vmem:[%s2211_s6] ss:$0 sm:$0xff]  ;;  %v595_v14 = vld [vmem:[%s2214_s9 + $0x8] sm:$0xff] }
  0x24   : > { %1775 = vmatmul.mubr.msk.f32.vlgmr.msra.gmra.mxu1 %vm428_vm1, %v385_v16  ;;  %1763 = vmatprep.mubr.msk.f32.mxu0 %vm1913_vm2, %v1912_v9  ;;  %v594_v57 = vld [vmem:[%s2214_s9] sm:$0xff] }
  0x25   : > { %1777 = vmatprep.subr.mxu0 %v1912_v9  ;;  %1784 = vmatprep.subr.mxu1 %v1912_v9 }
  0x26   : > { %1788 = vmatprep.mubr.msk.f32.mxu1 %vm1913_vm2, %v1912_v9 }
  0xa9   : > { %v391_v2 = vpop.xlane.xlu0 %390 }
  0xaa   : > { %v393_v3 = vmul.f32 0.03125, %v391_v2 }
  0xac   : > { %v394_v4 = vsub.f32 %v2004_v0, %v393_v3 }
  0xae   : > { %v395_v5 = vmul.f32 %v394_v4, %v394_v4 }
  0xb0   : > { %v396_v6 = vsel %vm388_vm0, %v395_v5, 0.0 }
  0xb1   : > { %397 = vadd.xlane.f32.xlu0 %v396_v6 }
  0xe4   : > { %v1776_v28 = vpop.f32.mrf.mxu1 }
  0xe5   : > { %v2062_v29 = vadd.f32 %v1776_v28, %v1681_v27 }
  0xe6   : > { %v585_v30 = vpop.f32.mrf.mxu1 }
  0xe7   : > { %v2066_v31 = vadd.f32 %v1681_v27, %v585_v30  ;;  %697 = vrot.lane.b32.xlu0 %v2062_v29, %s1914_s19 }
 0x13a   : > { %v398_v18 = vpop.xlane.xlu0 %397 }
 0x13b   : > { %v399_v19 = vmul.f32 0.03125, %v398_v18 }
 0x13d   : > { %v400_v20 = vadd.f32 1e-12, %v399_v19 }
 0x13f   : > { %1871 = vrsqrt.f32 %v400_v20 }
 0x14c   : > { %v1872_v21 = vpop.eup %1871 }
 0x14d   : > { %v402_v23 = vmul.f32 %v1872_v21, %v394_v4 }
 0x14f   : > { %v409_v25 = vmul.f32 %v1677_v22, %v402_v23 }
 0x151   : > { %v416_v26 = vadd.f32 %v1678_v24, %v409_v25 }
 0x153   : > { %1764 = vmatmul.mubr.msk.f32.vlgmr.msra.gmra.mxu0 %vm428_vm1, %v416_v26 }
 0x154   : > { %1781 = vmatprep.mubr.msk.f32.mxu0 %vm1913_vm2, %v1912_v9  ;;  %1778 = vmatpush3.xpose.msk.msra.mxu0 %vm602_vm3, %v2062_v29 }
 0x155   : > { %1779 = vmatprep.subr.mxu0 %v1912_v9 }
 0x158   : > { %1780 = vmatpush3.xpose.msk.msra.mxu0 %vm602_vm3, %v2066_v31 }
 0x159   : > { %1798 = vmatprep.subr.mxu0 %v1912_v9  ;;  %v698_v32 = vpop.permute.xlu0 %697 }
 0x15a   : > { %1785 = vmatpush3.msk.msra.mxu1 %vm704_vm4, %v698_v32 }
 0x15b   : > { %1786 = vmatprep.subr.mxu1 %v1912_v9 }
 0x213   : > { %v498_v34 = vpop.f32.mrf.mxu0 }
 0x214   : > { %v2078_v35 = vadd.f32 %v1679_v33, %v498_v34 }
 0x215   : > { %v1765_v36 = vpop.f32.mrf.mxu0 }
 0x216   : > { %777 = vrot.lane.b32.xlu0 %v2078_v35, %s1915_s25  ;;  %1782 = vmatmul.mubr.msk.f32.vlgmr.msra.gmra.mxu0 %vm602_vm3, %v2078_v35 }
 0x217   : > { %1802 = vmatprep.mubr.msk.f32.mxu0 %vm1913_vm2, %v1912_v9 }
 0x288   : > { %v778_v56 = vpop.permute.xlu0 %777 }
 0x2d6   : > { %v678_v41 = vpop.f32.mrf.mxu0 }
 0x2d7   : > { %v682_v42 = vsel %vm2086_vm5, %v678_v41, -1e+30 }
 0x2d8   : > { %v1783_v43 = vpop.f32.mrf.mxu0  ;;  %v684_v44 = vsel %vm683_vm6, %v682_v42, -inf }
 0x2d9   : > { %685 = vmax.xlane.f32.xlu1 %v684_v44 }
 0x2ea   : > { %695 = vrot.lane.b32.xlu1 %v2066_v31, %s1914_s19 }
 0x2ee   : > { %781 = vrot.lane.b32.xlu1 %v2062_v29, %s1915_s25 }
 0x362   : > { %v686_v45 = vpop.xlane.xlu1 %685 }
 0x363   : > { %v687_v46 = vsub.f32 %v682_v42, %v686_v45 }
 0x365   : > { %v688_v47 = vmul.f32 1.442695, %v687_v46 }
 0x366   : > { %v696_v48 = vpop.permute.xlu1 %695 }
 0x367   : > { %1873 = vpow2.f32 %v688_v47  ;;  %1787 = vmatpush3.msra.mxu1 %v696_v48 }
 0x368   : > { %1791 = vmatprep.subr.mxu1 %v1912_v9 }
 0x36a   : > { %v782_v51 = vpop.permute.xlu1 %781 }
 0x374   : > { %v1874_v49 = vpop.eup %1873 }
 0x375   : > { %v690_v50 = vsel %vm683_vm6, %v1874_v49, 0.0 }
 0x376   : > { %691 = vadd.xlane.f32.xlu1 %v690_v50 }
 0x387   : > { %779 = vrot.lane.b32.xlu1 %v2066_v31, %s1915_s25 }
 0x3ff   : > { %v692_v52 = vpop.xlane.xlu1 %691 }
 0x400   : > { %1875 = vrcp.f32 %v692_v52 }
 0x403   : > { %v780_v55 = vpop.permute.xlu1 %779 }
 0x40d   : > { %v1876_v53 = vpop.eup %1875 }
 0x40e   : > { %v694_v54 = vmul.f32 %v1876_v53, %v1874_v49  ;;  %v596_v49 = vld [vmem:[%s2214_s9 + $0x10] sm:$0xff] }
 0x410   : > { %1789 = vmatmul.mubr.msk.f32.vlgmr.msra.gmra.mxu1 %vm700_vm7, %v694_v54 }
 0x411   : > { %1792 = vmatpush3.xpose.msk.msra.mxu1 %vm602_vm3, %v782_v51  ;;  %1795 = vmatprep.mubr.msk.f32.mxu1 %vm1913_vm2, %v1912_v9 }
 0x412   : > { %1793 = vmatprep.subr.mxu1 %v1912_v9 }
 0x415   : > { %1794 = vmatpush3.xpose.msk.msra.mxu1 %vm602_vm3, %v780_v55 }
 0x416   : > { %1810 = vmatprep.subr.mxu1 %v1912_v9 }
 0x418   : > { %1796 = vmatmul.mubr.msk.f32.vlgmr.msra.gmra.mxu1 %vm602_vm3, %v778_v56  ;;  %v597_v56 = vld [vmem:[%s2214_s9 + $0x18] sm:$0xff] }
 0x419   : > { %1812 = vmatprep.mubr.msk.f32.mxu1 %vm1913_vm2, %v1912_v9  ;;  %1811 = vmatpush3.msra.mxu1 %v594_v57 }
 0x41a   : > { %1822 = vmatprep.subr.mxu1 %v1912_v9 }
 0x4d0   : > { %v773_v58 = vpop.f32.mrf.mxu1 }
 0x4d1   : > { %1813 = vmatmul.mubr.msk.f32.vlgmr.msra.gmra.mxu1 %vm602_vm3, %v773_v58 }
 0x4d2   : > { %v1790_v59 = vpop.f32.mrf.mxu1  ;;  %1826 = vmatprep.mubr.msk.f32.mxu1 %vm1913_vm2, %v1912_v9 }
 0x4d8   : > { %v855_v60 = vpop.f32.mrf.mxu1 }
 0x4d9   : > { %v859_v61 = vsel %vm2086_vm5, %v855_v60, -1e+30 }
 0x4da   : > { %v1797_v62 = vpop.f32.mrf.mxu1  ;;  %v860_v63 = vsel %vm683_vm6, %v859_v61, -inf }
 0x4db   : > { %861 = vmax.xlane.f32.xlu1 %v860_v63 }
 0x4ec   : > { %871 = vrot.lane.b32.xlu1 %v2066_v31, %s1916_s28 }
 0x4f0   : > { %1101 = vrot.lane.b32.xlu1 %v2062_v29, %s1917_s29 }
 0x4f4   : > { %1097 = vrot.lane.b32.xlu1 %v2078_v35, %s1917_s29 }
 0x4f8   : > { %1347 = vrot.lane.b32.xlu1 %v2066_v31, %s1918_s30 }
 0x564   : > { %v862_v1 = vpop.xlane.xlu1 %861 }
 0x565   : > { %v863_v2 = vsub.f32 %v859_v61, %v862_v1 }
 0x567   : > { %v864_v3 = vmul.f32 1.442695, %v863_v2 }
 0x568   : > { %v872_v11 = vpop.permute.xlu1 %871 }
 0x569   : > { %1877 = vpow2.f32 %v864_v3 }
 0x56c   : > { %v1102_v16 = vpop.permute.xlu1 %1101 }
 0x570   : > { %v1098_v19 = vpop.permute.xlu1 %1097 }
 0x574   : > { %v1348_v21 = vpop.permute.xlu1 %1347 }
 0x576   : > { %v1878_v4 = vpop.eup %1877 }
 0x577   : > { %v866_v5 = vsel %vm683_vm6, %v1878_v4, 0.0 }
 0x578   : > { %867 = vadd.xlane.f32.xlu0 %v866_v5 }
 0x58e   : > { %873 = vrot.lane.b32.xlu0 %v2062_v29, %s1916_s28 }
 0x591   : > { %v2124_v6 = vpop.f32.mrf.mxu1 }
 0x592   : > { %1099 = vrot.lane.b32.xlu0 %v2066_v31, %s1917_s29 }
 0x593   : > { %v1814_v7 = vpop.f32.mrf.mxu1 }
 0x596   : > { %1349 = vrot.lane.b32.xlu0 %v2062_v29, %s1918_s30 }
 0x59a   : > { %1345 = vrot.lane.b32.xlu0 %v2078_v35, %s1918_s30 }
 0x601   : > { %v868_v8 = vpop.xlane.xlu0 %867 }
 0x602   : > { %1879 = vrcp.f32 %v868_v8 }
 0x605   : > { %v874_v10 = vpop.permute.xlu0 %873 }
 0x606   : > { %1799 = vmatpush3.msk.msra.mxu0 %vm704_vm4, %v874_v10 }
 0x607   : > { %1800 = vmatprep.subr.mxu0 %v1912_v9 }
 0x608   : > { %1801 = vmatpush3.msra.mxu0 %v872_v11 }
 0x609   : > { %1805 = vmatprep.subr.mxu0 %v1912_v9  ;;  %v1100_v18 = vpop.permute.xlu0 %1099 }
 0x60d   : > { %v1350_v20 = vpop.permute.xlu0 %1349 }
 0x60f   : > { %v1880_v12 = vpop.eup %1879 }
 0x610   : > { %v870_v13 = vmul.f32 %v1880_v12, %v1878_v4 }
 0x611   : > { %v1346_v22 = vpop.permute.xlu0 %1345 }
 0x612   : > { %1803 = vmatmul.mubr.msk.f32.vlgmr.msra.gmra.mxu0 %vm700_vm7, %v870_v13 }
 0x613   : > { %1806 = vmatpush3.msra.mxu0 %v595_v14  ;;  %1807 = vmatprep.mubr.msk.f32.mxu0 %vm1913_vm2, %v1912_v9 }
 0x614   : > { %1815 = vmatprep.subr.mxu0 %v1912_v9 }
 0x6d2   : > { %v947_v15 = vpop.f32.mrf.mxu0 }
 0x6d3   : > { %1808 = vmatmul.mubr.msk.f32.vlgmr.msra.gmra.mxu0 %vm602_vm3, %v947_v15 }
 0x6d4   : > { %1816 = vmatpush3.xpose.msk.msra.mxu0 %vm602_vm3, %v1102_v16  ;;  %v1804_v17 = vpop.f32.mrf.mxu0  ;;  %1819 = vmatprep.mubr.msk.f32.mxu0 %vm1913_vm2, %v1912_v9 }
 0x6d5   : > { %1817 = vmatprep.subr.mxu0 %v1912_v9 }
 0x6d8   : > { %1818 = vmatpush3.xpose.msk.msra.mxu0 %vm602_vm3, %v1100_v18 }
 0x6d9   : > { %1834 = vmatprep.subr.mxu0 %v1912_v9 }
 0x6db   : > { %1820 = vmatmul.mubr.msk.f32.vlgmr.msra.gmra.mxu0 %vm602_vm3, %v1098_v19 }
 0x6dc   : > { %1835 = vmatpush3.xpose.msk.msra.mxu0 %vm602_vm3, %v1350_v20  ;;  %1838 = vmatprep.mubr.msk.f32.mxu0 %vm1913_vm2, %v1912_v9 }
 0x6dd   : > { %1836 = vmatprep.subr.mxu0 %v1912_v9 }
 0x6e0   : > { %1837 = vmatpush3.xpose.msk.msra.mxu0 %vm602_vm3, %v1348_v21 }
 0x6e3   : > { %1839 = vmatmul.mubr.msk.f32.vlgmr.msra.gmra.mxu0 %vm602_vm3, %v1346_v22 }
 0x793   : > { %v2153_v23 = vpop.f32.mrf.mxu0 }
 0x794   : > { %v1094_v57 = vadd.f32 %v2124_v6, %v2153_v23 }
 0x795   : > { %v1809_v24 = vpop.f32.mrf.mxu0 }
 0x79b   : > { %v1175_v25 = vpop.f32.mrf.mxu0 }
 0x79c   : > { %v1179_v26 = vsel %vm2086_vm5, %v1175_v25, -1e+30 }
 0x79d   : > { %v1821_v27 = vpop.f32.mrf.mxu0  ;;  %v1180_v28 = vsel %vm683_vm6, %v1179_v26, -inf }
 0x79e   : > { %1181 = vmax.xlane.f32.xlu1 %v1180_v28 }
 0x7a3   : > { %v1423_v30 = vpop.f32.mrf.mxu0 }
 0x7a4   : > { %v1427_v33 = vsel %vm2086_vm5, %v1423_v30, -1e+30 }
 0x7a5   : > { %v1840_v32 = vpop.f32.mrf.mxu0  ;;  %v1428_v34 = vsel %vm683_vm6, %v1427_v33, -inf }
 0x7af   : > { %1191 = vrot.lane.b32.xlu1 %v2066_v31, %s1919_s14 }
 0x7d3   : > { %1429 = vmax.xlane.f32.xlu1 %v1428_v34 }
 0x7e4   : > { %1439 = vrot.lane.b32.xlu1 %v2066_v31, %s1920_s15 }
 0x827   : > { %v1182_v35 = vpop.xlane.xlu1 %1181 }
 0x828   : > { %v1183_v36 = vsub.f32 %v1179_v26, %v1182_v35 }
 0x82a   : > { %v1184_v37 = vmul.f32 1.442695, %v1183_v36 }
 0x82b   : > { %v1192_v41 = vpop.permute.xlu1 %1191 }
 0x82c   : > { %1881 = vpow2.f32 %v1184_v37 }
 0x839   : > { %v1882_v38 = vpop.eup %1881 }
 0x83a   : > { %v1186_v39 = vsel %vm683_vm6, %v1882_v38, 0.0 }
 0x83b   : > { %1187 = vadd.xlane.f32.xlu0 %v1186_v39 }
 0x851   : > { %1193 = vrot.lane.b32.xlu0 %v2062_v29, %s1919_s14 }
 0x85c   : > { %v1430_v42 = vpop.xlane.xlu1 %1429 }
 0x85d   : > { %v1431_v40 = vsub.f32 %v1427_v33, %v1430_v42 }
 0x85f   : > { %v1432_v43 = vmul.f32 1.442695, %v1431_v40 }
 0x860   : > { %v1440_v54 = vpop.permute.xlu1 %1439 }
 0x861   : > { %1883 = vpow2.f32 %v1432_v43 }
 0x86e   : > { %v1884_v44 = vpop.eup %1883 }
 0x86f   : > { %v1434_v45 = vsel %vm683_vm6, %v1884_v44, 0.0 }
 0x870   : > { %1435 = vadd.xlane.f32.xlu0 %v1434_v45 }
 0x886   : > { %1441 = vrot.lane.b32.xlu0 %v2062_v29, %s1920_s15 }
 0x8c4   : > { %v1188_v31 = vpop.xlane.xlu0 %1187 }
 0x8c5   : > { %1885 = vrcp.f32 %v1188_v31 }
 0x8c8   : > { %v1194_v46 = vpop.permute.xlu0 %1193 }
 0x8c9   : > { %1823 = vmatpush3.msk.msra.mxu1 %vm704_vm4, %v1194_v46 }
 0x8ca   : > { %1824 = vmatprep.subr.mxu1 %v1912_v9 }
 0x8cb   : > { %1825 = vmatpush3.msra.mxu1 %v1192_v41 }
 0x8cc   : > { %1829 = vmatprep.subr.mxu1 %v1912_v9 }
 0x8d2   : > { %v1886_v47 = vpop.eup %1885 }
 0x8d3   : > { %v1190_v48 = vmul.f32 %v1886_v47, %v1882_v38 }
 0x8d5   : > { %1827 = vmatmul.mubr.msk.f32.vlgmr.msra.gmra.mxu1 %vm700_vm7, %v1190_v48 }
 0x8d6   : > { %1830 = vmatpush3.msra.mxu1 %v596_v49  ;;  %1831 = vmatprep.mubr.msk.f32.mxu1 %vm1913_vm2, %v1912_v9 }
 0x8d7   : > { %1841 = vmatprep.subr.mxu1 %v1912_v9 }
 0x8f9   : > { %v1436_v29 = vpop.xlane.xlu0 %1435 }
 0x8fa   : > { %1887 = vrcp.f32 %v1436_v29 }
 0x8fd   : > { %v1442_v52 = vpop.permute.xlu0 %1441 }
 0x907   : > { %v1888_v50 = vpop.eup %1887 }
 0x908   : > { %v1438_v55 = vmul.f32 %v1888_v50, %v1884_v44 }
 0x995   : > { %v1267_v51 = vpop.f32.mrf.mxu1 }
 0x996   : > { %1832 = vmatmul.mubr.msk.f32.vlgmr.msra.gmra.mxu1 %vm602_vm3, %v1267_v51 }
 0x997   : > { %1842 = vmatpush3.msk.msra.mxu1 %vm704_vm4, %v1442_v52  ;;  %v1828_v53 = vpop.f32.mrf.mxu1  ;;  %1845 = vmatprep.mubr.msk.f32.mxu1 %vm1913_vm2, %v1912_v9 }
 0x998   : > { %1843 = vmatprep.subr.mxu1 %v1912_v9 }
 0x999   : > { %1844 = vmatpush3.msra.mxu1 %v1440_v54 }
 0x99a   : > { %1846 = vmatmul.mubr.msk.f32.vlgmr.msra.gmra.mxu1 %vm700_vm7, %v1438_v55  ;;  %1848 = vmatprep.subr.mxu1 %v1912_v9 }
 0x99b   : > { %1850 = vmatprep.mubr.msk.f32.mxu1 %vm1913_vm2, %v1912_v9  ;;  %1849 = vmatpush3.msra.mxu1 %v597_v56  ;;  %v1708_v9 = vld [vmem:[%s2215_s10] ss:$0 sm:$0xff] }
 0xa56   : > { %v1340_v58 = vpop.f32.mrf.mxu1 }
 0xa57   : > { %v1344_v59 = vadd.f32 %v1340_v58, %v1094_v57 }
 0xa58   : > { %v1833_v60 = vpop.f32.mrf.mxu1 }
 0xa5a   : > { %v1515_v61 = vpop.f32.mrf.mxu1 }
 0xa5b   : > { %1851 = vmatmul.mubr.msk.f32.vlgmr.msra.gmra.mxu1 %vm602_vm3, %v1515_v61 }
 0xa5c   : > { %v1847_v62 = vpop.f32.mrf.mxu1 }
 0xb1b   : > { %v1588_v63 = vpop.f32.mrf.mxu1 }
 0xb1c   : > { %v1592_v1 = vadd.f32 %v1588_v63, %v1344_v59 }
 0xb1d   : > { %v1852_v2 = vpop.f32.mrf.mxu1 }
 0xb1e   : > { %v1593_v3 = vadd.f32 %v1592_v1, %v2004_v0 }
 0xb20   : > { %v1601_v4 = vadd.f32 %v1708_v9, %v1593_v3 }
 0xb22   : > { %1602 = vst.msk [vmem:[%s381_s0] sm:$0x3f] %vm388_vm0, %v1601_v4 }
 0xb23 PF: > { %s27_s22 = sadd.s32 1, %s1909_s22  }
 0xb24   : > { %p24_p9 = scmp.ge.s32.totalorder %s27_s22, 4  }
 0xb26   :  { %26 = sbr.rel (!%p24_p9) target bundleno = 16 (0x10), region = 93 }

</bundles_post_ra>
